<compile_context>
chip_gen: v5e
topology: v5e:2x2
jax: 0.10.0
libtpu: 0.0.40
codegen_flags: <defaults>
</compile_context>

<pallas_src>
import functools

import numpy as np
import jax
import jax.numpy as jnp
from jax import lax
from jax.experimental import pallas as pl
from jax.experimental.pallas import tpu as pltpu

N_STACK = 4
N_ACTIONS = 4


# ---------------------------------------------------------------------------
# Tiling helpers
# ---------------------------------------------------------------------------
def _round_up(x, m):
    return ((x + m - 1) // m) * m


def _imgs_per_block(n_imgs, target):
    """Images per grid block; >= 2 grid steps when the batch allows (v7x)."""
    if n_imgs <= 1:
        return 1
    return max(1, min(target, (n_imgs + 1) // 2))


def _pick_rows_per_block(n_rows, target):
    """Row-block size: multiple of 8 (sublane rule), <= target, and small
    enough to give >= 2 grid steps whenever possible."""
    if n_rows <= 8:
        return n_rows                       # single full-extent block
    half = _round_up((n_rows + 1) // 2, 8)
    t = min(target, half)
    return max(8, (t // 8) * 8)


# ---------------------------------------------------------------------------
# Conv as two row-shifted "wide" matmuls (banded weight, no im2col)
# ---------------------------------------------------------------------------
def _conv_wide_kernel(x_ref, w0_ref, w1_ref, b_ref, o_ref):
    """Per image: out = relu(x[0:R] @ W0 + x[1:R+1] @ W1 + b).

    x_ref : (n, R+1, K) bf16  -- n images, R+1 input rows, K lanes per row
    w0/w1 : (K, N) bf16       -- banded wide weights (kernel-row shift 0 / 1)
    b_ref : (1, N) f32
    o_ref : (n, R, N)
    """
    n = x_ref.shape[0]
    r_out = o_ref.shape[1]
    w0 = w0_ref[...]
    w1 = w1_ref[...]
    b = b_ref[...]
    for i in range(n):                       # small static unroll (<= 16)
        xi = x_ref[i]                        # (R+1, K)
        y = jnp.dot(xi[:r_out, :], w0, preferred_element_type=jnp.float32)
        y = y + jnp.dot(xi[1:r_out + 1, :], w1,
                        preferred_element_type=jnp.float32)
        y = jnp.maximum(y + b, 0.0)
        o_ref[i] = y.astype(o_ref.dtype)


def _conv_wide(x, w0, w1, b, imgs_per_block, out_dtype=jnp.bfloat16):
    """x: (B, r_in, K) bf16 -> (B, r_in - 1, N)  (NHWC rows, lane-dense)."""
    B, r_in, K = x.shape
    n_out = w0.shape[1]
    r_out = r_in - 1
    n = _imgs_per_block(B, imgs_per_block)
    return pl.pallas_call(
        _conv_wide_kernel,
        out_shape=jax.ShapeDtypeStruct((B, r_out, n_out), out_dtype),
        grid=(pl.cdiv(B, n),),
        in_specs=[
            pl.BlockSpec((n, r_in, K), lambda i: (i, 0, 0)),
            pl.BlockSpec((K, n_out), lambda i: (0, 0)),      # resident weight
            pl.BlockSpec((K, n_out), lambda i: (0, 0)),      # resident weight
            pl.BlockSpec((1, n_out), lambda i: (0, 0)),
        ],
        out_specs=pl.BlockSpec((n, r_out, n_out), lambda i: (i, 0, 0)),
        compiler_params=pltpu.CompilerParams(
            dimension_semantics=("parallel",)),
    )(x, w0, w1, b)


# ---------------------------------------------------------------------------
# Fused Linear(2592,256)+ReLU + value/policy heads (single combined output)
# ---------------------------------------------------------------------------
def _mlp_heads_kernel(x_ref, wl_ref, bl_ref, wh_ref, bh_ref, o_ref, *,
                      n_actions):
    h = jnp.dot(x_ref[...], wl_ref[...], preferred_element_type=jnp.float32)
    h = jnp.maximum(h + bl_ref[...], 0.0)
    y = jnp.dot(h.astype(wh_ref.dtype), wh_ref[...],
                preferred_element_type=jnp.float32) + bh_ref[...]
    # Combined output: col 0 = value, cols 1..n_actions = log_softmax(policy),
    # remaining cols = padding (never read).  Masked reduction avoids lane
    # slicing and a second tiny store.
    col = lax.broadcasted_iota(jnp.int32, y.shape, 1)
    is_pol = (col >= 1) & (col <= n_actions)
    logits = jnp.where(is_pol, y, -jnp.inf)
    m = jnp.max(logits, axis=-1, keepdims=True)
    e = jnp.where(is_pol, jnp.exp(y - m), 0.0)
    lse = m + jnp.log(jnp.sum(e, axis=-1, keepdims=True))
    o_ref[...] = jnp.where(is_pol, y - lse, y)


def _mlp_heads(x, wl, bl, wh, bh, n_actions, tile_rows=512):
    """x: (B, 2592) bf16 -> (value (B,1) f32, log-policy (B,n_actions) f32)."""
    B, K = x.shape
    H = wl.shape[1]
    NH = wh.shape[1]
    tb = _pick_rows_per_block(B, tile_rows)
    out = pl.pallas_call(
        functools.partial(_mlp_heads_kernel, n_actions=n_actions),
        out_shape=jax.ShapeDtypeStruct((B, NH), jnp.float32),
        grid=(pl.cdiv(B, tb),),
        in_specs=[
            pl.BlockSpec((tb, K), lambda i: (i, 0)),
            pl.BlockSpec((K, H), lambda i: (0, 0)),          # resident
            pl.BlockSpec((1, H), lambda i: (0, 0)),
            pl.BlockSpec((H, NH), lambda i: (0, 0)),
            pl.BlockSpec((1, NH), lambda i: (0, 0)),
        ],
        out_specs=pl.BlockSpec((tb, NH), lambda i: (i, 0)),
        compiler_params=pltpu.CompilerParams(
            dimension_semantics=("parallel",)),
    )(x, wl, bl, wh, bh)
    return out[:, :1], out[:, 1:1 + n_actions]


# ---------------------------------------------------------------------------
# Parameters (torch layouts) + one-time inference-layout preparation
# ---------------------------------------------------------------------------
def init_params(key):
    ks = jax.random.split(key, 10)

    def u(k, shape, fan_in):
        bound = 1.0 / jnp.sqrt(fan_in)
        return jax.random.uniform(k, shape, jnp.float32, -bound, bound)

    p = {}
    p["conv1_w"] = u(ks[0], (16, N_STACK, 8, 8), N_STACK * 8 * 8)
    p["conv1_b"] = u(ks[1], (16,), N_STACK * 8 * 8)
    p["conv2_w"] = u(ks[2], (32, 16, 4, 4), 16 * 4 * 4)
    p["conv2_b"] = u(ks[3], (32,), 16 * 4 * 4)
    p["lin_w"]   = u(ks[4], (256, 9 * 9 * 32), 9 * 9 * 32)   # torch (out, in)
    p["lin_b"]   = u(ks[5], (256,), 9 * 9 * 32)
    p["val_w"]   = u(ks[6], (1, 256), 256)
    p["val_b"]   = u(ks[7], (1,), 256)
    p["pol_w"]   = u(ks[8], (N_ACTIONS, 256), 256)
    p["pol_b"]   = u(ks[9], (N_ACTIONS,), 256)
    return p


def prepare_params(p):
    """One-time layout/dtype transforms so the jitted forward does no weight
    reshapes: banded 'wide' conv weights, NHWC-permuted linear weight,
    concatenated+padded head weight, bf16 casts."""
    q = {}

    # ---- conv1: 8x8 / stride-4 conv -> space-to-depth(4) kernel-2/stride-1.
    # s2d feature order f = pr*16 + qr*4 + c  (p = 4*ph + pr, q = 4*qh + qr).
    w1 = np.asarray(p["conv1_w"], np.float32)                # (16, 4, 8, 8)
    wk1 = w1.reshape(16, 4, 2, 4, 2, 4).transpose(2, 4, 3, 5, 1, 0)
    wk1 = wk1.reshape(2, 2, 64, 16)                          # (ph, qh, f, oc)
    wb1 = np.zeros((2, 21 * 64, 20 * 16), np.float32)        # (ph, K, N)
    for ph in range(2):
        for j in range(20):
            for qh in range(2):
                J = j + qh
                wb1[ph, J * 64:(J + 1) * 64, j * 16:(j + 1) * 16] = wk1[ph, qh]
    q["conv1_w0"] = jnp.asarray(wb1[0], jnp.bfloat16)
    q["conv1_w1"] = jnp.asarray(wb1[1], jnp.bfloat16)
    q["conv1_b"] = jnp.asarray(
        np.tile(np.asarray(p["conv1_b"], np.float32)[None, :], (1, 20)))

    # ---- conv2: 4x4 / stride-2 conv on the (B,20,320) NHWC conv1 output,
    # viewed as row-pairs (B,10,640); p = 2*P + p'.
    w2 = np.asarray(p["conv2_w"], np.float32)                # (32, 16, 4, 4)
    wb2 = np.zeros((2, 2 * 320, 9 * 32), np.float32)         # (P, K, N)
    for P in range(2):
        for pp in range(2):
            for j in range(9):
                for qq in range(4):
                    J = 2 * j + qq
                    blk = w2[:, :, 2 * P + pp, qq].T          # (c, oc) = (16, 32)
                    wb2[P, pp * 320 + J * 16: pp * 320 + (J + 1) * 16,
                        j * 32:(j + 1) * 32] = blk
    q["conv2_w0"] = jnp.asarray(wb2[0], jnp.bfloat16)
    q["conv2_w1"] = jnp.asarray(wb2[1], jnp.bfloat16)
    q["conv2_b"] = jnp.asarray(
        np.tile(np.asarray(p["conv2_b"], np.float32)[None, :], (1, 9)))

    # ---- linear: torch columns are NCHW-flatten (c*81 + h*9 + w); we feed
    # NHWC-flatten (h*288 + w*32 + c), so permute the input axis once here.
    wl = np.asarray(p["lin_w"], np.float32).reshape(256, 32, 9, 9)
    wl = wl.transpose(0, 2, 3, 1).reshape(256, 2592).T        # (2592, 256)
    q["lin_w"] = jnp.asarray(wl, jnp.bfloat16)
    q["lin_b"] = jnp.asarray(np.asarray(p["lin_b"], np.float32)[None, :])

    # ---- heads: value + policy concatenated (and padded to 8 lanes) so both
    # heads cost one MXU dot and one store.
    wh = np.zeros((256, 8), np.float32)
    bh = np.zeros((1, 8), np.float32)
    wh[:, 0] = np.asarray(p["val_w"], np.float32)[0]
    wh[:, 1:1 + N_ACTIONS] = np.asarray(p["pol_w"], np.float32).T
    bh[0, 0] = float(np.asarray(p["val_b"], np.float32)[0])
    bh[0, 1:1 + N_ACTIONS] = np.asarray(p["pol_b"], np.float32)
    q["head_w"] = jnp.asarray(wh, jnp.bfloat16)
    q["head_b"] = jnp.asarray(bh)
    return q


# ---------------------------------------------------------------------------
# Forward
# ---------------------------------------------------------------------------
@jax.jit
def model_forward(prepared, x):
    """x: (B, 4, 84, 84) f32 NCHW -> (value (B,1) f32, log_policy (B,4) f32)."""
    B = x.shape[0]
    # Space-to-depth(4) + bf16 cast: the only XLA data-movement op in the hot
    # path (same cost as the old NCHW->NHWC transpose).
    # TODO(synk): have the actor stack frames directly in this layout.
    xs = x.astype(jnp.bfloat16).reshape(B, N_STACK, 21, 4, 21, 4)
    xs = xs.transpose(0, 2, 4, 3, 5, 1).reshape(B, 21, 21 * 16 * N_STACK)

    # conv1 + ReLU: (B, 21, 1344) -> (B, 20, 320)  (== NHWC (B, 20, 20, 16))
    y1 = _conv_wide(xs, prepared["conv1_w0"], prepared["conv1_w1"],
                    prepared["conv1_b"], imgs_per_block=8)

    # free row-pair reshape -> (B, 10, 640); conv2 + ReLU -> (B, 9, 288)
    # (== NHWC (B, 9, 9, 32))
    y2 = _conv_wide(y1.reshape(B, 10, 640), prepared["conv2_w0"],
                    prepared["conv2_w1"], prepared["conv2_b"],
                    imgs_per_block=16)

    # free NHWC flatten -> fused Linear(2592,256)+ReLU + value/policy heads
    value_out, policy_out = _mlp_heads(
        y2.reshape(B, 9 * 288), prepared["lin_w"], prepared["lin_b"],
        prepared["head_w"], prepared["head_b"], N_ACTIONS)
    return value_out, policy_out


# ---------------------------------------------------------------------------
# Pure-JAX reference (same bf16 quantization points as the Pallas pipeline)
# ---------------------------------------------------------------------------
def reference_forward(p, x):
    q = lambda a: a.astype(jnp.bfloat16).astype(jnp.float32)
    y = lax.conv_general_dilated(q(x), q(p["conv1_w"]), (4, 4), "VALID",
                                 dimension_numbers=("NCHW", "OIHW", "NCHW"))
    y = jnp.maximum(y + p["conv1_b"].reshape(1, -1, 1, 1), 0.0)
    y = lax.conv_general_dilated(q(y), q(p["conv2_w"]), (2, 2), "VALID",
                                 dimension_numbers=("NCHW", "OIHW", "NCHW"))
    y = jnp.maximum(y + p["conv2_b"].reshape(1, -1, 1, 1), 0.0)
    h = q(y).reshape(x.shape[0], -1) @ q(p["lin_w"]).T + p["lin_b"]
    h = jnp.maximum(h, 0.0)
    value = q(h) @ q(p["val_w"]).T + p["val_b"]
    logits = q(h) @ q(p["pol_w"]).T + p["pol_b"]
    return value, jax.nn.log_softmax(logits, axis=1)


if __name__ == "__main__":
    key = jax.random.PRNGKey(0)
    pkey, xkey = jax.random.split(key)
    raw_params = init_params(pkey)
    prepared = prepare_params(raw_params)
    # Linear(9*9*32, 256) implies 84x84 Atari frames with a 4-frame stack.
    x = jax.random.normal(xkey, (2, N_STACK, 84, 84), jnp.float32)

    value_out, policy_out = model_forward(prepared, x)
    jax.block_until_ready((value_out, policy_out))

    assert value_out.shape == (2, 1)
    assert policy_out.shape == (2, N_ACTIONS)
    # log_softmax rows must exp-sum to 1
    assert jnp.allclose(jnp.sum(jnp.exp(policy_out), axis=1), 1.0, atol=1e-4)
    # golden check against the pure-JAX reference
    ref_v, ref_p = reference_forward(raw_params, x)
    assert float(jnp.max(jnp.abs(value_out - ref_v))) < 5e-3
    assert float(jnp.max(jnp.abs(policy_out - ref_p))) < 5e-3
    print("KERNEL_OK")
</pallas_src>

<mosaic_0001>
module attributes {stable_mosaic.version = 11 : i64} {
  func.func @_conv_wide_kernel(%arg0: i32, %arg1: memref<1x21x1344xbf16, #tpu.memory_space<vmem>>, %arg2: memref<1344x320xbf16, #tpu.memory_space<vmem>>, %arg3: memref<1344x320xbf16, #tpu.memory_space<vmem>>, %arg4: memref<1x320xf32, #tpu.memory_space<vmem>>, %arg5: memref<1x20x320xbf16, #tpu.memory_space<vmem>>) attributes {dimension_semantics = [#tpu.dimension_semantics<parallel>], iteration_bounds = array<i64: 2>, scalar_prefetch = 0 : i64, scratch_operands = 0 : i64, tpu.core_type = #tpu.core_type<tc>, window_params = [{transform_indices = @transform_0, window_bounds = array<i64: 1, 21, 1344>}, {pipeline_mode = #tpu.pipeline_mode<synchronous>, transform_indices = @transform_1, window_bounds = array<i64: 1344, 320>}, {pipeline_mode = #tpu.pipeline_mode<synchronous>, transform_indices = @transform_2, window_bounds = array<i64: 1344, 320>}, {pipeline_mode = #tpu.pipeline_mode<synchronous>, transform_indices = @transform_3, window_bounds = array<i64: 1, 320>}, {transform_indices = @transform_4, window_bounds = array<i64: 1, 20, 320>}]} {
    %c0 = arith.constant 0 : index
    %c0_0 = arith.constant 0 : index
    %0 = vector.load %arg2[%c0, %c0_0] : memref<1344x320xbf16, #tpu.memory_space<vmem>>, vector<1344x320xbf16>
    %c0_1 = arith.constant 0 : index
    %c0_2 = arith.constant 0 : index
    %1 = vector.load %arg3[%c0_1, %c0_2] : memref<1344x320xbf16, #tpu.memory_space<vmem>>, vector<1344x320xbf16>
    %c0_3 = arith.constant 0 : index
    %c0_4 = arith.constant 0 : index
    %2 = vector.load %arg4[%c0_3, %c0_4] : memref<1x320xf32, #tpu.memory_space<vmem>>, vector<1x320xf32>
    %c0_5 = arith.constant 0 : index
    %c0_6 = arith.constant 0 : index
    %c0_7 = arith.constant 0 : index
    %3 = vector.load %arg1[%c0_5, %c0_6, %c0_7] : memref<1x21x1344xbf16, #tpu.memory_space<vmem>>, vector<1x21x1344xbf16>
    %4 = vector.shape_cast %3 : vector<1x21x1344xbf16> to vector<21x1344xbf16>
    %5 = vector.extract_strided_slice %4 {offsets = [0, 0], sizes = [20, 1344], strides = [1, 1]} : vector<21x1344xbf16> to vector<20x1344xbf16>
    %cst = arith.constant dense<0.000000e+00> : vector<20x320xf32>
    %6 = tpu.matmul %5, %0, %cst {dimension_numbers = #tpu.dot_dimension_numbers<[1], [0], [0], [1], [0, 0, 1, 1], [], []>} : vector<20x1344xbf16>, vector<1344x320xbf16>, vector<20x320xf32> -> vector<20x320xf32>
    %7 = vector.extract_strided_slice %4 {offsets = [1, 0], sizes = [20, 1344], strides = [1, 1]} : vector<21x1344xbf16> to vector<20x1344xbf16>
    %cst_8 = arith.constant dense<0.000000e+00> : vector<20x320xf32>
    %8 = tpu.matmul %7, %1, %cst_8 {dimension_numbers = #tpu.dot_dimension_numbers<[1], [0], [0], [1], [0, 0, 1, 1], [], []>} : vector<20x1344xbf16>, vector<1344x320xbf16>, vector<20x320xf32> -> vector<20x320xf32>
    %9 = arith.addf %6, %8 : vector<20x320xf32>
    %10 = vector.broadcast %2 : vector<1x320xf32> to vector<20x320xf32>
    %11 = arith.addf %9, %10 : vector<20x320xf32>
    %cst_9 = arith.constant 0.000000e+00 : f32
    %12 = vector.broadcast %cst_9 : f32 to vector<20x320xf32>
    %13 = arith.maximumf %11, %12 : vector<20x320xf32>
    %14 = arith.truncf %13 : vector<20x320xf32> to vector<20x320xbf16>
    %c0_10 = arith.constant 0 : index
    %c0_11 = arith.constant 0 : index
    %c0_12 = arith.constant 0 : index
    %15 = vector.load %arg5[%c0_10, %c0_11, %c0_12] : memref<1x20x320xbf16, #tpu.memory_space<vmem>>, vector<1x20x320xbf16>
    %16 = vector.shape_cast %15 : vector<1x20x320xbf16> to vector<20x320xbf16>
    %17 = vector.shape_cast %14 : vector<20x320xbf16> to vector<1x20x320xbf16>
    tpu.vector_store %arg5[%c0_10, %c0_11, %c0_12], %17 {strides = array<i32>} : memref<1x20x320xbf16, #tpu.memory_space<vmem>>, vector<1x20x320xbf16>,
    return
  }
  func.func @transform_0(%arg0: i32) -> (i32, i32, i32) {
    %c0_i32 = arith.constant 0 : i32
    %c0_i32_0 = arith.constant 0 : i32
    %c0_i32_1 = arith.constant 0 : i32
    return %arg0, %c0_i32, %c0_i32_0 : i32, i32, i32
  }
  func.func @transform_1(%arg0: i32) -> (i32, i32) {
    %c0_i32 = arith.constant 0 : i32
    %c0_i32_0 = arith.constant 0 : i32
    %c0_i32_1 = arith.constant 0 : i32
    return %c0_i32, %c0_i32_0 : i32, i32
  }
  func.func @transform_2(%arg0: i32) -> (i32, i32) {
    %c0_i32 = arith.constant 0 : i32
    %c0_i32_0 = arith.constant 0 : i32
    %c0_i32_1 = arith.constant 0 : i32
    return %c0_i32, %c0_i32_0 : i32, i32
  }
  func.func @transform_3(%arg0: i32) -> (i32, i32) {
    %c0_i32 = arith.constant 0 : i32
    %c0_i32_0 = arith.constant 0 : i32
    %c0_i32_1 = arith.constant 0 : i32
    return %c0_i32, %c0_i32_0 : i32, i32
  }
  func.func @transform_4(%arg0: i32) -> (i32, i32, i32) {
    %c0_i32 = arith.constant 0 : i32
    %c0_i32_0 = arith.constant 0 : i32
    %c0_i32_1 = arith.constant 0 : i32
    return %arg0, %c0_i32, %c0_i32_0 : i32, i32, i32
  }
}

module attributes {stable_mosaic.version = 11 : i64} {
  func.func @_conv_wide_kernel(%arg0: i32, %arg1: memref<1x10x640xbf16, #tpu.memory_space<vmem>>, %arg2: memref<640x288xbf16, #tpu.memory_space<vmem>>, %arg3: memref<640x288xbf16, #tpu.memory_space<vmem>>, %arg4: memref<1x288xf32, #tpu.memory_space<vmem>>, %arg5: memref<1x9x288xbf16, #tpu.memory_space<vmem>>) attributes {dimension_semantics = [#tpu.dimension_semantics<parallel>], iteration_bounds = array<i64: 2>, scalar_prefetch = 0 : i64, scratch_operands = 0 : i64, tpu.core_type = #tpu.core_type<tc>, window_params = [{transform_indices = @transform_0, window_bounds = array<i64: 1, 10, 640>}, {pipeline_mode = #tpu.pipeline_mode<synchronous>, transform_indices = @transform_1, window_bounds = array<i64: 640, 288>}, {pipeline_mode = #tpu.pipeline_mode<synchronous>, transform_indices = @transform_2, window_bounds = array<i64: 640, 288>}, {pipeline_mode = #tpu.pipeline_mode<synchronous>, transform_indices = @transform_3, window_bounds = array<i64: 1, 288>}, {transform_indices = @transform_4, window_bounds = array<i64: 1, 9, 288>}]} {
    %c0 = arith.constant 0 : index
    %c0_0 = arith.constant 0 : index
    %0 = vector.load %arg2[%c0, %c0_0] : memref<640x288xbf16, #tpu.memory_space<vmem>>, vector<640x288xbf16>
    %c0_1 = arith.constant 0 : index
    %c0_2 = arith.constant 0 : index
    %1 = vector.load %arg3[%c0_1, %c0_2] : memref<640x288xbf16, #tpu.memory_space<vmem>>, vector<640x288xbf16>
    %c0_3 = arith.constant 0 : index
    %c0_4 = arith.constant 0 : index
    %2 = vector.load %arg4[%c0_3, %c0_4] : memref<1x288xf32, #tpu.memory_space<vmem>>, vector<1x288xf32>
    %c0_5 = arith.constant 0 : index
    %c0_6 = arith.constant 0 : index
    %c0_7 = arith.constant 0 : index
    %3 = vector.load %arg1[%c0_5, %c0_6, %c0_7] : memref<1x10x640xbf16, #tpu.memory_space<vmem>>, vector<1x10x640xbf16>
    %4 = vector.shape_cast %3 : vector<1x10x640xbf16> to vector<10x640xbf16>
    %5 = vector.extract_strided_slice %4 {offsets = [0, 0], sizes = [9, 640], strides = [1, 1]} : vector<10x640xbf16> to vector<9x640xbf16>
    %cst = arith.constant dense<0.000000e+00> : vector<9x288xf32>
    %6 = tpu.matmul %5, %0, %cst {dimension_numbers = #tpu.dot_dimension_numbers<[1], [0], [0], [1], [0, 0, 1, 1], [], []>} : vector<9x640xbf16>, vector<640x288xbf16>, vector<9x288xf32> -> vector<9x288xf32>
    %7 = vector.extract_strided_slice %4 {offsets = [1, 0], sizes = [9, 640], strides = [1, 1]} : vector<10x640xbf16> to vector<9x640xbf16>
    %cst_8 = arith.constant dense<0.000000e+00> : vector<9x288xf32>
    %8 = tpu.matmul %7, %1, %cst_8 {dimension_numbers = #tpu.dot_dimension_numbers<[1], [0], [0], [1], [0, 0, 1, 1], [], []>} : vector<9x640xbf16>, vector<640x288xbf16>, vector<9x288xf32> -> vector<9x288xf32>
    %9 = arith.addf %6, %8 : vector<9x288xf32>
    %10 = vector.broadcast %2 : vector<1x288xf32> to vector<9x288xf32>
    %11 = arith.addf %9, %10 : vector<9x288xf32>
    %cst_9 = arith.constant 0.000000e+00 : f32
    %12 = vector.broadcast %cst_9 : f32 to vector<9x288xf32>
    %13 = arith.maximumf %11, %12 : vector<9x288xf32>
    %14 = arith.truncf %13 : vector<9x288xf32> to vector<9x288xbf16>
    %c0_10 = arith.constant 0 : index
    %c0_11 = arith.constant 0 : index
    %c0_12 = arith.constant 0 : index
    %15 = vector.load %arg5[%c0_10, %c0_11, %c0_12] : memref<1x9x288xbf16, #tpu.memory_space<vmem>>, vector<1x9x288xbf16>
    %16 = vector.shape_cast %15 : vector<1x9x288xbf16> to vector<9x288xbf16>
    %17 = vector.shape_cast %14 : vector<9x288xbf16> to vector<1x9x288xbf16>
    tpu.vector_store %arg5[%c0_10, %c0_11, %c0_12], %17 {strides = array<i32>} : memref<1x9x288xbf16, #tpu.memory_space<vmem>>, vector<1x9x288xbf16>,
    return
  }
  func.func @transform_0(%arg0: i32) -> (i32, i32, i32) {
    %c0_i32 = arith.constant 0 : i32
    %c0_i32_0 = arith.constant 0 : i32
    %c0_i32_1 = arith.constant 0 : i32
    return %arg0, %c0_i32, %c0_i32_0 : i32, i32, i32
  }
  func.func @transform_1(%arg0: i32) -> (i32, i32) {
    %c0_i32 = arith.constant 0 : i32
    %c0_i32_0 = arith.constant 0 : i32
    %c0_i32_1 = arith.constant 0 : i32
    return %c0_i32, %c0_i32_0 : i32, i32
  }
  func.func @transform_2(%arg0: i32) -> (i32, i32) {
    %c0_i32 = arith.constant 0 : i32
    %c0_i32_0 = arith.constant 0 : i32
    %c0_i32_1 = arith.constant 0 : i32
    return %c0_i32, %c0_i32_0 : i32, i32
  }
  func.func @transform_3(%arg0: i32) -> (i32, i32) {
    %c0_i32 = arith.constant 0 : i32
    %c0_i32_0 = arith.constant 0 : i32
    %c0_i32_1 = arith.constant 0 : i32
    return %c0_i32, %c0_i32_0 : i32, i32
  }
  func.func @transform_4(%arg0: i32) -> (i32, i32, i32) {
    %c0_i32 = arith.constant 0 : i32
    %c0_i32_0 = arith.constant 0 : i32
    %c0_i32_1 = arith.constant 0 : i32
    return %arg0, %c0_i32, %c0_i32_0 : i32, i32, i32
  }
}

module attributes {stable_mosaic.version = 11 : i64} {
  func.func @_mlp_heads_kernel(%arg0: i32, %arg1: memref<2x2592xbf16, #tpu.memory_space<vmem>>, %arg2: memref<2592x256xbf16, #tpu.memory_space<vmem>>, %arg3: memref<1x256xf32, #tpu.memory_space<vmem>>, %arg4: memref<256x8xbf16, #tpu.memory_space<vmem>>, %arg5: memref<1x8xf32, #tpu.memory_space<vmem>>, %arg6: memref<2x8xf32, #tpu.memory_space<vmem>>) attributes {dimension_semantics = [#tpu.dimension_semantics<parallel>], iteration_bounds = array<i64: 1>, scalar_prefetch = 0 : i64, scratch_operands = 0 : i64, tpu.core_type = #tpu.core_type<tc>, window_params = [{transform_indices = @transform_0, window_bounds = array<i64: 2, 2592>}, {pipeline_mode = #tpu.pipeline_mode<synchronous>, transform_indices = @transform_1, window_bounds = array<i64: 2592, 256>}, {pipeline_mode = #tpu.pipeline_mode<synchronous>, transform_indices = @transform_2, window_bounds = array<i64: 1, 256>}, {pipeline_mode = #tpu.pipeline_mode<synchronous>, transform_indices = @transform_3, window_bounds = array<i64: 256, 8>}, {pipeline_mode = #tpu.pipeline_mode<synchronous>, transform_indices = @transform_4, window_bounds = array<i64: 1, 8>}, {transform_indices = @transform_5, window_bounds = array<i64: 2, 8>}]} {
    %c0 = arith.constant 0 : index
    %c0_0 = arith.constant 0 : index
    %0 = vector.load %arg1[%c0, %c0_0] : memref<2x2592xbf16, #tpu.memory_space<vmem>>, vector<2x2592xbf16>
    %c0_1 = arith.constant 0 : index
    %c0_2 = arith.constant 0 : index
    %1 = vector.load %arg2[%c0_1, %c0_2] : memref<2592x256xbf16, #tpu.memory_space<vmem>>, vector<2592x256xbf16>
    %cst = arith.constant dense<0.000000e+00> : vector<2x256xf32>
    %2 = tpu.matmul %0, %1, %cst {dimension_numbers = #tpu.dot_dimension_numbers<[1], [0], [0], [1], [0, 0, 1, 1], [], []>} : vector<2x2592xbf16>, vector<2592x256xbf16>, vector<2x256xf32> -> vector<2x256xf32>
    %c0_3 = arith.constant 0 : index
    %c0_4 = arith.constant 0 : index
    %3 = vector.load %arg3[%c0_3, %c0_4] : memref<1x256xf32, #tpu.memory_space<vmem>>, vector<1x256xf32>
    %4 = vector.broadcast %3 : vector<1x256xf32> to vector<2x256xf32>
    %5 = arith.addf %2, %4 : vector<2x256xf32>
    %cst_5 = arith.constant 0.000000e+00 : f32
    %6 = vector.broadcast %cst_5 : f32 to vector<2x256xf32>
    %7 = arith.maximumf %5, %6 : vector<2x256xf32>
    %8 = arith.truncf %7 : vector<2x256xf32> to vector<2x256xbf16>
    %c0_6 = arith.constant 0 : index
    %c0_7 = arith.constant 0 : index
    %9 = vector.load %arg4[%c0_6, %c0_7] : memref<256x8xbf16, #tpu.memory_space<vmem>>, vector<256x8xbf16>
    %cst_8 = arith.constant dense<0.000000e+00> : vector<2x8xf32>
    %10 = tpu.matmul %8, %9, %cst_8 {dimension_numbers = #tpu.dot_dimension_numbers<[1], [0], [0], [1], [0, 0, 1, 1], [], []>} : vector<2x256xbf16>, vector<256x8xbf16>, vector<2x8xf32> -> vector<2x8xf32>
    %c0_9 = arith.constant 0 : index
    %c0_10 = arith.constant 0 : index
    %11 = vector.load %arg5[%c0_9, %c0_10] : memref<1x8xf32, #tpu.memory_space<vmem>>, vector<1x8xf32>
    %12 = vector.broadcast %11 : vector<1x8xf32> to vector<2x8xf32>
    %13 = arith.addf %10, %12 : vector<2x8xf32>
    %14 = tpu.iota {dimensions = array<i32: 1>} : vector<2x8xi32>
    %c1_i32 = arith.constant 1 : i32
    %15 = vector.broadcast %c1_i32 : i32 to vector<2x8xi32>
    %16 = arith.cmpi sge, %14, %15 : vector<2x8xi32>
    %c4_i32 = arith.constant 4 : i32
    %17 = vector.broadcast %c4_i32 : i32 to vector<2x8xi32>
    %18 = arith.cmpi sle, %14, %17 : vector<2x8xi32>
    %19 = arith.andi %16, %18 : vector<2x8xi1>
    %cst_11 = arith.constant 0xFF800000 : f32
    %20 = vector.broadcast %cst_11 : f32 to vector<2x8xf32>
    %21 = arith.select %19, %13, %20 : vector<2x8xi1>, vector<2x8xf32>
    %cst_12 = arith.constant dense<0xFF800000> : vector<2xf32>
    %22 = vector.multi_reduction <maximumf>, %21, %cst_12 [1] : vector<2x8xf32> to vector<2xf32>
    %23 = vector.shape_cast %22 : vector<2xf32> to vector<2x1xf32>
    %24 = vector.broadcast %23 : vector<2x1xf32> to vector<2x8xf32>
    %25 = arith.subf %13, %24 : vector<2x8xf32>
    %26 = math.exp %25 : vector<2x8xf32>
    %cst_13 = arith.constant 0.000000e+00 : f32
    %27 = vector.broadcast %cst_13 : f32 to vector<2x8xf32>
    %28 = arith.select %19, %26, %27 : vector<2x8xi1>, vector<2x8xf32>
    %cst_14 = arith.constant dense<0.000000e+00> : vector<2xf32>
    %29 = vector.multi_reduction <add>, %28, %cst_14 [1] : vector<2x8xf32> to vector<2xf32>
    %30 = vector.shape_cast %29 : vector<2xf32> to vector<2x1xf32>
    %31 = math.log %30 : vector<2x1xf32>
    %32 = arith.addf %23, %31 : vector<2x1xf32>
    %33 = vector.broadcast %32 : vector<2x1xf32> to vector<2x8xf32>
    %34 = arith.subf %13, %33 : vector<2x8xf32>
    %35 = arith.select %19, %34, %13 : vector<2x8xi1>, vector<2x8xf32>
    %c0_15 = arith.constant 0 : index
    %c0_16 = arith.constant 0 : index
    %36 = vector.load %arg6[%c0_15, %c0_16] : memref<2x8xf32, #tpu.memory_space<vmem>>, vector<2x8xf32>
    tpu.vector_store %arg6[%c0_15, %c0_16], %35 {strides = array<i32>} : memref<2x8xf32, #tpu.memory_space<vmem>>, vector<2x8xf32>,
    return
  }
  func.func @transform_0(%arg0: i32) -> (i32, i32) {
    %c0_i32 = arith.constant 0 : i32
    %c0_i32_0 = arith.constant 0 : i32
    return %arg0, %c0_i32 : i32, i32
  }
  func.func @transform_1(%arg0: i32) -> (i32, i32) {
    %c0_i32 = arith.constant 0 : i32
    %c0_i32_0 = arith.constant 0 : i32
    %c0_i32_1 = arith.constant 0 : i32
    return %c0_i32, %c0_i32_0 : i32, i32
  }
  func.func @transform_2(%arg0: i32) -> (i32, i32) {
    %c0_i32 = arith.constant 0 : i32
    %c0_i32_0 = arith.constant 0 : i32
    %c0_i32_1 = arith.constant 0 : i32
    return %c0_i32, %c0_i32_0 : i32, i32
  }
  func.func @transform_3(%arg0: i32) -> (i32, i32) {
    %c0_i32 = arith.constant 0 : i32
    %c0_i32_0 = arith.constant 0 : i32
    %c0_i32_1 = arith.constant 0 : i32
    return %c0_i32, %c0_i32_0 : i32, i32
  }
  func.func @transform_4(%arg0: i32) -> (i32, i32) {
    %c0_i32 = arith.constant 0 : i32
    %c0_i32_0 = arith.constant 0 : i32
    %c0_i32_1 = arith.constant 0 : i32
    return %c0_i32, %c0_i32_0 : i32, i32
  }
  func.func @transform_5(%arg0: i32) -> (i32, i32) {
    %c0_i32 = arith.constant 0 : i32
    %c0_i32_0 = arith.constant 0 : i32
    return %arg0, %c0_i32 : i32, i32
  }
}

</mosaic_0001>

<bundles_post_ra>
// kernel: model_forward.3
= control target key start
LH: loop header
LB: loop body
LE: loop exit
PB: predicated region body
PF: predicated region fallthrough
CT: control target
= control target key end

     0   :  { %s7801_s15 = smov 0   ;;  %s11480_s0 = inlined_call_operand.vmem [shape: bf16[2,21,1344], index: 0, kind: input, shape index: {}]   ;;  %s11481_s1 = inlined_call_operand.vmem [shape: bf16[1344,320], index: 1, kind: input, shape index: {}]   ;;  %s11482_s2 = inlined_call_operand.vmem [shape: bf16[1344,320], index: 2, kind: input, shape index: {}]   ;;  %s11483_s3 = inlined_call_operand.vmem [shape: f32[1,320], index: 3, kind: input, shape index: {}]   ;;  %s11484_s4 = inlined_call_operand.vmem [shape: bf16[2,20,320], index: 4, kind: output, shape index: {}]  }
   0x1 LB: > { %s5150_s16 = sadd.s32 4294967295, %s7774_s15   ;;  %p5154_p0 = scmp.ge.s32.totalorder %s7774_s15, 1  ;;  %s7774_s15 = sphi %s7801_s15, %s14_s15  }
   0x2   : > { %p162_p1 = scmp.lt.s32.totalorder %s7774_s15, 3 }
   0x4   : > { %p163_p2 = pnand %p5154_p0, %p162_p1 }
   0x6   : > { %166 = sbr.rel (%p163_p2) target bundleno = 720 (0x2d0), region = 36 }
   0xb   : > { %v5287_v0 = vld [vmem:[%s11482_s2 + $0xa8] sm:$0xf]  ;;  %v7505_v1 = vld [vmem:[%s11482_s2 + $0xb0] sm:$0xf0]  ;;  %v5275_v11 = vld [vmem:[%s11482_s2 + $0x90] sm:$0xf] }
   0xc   : > { %v5383_v2 = vld [vmem:[%s11482_s2 + $0x168] sm:$0xf]  ;;  %v5288_v3 = vor.u32 %v7505_v1, %v5287_v0  ;;  %v7529_v4 = vld [vmem:[%s11482_s2 + $0x170] sm:$0xf0]  ;;  %v7502_v13 = vld [vmem:[%s11482_s2 + $0x98] sm:$0xf0] }
   0xd   : > { %v5479_v5 = vld [vmem:[%s11482_s2 + $0x228] sm:$0xf]  ;;  %v7553_v6 = vld [vmem:[%s11482_s2 + $0x230] sm:$0xf0]  ;;  %v5384_v7 = vor.u32 %v7529_v4, %v5383_v2  ;;  %v5371_v14 = vld [vmem:[%s11482_s2 + $0x150] sm:$0xf]  ;;  %v5276_v16 = vor.u32 %v7502_v13, %v5275_v11 }
   0xe   : > { %v5480_v8 = vor.u32 %v7553_v6, %v5479_v5  ;;  %v5575_v9 = vld [vmem:[%s11482_s2 + $0x2e8] sm:$0xf]  ;;  %v7577_v10 = vld [vmem:[%s11482_s2 + $0x2f0] sm:$0xf0]  ;;  %2500 = vmatpush.bf16.msra.mxu0 %v5288_v3  ;;  %v7526_v15 = vld [vmem:[%s11482_s2 + $0x158] sm:$0xf0] }
   0xf   : > { %v5576_v12 = vor.u32 %v7577_v10, %v5575_v9  ;;  %2518 = vmatpush.bf16.msra.mxu1 %v5384_v7  ;;  %v5372_v17 = vor.u32 %v7526_v15, %v5371_v14  ;;  %v5467_v18 = vld [vmem:[%s11482_s2 + $0x210] sm:$0xf]  ;;  %v7550_v19 = vld [vmem:[%s11482_s2 + $0x218] sm:$0xf0]  ;;  %v5263_v23 = vld [vmem:[%s11482_s2 + $0x78] sm:$0xf] }
  0x10   : > { %2536 = vmatpush.bf16.msra.mxu2 %v5480_v8  ;;  %v5563_v20 = vld [vmem:[%s11482_s2 + $0x2d0] sm:$0xf]  ;;  %v5468_v21 = vor.u32 %v7550_v19, %v5467_v18  ;;  %v7574_v22 = vld [vmem:[%s11482_s2 + $0x2d8] sm:$0xf0]  ;;  %v7499_v24 = vld [vmem:[%s11482_s2 + $0x80] sm:$0xf0] }
  0x11   : > { %2554 = vmatpush.bf16.msra.mxu3 %v5576_v12  ;;  %v5564_v25 = vor.u32 %v7574_v22, %v5563_v20  ;;  %v5359_v26 = vld [vmem:[%s11482_s2 + $0x138] sm:$0xf]  ;;  %v7523_v27 = vld [vmem:[%s11482_s2 + $0x140] sm:$0xf0]  ;;  %v5264_v29 = vor.u32 %v7499_v24, %v5263_v23  ;;  %v5251_v35 = vld [vmem:[%s11482_s2 + $0x60] sm:$0xf] }
  0x12   : > { %v5455_v28 = vld [vmem:[%s11482_s2 + $0x1f8] sm:$0xf]  ;;  %2501 = vmatpush.bf16.msra.mxu0 %v5276_v16  ;;  %v7547_v30 = vld [vmem:[%s11482_s2 + $0x200] sm:$0xf0]  ;;  %v5360_v33 = vor.u32 %v7523_v27, %v5359_v26  ;;  %v7496_v36 = vld [vmem:[%s11482_s2 + $0x68] sm:$0xf0] }
  0x13   : > { %v5551_v31 = vld [vmem:[%s11482_s2 + $0x2b8] sm:$0xf]  ;;  %v7571_v32 = vld [vmem:[%s11482_s2 + $0x2c0] sm:$0xf0]  ;;  %2519 = vmatpush.bf16.msra.mxu1 %v5372_v17  ;;  %v5456_v34 = vor.u32 %v7547_v30, %v5455_v28  ;;  %v5347_v37 = vld [vmem:[%s11482_s2 + $0x120] sm:$0xf]  ;;  %v5252_v44 = vor.u32 %v7496_v36, %v5251_v35 }
  0x14   : > { %2537 = vmatpush.bf16.msra.mxu2 %v5468_v21  ;;  %v5552_v38 = vor.u32 %v7571_v32, %v5551_v31  ;;  %v7520_v39 = vld [vmem:[%s11482_s2 + $0x128] sm:$0xf0]  ;;  %v5443_v40 = vld [vmem:[%s11482_s2 + $0x1e0] sm:$0xf]  ;;  %v5239_v47 = vld [vmem:[%s11482_s2 + $0x48] sm:$0xf] }
  0x15   : > { %2555 = vmatpush.bf16.msra.mxu3 %v5564_v25  ;;  %v7544_v41 = vld [vmem:[%s11482_s2 + $0x1e8] sm:$0xf0]  ;;  %v5539_v42 = vld [vmem:[%s11482_s2 + $0x2a0] sm:$0xf]  ;;  %v5348_v45 = vor.u32 %v7520_v39, %v5347_v37  ;;  %v7493_v48 = vld [vmem:[%s11482_s2 + $0x50] sm:$0xf0] }
  0x16   : > { %v7568_v43 = vld [vmem:[%s11482_s2 + $0x2a8] sm:$0xf0]  ;;  %2502 = vmatpush.bf16.msra.mxu0 %v5264_v29  ;;  %v5444_v46 = vor.u32 %v7544_v41, %v5443_v40  ;;  %v5335_v49 = vld [vmem:[%s11482_s2 + $0x108] sm:$0xf]  ;;  %v7517_v51 = vld [vmem:[%s11482_s2 + $0x110] sm:$0xf0]  ;;  %v5240_v56 = vor.u32 %v7493_v48, %v5239_v47 }
  0x17   : > { %2520 = vmatpush.bf16.msra.mxu1 %v5360_v33  ;;  %v5540_v50 = vor.u32 %v7568_v43, %v5539_v42  ;;  %v5431_v52 = vld [vmem:[%s11482_s2 + $0x1c8] sm:$0xf]  ;;  %v7541_v53 = vld [vmem:[%s11482_s2 + $0x1d0] sm:$0xf0]  ;;  %v5227_v57 = vld [vmem:[%s11482_s2 + $0x30] sm:$0xf]  ;;  %v5336_v58 = vor.u32 %v7517_v51, %v5335_v49 }
  0x18   : > { %2538 = vmatpush.bf16.msra.mxu2 %v5456_v34  ;;  %v5527_v54 = vld [vmem:[%s11482_s2 + $0x288] sm:$0xf]  ;;  %v7565_v55 = vld [vmem:[%s11482_s2 + $0x290] sm:$0xf0]  ;;  %v5432_v59 = vor.u32 %v7541_v53, %v5431_v52  ;;  %v7490_v60 = vld [vmem:[%s11482_s2 + $0x38] sm:$0xf0] }
  0x19   : > { %2556 = vmatpush.bf16.msra.mxu3 %v5552_v38  ;;  %v5323_v61 = vld [vmem:[%s11482_s2 + $0xf0] sm:$0xf]  ;;  %v7514_v62 = vld [vmem:[%s11482_s2 + $0xf8] sm:$0xf0]  ;;  %v5528_v63 = vor.u32 %v7565_v55, %v5527_v54  ;;  %v5215_v4 = vld [vmem:[%s11482_s2 + $0x18] sm:$0xf]  ;;  %v5228_v6 = vor.u32 %v7490_v60, %v5227_v57 }
  0x1a   : > { %2503 = vmatpush.bf16.msra.mxu0 %v5252_v44  ;;  %v5419_v0 = vld [vmem:[%s11482_s2 + $0x1b0] sm:$0xf]  ;;  %v7538_v1 = vld [vmem:[%s11482_s2 + $0x1b8] sm:$0xf0]  ;;  %v7487_v5 = vld [vmem:[%s11482_s2 + $0x20] sm:$0xf0]  ;;  %v5324_v10 = vor.u32 %v7514_v62, %v5323_v61 }
  0x1b   : > { %2521 = vmatpush.bf16.msra.mxu1 %v5348_v45  ;;  %v5515_v2 = vld [vmem:[%s11482_s2 + $0x270] sm:$0xf]  ;;  %v7562_v3 = vld [vmem:[%s11482_s2 + $0x278] sm:$0xf0]  ;;  %v5311_v7 = vld [vmem:[%s11482_s2 + $0xd8] sm:$0xf]  ;;  %v5420_v11 = vor.u32 %v7538_v1, %v5419_v0  ;;  %v5216_v26 = vor.u32 %v7487_v5, %v5215_v4 }
  0x1c   : > { %2539 = vmatpush.bf16.msra.mxu2 %v5444_v46  ;;  %v7511_v8 = vld [vmem:[%s11482_s2 + $0xe0] sm:$0xf0]  ;;  %v5407_v9 = vld [vmem:[%s11482_s2 + $0x198] sm:$0xf]  ;;  %v5516_v15 = vor.u32 %v7562_v3, %v5515_v2  ;;  %v7980_v16 = vld [vmem:[%s11482_s2] sm:$0xf] }
  0x1d   : > { %2557 = vmatpush.bf16.msra.mxu3 %v5540_v50  ;;  %v7535_v12 = vld [vmem:[%s11482_s2 + $0x1a0] sm:$0xf0]  ;;  %v5503_v13 = vld [vmem:[%s11482_s2 + $0x258] sm:$0xf]  ;;  %v7985_v17 = vld [vmem:[%s11482_s2 + $0x8] sm:$0xf0]  ;;  %v5312_v30 = vor.u32 %v7511_v8, %v5311_v7 }
  0x1e   : > { %2504 = vmatpush.bf16.msra.mxu0 %v5240_v56  ;;  %v7559_v14 = vld [vmem:[%s11482_s2 + $0x260] sm:$0xf0]  ;;  %p188_p3 = scmp.lt.s32.totalorder %s5150_s16, 1  ;;  %v7992_v18 = vld [vmem:[%s11482_s2 + $0xc0] sm:$0xf]  ;;  %v5408_v31 = vor.u32 %v7535_v12, %v5407_v9  ;;  %v5204_v38 = vor.u32 %v7985_v17, %v7980_v16  ;;  %vm2493_vm1 = vcmask 523264  }
  0x1f   : > { %2522 = vmatpush.bf16.msra.mxu1 %v5336_v58  ;;  %v7997_v19 = vld [vmem:[%s11482_s2 + $0xc8] sm:$0xf0]  ;;  %v8002_v20 = vld [vmem:[%s11482_s2 + $0x180] sm:$0xf]  ;;  %v8022_v24 = vld [vmem:[%s11482_s2 + $0x3a8] sm:$0xf]  ;;  %v5504_v35 = vor.u32 %v7559_v14, %v5503_v13 }
  0x20   : > { %2540 = vmatpush.bf16.msra.mxu2 %v5432_v59  ;;  %v8007_v21 = vld [vmem:[%s11482_s2 + $0x188] sm:$0xf0]  ;;  %v8012_v22 = vld [vmem:[%s11482_s2 + $0x240] sm:$0xf]  ;;  %v8027_v25 = vld [vmem:[%s11482_s2 + $0x3b0] sm:$0xf0]  ;;  %v5300_v42 = vor.u32 %v7997_v19, %v7992_v18 }
  0x21   : > { %2558 = vmatpush.bf16.msra.mxu3 %v5528_v63  ;;  %v8017_v23 = vld [vmem:[%s11482_s2 + $0x248] sm:$0xf0]  ;;  %s11506_s16 = smov (!%p188_p3, %s5150_s16), 1  ;;  %v8036_v27 = vld [vmem:[%s11482_s2 + $0x468] sm:$0xf]  ;;  %v5396_v43 = vor.u32 %v8007_v21, %v8002_v20  ;;  %v5672_v45 = vor.u32 %v8027_v25, %v8022_v24  ;;  %vm5088_vm2 = vcmask 519168  }
  0x22   : > { %2505 = vmatpush.bf16.msra.mxu0 %v5228_v6  ;;  %v8041_v28 = vld [vmem:[%s11482_s2 + $0x470] sm:$0xf0]  ;;  %v8046_v29 = vld [vmem:[%s11482_s2 + $0x528] sm:$0xf]  ;;  %s7758_s17 = smul.u32 132, %s11506_s16  ;;  %v5492_v44 = vor.u32 %v8017_v23, %v8012_v22  ;;  %vm5093_vm3 = vcmask 517120  }
  0x23   : > { %2523 = vmatpush.bf16.msra.mxu1 %v5324_v10  ;;  %v8051_v32 = vld [vmem:[%s11482_s2 + $0x530] sm:$0xf0]  ;;  %v8056_v33 = vld [vmem:[%s11482_s2 + $0x5e8] sm:$0xf]  ;;  %v8067_v36 = vld [vmem:[%s11482_s2 + $0x390] sm:$0xf]  ;;  %v5768_v52 = vor.u32 %v8041_v28, %v8036_v27 }
  0x24   : > { %2541 = vmatpush.bf16.msra.mxu2 %v5420_v11  ;;  %v8061_v34 = vld [vmem:[%s11482_s2 + $0x5f0] sm:$0xf0]  ;;  %v8072_v37 = vld [vmem:[%s11482_s2 + $0x398] sm:$0xf0]  ;;  %vm963_vm0 = vsmask.f32 7424  ;;  %s8100_s30 = scalar_lea.vmem %s11480_s0, %s7758_s17  ;;  %v5864_v53 = vor.u32 %v8051_v32, %v8046_v29 }
  0x25   : > { %2559 = vmatpush.bf16.msra.mxu3 %v5516_v15  ;;  %v8079_v39 = vld [vmem:[%s11482_s2 + $0x450] sm:$0xf]  ;;  %v8084_v40 = vld [vmem:[%s11482_s2 + $0x458] sm:$0xf0]  ;;  %v5159_v49 = vld [vmem:[%s8100_s30] sm:$0xf]  ;;  %v5960_v54 = vor.u32 %v8061_v34, %v8056_v33  ;;  %v5660_v61 = vor.u32 %v8072_v37, %v8067_v36 }
  0x26   : > { %v8089_v41 = vld [vmem:[%s11482_s2 + $0x510] sm:$0xf]  ;;  %2506 = vmatpush.bf16.msra.mxu0 %v5216_v26  ;;  %v8107_v46 = vld [vmem:[%s11482_s2 + $0x518] sm:$0xf0]  ;;  %v7740_v50 = vld [vmem:[%s8100_s30 + $0x28] sm:$0xf0]  ;;  %v5756_v1 = vor.u32 %v8084_v40, %v8079_v39 }
  0x27   : > { %v8112_v47 = vld [vmem:[%s11482_s2 + $0x5d0] sm:$0xf]  ;;  %v8117_v48 = vld [vmem:[%s11482_s2 + $0x5d8] sm:$0xf0]  ;;  %2524 = vmatpush.bf16.msra.mxu1 %v5312_v30  ;;  %v8128_v56 = vor.u32 %v7740_v50, %v5159_v49  ;;  %v7735_v57 = vld [vmem:[%s8100_s30 + $0x4] sm:$0xf]  ;;  %v5852_v2 = vor.u32 %v8107_v46, %v8089_v41 }
  0x28   : > { %2542 = vmatpush.bf16.msra.mxu2 %v5408_v31  ;;  %v884_v51 = vld [vmem:[%s8100_s30 + $0x58] sm:$0x77]  ;;  %v5161_v58 = vld [vmem:[%s8100_s30 + $0x2c] sm:$0xf0]  ;;  %v5167_v60 = vld [vmem:[%s8100_s30 + $0x8] sm:$0xf]  ;;  %v5948_v3 = vor.u32 %v8117_v48, %v8112_v47 }
  0x29   : > { %2560 = vmatpush.bf16.msra.mxu3 %v5504_v35  ;;  %v930_v55 = vunpack.c.l.b16 %v884_v51  ;;  %v931_v59 = vunpack.c.h.b16 %v884_v51  ;;  %v8135_v62 = vor.u32 %v7735_v57, %v5161_v58  ;;  %v7741_v63 = vld [vmem:[%s8100_s30 + $0x30] sm:$0xf0]  ;;  %v885_v0 = vld [vmem:[%s8100_s30 + $0x60] sm:$0x77]  ;;  %v965_v5 = vshrl.u32 %v8128_v56, 16  ;;  %s7759_s6 = smul.u32 36, %s11506_s16 }
  0x2a   : > { %2507 = vmatpush.bf16.msra.mxu0 %v5204_v38  ;;  %v967_v6 = vshll.u32 %v8128_v56, 16  ;;  %v7736_v8 = vld [vmem:[%s8100_s30 + $0xc] sm:$0xf]  ;;  %v932_v11 = vunpack.c.l.b16 %v885_v0  ;;  %v8154_v12 = vor.u32 %v7741_v63, %v5167_v60  ;;  %v5169_v13 = vld [vmem:[%s8100_s30 + $0x34] sm:$0xf0]  ;;  %v933_v18 = vunpack.c.h.b16 %v885_v0 }
  0x2b   : > { %v8145_v4 = vpack.c.b16 %v930_v55, %v930_v55  ;;  %v8149_v7 = vpack.c.b16 %v931_v59, %v931_v59  ;;  %2525 = vmatpush.bf16.msra.mxu1 %v5300_v42  ;;  %v977_v9 = vshrl.u32 %v8135_v62, 16  ;;  %v979_v10 = vshll.u32 %v8135_v62, 16  ;;  %v5647_v14 = vld [vmem:[%s11482_s2 + $0x378] sm:$0xf]  ;;  %v7595_v19 = vld [vmem:[%s11482_s2 + $0x380] sm:$0xf0]  ;;  %s11462_s8 = scalar_lea.vmem %s11484_s4, %s7759_s6 }
  0x2c   : > { %2543 = vmatpush.bf16.msra.mxu2 %v5396_v43  ;;  %v969_v15 = vrot.slane %v967_v6, 1  ;;  %v8165_v21 = vpack.c.b16 %v932_v11, %v932_v11  ;;  %v989_v22 = vshrl.u32 %v8154_v12, 16  ;;  %v991_v23 = vshll.u32 %v8154_v12, 16  ;;  %v5743_v24 = vld [vmem:[%s11482_s2 + $0x438] sm:$0xf] }
  0x2d   : > { %2561 = vmatpush.bf16.msra.mxu3 %v5492_v44  ;;  %v972_v16 = vshll.u32 %v8145_v4, 16  ;;  %v984_v17 = vshll.u32 %v8149_v7, 16  ;;  %v981_v20 = vrot.slane %v979_v10, 1  ;;  %v7619_v25 = vld [vmem:[%s11482_s2 + $0x440] sm:$0xf0]  ;;  %v8179_v29 = vor.u32 %v7736_v8, %v5169_v13 }
  0x2e   : > { %2572 = vmatpush.bf16.msrb.mxu0 %v5672_v45  ;;  %v970_v26 = vor.u32 %v969_v15, %v965_v5  ;;  %v5839_v30 = vld [vmem:[%s11482_s2 + $0x4f8] sm:$0xf]  ;;  %v7643_v31 = vld [vmem:[%s11482_s2 + $0x500] sm:$0xf0]  ;;  %v993_v33 = vrot.slane %v991_v23, 1  ;;  %v996_v34 = vshll.u32 %v8165_v21, 16  ;;  %v8188_v35 = vpack.c.b16 %v933_v18, %v933_v18 }
  0x2f   : > { %2590 = vmatpush.bf16.msrb.mxu1 %v5768_v52  ;;  %v8175_v27 = vrot.slane %v972_v16, 1  ;;  %v8177_v28 = vrot.slane %v984_v17, 1  ;;  %v982_v32 = vor.u32 %v981_v20, %v977_v9  ;;  %v5935_v36 = vld [vmem:[%s11482_s2 + $0x5b8] sm:$0xf]  ;;  %v7667_v37 = vld [vmem:[%s11482_s2 + $0x5c0] sm:$0xf0]  ;;  %v5648_v41 = vor.u32 %v7595_v19, %v5647_v14 }
  0x30   : > { %2608 = vmatpush.bf16.msrb.mxu2 %v5864_v53  ;;  %v1001_v39 = vshrl.u32 %v8179_v29, 16  ;;  %v1003_v40 = vshll.u32 %v8179_v29, 16  ;;  %v5635_v42 = vld [vmem:[%s11482_s2 + $0x360] sm:$0xf]  ;;  %v7592_v43 = vld [vmem:[%s11482_s2 + $0x368] sm:$0xf0]  ;;  %v994_v45 = vor.u32 %v993_v33, %v989_v22  ;;  %v5744_v53 = vor.u32 %v7619_v25, %v5743_v24 }
  0x31   : > { %2626 = vmatpush.bf16.msrb.mxu3 %v5960_v54  ;;  %v8198_v38 = vsel %vm963_vm0, %v970_v26, %v8175_v27  ;;  %v8211_v44 = vsel %vm963_vm0, %v982_v32, %v8177_v28  ;;  %v8213_v46 = vrot.slane %v996_v34, 1  ;;  %v1008_v49 = vshll.u32 %v8188_v35, 16  ;;  %v5731_v50 = vld [vmem:[%s11482_s2 + $0x420] sm:$0xf]  ;;  %v7616_v51 = vld [vmem:[%s11482_s2 + $0x428] sm:$0xf0] }
  0x32   : > { %2573 = vmatpush.bf16.msrb.mxu0 %v5660_v61  ;;  %2526 = vmatmul.bf16.vlgmr.msra.gmra.mxu1 %v8211_v44  ;;  %v1005_v52 = vrot.slane %v1003_v40, 1  ;;  %v5840_v54 = vor.u32 %v7643_v31, %v5839_v30  ;;  %v5827_v55 = vld [vmem:[%s11482_s2 + $0x4e0] sm:$0xf]  ;;  %v7640_v57 = vld [vmem:[%s11482_s2 + $0x4e8] sm:$0xf0]  ;;  %v5936_v61 = vor.u32 %v7667_v37, %v5935_v36  ;;  %v5636_v63 = vor.u32 %v7592_v43, %v5635_v42 }
  0x33   : > { %2508 = vmatmul.bf16.vlgmr.msra.gmra.mxu0 %v8198_v38  ;;  %2591 = vmatpush.bf16.msrb.mxu1 %v5756_v1  ;;  %v8231_v58 = vsel %vm963_vm0, %v994_v45, %v8213_v46  ;;  %v8233_v59 = vrot.slane %v1008_v49, 1  ;;  %v5923_v0 = vld [vmem:[%s11482_s2 + $0x5a0] sm:$0xf]  ;;  %v7664_v1 = vld [vmem:[%s11482_s2 + $0x5a8] sm:$0xf0]  ;;  %v5732_v47 = vor.u32 %v7616_v51, %v5731_v50  ;;  %v5828_v48 = vor.u32 %v7640_v57, %v5827_v55 }
  0x34   : > { %2609 = vmatpush.bf16.msrb.mxu2 %v5852_v2  ;;  %v1006_v60 = vor.u32 %v1005_v52, %v1001_v39  ;;  %v5623_v2 = vld [vmem:[%s11482_s2 + $0x348] sm:$0xf]  ;;  %v7589_v5 = vld [vmem:[%s11482_s2 + $0x350] sm:$0xf0]  ;;  %v1099_v9 = vshrl.u32 %v8149_v7, 16  ;;  %v1102_v10 = vshrl.u32 %v8165_v21, 16  ;;  %v5924_v17 = vor.u32 %v7664_v1, %v5923_v0 }
  0x35   : > { %2627 = vmatpush.bf16.msrb.mxu3 %v5948_v3  ;;  %2544 = vmatmul.bf16.vlgmr.msra.gmra.mxu2 %v8231_v58  ;;  %v1096_v3 = vshrl.u32 %v8145_v4, 16  ;;  %v5719_v6 = vld [vmem:[%s11482_s2 + $0x408] sm:$0xf]  ;;  %v1105_v11 = vshrl.u32 %v8188_v35, 16  ;;  %v7613_v13 = vld [vmem:[%s11482_s2 + $0x410] sm:$0xf0]  ;;  %v5624_v18 = vor.u32 %v7589_v5, %v5623_v2 }
  0x36   : > { %2574 = vmatpush.bf16.msrb.mxu0 %v5648_v41  ;;  %v8257_v8 = vsel %vm963_vm0, %v1006_v60, %v8233_v59  ;;  %v5815_v14 = vld [vmem:[%s11482_s2 + $0x4c8] sm:$0xf]  ;;  %v7637_v15 = vld [vmem:[%s11482_s2 + $0x4d0] sm:$0xf0]  ;;  %v5611_v20 = vld [vmem:[%s11482_s2 + $0x330] sm:$0xf]  ;;  %v5720_v23 = vor.u32 %v7613_v13, %v5719_v6 }
  0x37   : > { %2592 = vmatpush.bf16.msrb.mxu1 %v5744_v53  ;;  %2562 = vmatmul.bf16.vlgmr.msra.gmra.mxu3 %v8257_v8  ;;  %v5911_v16 = vld [vmem:[%s11482_s2 + $0x588] sm:$0xf]  ;;  %v7661_v19 = vld [vmem:[%s11482_s2 + $0x590] sm:$0xf0]  ;;  %v7586_v22 = vld [vmem:[%s11482_s2 + $0x338] sm:$0xf0]  ;;  %v5816_v30 = vor.u32 %v7637_v15, %v5815_v14  ;;  %v8337_v45 = vor.u32 %v1096_v3, %v8175_v27  ;;  %v8355_v27 = vor.u32 %v1099_v9, %v8177_v28 }
  0x38   : > { %2610 = vmatpush.bf16.msrb.mxu2 %v5840_v54  ;;  %v5707_v24 = vld [vmem:[%s11482_s2 + $0x3f0] sm:$0xf]  ;;  %v7610_v25 = vld [vmem:[%s11482_s2 + $0x3f8] sm:$0xf0]  ;;  %v8309_v34 = vld [vmem:[%s11482_s2 + $0x318] sm:$0xf]  ;;  %v5912_v39 = vor.u32 %v7661_v19, %v5911_v16  ;;  %v5612_v40 = vor.u32 %v7586_v22, %v5611_v20  ;;  %v8373_v28 = vor.u32 %v1102_v10, %v8213_v46  ;;  %v8376_v60 = vor.u32 %v1105_v11, %v8233_v59 }
  0x39   : > { %2628 = vmatpush.bf16.msrb.mxu3 %v5936_v61  ;;  %v5803_v26 = vld [vmem:[%s11482_s2 + $0x4b0] sm:$0xf]  ;;  %v7634_v31 = vld [vmem:[%s11482_s2 + $0x4b8] sm:$0xf0]  ;;  %v8314_v36 = vld [vmem:[%s11482_s2 + $0x320] sm:$0xf0]  ;;  %v5708_v49 = vor.u32 %v7610_v25, %v5707_v24 }
  0x3a   : > { %2575 = vmatpush.bf16.msrb.mxu0 %v5636_v63  ;;  %v8299_v32 = vld [vmem:[%s11482_s2 + $0x570] sm:$0xf]  ;;  %v8304_v33 = vld [vmem:[%s11482_s2 + $0x578] sm:$0xf0]  ;;  %v8319_v37 = vld [vmem:[%s11482_s2 + $0x3d8] sm:$0xf]  ;;  %v5804_v53 = vor.u32 %v7634_v31, %v5803_v26  ;;  %v5600_v63 = vor.u32 %v8314_v36, %v8309_v34 }
  0x3b   : > { %2593 = vmatpush.bf16.msrb.mxu1 %v5732_v47  ;;  %v8324_v41 = vld [vmem:[%s11482_s2 + $0x3e0] sm:$0xf0]  ;;  %v8329_v42 = vld [vmem:[%s11482_s2 + $0x498] sm:$0xf]  ;;  %v8352_v52 = vld [vmem:[%s11482_s2 + $0x300] sm:$0xf]  ;;  %v5900_v61 = vor.u32 %v8304_v33, %v8299_v32 }
  0x3c   : > { %2611 = vmatpush.bf16.msrb.mxu2 %v5828_v48  ;;  %v8334_v43 = vld [vmem:[%s11482_s2 + $0x4a0] sm:$0xf0]  ;;  %v8342_v50 = vld [vmem:[%s11482_s2 + $0x558] sm:$0xf]  ;;  %v8360_v54 = vld [vmem:[%s11482_s2 + $0x308] sm:$0xf0]  ;;  %v5696_v2 = vor.u32 %v8324_v41, %v8319_v37 }
  0x3d   : > { %2629 = vmatpush.bf16.msrb.mxu3 %v5924_v17  ;;  %v8347_v51 = vld [vmem:[%s11482_s2 + $0x560] sm:$0xf0]  ;;  %v8365_v55 = vld [vmem:[%s11482_s2 + $0x3c0] sm:$0xf]  ;;  %v8370_v57 = vld [vmem:[%s11482_s2 + $0x3c8] sm:$0xf0]  ;;  %v5792_v47 = vor.u32 %v8334_v43, %v8329_v42  ;;  %v5588_v17 = vor.u32 %v8360_v54, %v8352_v52 }
  0x3e   : > { %2576 = vmatpush.bf16.msrb.mxu0 %v5624_v18  ;;  %v8385_v0 = vld [vmem:[%s11482_s2 + $0x480] sm:$0xf]  ;;  %v8390_v1 = vld [vmem:[%s11482_s2 + $0x488] sm:$0xf0]  ;;  %v5175_v46 = vld [vmem:[%s8100_s30 + $0x10] sm:$0xf]  ;;  %v5888_v9 = vor.u32 %v8347_v51, %v8342_v50  ;;  %v5684_v22 = vor.u32 %v8370_v57, %v8365_v55 }
  0x3f   : > { %2594 = vmatpush.bf16.msrb.mxu1 %v5720_v23  ;;  %v7742_v59 = vld [vmem:[%s8100_s30 + $0x38] sm:$0xf0]  ;;  %v886_v48 = vld [vmem:[%s8100_s30 + $0x68] sm:$0x77]  ;;  %v7737_v5 = vld [vmem:[%s8100_s30 + $0x14] sm:$0xf]  ;;  %v5780_v33 = vor.u32 %v8390_v1, %v8385_v0 }
  0x40   : > { %2612 = vmatpush.bf16.msrb.mxu2 %v5816_v30  ;;  %v8399_v3 = vor.u32 %v7742_v59, %v5175_v46  ;;  %v5177_v6 = vld [vmem:[%s8100_s30 + $0x3c] sm:$0xf0]  ;;  %v934_v10 = vunpack.c.l.b16 %v886_v48  ;;  %v935_v11 = vunpack.c.h.b16 %v886_v48  ;;  %v5183_v14 = vld [vmem:[%s8100_s30 + $0x18] sm:$0xf]  ;;  %v7743_v15 = vld [vmem:[%s8100_s30 + $0x40] sm:$0xf0] }
  0x41   : > { %2630 = vmatpush.bf16.msrb.mxu3 %v5912_v39  ;;  %v8406_v13 = vor.u32 %v7737_v5, %v5177_v6  ;;  %v887_v16 = vld [vmem:[%s8100_s30 + $0x70] sm:$0x77]  ;;  %v8415_v20 = vor.u32 %v7743_v15, %v5183_v14  ;;  %v5875_v23 = vld [vmem:[%s11482_s2 + $0x540] sm:$0xf]  ;;  %v7652_v24 = vld [vmem:[%s11482_s2 + $0x548] sm:$0xf0] }
  0x42   : > { %2577 = vmatpush.bf16.msrb.mxu0 %v5612_v40  ;;  %2531 = vmatmul.bf16.gmra.mxu1 %v8355_v27  ;;  %v1015_v18 = vshll.u32 %v8399_v3, 16  ;;  %v936_v19 = vunpack.c.l.b16 %v887_v16  ;;  %v8425_v25 = vpack.c.b16 %v934_v10, %v934_v10  ;;  %v8427_v26 = vpack.c.b16 %v935_v11, %v935_v11  ;;  %v7738_v31 = vld [vmem:[%s8100_s30 + $0x1c] sm:$0xf]  ;;  %v5185_v32 = vld [vmem:[%s8100_s30 + $0x44] sm:$0xf0] }
  0x43   : > { %2513 = vmatmul.bf16.gmra.mxu0 %v8337_v45  ;;  %2595 = vmatpush.bf16.msrb.mxu1 %v5708_v49  ;;  %v1027_v30 = vshll.u32 %v8406_v13, 16  ;;  %v1013_v34 = vshrl.u32 %v8399_v3, 16  ;;  %v1025_v36 = vshrl.u32 %v8406_v13, 16  ;;  %v6055_v39 = vld [vmem:[%s11482_s2 + $0x6a8] sm:$0xf]  ;;  %v1039_v43 = vshll.u32 %v8415_v20, 16 }
  0x44   : > { %2613 = vmatpush.bf16.msrb.mxu2 %v5804_v53  ;;  %v8437_v37 = vpack.c.b16 %v936_v19, %v936_v19  ;;  %v7697_v40 = vld [vmem:[%s11482_s2 + $0x6b0] sm:$0xf0]  ;;  %v1017_v41 = vrot.slane %v1015_v18, 1  ;;  %v1020_v42 = vshll.u32 %v8425_v25, 16  ;;  %v937_v49 = vunpack.c.h.b16 %v887_v16  ;;  %v6151_v50 = vld [vmem:[%s11482_s2 + $0x768] sm:$0xf] }
  0x45   : > { %2549 = vmatmul.bf16.gmra.mxu2 %v8373_v28  ;;  %2631 = vmatpush.bf16.msrb.mxu3 %v5900_v61  ;;  %v1029_v51 = vrot.slane %v1027_v30, 1  ;;  %v1032_v52 = vshll.u32 %v8427_v26, 16  ;;  %v8452_v54 = vor.u32 %v7738_v31, %v5185_v32  ;;  %v7721_v55 = vld [vmem:[%s11482_s2 + $0x770] sm:$0xf0]  ;;  %v7504_v57 = vld [vmem:[%s11482_s2 + $0xac] sm:$0xf]  ;;  %v5876_v0 = vor.u32 %v7652_v24, %v5875_v23 }
  0x46   : > { %2578 = vmatpush.bf16.msrb.mxu0 %v5600_v63  ;;  %v1044_v53 = vshll.u32 %v8437_v37, 16  ;;  %v5289_v61 = vld [vmem:[%s11482_s2 + $0xb4] sm:$0xf0]  ;;  %v6199_v63 = vld [vmem:[%s11482_s2 + $0x7c8] sm:$0xf]  ;;  %v1037_v1 = vshrl.u32 %v8415_v20, 16  ;;  %v8468_v46 = vpack.c.b16 %v937_v49, %v937_v49  ;;  %v1018_v48 = vor.u32 %v1017_v41, %v1013_v34 }
  0x47   : > { %2596 = vmatpush.bf16.msrb.mxu1 %v5696_v2  ;;  %2567 = vmatmul.bf16.gmra.mxu3 %v8376_v60  ;;  %v1051_v59 = vshll.u32 %v8452_v54, 16  ;;  %v7733_v2 = vld [vmem:[%s11482_s2 + $0x7d0] sm:$0xf0]  ;;  %v8477_v5 = vrot.slane %v1020_v42, 1  ;;  %v1041_v6 = vrot.slane %v1039_v43, 1  ;;  %v1030_v14 = vor.u32 %v1029_v51, %v1025_v36 }
  0x48   : > { %2614 = vmatpush.bf16.msrb.mxu2 %v5792_v47  ;;  %11495 = vst [vmem:[#allocation2_spill] sm:$0xff] %v8468_v46  ;;  %v6043_v47 = vld [vmem:[%s11482_s2 + $0x690] sm:$0xf]  ;;  %v7694_v10 = vld [vmem:[%s11482_s2 + $0x698] sm:$0xf0]  ;;  %v8485_v15 = vrot.slane %v1032_v52, 1  ;;  %v6152_v16 = vor.u32 %v7721_v55, %v6151_v50  ;;  %v6200_v24 = vor.u32 %v7733_v2, %v6199_v63 }
  0x49   : > { %2632 = vmatpush.bf16.msrb.mxu3 %v5888_v9  ;;  %v6056_v9 = vor.u32 %v7697_v40, %v6055_v39  ;;  %v6139_v11 = vld [vmem:[%s11482_s2 + $0x750] sm:$0xf]  ;;  %v7718_v18 = vld [vmem:[%s11482_s2 + $0x758] sm:$0xf0]  ;;  %v7501_v19 = vld [vmem:[%s11482_s2 + $0x94] sm:$0xf]  ;;  %v6044_v30 = vor.u32 %v7694_v10, %v6043_v47  ;;  %v1042_v40 = vor.u32 %v1041_v6, %v1037_v1  ;;  %v8517_v50 = vsel %vm963_vm0, %v1018_v48, %v8477_v5 }
  0x4a   : > { %2579 = vmatpush.bf16.msrb.mxu0 %v5588_v17  ;;  %v5292_v17 = vor.u32 %v7504_v57, %v5289_v61  ;;  %v1049_v23 = vshrl.u32 %v8452_v54, 16  ;;  %v5277_v31 = vld [vmem:[%s11482_s2 + $0x9c] sm:$0xf0]  ;;  %v1053_v32 = vrot.slane %v1051_v59, 1  ;;  %v6140_v34 = vor.u32 %v7718_v18, %v6139_v11  ;;  %v6031_v36 = vld [vmem:[%s11482_s2 + $0x678] sm:$0xf] }
  0x4b   : > { %2597 = vmatpush.bf16.msrb.mxu1 %v5684_v22  ;;  %v8493_v22 = vrot.slane %v1044_v53, 1  ;;  %v7691_v39 = vld [vmem:[%s11482_s2 + $0x680] sm:$0xf0]  ;;  %v5280_v41 = vor.u32 %v7501_v19, %v5277_v31  ;;  %v6127_v42 = vld [vmem:[%s11482_s2 + $0x738] sm:$0xf]  ;;  %v8530_v55 = vsel %vm963_vm0, %v1030_v14, %v8485_v15 }
  0x4c   : > { %2615 = vmatpush.bf16.msrb.mxu2 %v5780_v33  ;;  %v1056_v33 = vshll.u32 %v8468_v46, 16  ;;  %v7715_v43 = vld [vmem:[%s11482_s2 + $0x740] sm:$0xf0]  ;;  %v6187_v49 = vld [vmem:[%s11482_s2 + $0x7b0] sm:$0xf]  ;;  %v6032_v57 = vor.u32 %v7691_v39, %v6031_v36  ;;  %v1054_v63 = vor.u32 %v1053_v32, %v1049_v23  ;;  %v1111_v36 = vshrl.u32 %v8427_v26, 16 }
  0x4d   : > { %2633 = vmatpush.bf16.msrb.mxu3 %v5876_v0  ;;  %v7498_v51 = vld [vmem:[%s11482_s2 + $0x7c] sm:$0xf]  ;;  %v5265_v52 = vld [vmem:[%s11482_s2 + $0x84] sm:$0xf0]  ;;  %v6128_v1 = vor.u32 %v7715_v43, %v6127_v42  ;;  %v6019_v59 = vld [vmem:[%s11482_s2 + $0x660] sm:$0xf]  ;;  %v8543_v47 = vsel %vm963_vm0, %v1042_v40, %v8493_v22 }
  0x4e   : > { %2644 = vmatpush.bf16.msra.mxu0 %v6056_v9  ;;  %v7730_v53 = vld [vmem:[%s11482_s2 + $0x7b8] sm:$0xf0]  ;;  %v8532_v0 = vrot.slane %v1056_v33, 1  ;;  %v7688_v2 = vld [vmem:[%s11482_s2 + $0x668] sm:$0xf0]  ;;  %v5268_v48 = vor.u32 %v7498_v51, %v5265_v52  ;;  %v1117_v42 = vshrl.u32 %v8468_v46, 16 }
  0x4f   : > { %2662 = vmatpush.bf16.msra.mxu1 %v6152_v16  ;;  %v6188_v61 = vor.u32 %v7730_v53, %v6187_v49  ;;  %v6115_v6 = vld [vmem:[%s11482_s2 + $0x720] sm:$0xf]  ;;  %v7712_v9 = vld [vmem:[%s11482_s2 + $0x728] sm:$0xf0]  ;;  %v7495_v10 = vld [vmem:[%s11482_s2 + $0x64] sm:$0xf]  ;;  %v6020_v14 = vor.u32 %v7688_v2, %v6019_v59 }
  0x50   : > { %2684 = vmatpush.bf16.msra.mxu2 %v6200_v24  ;;  %v5253_v11 = vld [vmem:[%s11482_s2 + $0x6c] sm:$0xf0]  ;;  %v6175_v16 = vld [vmem:[%s11482_s2 + $0x798] sm:$0xf]  ;;  %v8567_v18 = vsel %vm963_vm0, %v1054_v63, %v8532_v0  ;;  %v6116_v19 = vor.u32 %v7712_v9, %v6115_v6  ;;  %v6007_v23 = vld [vmem:[%s11482_s2 + $0x648] sm:$0xf] }
  0x51   : > { %2698 = vmatpush.bf16.msra.mxu3 %v5292_v17  ;;  %v7727_v17 = vld [vmem:[%s11482_s2 + $0x7a0] sm:$0xf0]  ;;  %v7685_v24 = vld [vmem:[%s11482_s2 + $0x650] sm:$0xf0]  ;;  %v5256_v31 = vor.u32 %v7495_v10, %v5253_v11  ;;  %v6103_v32 = vld [vmem:[%s11482_s2 + $0x708] sm:$0xf] }
  0x52   : > { %2645 = vmatpush.bf16.msra.mxu0 %v6044_v30  ;;  %2598 = vmatmul.bf16.vlgmr.msrb.gmra.mxu1 %v8530_v55  ;;  %v6176_v30 = vor.u32 %v7727_v17, %v6175_v16  ;;  %v7709_v33 = vld [vmem:[%s11482_s2 + $0x710] sm:$0xf0]  ;;  %v7492_v39 = vld [vmem:[%s11482_s2 + $0x4c] sm:$0xf]  ;;  %v5241_v40 = vld [vmem:[%s11482_s2 + $0x54] sm:$0xf0]  ;;  %v6008_v43 = vor.u32 %v7685_v24, %v6007_v23 }
  0x53   : > { %2663 = vmatpush.bf16.msra.mxu1 %v6140_v34  ;;  %2580 = vmatmul.bf16.vlgmr.msrb.gmra.mxu0 %v8517_v50  ;;  %v1108_v34 = vshrl.u32 %v8425_v25, 16  ;;  %v5995_v49 = vld [vmem:[%s11482_s2 + $0x630] sm:$0xf]  ;;  %v7682_v51 = vld [vmem:[%s11482_s2 + $0x638] sm:$0xf0]  ;;  %v6104_v52 = vor.u32 %v7709_v33, %v6103_v32  ;;  %v5244_v63 = vor.u32 %v7492_v39, %v5241_v40 }
  0x54   : > { %2685 = vmatpush.bf16.msra.mxu2 %v6188_v61  ;;  %v6091_v53 = vld [vmem:[%s11482_s2 + $0x6f0] sm:$0xf]  ;;  %v7724_v61 = vld [vmem:[%s11482_s2 + $0x788] sm:$0xf0]  ;;  %v7489_v59 = vld [vmem:[%s11482_s2 + $0x34] sm:$0xf]  ;;  %v5996_v11 = vor.u32 %v7682_v51, %v5995_v49  ;;  %v8644_v51 = vor.u32 %v1111_v36, %v8485_v15 }
  0x55   : > { %2699 = vmatpush.bf16.msra.mxu3 %v5280_v41  ;;  %2616 = vmatmul.bf16.vlgmr.msrb.gmra.mxu2 %v8543_v47  ;;  %v1114_v41 = vshrl.u32 %v8437_v37, 16  ;;  %v5229_v2 = vld [vmem:[%s11482_s2 + $0x3c] sm:$0xf0]  ;;  %v5983_v6 = vld [vmem:[%s11482_s2 + $0x618] sm:$0xf]  ;;  %v8636_v33 = vor.u32 %v1108_v34, %v8477_v5 }
  0x56   : > { %2646 = vmatpush.bf16.msra.mxu0 %v6032_v57  ;;  %v6163_v57 = vld [vmem:[%s11482_s2 + $0x780] sm:$0xf]  ;;  %v7679_v9 = vld [vmem:[%s11482_s2 + $0x620] sm:$0xf0]  ;;  %v888_v16 = vld [vmem:[%s8100_s30 + $0x78] sm:$0x77]  ;;  %v5232_v39 = vor.u32 %v7489_v59, %v5229_v2 }
  0x57   : > { %2664 = vmatpush.bf16.msra.mxu1 %v6128_v1  ;;  %2634 = vmatmul.bf16.vlgmr.msrb.gmra.mxu3 %v8567_v18  ;;  %v7706_v1 = vld [vmem:[%s11482_s2 + $0x6f8] sm:$0xf0]  ;;  %v5191_v10 = vld [vmem:[%s8100_s30 + $0x20] sm:$0xf]  ;;  %v7739_v17 = vld [vmem:[%s8100_s30 + $0x24] sm:$0xf]  ;;  %v939_v34 = vunpack.c.h.b16 %v888_v16 }
  0x58   : > { %2686 = vmatpush.bf16.msra.mxu2 %v6176_v30  ;;  %v6079_v23 = vld [vmem:[%s11482_s2 + $0x6d8] sm:$0xf]  ;;  %v7703_v24 = vld [vmem:[%s11482_s2 + $0x6e0] sm:$0xf0]  ;;  %v938_v30 = vunpack.c.l.b16 %v888_v16  ;;  %v5193_v32 = vld [vmem:[%s8100_s30 + $0x4c] sm:$0xf0] }
  0x59   : > { %2700 = vmatpush.bf16.msra.mxu3 %v5268_v48  ;;  %v6164_v48 = vor.u32 %v7724_v61, %v6163_v57  ;;  %v7486_v40 = vld [vmem:[%s11482_s2 + $0x1c] sm:$0xf]  ;;  %v7745_v49 = vld [vmem:[%s8100_s30 + $0x50] sm:$0xf0]  ;;  %v5971_v5 = vld [vmem:[%s11482_s2 + $0x600] sm:$0xf]  ;;  %v8656_v61 = vor.u32 %v1114_v41, %v8493_v22  ;;  %v6080_v59 = vor.u32 %v7703_v24, %v6079_v23  ;;  %v8697_v24 = vpack.c.b16 %v939_v34, %v939_v34 }
  0x5a   : > { %2647 = vmatpush.bf16.msra.mxu0 %v6020_v14  ;;  %v7744_v14 = vld [vmem:[%s8100_s30 + $0x48] sm:$0xf0]  ;;  %v889_v57 = vld [vmem:[%s8100_s30 + $0x80] sm:$0x7]  ;;  %v7483_v22 = vld [vmem:[%s11482_s2 + $0x4] sm:$0xf]  ;;  %v8673_v2 = vpack.c.b16 %v938_v30, %v938_v30 }
  0x5b   : > { %2665 = vmatpush.bf16.msra.mxu1 %v6116_v19  ;;  %v6092_v19 = vor.u32 %v7706_v1, %v6091_v53  ;;  %v8652_v53 = vor.u32 %v7739_v17, %v5193_v32  ;;  %v7676_v15 = vld [vmem:[%s11482_s2 + $0x608] sm:$0xf0]  ;;  %v6067_v36 = vld [vmem:[%s11482_s2 + $0x6c0] sm:$0xf]  ;;  %v5205_v41 = vld [vmem:[%s11482_s2 + $0xc] sm:$0xf0] }
  0x5c   : > { %2687 = vmatpush.bf16.msra.mxu2 %v6164_v48  ;;  %v7700_v1 = vld [vmem:[%s11482_s2 + $0x6c8] sm:$0xf0]  ;;  %11496 = vst [vmem:[#allocation3_spill] sm:$0xff] %v8673_v2  ;;  %v5385_v16 = vld [vmem:[%s11482_s2 + $0x174] sm:$0xf0]  ;;  %v5972_v23 = vor.u32 %v7676_v15, %v5971_v5  ;;  %v1068_v34 = vshll.u32 %v8673_v2, 16 }
  0x5d   : > { %2701 = vmatpush.bf16.msra.mxu3 %v5256_v31  ;;  %v8632_v31 = vor.u32 %v7744_v14, %v5191_v10  ;;  %v7528_v14 = vld [vmem:[%s11482_s2 + $0x16c] sm:$0xf]  ;;  %v5577_v17 = vld [vmem:[%s11482_s2 + $0x2f4] sm:$0xf0]  ;;  %11498 = vst [vmem:[#allocation5_spill] sm:$0xff] %v8697_v24  ;;  %v1075_v30 = vshll.u32 %v8652_v53, 16 }
  0x5e   : > { %2648 = vmatpush.bf16.msra.mxu0 %v6008_v43  ;;  %v5199_v43 = vld [vmem:[%s8100_s30 + $0x28] sm:$0xf]  ;;  %v7552_v32 = vld [vmem:[%s11482_s2 + $0x22c] sm:$0xf]  ;;  %v7573_v15 = vld [vmem:[%s11482_s2 + $0x2d4] sm:$0xf] }
  0x5f   : > { %2666 = vmatpush.bf16.msra.mxu1 %v6104_v52  ;;  %v5217_v52 = vld [vmem:[%s11482_s2 + $0x24] sm:$0xf0]  ;;  %v1063_v48 = vshll.u32 %v8632_v31, 16  ;;  %v7522_v46 = vld [vmem:[%s11482_s2 + $0x13c] sm:$0xf] }
  0x60   : > { %v5220_v10 = vor.u32 %v7486_v40, %v5217_v52  ;;  %v6068_v40 = vor.u32 %v7700_v1, %v6067_v36  ;;  %v5673_v52 = vld [vmem:[%s11482_s2 + $0x3b4] sm:$0xf0]  ;;  %v5208_v36 = vor.u32 %v7483_v22, %v5205_v41  ;;  %v7549_v41 = vld [vmem:[%s11482_s2 + $0x214] sm:$0xf] }
  0x61   : > { %2702 = vmatpush.bf16.msra.mxu3 %v5244_v63  ;;  %v5984_v63 = vor.u32 %v7679_v9, %v5983_v6  ;;  %v8676_v6 = vor.u32 %v7745_v49, %v5199_v43  ;;  %v7576_v9 = vld [vmem:[%s11482_s2 + $0x2ec] sm:$0xf]  ;;  %v1061_v43 = vshrl.u32 %v8632_v31, 16  ;;  %v1065_v5 = vrot.slane %v1063_v48, 1  ;;  %v5373_v48 = vld [vmem:[%s11482_s2 + $0x15c] sm:$0xf0] }
  0x62   : > { %2649 = vmatpush.bf16.msra.mxu0 %v5996_v11  ;;  %v940_v11 = vunpack.c.l.b16 %v889_v57  ;;  %2603 = vmatmul.bf16.gmra.mxu1 %v8644_v51  ;;  %v7600_v49 = vld [vmem:[%s11482_s2 + $0x3ac] sm:$0xf] }
  0x63   : > { %2667 = vmatpush.bf16.msra.mxu1 %v6092_v19  ;;  %11497 = vst [vmem:[#allocation4_spill] sm:$0xff] %v8676_v6  ;;  %2585 = vmatmul.bf16.gmra.mxu0 %v8636_v33  ;;  %v8695_v19 = vor.u32 %v1117_v42, %v8532_v0  ;;  %v1073_v0 = vshrl.u32 %v8652_v53, 16  ;;  %v5580_v42 = vor.u32 %v7576_v9, %v5577_v17  ;;  %v1087_v57 = vshll.u32 %v8676_v6, 16 }
  0x64   : > { %v8720_v1 = vpack.c.b16 %v940_v11, %v940_v11  ;;  %v5676_v22 = vor.u32 %v7600_v49, %v5673_v52  ;;  %v5469_v11 = vld [vmem:[%s11482_s2 + $0x21c] sm:$0xf0] }
  0x65   : > { %2703 = vmatpush.bf16.msra.mxu3 %v5232_v39  ;;  %v5481_v39 = vld [vmem:[%s11482_s2 + $0x234] sm:$0xf0]  ;;  %2621 = vmatmul.bf16.gmra.mxu2 %v8656_v61  ;;  %v1089_v52 = vrot.slane %v1087_v57, 1  ;;  %v7546_v57 = vld [vmem:[%s11482_s2 + $0x1fc] sm:$0xf] }
  0x66   : > { %2650 = vmatpush.bf16.msra.mxu0 %v5984_v63  ;;  %v5388_v63 = vor.u32 %v7528_v14, %v5385_v16  ;;  %11499 = vst [vmem:[#allocation6_spill] sm:$0xff] %v8720_v1  ;;  %v5484_v9 = vor.u32 %v7552_v32, %v5481_v39  ;;  %2752 = vmatpush.bf16.msrb.mxu2 %v5580_v42  ;;  %v5565_v14 = vld [vmem:[%s11482_s2 + $0x2dc] sm:$0xf0]  ;;  %v1077_v16 = vrot.slane %v1075_v30, 1  ;;  %v7597_v32 = vld [vmem:[%s11482_s2 + $0x394] sm:$0xf] }
  0x67   : > { %2668 = vmatpush.bf16.msra.mxu1 %v6080_v59  ;;  %v7525_v59 = vld [vmem:[%s11482_s2 + $0x154] sm:$0xf]  ;;  %v5568_v17 = vor.u32 %v7573_v15, %v5565_v14  ;;  %2639 = vmatmul.bf16.gmra.mxu3 %v8695_v19  ;;  %v5661_v30 = vld [vmem:[%s11482_s2 + $0x39c] sm:$0xf0]  ;;  %v7570_v39 = vld [vmem:[%s11482_s2 + $0x2bc] sm:$0xf]  ;;  %v5472_v14 = vor.u32 %v7549_v41, %v5469_v11 }
  0x68   : > { %v1085_v42 = vshrl.u32 %v8676_v6, 16  ;;  %v5376_v49 = vor.u32 %v7525_v59, %v5373_v48  ;;  %v1092_v15 = vshll.u32 %v8720_v1, 16  ;;  %v8759_v59 = vrot.slane %v1068_v34, 1 }
  0x69   : > { %2704 = vmatpush.bf16.msra.mxu3 %v5220_v10  ;;  %v1080_v10 = vshll.u32 %v8697_v24, 16  ;;  %v5664_v48 = vor.u32 %v7597_v32, %v5661_v30  ;;  %v1078_v41 = vor.u32 %v1077_v16, %v1073_v0  ;;  %v5541_v0 = vld [vmem:[%s11482_s2 + $0x2ac] sm:$0xf0]  ;;  %v7519_v32 = vld [vmem:[%s11482_s2 + $0x124] sm:$0xf] }
  0x6a   : > { %2651 = vmatpush.bf16.msra.mxu0 %v5972_v23  ;;  %v5553_v23 = vld [vmem:[%s11482_s2 + $0x2c4] sm:$0xf0]  ;;  %2753 = vmatpush.bf16.msrb.mxu2 %v5568_v17  ;;  %v1090_v16 = vor.u32 %v1089_v52, %v1085_v42  ;;  %v7543_v42 = vld [vmem:[%s11482_s2 + $0x1e4] sm:$0xf] }
  0x6b   : > { %2669 = vmatpush.bf16.msra.mxu1 %v6068_v40  ;;  %v5361_v40 = vld [vmem:[%s11482_s2 + $0x144] sm:$0xf0]  ;;  %v8767_v11 = vrot.slane %v1080_v10, 1  ;;  %v8781_v10 = vrot.slane %v1092_v15, 1  ;;  %v7591_v15 = vld [vmem:[%s11482_s2 + $0x364] sm:$0xf] }
  0x6c   : > { %v5364_v34 = vor.u32 %v7522_v46, %v5361_v40  ;;  %v5349_v46 = vld [vmem:[%s11482_s2 + $0x12c] sm:$0xf0] }
  0x6d   : > { %2705 = vmatpush.bf16.msra.mxu3 %v5208_v36  ;;  %v5457_v36 = vld [vmem:[%s11482_s2 + $0x204] sm:$0xf0]  ;;  %v5352_v40 = vor.u32 %v7519_v32, %v5349_v46  ;;  %v7561_v32 = vld [vmem:[%s11482_s2 + $0x274] sm:$0xf]  ;;  %v5517_v46 = vld [vmem:[%s11482_s2 + $0x27c] sm:$0xf0] }
  0x6e   : > { %2716 = vmatpush.bf16.msrb.mxu0 %v5388_v63  ;;  %v1066_v63 = vor.u32 %v1065_v5, %v1061_v43  ;;  %v7594_v43 = vld [vmem:[%s11482_s2 + $0x37c] sm:$0xf]  ;;  %v5649_v5 = vld [vmem:[%s11482_s2 + $0x384] sm:$0xf0]  ;;  %v5460_v17 = vor.u32 %v7546_v57, %v5457_v36  ;;  %v8818_v57 = vsel %vm963_vm0, %v1090_v16, %v8781_v10  ;;  %v5625_v16 = vld [vmem:[%s11482_s2 + $0x354] sm:$0xf0] }
  0x6f   : > { %2734 = vmatpush.bf16.msrb.mxu1 %v5484_v9  ;;  %v5556_v9 = vor.u32 %v7570_v39, %v5553_v23  ;;  %v5652_v39 = vor.u32 %v7594_v43, %v5649_v5  ;;  %v8801_v23 = vsel %vm963_vm0, %v1078_v41, %v8767_v11  ;;  %v5337_v41 = vld [vmem:[%s11482_s2 + $0x114] sm:$0xf0]  ;;  %v7540_v5 = vld [vmem:[%s11482_s2 + $0x1cc] sm:$0xf] }
  0x70   : > { %v8791_v30 = vsel %vm963_vm0, %v1066_v63, %v8759_v59  ;;  %v7564_v63 = vld [vmem:[%s11482_s2 + $0x28c] sm:$0xf] }
  0x71   : > { %2770 = vmatpush.bf16.msrb.mxu3 %v5676_v22  ;;  %v7567_v22 = vld [vmem:[%s11482_s2 + $0x2a4] sm:$0xf]  ;;  %2754 = vmatpush.bf16.msrb.mxu2 %v5556_v9  ;;  %v7516_v9 = vld [vmem:[%s11482_s2 + $0x10c] sm:$0xf] }
  0x72   : > { %2717 = vmatpush.bf16.msrb.mxu0 %v5376_v49  ;;  %v5445_v49 = vld [vmem:[%s11482_s2 + $0x1ec] sm:$0xf0]  ;;  %v5544_v52 = vor.u32 %v7567_v22, %v5541_v0  ;;  %2670 = vmatmul.bf16.vlgmr.msra.gmra.mxu1 %v8801_v23  ;;  %v7588_v0 = vld [vmem:[%s11482_s2 + $0x34c] sm:$0xf] }
  0x73   : > { %2735 = vmatpush.bf16.msrb.mxu1 %v5472_v14  ;;  %v5637_v14 = vld [vmem:[%s11482_s2 + $0x36c] sm:$0xf0]  ;;  %2652 = vmatmul.bf16.vlgmr.msra.gmra.mxu0 %v8791_v30  ;;  %v5448_v36 = vor.u32 %v7543_v42, %v5445_v49  ;;  %v7513_v42 = vld [vmem:[%s11482_s2 + $0xf4] sm:$0xf]  ;;  %v5325_v49 = vld [vmem:[%s11482_s2 + $0xfc] sm:$0xf0] }
  0x74   : > { %v5640_v43 = vor.u32 %v7591_v15, %v5637_v14  ;;  %v7537_v15 = vld [vmem:[%s11482_s2 + $0x1b4] sm:$0xf]  ;;  %v5421_v14 = vld [vmem:[%s11482_s2 + $0x1bc] sm:$0xf0] }
  0x75   : > { %2771 = vmatpush.bf16.msrb.mxu3 %v5664_v48  ;;  %v5529_v48 = vld [vmem:[%s11482_s2 + $0x294] sm:$0xf0]  ;;  %2755 = vmatpush.bf16.msrb.mxu2 %v5544_v52  ;;  %v5628_v52 = vor.u32 %v7588_v0, %v5625_v16  ;;  %v1123_v0 = vshrl.u32 %v8697_v24, 16 }
  0x76   : > { %2718 = vmatpush.bf16.msrb.mxu0 %v5364_v34  ;;  %v5433_v34 = vld [vmem:[%s11482_s2 + $0x1d4] sm:$0xf0]  ;;  %v5532_v22 = vor.u32 %v7564_v63, %v5529_v48  ;;  %6209 = vmatmul.msk.bf16.vlgmr.msra.gmra.mxu2 %vm2493_vm1, %v8818_v57  ;;  %v7585_v63 = vld [vmem:[%s11482_s2 + $0x334] sm:$0xf]  ;;  %v5613_v48 = vld [vmem:[%s11482_s2 + $0x33c] sm:$0xf0] }
  0x77   : > { %2736 = vmatpush.bf16.msrb.mxu1 %v5460_v17  ;;  %v5340_v17 = vor.u32 %v7516_v9, %v5337_v41  ;;  %2706 = vmatmul.bf16.vlgmr.msra.gmra.mxu3 %v8198_v38  ;;  %v7558_v9 = vld [vmem:[%s11482_s2 + $0x25c] sm:$0xf]  ;;  %v5505_v41 = vld [vmem:[%s11482_s2 + $0x264] sm:$0xf0]  ;;  %v5616_v16 = vor.u32 %v7585_v63, %v5613_v48 }
  0x79   : > { %2772 = vmatpush.bf16.msrb.mxu3 %v5652_v39  ;;  %v5436_v39 = vor.u32 %v7540_v5, %v5433_v34  ;;  %2756 = vmatpush.bf16.msrb.mxu2 %v5532_v22  ;;  %v5424_v5 = vor.u32 %v7537_v15, %v5421_v14  ;;  %v7510_v34 = vld [vmem:[%s11482_s2 + $0xdc] sm:$0xf]  ;;  %v5313_v22 = vld [vmem:[%s11482_s2 + $0xe4] sm:$0xf0]  ;;  %v7507_v15 = vld [vmem:[%s11482_s2 + $0xc4] sm:$0xf] }
  0x7a   : > { %2719 = vmatpush.bf16.msrb.mxu0 %v5352_v40  ;;  %v5520_v40 = vor.u32 %v7561_v32, %v5517_v46  ;;  %v5409_v32 = vld [vmem:[%s11482_s2 + $0x1a4] sm:$0xf0]  ;;  %v1126_v46 = vshrl.u32 %v8720_v1, 16  ;;  %v7555_v14 = vld [vmem:[%s11482_s2 + $0x244] sm:$0xf] }
  0x7b   : > { %2737 = vmatpush.bf16.msrb.mxu1 %v5448_v36  ;;  %v5328_v36 = vor.u32 %v7513_v42, %v5325_v49  ;;  %v7582_v42 = vld [vmem:[%s11482_s2 + $0x31c] sm:$0xf]  ;;  %v5601_v49 = vld [vmem:[%s11482_s2 + $0x324] sm:$0xf0] }
  0x7d   : > { %2773 = vmatpush.bf16.msrb.mxu3 %v5640_v43  ;;  %v1120_v43 = vshrl.u32 %v8673_v2, 16  ;;  %2757 = vmatpush.bf16.msrb.mxu2 %v5520_v40  ;;  %v5493_v40 = vld [vmem:[%s11482_s2 + $0x24c] sm:$0xf0] }
  0x7e   : > { %2720 = vmatpush.bf16.msrb.mxu0 %v5340_v17  ;;  %v7534_v17 = vld [vmem:[%s11482_s2 + $0x19c] sm:$0xf] }
  0x7f   : > { %2738 = vmatpush.bf16.msrb.mxu1 %v5436_v39  ;;  %v5508_v39 = vor.u32 %v7558_v9, %v5505_v41  ;;  %v8903_v63 = vor.u32 %v1120_v43, %v8759_v59  ;;  %v5412_v48 = vor.u32 %v7534_v17, %v5409_v32  ;;  %v7531_v9 = vld [vmem:[%s11482_s2 + $0x184] sm:$0xf]  ;;  %v5397_v41 = vld [vmem:[%s11482_s2 + $0x18c] sm:$0xf0]  ;;  %v5604_v59 = vor.u32 %v7582_v42, %v5601_v49  ;;  %v5961_v49 = vld [vmem:[%s11482_s2 + $0x5f4] sm:$0xf0] }
  0x80   : > { %v7579_v43 = vld [vmem:[%s11482_s2 + $0x304] sm:$0xf]  ;;  %v5496_v17 = vor.u32 %v7555_v14, %v5493_v40  ;;  %v8936_v32 = vor.u32 %v1126_v46, %v8781_v10  ;;  %v5400_v14 = vor.u32 %v7531_v9, %v5397_v41  ;;  %v7696_v10 = vld [vmem:[%s11482_s2 + $0x6ac] sm:$0xf]  ;;  %v6057_v46 = vld [vmem:[%s11482_s2 + $0x6b4] sm:$0xf0] }
  0x81   : > { %2774 = vmatpush.bf16.msrb.mxu3 %v5628_v52  ;;  %v5316_v52 = vor.u32 %v7510_v34, %v5313_v22  ;;  %v8915_v34 = vor.u32 %v1123_v0, %v8767_v11  ;;  %v5769_v22 = vld [vmem:[%s11482_s2 + $0x474] sm:$0xf0]  ;;  %2758 = vmatpush.bf16.msrb.mxu2 %v5508_v39  ;;  %v5589_v11 = vld [vmem:[%s11482_s2 + $0x30c] sm:$0xf0]  ;;  %v7648_v0 = vld [vmem:[%s11482_s2 + $0x52c] sm:$0xf] }
  0x82   : > { %2721 = vmatpush.bf16.msrb.mxu0 %v5328_v36  ;;  %v5301_v36 = vld [vmem:[%s11482_s2 + $0xcc] sm:$0xf0]  ;;  %v7672_v39 = vld [vmem:[%s11482_s2 + $0x5ec] sm:$0xf]  ;;  %v7645_v41 = vld [vmem:[%s11482_s2 + $0x514] sm:$0xf] }
  0x83   : > { %2739 = vmatpush.bf16.msrb.mxu1 %v5424_v5  ;;  %v7624_v5 = vld [vmem:[%s11482_s2 + $0x46c] sm:$0xf]  ;;  %v5304_v42 = vor.u32 %v7507_v15, %v5301_v36  ;;  %2657 = vmatmul.bf16.gmra.mxu0 %v8903_v63  ;;  %v7621_v36 = vld [vmem:[%s11482_s2 + $0x454] sm:$0xf]  ;;  %v5964_v9 = vor.u32 %v7672_v39, %v5961_v49  ;;  %v5745_v39 = vld [vmem:[%s11482_s2 + $0x444] sm:$0xf0] }
  0x84   : > { %v5772_v40 = vor.u32 %v7624_v5, %v5769_v22  ;;  %2675 = vmatmul.bf16.gmra.mxu1 %v8915_v34  ;;  %v7669_v5 = vld [vmem:[%s11482_s2 + $0x5d4] sm:$0xf]  ;;  %v5949_v22 = vld [vmem:[%s11482_s2 + $0x5dc] sm:$0xf0] }
  0x85   : > { %2775 = vmatpush.bf16.msrb.mxu3 %v5616_v16  ;;  %v5865_v16 = vld [vmem:[%s11482_s2 + $0x534] sm:$0xf0]  ;;  %2759 = vmatpush.bf16.msrb.mxu2 %v5496_v17  ;;  %v5952_v49 = vor.u32 %v7669_v5, %v5949_v22  ;;  %v7639_v5 = vld [vmem:[%s11482_s2 + $0x4e4] sm:$0xf] }
  0x86   : > { %2722 = vmatpush.bf16.msrb.mxu0 %v5316_v52  ;;  %v5592_v52 = vor.u32 %v7579_v43, %v5589_v11  ;;  %v5868_v15 = vor.u32 %v7648_v0, %v5865_v16  ;;  %6210 = vmatmul.msk.bf16.gmra.mxu2 %vm2493_vm1, %v8936_v32  ;;  %v6060_v43 = vor.u32 %v7696_v10, %v6057_v46  ;;  %v7693_v11 = vld [vmem:[%s11482_s2 + $0x694] sm:$0xf]  ;;  %v6045_v0 = vld [vmem:[%s11482_s2 + $0x69c] sm:$0xf0]  ;;  %v7666_v46 = vld [vmem:[%s11482_s2 + $0x5bc] sm:$0xf] }
  0x87   : > { %2740 = vmatpush.bf16.msrb.mxu1 %v5412_v48  ;;  %v5757_v48 = vld [vmem:[%s11482_s2 + $0x45c] sm:$0xf0]  ;;  %2711 = vmatmul.bf16.gmra.mxu3 %v8337_v45  ;;  %v6048_v10 = vor.u32 %v7693_v11, %v6045_v0  ;;  %v7663_v11 = vld [vmem:[%s11482_s2 + $0x5a4] sm:$0xf]  ;;  %v5925_v0 = vld [vmem:[%s11482_s2 + $0x5ac] sm:$0xf0] }
  0x88   : > { %v5760_v17 = vor.u32 %v7621_v36, %v5757_v48  ;;  %v7690_v36 = vld [vmem:[%s11482_s2 + $0x67c] sm:$0xf]  ;;  %v6033_v48 = vld [vmem:[%s11482_s2 + $0x684] sm:$0xf0] }
  0x89   : > { %2776 = vmatpush.bf16.msrb.mxu3 %v5604_v59  ;;  %v5853_v59 = vld [vmem:[%s11482_s2 + $0x51c] sm:$0xf0]  ;;  %2824 = vmatpush.bf16.msra.mxu2 %v5964_v9  ;;  %v6036_v22 = vor.u32 %v7690_v36, %v6033_v48  ;;  %v7660_v36 = vld [vmem:[%s11482_s2 + $0x58c] sm:$0xf]  ;;  %v5913_v48 = vld [vmem:[%s11482_s2 + $0x594] sm:$0xf0] }
  0x8a   : > { %2723 = vmatpush.bf16.msrb.mxu0 %v5304_v42  ;;  %v5856_v16 = vor.u32 %v7645_v41, %v5853_v59  ;;  %v7618_v42 = vld [vmem:[%s11482_s2 + $0x43c] sm:$0xf]  ;;  %v7615_v59 = vld [vmem:[%s11482_s2 + $0x424] sm:$0xf] }
  0x8b   : > { %2741 = vmatpush.bf16.msrb.mxu1 %v5400_v14  ;;  %v7642_v14 = vld [vmem:[%s11482_s2 + $0x4fc] sm:$0xf] }
  0x8d   : > { %2777 = vmatpush.bf16.msrb.mxu3 %v5592_v52  ;;  %v5937_v52 = vld [vmem:[%s11482_s2 + $0x5c4] sm:$0xf0]  ;;  %2825 = vmatpush.bf16.msra.mxu2 %v5952_v49 }
  0x8e   : > { %2788 = vmatpush.bf16.msra.mxu0 %v5772_v40  ;;  %v5841_v40 = vld [vmem:[%s11482_s2 + $0x504] sm:$0xf0]  ;;  %v5940_v41 = vor.u32 %v7666_v46, %v5937_v52  ;;  %v7636_v52 = vld [vmem:[%s11482_s2 + $0x4cc] sm:$0xf] }
  0x8f   : > { %2806 = vmatpush.bf16.msra.mxu1 %v5868_v15  ;;  %v5748_v15 = vor.u32 %v7618_v42, %v5745_v39  ;;  %v5844_v9 = vor.u32 %v7642_v14, %v5841_v40  ;;  %v6021_v42 = vld [vmem:[%s11482_s2 + $0x66c] sm:$0xf0]  ;;  %v5928_v14 = vor.u32 %v7663_v11, %v5925_v0  ;;  %v7612_v40 = vld [vmem:[%s11482_s2 + $0x40c] sm:$0xf]  ;;  %v7633_v0 = vld [vmem:[%s11482_s2 + $0x4b4] sm:$0xf] }
  0x91   : > { %2842 = vmatpush.bf16.msra.mxu3 %v6060_v43  ;;  %v5733_v43 = vld [vmem:[%s11482_s2 + $0x42c] sm:$0xf0]  ;;  %2826 = vmatpush.bf16.msra.mxu2 %v5940_v41  ;;  %v6009_v41 = vld [vmem:[%s11482_s2 + $0x654] sm:$0xf0] }
  0x92   : > { %2789 = vmatpush.bf16.msra.mxu0 %v5760_v17  ;;  %v5829_v17 = vld [vmem:[%s11482_s2 + $0x4ec] sm:$0xf0]  ;;  %v5736_v39 = vor.u32 %v7615_v59, %v5733_v43 }
  0x93   : > { %2807 = vmatpush.bf16.msra.mxu1 %v5856_v16  ;;  %v7687_v16 = vld [vmem:[%s11482_s2 + $0x664] sm:$0xf]  ;;  %v5832_v49 = vor.u32 %v7639_v5, %v5829_v17  ;;  %2724 = vmatmul.bf16.vlgmr.msrb.gmra.mxu0 %v8211_v44  ;;  %v7609_v5 = vld [vmem:[%s11482_s2 + $0x3f4] sm:$0xf]  ;;  %v5916_v17 = vor.u32 %v7660_v36, %v5913_v48  ;;  %v7630_v48 = vld [vmem:[%s11482_s2 + $0x49c] sm:$0xf] }
  0x94   : > { %v6024_v46 = vor.u32 %v7687_v16, %v6021_v42  ;;  %2742 = vmatmul.bf16.vlgmr.msrb.gmra.mxu1 %v8231_v58  ;;  %v5805_v16 = vld [vmem:[%s11482_s2 + $0x4bc] sm:$0xf0]  ;;  %v7657_v42 = vld [vmem:[%s11482_s2 + $0x574] sm:$0xf] }
  0x95   : > { %2843 = vmatpush.bf16.msra.mxu3 %v6048_v10  ;;  %v5721_v10 = vld [vmem:[%s11482_s2 + $0x414] sm:$0xf0]  ;;  %2827 = vmatpush.bf16.msra.mxu2 %v5928_v14  ;;  %v5997_v14 = vld [vmem:[%s11482_s2 + $0x63c] sm:$0xf0] }
  0x96   : > { %2790 = vmatpush.bf16.msra.mxu0 %v5748_v15  ;;  %v5817_v15 = vld [vmem:[%s11482_s2 + $0x4d4] sm:$0xf0]  ;;  %v5724_v59 = vor.u32 %v7612_v40, %v5721_v10  ;;  %2760 = vmatmul.bf16.vlgmr.msrb.gmra.mxu2 %v8257_v8  ;;  %v5808_v10 = vor.u32 %v7633_v0, %v5805_v16  ;;  %v5685_v0 = vld [vmem:[%s11482_s2 + $0x3cc] sm:$0xf0]  ;;  %v7627_v16 = vld [vmem:[%s11482_s2 + $0x484] sm:$0xf] }
  0x97   : > { %2808 = vmatpush.bf16.msra.mxu1 %v5844_v9  ;;  %v7684_v9 = vld [vmem:[%s11482_s2 + $0x64c] sm:$0xf]  ;;  %v5820_v43 = vor.u32 %v7636_v52, %v5817_v15  ;;  %2778 = vmatmul.bf16.vlgmr.msrb.gmra.mxu3 %v8517_v50  ;;  %v5697_v52 = vld [vmem:[%s11482_s2 + $0x3e4] sm:$0xf0] }
  0x98   : > { %v6012_v11 = vor.u32 %v7684_v9, %v6009_v41  ;;  %v5793_v9 = vld [vmem:[%s11482_s2 + $0x4a4] sm:$0xf0]  ;;  %v7654_v41 = vld [vmem:[%s11482_s2 + $0x55c] sm:$0xf] }
  0x99   : > { %2844 = vmatpush.bf16.msra.mxu3 %v6036_v22  ;;  %v5709_v22 = vld [vmem:[%s11482_s2 + $0x3fc] sm:$0xf0]  ;;  %2828 = vmatpush.bf16.msra.mxu2 %v5916_v17  ;;  %v7603_v17 = vld [vmem:[%s11482_s2 + $0x3c4] sm:$0xf] }
  0x9a   : > { %2791 = vmatpush.bf16.msra.mxu0 %v5736_v39  ;;  %v5901_v39 = vld [vmem:[%s11482_s2 + $0x57c] sm:$0xf0]  ;;  %v5712_v40 = vor.u32 %v7609_v5, %v5709_v22  ;;  %v5985_v5 = vld [vmem:[%s11482_s2 + $0x624] sm:$0xf0] }
  0x9b   : > { %2809 = vmatpush.bf16.msra.mxu1 %v5832_v49  ;;  %v7681_v49 = vld [vmem:[%s11482_s2 + $0x634] sm:$0xf]  ;;  %v5904_v15 = vor.u32 %v7657_v42, %v5901_v39  ;;  %v5781_v42 = vld [vmem:[%s11482_s2 + $0x48c] sm:$0xf0] }
  0x9c   : > { %v6000_v36 = vor.u32 %v7681_v49, %v5997_v14  ;;  %v7651_v14 = vld [vmem:[%s11482_s2 + $0x544] sm:$0xf] }
  0x9d   : > { %2845 = vmatpush.bf16.msra.mxu3 %v6024_v46  ;;  %v7606_v46 = vld [vmem:[%s11482_s2 + $0x3dc] sm:$0xf]  ;;  %2829 = vmatpush.bf16.msra.mxu2 %v5904_v15  ;;  %v5973_v15 = vld [vmem:[%s11482_s2 + $0x60c] sm:$0xf0] }
  0x9e   : > { %2792 = vmatpush.bf16.msra.mxu0 %v5724_v59  ;;  %v5889_v59 = vld [vmem:[%s11482_s2 + $0x564] sm:$0xf0]  ;;  %v5700_v22 = vor.u32 %v7606_v46, %v5697_v52  ;;  %v5877_v46 = vld [vmem:[%s11482_s2 + $0x54c] sm:$0xf0]  ;;  %v7675_v52 = vld [vmem:[%s11482_s2 + $0x604] sm:$0xf] }
  0x9f   : > { %2810 = vmatpush.bf16.msra.mxu1 %v5820_v43  ;;  %v7678_v43 = vld [vmem:[%s11482_s2 + $0x61c] sm:$0xf]  ;;  %v5892_v39 = vor.u32 %v7654_v41, %v5889_v59  ;;  %v5784_v59 = vor.u32 %v7627_v16, %v5781_v42  ;;  %v6141_v16 = vld [vmem:[%s11482_s2 + $0x75c] sm:$0xf0]  ;;  %v5880_v42 = vor.u32 %v7651_v14, %v5877_v46  ;;  %v7503_v46 = vld [vmem:[%s11482_s2 + $0xa0] sm:$0xf0] }
  0xa0   : > { %v5988_v49 = vor.u32 %v7678_v43, %v5985_v5  ;;  %v7530_v41 = vld [vmem:[%s11482_s2 + $0x178] sm:$0xf0] }
  0xa1   : > { %2846 = vmatpush.bf16.msra.mxu3 %v6012_v11  ;;  %v5796_v11 = vor.u32 %v7630_v48, %v5793_v9  ;;  %v5295_v48 = vld [vmem:[%s11482_s2 + $0xb0] sm:$0xf]  ;;  %v7506_v5 = vld [vmem:[%s11482_s2 + $0xb8] sm:$0xf0]  ;;  %2830 = vmatpush.bf16.msra.mxu2 %v5892_v39  ;;  %v5283_v39 = vld [vmem:[%s11482_s2 + $0x98] sm:$0xf] }
  0xa2   : > { %2793 = vmatpush.bf16.msra.mxu0 %v5712_v40  ;;  %v7720_v40 = vld [vmem:[%s11482_s2 + $0x76c] sm:$0xf]  ;;  %v5391_v9 = vld [vmem:[%s11482_s2 + $0x170] sm:$0xf] }
  0xa3   : > { %2811 = vmatpush.bf16.msra.mxu1 %v5808_v10  ;;  %v6153_v10 = vld [vmem:[%s11482_s2 + $0x774] sm:$0xf0]  ;;  %2729 = vmatmul.bf16.gmra.mxu0 %v8355_v27 }
  0xa4   : > { %v6156_v43 = vor.u32 %v7720_v40, %v6153_v10  ;;  %v5392_v40 = vor.u32 %v7530_v41, %v5391_v9  ;;  %2747 = vmatmul.bf16.gmra.mxu1 %v8373_v28  ;;  %v5296_v10 = vor.u32 %v7506_v5, %v5295_v48  ;;  %v7714_v48 = vld [vmem:[%s11482_s2 + $0x73c] sm:$0xf]  ;;  %v6129_v9 = vld [vmem:[%s11482_s2 + $0x744] sm:$0xf0]  ;;  %v5367_v5 = vld [vmem:[%s11482_s2 + $0x140] sm:$0xf] }
  0xa5   : > { %2847 = vmatpush.bf16.msra.mxu3 %v6000_v36  ;;  %v5688_v36 = vor.u32 %v7603_v17, %v5685_v0  ;;  %v6201_v17 = vld [vmem:[%s11482_s2 + $0x7d4] sm:$0xf0]  ;;  %v5976_v0 = vor.u32 %v7675_v52, %v5973_v15  ;;  %v7527_v52 = vld [vmem:[%s11482_s2 + $0x160] sm:$0xf0]  ;;  %v7729_v15 = vld [vmem:[%s11482_s2 + $0x7b4] sm:$0xf]  ;;  %2831 = vmatpush.bf16.msra.mxu2 %v5880_v42 }
  0xa6   : > { %2794 = vmatpush.bf16.msra.mxu0 %v5700_v22  ;;  %v7732_v22 = vld [vmem:[%s11482_s2 + $0x7cc] sm:$0xf]  ;;  %2765 = vmatmul.bf16.gmra.mxu2 %v8376_v60  ;;  %v7711_v42 = vld [vmem:[%s11482_s2 + $0x724] sm:$0xf] }
  0xa7   : > { %2812 = vmatpush.bf16.msra.mxu1 %v5796_v11  ;;  %v7717_v11 = vld [vmem:[%s11482_s2 + $0x754] sm:$0xf]  ;;  %v6204_v1 = vor.u32 %v7732_v22, %v6201_v17  ;;  %v7524_v22 = vld [vmem:[%s11482_s2 + $0x148] sm:$0xf0]  ;;  %2783 = vmatmul.bf16.gmra.mxu3 %v8636_v33 }
  0xa8   : > { %v6144_v14 = vor.u32 %v7717_v11, %v6141_v16  ;;  %v7726_v11 = vld [vmem:[%s11482_s2 + $0x79c] sm:$0xf]  ;;  %v6177_v16 = vld [vmem:[%s11482_s2 + $0x7a4] sm:$0xf0] }
  0xa9   : > { %2848 = vmatpush.bf16.msra.mxu3 %v5988_v49  ;;  %v5379_v49 = vld [vmem:[%s11482_s2 + $0x158] sm:$0xf]  ;;  %2896 = vmatpush.bf16.msrb.mxu2 %v5296_v10  ;;  %v5368_v10 = vor.u32 %v7524_v22, %v5367_v5 }
  0xaa   : > { %2795 = vmatpush.bf16.msra.mxu0 %v5688_v36  ;;  %v6189_v36 = vld [vmem:[%s11482_s2 + $0x7bc] sm:$0xf0]  ;;  %v5380_v41 = vor.u32 %v7527_v52, %v5379_v49  ;;  %v5355_v49 = vld [vmem:[%s11482_s2 + $0x128] sm:$0xf]  ;;  %v7521_v52 = vld [vmem:[%s11482_s2 + $0x130] sm:$0xf0] }
  0xab   : > { %2813 = vmatpush.bf16.msra.mxu1 %v5784_v59  ;;  %v5284_v59 = vor.u32 %v7503_v46, %v5283_v39  ;;  %v6192_v17 = vor.u32 %v7729_v15, %v6189_v36  ;;  %v5259_v15 = vld [vmem:[%s11482_s2 + $0x68] sm:$0xf]  ;;  %v7497_v36 = vld [vmem:[%s11482_s2 + $0x70] sm:$0xf0] }
  0xac   : > { %v5260_v22 = vor.u32 %v7497_v36, %v5259_v15  ;;  %v7515_v15 = vld [vmem:[%s11482_s2 + $0x100] sm:$0xf0] }
  0xad   : > { %2849 = vmatpush.bf16.msra.mxu3 %v5976_v0  ;;  %v6132_v0 = vor.u32 %v7714_v48, %v6129_v9  ;;  %2897 = vmatpush.bf16.msrb.mxu2 %v5284_v59  ;;  %v7708_v48 = vld [vmem:[%s11482_s2 + $0x70c] sm:$0xf]  ;;  %v6105_v9 = vld [vmem:[%s11482_s2 + $0x714] sm:$0xf0]  ;;  %v7723_v59 = vld [vmem:[%s11482_s2 + $0x784] sm:$0xf] }
  0xae   : > { %2860 = vmatpush.bf16.msrb.mxu0 %v6156_v43  ;;  %v5271_v43 = vld [vmem:[%s11482_s2 + $0x80] sm:$0xf] }
  0xaf   : > { %2882 = vmatpush.bf16.msrb.mxu1 %v6204_v1  ;;  %v7500_v1 = vld [vmem:[%s11482_s2 + $0x88] sm:$0xf0] }
  0xb0   : > { %v5272_v39 = vor.u32 %v7500_v1, %v5271_v43  ;;  %v6165_v43 = vld [vmem:[%s11482_s2 + $0x78c] sm:$0xf0]  ;;  %v2509_v5 = vpop.f32.mrf.mxu0  ;;  %v2527_v1 = vpop.f32.mrf.mxu1 }
  0xb1   : > { %2914 = vmatpush.bf16.msrb.mxu3 %v5392_v40  ;;  %v6117_v40 = vld [vmem:[%s11482_s2 + $0x72c] sm:$0xf0] }
  0xb2   : > { %2861 = vmatpush.bf16.msrb.mxu0 %v6144_v14  ;;  %v6180_v14 = vor.u32 %v7726_v11, %v6177_v16  ;;  %v6120_v46 = vor.u32 %v7711_v42, %v6117_v40  ;;  %2898 = vmatpush.bf16.msrb.mxu2 %v5272_v39  ;;  %v6108_v11 = vor.u32 %v7708_v48, %v6105_v9  ;;  %v5247_v16 = vld [vmem:[%s11482_s2 + $0x50] sm:$0xf]  ;;  %v7494_v42 = vld [vmem:[%s11482_s2 + $0x58] sm:$0xf0]  ;;  %v7705_v39 = vld [vmem:[%s11482_s2 + $0x6f4] sm:$0xf] }
  0xb3   : > { %2883 = vmatpush.bf16.msrb.mxu1 %v6192_v17  ;;  %v5343_v17 = vld [vmem:[%s11482_s2 + $0x110] sm:$0xf]  ;;  %v6168_v40 = vor.u32 %v7723_v59, %v6165_v43  ;;  %2796 = vmatmul.bf16.vlgmr.msra.gmra.mxu0 %v8530_v55  ;;  %v5235_v48 = vld [vmem:[%s11482_s2 + $0x38] sm:$0xf]  ;;  %v7491_v9 = vld [vmem:[%s11482_s2 + $0x40] sm:$0xf0] }
  0xb4   : > { %2814 = vmatmul.bf16.vlgmr.msra.gmra.mxu1 %v8543_v47  ;;  %v6081_v59 = vld [vmem:[%s11482_s2 + $0x6e4] sm:$0xf0] }
  0xb5   : > { %2915 = vmatpush.bf16.msrb.mxu3 %v5380_v41  ;;  %v5356_v41 = vor.u32 %v7521_v52, %v5355_v49  ;;  %v6093_v49 = vld [vmem:[%s11482_s2 + $0x6fc] sm:$0xf0] }
  0xb6   : > { %2862 = vmatpush.bf16.msrb.mxu0 %v6132_v0  ;;  %v7518_v0 = vld [vmem:[%s11482_s2 + $0x118] sm:$0xf0]  ;;  %2899 = vmatpush.bf16.msrb.mxu2 %v5260_v22  ;;  %v6096_v36 = vor.u32 %v7705_v39, %v6093_v49  ;;  %v5223_v39 = vld [vmem:[%s11482_s2 + $0x20] sm:$0xf]  ;;  %v7488_v49 = vld [vmem:[%s11482_s2 + $0x28] sm:$0xf0] }
  0xb7   : > { %2884 = vmatpush.bf16.msrb.mxu1 %v6180_v14  ;;  %v5344_v52 = vor.u32 %v7518_v0, %v5343_v17  ;;  %v5248_v14 = vor.u32 %v7494_v42, %v5247_v16  ;;  %2832 = vmatmul.bf16.vlgmr.msra.gmra.mxu2 %v8567_v18  ;;  %v5236_v17 = vor.u32 %v7491_v9, %v5235_v48  ;;  %v5319_v0 = vld [vmem:[%s11482_s2 + $0xe0] sm:$0xf]  ;;  %v5487_v9 = vld [vmem:[%s11482_s2 + $0x230] sm:$0xf] }
  0xb8   : > { %v2511_v22 = vpop.f32.mrf.mxu0  ;;  %2850 = vmatmul.bf16.vlgmr.msra.gmra.mxu3 %v8791_v30  ;;  %v2545_v16 = vpop.f32.mrf.mxu2 }
  0xb9   : > { %2916 = vmatpush.bf16.msrb.mxu3 %v5368_v10  ;;  %v2528_v10 = vadd.f32 %v2527_v1, %v2509_v5  ;;  %v5583_v5 = vld [vmem:[%s11482_s2 + $0x2f0] sm:$0xf]  ;;  %v7512_v1 = vld [vmem:[%s11482_s2 + $0xe8] sm:$0xf0]  ;;  %v2529_v42 = vpop.f32.mrf.mxu1 }
  0xba   : > { %2863 = vmatpush.bf16.msrb.mxu0 %v6120_v46  ;;  %v5331_v46 = vld [vmem:[%s11482_s2 + $0xf8] sm:$0xf]  ;;  %2900 = vmatpush.bf16.msrb.mxu2 %v5248_v14  ;;  %v5320_v48 = vor.u32 %v7512_v1, %v5319_v0  ;;  %v7575_v0 = vld [vmem:[%s11482_s2 + $0x2e0] sm:$0xf0] }
  0xbb   : > { %2885 = vmatpush.bf16.msrb.mxu1 %v6168_v40  ;;  %v5332_v43 = vor.u32 %v7515_v15, %v5331_v46  ;;  %v2546_v14 = vadd.f32 %v2545_v16, %v2528_v10  ;;  %v2530_v46 = vadd.f32 %v2529_v42, %v2511_v22  ;;  %v7699_v15 = vld [vmem:[%s11482_s2 + $0x6c4] sm:$0xf]  ;;  %v5571_v10 = vld [vmem:[%s11482_s2 + $0x2d8] sm:$0xf]  ;;  %v7509_v22 = vld [vmem:[%s11482_s2 + $0xd0] sm:$0xf0] }
  0xbc   : > { %v7485_v16 = vld [vmem:[%s11482_s2 + $0x10] sm:$0xf0]  ;;  %v5679_v42 = vld [vmem:[%s11482_s2 + $0x3b0] sm:$0xf] }
  0xbd   : > { %2917 = vmatpush.bf16.msrb.mxu3 %v5356_v41  ;;  %v7702_v41 = vld [vmem:[%s11482_s2 + $0x6dc] sm:$0xf] }
  0xbe   : > { %2864 = vmatpush.bf16.msrb.mxu0 %v6108_v11  ;;  %v7578_v11 = vld [vmem:[%s11482_s2 + $0x2f8] sm:$0xf0]  ;;  %v6084_v40 = vor.u32 %v7702_v41, %v6081_v59  ;;  %v2563_v59 = vpop.f32.mrf.mxu3  ;;  %2901 = vmatpush.bf16.msrb.mxu2 %v5236_v17  ;;  %v5211_v17 = vld [vmem:[%s11482_s2 + $0x8] sm:$0xf] }
  0xbf   : > { %v7554_v41 = vld [vmem:[%s11482_s2 + $0x238] sm:$0xf0]  ;;  %v9315_v1 = vadd.f32 %v2563_v59, %v2546_v14  ;;  %v5559_v59 = vld [vmem:[%s11482_s2 + $0x2c0] sm:$0xf] }
  0xc0   : > { %v7626_v14 = vld [vmem:[%s11482_s2 + $0x478] sm:$0xf0] }
  0xc1   : > { %2918 = vmatpush.bf16.msrb.mxu3 %v5344_v52  ;;  %v5584_v52 = vor.u32 %v7578_v11, %v5583_v5  ;;  %v5224_v5 = vor.u32 %v7488_v49, %v5223_v39  ;;  %v5572_v39 = vor.u32 %v7575_v0, %v5571_v10  ;;  %v5488_v49 = vor.u32 %v7554_v41, %v5487_v9  ;;  %v7551_v9 = vld [vmem:[%s11482_s2 + $0x220] sm:$0xf0]  ;;  %v2514_v41 = vpop.f32.mrf.mxu0 }
  0xc2   : > { %2865 = vmatpush.bf16.msrb.mxu0 %v6096_v36  ;;  %v6069_v36 = vld [vmem:[%s11482_s2 + $0x6cc] sm:$0xf0]  ;;  %v5212_v10 = vor.u32 %v7485_v16, %v5211_v17  ;;  %v7599_v17 = vld [vmem:[%s11482_s2 + $0x3a0] sm:$0xf0]  ;;  %v5763_v16 = vld [vmem:[%s11482_s2 + $0x458] sm:$0xf] }
  0xc3   : > { %2950 = vmatpush.bf16.msra.mxu1 %v5584_v52  ;;  %v6072_v11 = vor.u32 %v7699_v15, %v6069_v36  ;;  %v7602_v52 = vld [vmem:[%s11482_s2 + $0x3b8] sm:$0xf0]  ;;  %v5475_v36 = vld [vmem:[%s11482_s2 + $0x218] sm:$0xf]  ;;  %2902 = vmatpush.bf16.msrb.mxu2 %v5224_v5 }
  0xc4   : > { %v5680_v0 = vor.u32 %v7602_v52, %v5679_v42  ;;  %v5667_v5 = vld [vmem:[%s11482_s2 + $0x398] sm:$0xf]  ;;  %2801 = vmatmul.bf16.gmra.mxu0 %v8644_v51  ;;  %v7548_v42 = vld [vmem:[%s11482_s2 + $0x208] sm:$0xf0]  ;;  %2819 = vmatmul.bf16.gmra.mxu1 %v8656_v61 }
  0xc5   : > { %2919 = vmatpush.bf16.msrb.mxu3 %v5332_v43  ;;  %v5307_v43 = vld [vmem:[%s11482_s2 + $0xc8] sm:$0xf] }
  0xc6   : > { %2866 = vmatpush.bf16.msrb.mxu0 %v6084_v40  ;;  %v5775_v40 = vld [vmem:[%s11482_s2 + $0x470] sm:$0xf]  ;;  %v5308_v15 = vor.u32 %v7509_v22, %v5307_v43  ;;  %v2547_v43 = vpop.f32.mrf.mxu2  ;;  %v2532_v22 = vpop.f32.mrf.mxu1 }
  0xc7   : > { %2951 = vmatpush.bf16.msra.mxu1 %v5572_v39  ;;  %v5776_v24 = vor.u32 %v7626_v14, %v5775_v40  ;;  %v2548_v2 = vadd.f32 %v2547_v43, %v2530_v46  ;;  %v2533_v6 = vadd.f32 %v2532_v22, %v2514_v41  ;;  %v5476_v39 = vor.u32 %v7551_v9, %v5475_v36  ;;  %v7623_v46 = vld [vmem:[%s11482_s2 + $0x460] sm:$0xf0]  ;;  %v2565_v52 = vpop.f32.mrf.mxu3  ;;  %v5547_v40 = vld [vmem:[%s11482_s2 + $0x2a8] sm:$0xf]  ;;  %v7569_v14 = vld [vmem:[%s11482_s2 + $0x2b0] sm:$0xf0] }
  0xc8   : > { %2903 = vmatpush.bf16.msrb.mxu2 %v5212_v10  ;;  %v5668_v36 = vor.u32 %v7599_v17, %v5667_v5  ;;  %v5764_v9 = vor.u32 %v7623_v46, %v5763_v16  ;;  %v5655_v10 = vld [vmem:[%s11482_s2 + $0x380] sm:$0xf]  ;;  %v7545_v43 = vld [vmem:[%s11482_s2 + $0x1f0] sm:$0xf0]  ;;  %v5548_v22 = vor.u32 %v7569_v14, %v5547_v40  ;;  %v7566_v5 = vld [vmem:[%s11482_s2 + $0x298] sm:$0xf0]  ;;  %2855 = vmatmul.bf16.gmra.mxu3 %v8903_v63 }
  0xc9   : > { %2920 = vmatpush.bf16.msrb.mxu3 %v5320_v48  ;;  %v7572_v48 = vld [vmem:[%s11482_s2 + $0x2c8] sm:$0xf0]  ;;  %2837 = vmatmul.bf16.gmra.mxu2 %v8695_v19  ;;  %v7593_v40 = vld [vmem:[%s11482_s2 + $0x370] sm:$0xf0]  ;;  %v5739_v14 = vld [vmem:[%s11482_s2 + $0x428] sm:$0xf] }
  0xca   : > { %2867 = vmatpush.bf16.msrb.mxu0 %v6072_v11  ;;  %v5463_v11 = vld [vmem:[%s11482_s2 + $0x200] sm:$0xf] }
  0xcb   : > { %v5464_v41 = vor.u32 %v7548_v42, %v5463_v11 }
  0xcc   : > { %2968 = vmatpush.bf16.msra.mxu2 %v5680_v0  ;;  %v2516_v0 = vpop.f32.mrf.mxu0 }
  0xcd   : > { %2921 = vmatpush.bf16.msrb.mxu3 %v5308_v15  ;;  %v9373_v15 = vadd.f32 %v2565_v52, %v2548_v2  ;;  %v5751_v2 = vld [vmem:[%s11482_s2 + $0x440] sm:$0xf]  ;;  %v5643_v52 = vld [vmem:[%s11482_s2 + $0x368] sm:$0xf]  ;;  %v5631_v0 = vld [vmem:[%s11482_s2 + $0x350] sm:$0xf] }
  0xce   : > { %2932 = vmatpush.bf16.msra.mxu0 %v5488_v49  ;;  %v5560_v49 = vor.u32 %v7572_v48, %v5559_v59  ;;  %v7596_v59 = vld [vmem:[%s11482_s2 + $0x388] sm:$0xf0]  ;;  %v5451_v48 = vld [vmem:[%s11482_s2 + $0x1e8] sm:$0xf]  ;;  %v2550_v17 = vpop.f32.mrf.mxu2  ;;  %v2534_v16 = vpop.f32.mrf.mxu1 }
  0xcf   : > { %v5656_v46 = vor.u32 %v7596_v59, %v5655_v10  ;;  %v2551_v11 = vadd.f32 %v2550_v17, %v2533_v6  ;;  %v7617_v6 = vld [vmem:[%s11482_s2 + $0x430] sm:$0xf0]  ;;  %v2568_v10 = vpop.f32.mrf.mxu3  ;;  %v5523_v59 = vld [vmem:[%s11482_s2 + $0x278] sm:$0xf]  ;;  %v7614_v17 = vld [vmem:[%s11482_s2 + $0x418] sm:$0xf0] }
  0xd0   : > { %2952 = vmatpush.bf16.msra.mxu1 %v5560_v49  ;;  %2969 = vmatpush.bf16.msra.mxu2 %v5668_v36  ;;  %v5452_v49 = vor.u32 %v7545_v43, %v5451_v48  ;;  %v5439_v36 = vld [vmem:[%s11482_s2 + $0x1d0] sm:$0xf]  ;;  %v5644_v48 = vor.u32 %v7593_v40, %v5643_v52  ;;  %v5740_v43 = vor.u32 %v7617_v6, %v5739_v14  ;;  %v5427_v16 = vld [vmem:[%s11482_s2 + $0x1b8] sm:$0xf]  ;;  %v7560_v52 = vld [vmem:[%s11482_s2 + $0x268] sm:$0xf0] }
  0xd1   : > { %2986 = vmatpush.bf16.msra.mxu3 %v5776_v24  ;;  %v7620_v24 = vld [vmem:[%s11482_s2 + $0x448] sm:$0xf0] }
  0xd2   : > { %2933 = vmatpush.bf16.msra.mxu0 %v5476_v39  ;;  %v5535_v39 = vld [vmem:[%s11482_s2 + $0x290] sm:$0xf]  ;;  %v5752_v42 = vor.u32 %v7620_v24, %v5751_v2  ;;  %v7563_v2 = vld [vmem:[%s11482_s2 + $0x280] sm:$0xf0]  ;;  %v9425_v24 = vadd.f32 %v2568_v10, %v2551_v11 }
  0xd3   : > { %v7587_v10 = vld [vmem:[%s11482_s2 + $0x340] sm:$0xf0] }
  0xd4   : > { %2953 = vmatpush.bf16.msra.mxu1 %v5548_v22  ;;  %2970 = vmatpush.bf16.msra.mxu2 %v5656_v46  ;;  %v5524_v46 = vor.u32 %v7563_v2, %v5523_v59  ;;  %v2581_v11 = vpop.f32.mrf.mxu0 }
  0xd5   : > { %2987 = vmatpush.bf16.msra.mxu3 %v5764_v9  ;;  %v7542_v9 = vld [vmem:[%s11482_s2 + $0x1d8] sm:$0xf0]  ;;  %v2582_v14 = vadd.f32 %v2581_v11, %v9315_v1  ;;  %2868 = vmatmul.bf16.vlgmr.msrb.gmra.mxu0 %v8801_v23  ;;  %v5715_v1 = vld [vmem:[%s11482_s2 + $0x3f8] sm:$0xf]  ;;  %v5607_v11 = vld [vmem:[%s11482_s2 + $0x320] sm:$0xf] }
  0xd6   : > { %2934 = vmatpush.bf16.msra.mxu0 %v5464_v41  ;;  %v5536_v41 = vor.u32 %v7566_v5, %v5535_v39  ;;  %v5440_v22 = vor.u32 %v7542_v9, %v5439_v36  ;;  %v7590_v39 = vld [vmem:[%s11482_s2 + $0x358] sm:$0xf0]  ;;  %v5727_v5 = vld [vmem:[%s11482_s2 + $0x410] sm:$0xf]  ;;  %v2552_v40 = vpop.f32.mrf.mxu2  ;;  %v2599_v6 = vpop.f32.mrf.mxu1  ;;  %6211 = vmatmul.msk.bf16.vlgmr.msrb.gmra.mxu1 %vm2493_vm1, %v8818_v57 }
  0xd7   : > { %v5632_v36 = vor.u32 %v7590_v39, %v5631_v0  ;;  %v5728_v9 = vor.u32 %v7614_v17, %v5727_v5  ;;  %v2600_v59 = vadd.f32 %v2599_v6, %v2582_v14  ;;  %v2570_v0 = vpop.f32.mrf.mxu3  ;;  %v7536_v39 = vld [vmem:[%s11482_s2 + $0x1a8] sm:$0xf0]  ;;  %v5499_v5 = vld [vmem:[%s11482_s2 + $0x248] sm:$0xf]  ;;  %v7557_v17 = vld [vmem:[%s11482_s2 + $0x250] sm:$0xf0] }
  0xd8   : > { %2954 = vmatpush.bf16.msra.mxu1 %v5536_v41  ;;  %2971 = vmatpush.bf16.msra.mxu2 %v5644_v48  ;;  %v5619_v41 = vld [vmem:[%s11482_s2 + $0x338] sm:$0xf]  ;;  %v7611_v48 = vld [vmem:[%s11482_s2 + $0x400] sm:$0xf0]  ;;  %v5500_v40 = vor.u32 %v7557_v17, %v5499_v5  ;;  %v5967_v14 = vld [vmem:[%s11482_s2 + $0x5f0] sm:$0xf] }
  0xd9   : > { %2988 = vmatpush.bf16.msra.mxu3 %v5752_v42  ;;  %v7539_v42 = vld [vmem:[%s11482_s2 + $0x1c0] sm:$0xf0]  ;;  %2904 = vmatmul.bf16.vlgmr.msrb.gmra.mxu2 %v8198_v38  ;;  %v7608_v38 = vld [vmem:[%s11482_s2 + $0x3e8] sm:$0xf0]  ;;  %v7650_v0 = vld [vmem:[%s11482_s2 + $0x538] sm:$0xf0] }
  0xda   : > { %2935 = vmatpush.bf16.msra.mxu0 %v5452_v49  ;;  %v5511_v49 = vld [vmem:[%s11482_s2 + $0x260] sm:$0xf]  ;;  %v5428_v2 = vor.u32 %v7539_v42, %v5427_v16  ;;  %v5620_v16 = vor.u32 %v7587_v10, %v5619_v41  ;;  %v7584_v42 = vld [vmem:[%s11482_s2 + $0x328] sm:$0xf0]  ;;  %v7674_v41 = vld [vmem:[%s11482_s2 + $0x5f8] sm:$0xf0]  ;;  %2922 = vmatmul.bf16.vlgmr.msrb.gmra.mxu3 %v8211_v44 }
  0xdb   : > { %v5691_v17 = vld [vmem:[%s11482_s2 + $0x3c8] sm:$0xf] }
  0xdc   : > { %2955 = vmatpush.bf16.msra.mxu1 %v5524_v46  ;;  %2972 = vmatpush.bf16.msra.mxu2 %v5632_v36  ;;  %v5716_v46 = vor.u32 %v7611_v48, %v5715_v1  ;;  %v2583_v6 = vpop.f32.mrf.mxu0  ;;  %v5403_v36 = vld [vmem:[%s11482_s2 + $0x188] sm:$0xf]  ;;  %v5608_v48 = vor.u32 %v7584_v42, %v5607_v11 }
  0xdd   : > { %2989 = vmatpush.bf16.msra.mxu3 %v5740_v43  ;;  %v5415_v43 = vld [vmem:[%s11482_s2 + $0x1a0] sm:$0xf] }
  0xde   : > { %2936 = vmatpush.bf16.msra.mxu0 %v5440_v22  ;;  %v5512_v22 = vor.u32 %v7560_v52, %v5511_v49  ;;  %v5416_v49 = vor.u32 %v7536_v39, %v5415_v43  ;;  %v5703_v52 = vld [vmem:[%s11482_s2 + $0x3e0] sm:$0xf]  ;;  %v2617_v10 = vpop.f32.mrf.mxu2  ;;  %v2601_v1 = vpop.f32.mrf.mxu1  ;;  %v5595_v43 = vld [vmem:[%s11482_s2 + $0x308] sm:$0xf]  ;;  %v5968_v39 = vor.u32 %v7674_v41, %v5967_v14  ;;  %v5859_v41 = vld [vmem:[%s11482_s2 + $0x518] sm:$0xf] }
  0xdf   : > { %v2618_v44 = vadd.f32 %v2617_v10, %v2600_v59  ;;  %v5704_v5 = vor.u32 %v7608_v38, %v5703_v52  ;;  %v6063_v59 = vld [vmem:[%s11482_s2 + $0x6b0] sm:$0xf]  ;;  %v5955_v52 = vld [vmem:[%s11482_s2 + $0x5d8] sm:$0xf]  ;;  %v2635_v38 = vpop.f32.mrf.mxu3  ;;  %v7647_v10 = vld [vmem:[%s11482_s2 + $0x520] sm:$0xf0] }
  0xe0   : > { %2956 = vmatpush.bf16.msra.mxu1 %v5512_v22  ;;  %2973 = vmatpush.bf16.msra.mxu2 %v5620_v16  ;;  %v5871_v22 = vld [vmem:[%s11482_s2 + $0x530] sm:$0xf]  ;;  %v7605_v16 = vld [vmem:[%s11482_s2 + $0x3d0] sm:$0xf0] }
  0xe1   : > { %2990 = vmatpush.bf16.msra.mxu3 %v5728_v9  ;;  %v7533_v9 = vld [vmem:[%s11482_s2 + $0x190] sm:$0xf0]  ;;  %v5872_v14 = vor.u32 %v7650_v0, %v5871_v22  ;;  %v5943_v0 = vld [vmem:[%s11482_s2 + $0x5c0] sm:$0xf] }
  0xe2   : > { %2937 = vmatpush.bf16.msra.mxu0 %v5428_v2  ;;  %v2584_v2 = vadd.f32 %v2583_v6, %v9373_v15  ;;  %v7581_v15 = vld [vmem:[%s11482_s2 + $0x310] sm:$0xf0]  ;;  %v5404_v42 = vor.u32 %v7533_v9, %v5403_v36  ;;  %v7671_v6 = vld [vmem:[%s11482_s2 + $0x5e0] sm:$0xf0]  ;;  %v9542_v36 = vadd.f32 %v2635_v38, %v2618_v44  ;;  %v7644_v38 = vld [vmem:[%s11482_s2 + $0x508] sm:$0xf0] }
  0xe3   : > { %v5596_v9 = vor.u32 %v7581_v15, %v5595_v43  ;;  %v5860_v15 = vor.u32 %v7647_v10, %v5859_v41  ;;  %v7692_v41 = vld [vmem:[%s11482_s2 + $0x688] sm:$0xf0] }
  0xe4   : > { %v2602_v11 = vadd.f32 %v2601_v1, %v2584_v2  ;;  %2957 = vmatpush.bf16.msra.mxu1 %v5500_v40  ;;  %v7722_v40 = vld [vmem:[%s11482_s2 + $0x778] sm:$0xf0]  ;;  %2974 = vmatpush.bf16.msra.mxu2 %v5608_v48  ;;  %v5956_v2 = vor.u32 %v7671_v6, %v5955_v52  ;;  %v5692_v1 = vor.u32 %v7605_v16, %v5691_v17  ;;  %v7668_v48 = vld [vmem:[%s11482_s2 + $0x5c8] sm:$0xf0]  ;;  %v2586_v44 = vpop.f32.mrf.mxu0  ;;  %v6147_v17 = vld [vmem:[%s11482_s2 + $0x758] sm:$0xf] }
  0xe5   : > { %2991 = vmatpush.bf16.msra.mxu3 %v5716_v46  ;;  %v7698_v46 = vld [vmem:[%s11482_s2 + $0x6b8] sm:$0xf0]  ;;  %v7719_v16 = vld [vmem:[%s11482_s2 + $0x760] sm:$0xf0]  ;;  %v5847_v52 = vld [vmem:[%s11482_s2 + $0x500] sm:$0xf]  ;;  %2873 = vmatmul.bf16.gmra.mxu0 %v8915_v34 }
  0xe6   : > { %2938 = vmatpush.bf16.msra.mxu0 %v5416_v49  ;;  %v6159_v49 = vld [vmem:[%s11482_s2 + $0x770] sm:$0xf]  ;;  %v6064_v22 = vor.u32 %v7698_v46, %v6063_v59  ;;  %v2587_v59 = vadd.f32 %v2586_v44, %v9425_v24  ;;  %v2604_v46 = vpop.f32.mrf.mxu1  ;;  %v6148_v24 = vor.u32 %v7719_v16, %v6147_v17  ;;  %6212 = vmatmul.msk.bf16.gmra.mxu1 %vm2493_vm1, %v8936_v32  ;;  %v6027_v17 = vld [vmem:[%s11482_s2 + $0x668] sm:$0xf]  ;;  %v7689_v16 = vld [vmem:[%s11482_s2 + $0x670] sm:$0xf0] }
  0xe7   : > { %v6160_v43 = vor.u32 %v7722_v40, %v6159_v49  ;;  %v2637_v10 = vpop.f32.mrf.mxu3 }
  0xe8   : > { %3022 = vmatpush.bf16.msrb.mxu1 %v5968_v39  ;;  %v6051_v39 = vld [vmem:[%s11482_s2 + $0x698] sm:$0xf]  ;;  %2975 = vmatpush.bf16.msra.mxu2 %v5596_v9  ;;  %v2605_v40 = vadd.f32 %v2604_v46, %v2587_v59  ;;  %v6039_v9 = vld [vmem:[%s11482_s2 + $0x680] sm:$0xf] }
  0xe9   : > { %2992 = vmatpush.bf16.msra.mxu3 %v5704_v5  ;;  %v7695_v5 = vld [vmem:[%s11482_s2 + $0x6a0] sm:$0xf0]  ;;  %2909 = vmatmul.bf16.gmra.mxu2 %v8337_v45  ;;  %v6123_v45 = vld [vmem:[%s11482_s2 + $0x728] sm:$0xf] }
  0xea   : > { %2939 = vmatpush.bf16.msra.mxu0 %v5404_v42  ;;  %v2619_v42 = vpop.f32.mrf.mxu2  ;;  %v6052_v6 = vor.u32 %v7695_v5, %v6051_v39  ;;  %v7641_v39 = vld [vmem:[%s11482_s2 + $0x4f0] sm:$0xf0]  ;;  %2927 = vmatmul.bf16.gmra.mxu3 %v8355_v27  ;;  %v5907_v27 = vld [vmem:[%s11482_s2 + $0x578] sm:$0xf] }
  0xeb   : > { %v2620_v49 = vadd.f32 %v2619_v42, %v2602_v11  ;;  %v5931_v11 = vld [vmem:[%s11482_s2 + $0x5a8] sm:$0xf]  ;;  %v5919_v42 = vld [vmem:[%s11482_s2 + $0x590] sm:$0xf] }
  0xec   : > { %3023 = vmatpush.bf16.msrb.mxu1 %v5956_v2  ;;  %3040 = vmatpush.bf16.msrb.mxu2 %v6064_v22  ;;  %v5848_v2 = vor.u32 %v7644_v38, %v5847_v52  ;;  %v7716_v22 = vld [vmem:[%s11482_s2 + $0x748] sm:$0xf0]  ;;  %v2588_v59 = vpop.f32.mrf.mxu0  ;;  %v7713_v52 = vld [vmem:[%s11482_s2 + $0x730] sm:$0xf0]  ;;  %v7662_v38 = vld [vmem:[%s11482_s2 + $0x598] sm:$0xf0] }
  0xed   : > { %2993 = vmatpush.bf16.msra.mxu3 %v5692_v1  ;;  %v6135_v1 = vld [vmem:[%s11482_s2 + $0x740] sm:$0xf] }
  0xee   : > { %3004 = vmatpush.bf16.msrb.mxu0 %v5872_v14  ;;  %v5944_v14 = vor.u32 %v7668_v48, %v5943_v0  ;;  %v7665_v0 = vld [vmem:[%s11482_s2 + $0x5b0] sm:$0xf0]  ;;  %v9596_v48 = vadd.f32 %v2637_v10, %v2620_v49  ;;  %v6136_v5 = vor.u32 %v7716_v22, %v6135_v1  ;;  %v2606_v49 = vpop.f32.mrf.mxu1  ;;  %v6124_v10 = vor.u32 %v7713_v52, %v6123_v45  ;;  %v6015_v22 = vld [vmem:[%s11482_s2 + $0x650] sm:$0xf]  ;;  %v6003_v52 = vld [vmem:[%s11482_s2 + $0x638] sm:$0xf] }
  0xef   : > { %v5932_v44 = vor.u32 %v7665_v0, %v5931_v11  ;;  %v6028_v11 = vor.u32 %v7689_v16, %v6027_v17  ;;  %v7686_v0 = vld [vmem:[%s11482_s2 + $0x658] sm:$0xf0]  ;;  %v7635_v17 = vld [vmem:[%s11482_s2 + $0x4c0] sm:$0xf0]  ;;  %v5895_v16 = vld [vmem:[%s11482_s2 + $0x560] sm:$0xf] }
  0xf0   : > { %3024 = vmatpush.bf16.msrb.mxu1 %v5944_v14  ;;  %3041 = vmatpush.bf16.msrb.mxu2 %v6052_v6  ;;  %v5823_v6 = vld [vmem:[%s11482_s2 + $0x4d0] sm:$0xf]  ;;  %v6016_v59 = vor.u32 %v7686_v0, %v6015_v22 }
  0xf1   : > { %3058 = vmatpush.bf16.msrb.mxu3 %v6160_v43  ;;  %v5835_v43 = vld [vmem:[%s11482_s2 + $0x4e8] sm:$0xf] }
  0xf2   : > { %3005 = vmatpush.bf16.msrb.mxu0 %v5860_v15  ;;  %v6040_v15 = vor.u32 %v7692_v41, %v6039_v9  ;;  %v5836_v46 = vor.u32 %v7641_v39, %v5835_v43  ;;  %v2622_v14 = vpop.f32.mrf.mxu2  ;;  %v5920_v9 = vor.u32 %v7662_v38, %v5919_v42  ;;  %v6111_v39 = vld [vmem:[%s11482_s2 + $0x710] sm:$0xf]  ;;  %v7656_v42 = vld [vmem:[%s11482_s2 + $0x568] sm:$0xf0]  ;;  %v7683_v38 = vld [vmem:[%s11482_s2 + $0x640] sm:$0xf0] }
  0xf3   : > { %v2623_v41 = vadd.f32 %v2622_v14, %v2605_v40  ;;  %v7659_v40 = vld [vmem:[%s11482_s2 + $0x580] sm:$0xf0] }
  0xf4   : > { %3025 = vmatpush.bf16.msrb.mxu1 %v5932_v44  ;;  %3042 = vmatpush.bf16.msrb.mxu2 %v6040_v15  ;;  %v7710_v44 = vld [vmem:[%s11482_s2 + $0x718] sm:$0xf0]  ;;  %v5811_v15 = vld [vmem:[%s11482_s2 + $0x4b8] sm:$0xf] }
  0xf5   : > { %3059 = vmatpush.bf16.msrb.mxu3 %v6148_v24  ;;  %v7638_v24 = vld [vmem:[%s11482_s2 + $0x4d8] sm:$0xf0]  ;;  %v6112_v45 = vor.u32 %v7710_v44, %v6111_v39  ;;  %2940 = vmatmul.bf16.vlgmr.msra.gmra.mxu0 %v8231_v58  ;;  %v7680_v39 = vld [vmem:[%s11482_s2 + $0x628] sm:$0xf0]  ;;  %v7653_v58 = vld [vmem:[%s11482_s2 + $0x550] sm:$0xf0] }
  0xf6   : > { %3006 = vmatpush.bf16.msrb.mxu0 %v5848_v2  ;;  %v2640_v2 = vpop.f32.mrf.mxu3  ;;  %v5824_v1 = vor.u32 %v7638_v24, %v5823_v6  ;;  %v2671_v6 = vpop.f32.mrf.mxu1  ;;  %v5812_v24 = vor.u32 %v7635_v17, %v5811_v15  ;;  %2958 = vmatmul.bf16.vlgmr.msra.gmra.mxu1 %v8257_v8  ;;  %v6087_v8 = vld [vmem:[%s11482_s2 + $0x6e0] sm:$0xf]  ;;  %v7704_v15 = vld [vmem:[%s11482_s2 + $0x6e8] sm:$0xf0]  ;;  %v7629_v17 = vld [vmem:[%s11482_s2 + $0x490] sm:$0xf0] }
  0xf7   : > { %v9642_v43 = vadd.f32 %v2640_v2, %v2623_v41  ;;  %v7707_v41 = vld [vmem:[%s11482_s2 + $0x700] sm:$0xf0]  ;;  %v6004_v2 = vor.u32 %v7683_v38, %v6003_v52  ;;  %v6088_v38 = vor.u32 %v7704_v15, %v6087_v8 }
  0xf8   : > { %3026 = vmatpush.bf16.msrb.mxu1 %v5920_v9  ;;  %3043 = vmatpush.bf16.msrb.mxu2 %v6028_v11  ;;  %v6099_v9 = vld [vmem:[%s11482_s2 + $0x6f8] sm:$0xf]  ;;  %v5896_v11 = vor.u32 %v7656_v42, %v5895_v16  ;;  %v5979_v42 = vld [vmem:[%s11482_s2 + $0x608] sm:$0xf] }
  0xf9   : > { %3060 = vmatpush.bf16.msrb.mxu3 %v6136_v5  ;;  %v5908_v5 = vor.u32 %v7659_v40, %v5907_v27  ;;  %v6100_v0 = vor.u32 %v7707_v41, %v6099_v9  ;;  %v5991_v40 = vld [vmem:[%s11482_s2 + $0x620] sm:$0xf]  ;;  %2976 = vmatmul.bf16.vlgmr.msra.gmra.mxu2 %v8517_v50  ;;  %v6301_v50 = vld [vmem:[%s11481_s1 + $0xa8] sm:$0xf] }
  0xfa   : > { %3007 = vmatpush.bf16.msrb.mxu0 %v5836_v46  ;;  %v2653_v46 = vpop.f32.mrf.mxu0  ;;  %v2624_v14 = vpop.f32.mrf.mxu2  ;;  %2994 = vmatmul.bf16.vlgmr.msra.gmra.mxu3 %v8530_v55 }
  0xfb   : > { %v2654_v49 = vadd.f32 %v2653_v46, %v9542_v36  ;;  %v7632_v36 = vld [vmem:[%s11482_s2 + $0x4a8] sm:$0xf0]  ;;  %v7677_v46 = vld [vmem:[%s11482_s2 + $0x610] sm:$0xf0]  ;;  %v6075_v14 = vld [vmem:[%s11482_s2 + $0x6c8] sm:$0xf] }
  0xfc   : > { %3027 = vmatpush.bf16.msrb.mxu1 %v5908_v5  ;;  %3044 = vmatpush.bf16.msrb.mxu2 %v6016_v59  ;;  %v5787_v5 = vld [vmem:[%s11482_s2 + $0x488] sm:$0xf]  ;;  %v5992_v59 = vor.u32 %v7680_v39, %v5991_v40  ;;  %v5980_v39 = vor.u32 %v7677_v46, %v5979_v42  ;;  %v7731_v46 = vld [vmem:[%s11482_s2 + $0x7c0] sm:$0xf0] }
  0xfd   : > { %3061 = vmatpush.bf16.msrb.mxu3 %v6124_v10  ;;  %v5799_v10 = vld [vmem:[%s11482_s2 + $0x4a0] sm:$0xf]  ;;  %v2672_v27 = vadd.f32 %v2671_v6, %v2654_v49  ;;  %v7701_v49 = vld [vmem:[%s11482_s2 + $0x6d0] sm:$0xf0] }
  0xfe   : > { %3008 = vmatpush.bf16.msrb.mxu0 %v5824_v1  ;;  %v5883_v1 = vld [vmem:[%s11482_s2 + $0x548] sm:$0xf]  ;;  %v2642_v22 = vpop.f32.mrf.mxu3  ;;  %v5800_v44 = vor.u32 %v7632_v36, %v5799_v10  ;;  %v5788_v10 = vor.u32 %v7629_v17, %v5787_v5  ;;  %v6207_v36 = vld [vmem:[%s11482_s2 + $0x7d0] sm:$0xf]  ;;  %v6076_v8 = vor.u32 %v7701_v49, %v6075_v14  ;;  %v7247_v14 = vld [vmem:[%s11481_s1 + $0x80] sm:$0xf0] }
  0xff   : > { %v5884_v16 = vor.u32 %v7653_v58, %v5883_v1  ;;  %v7277_v1 = vld [vmem:[%s11481_s1 + $0x170] sm:$0xf0]  ;;  %v6289_v58 = vld [vmem:[%s11481_s1 + $0x90] sm:$0xf] }
 0x100   : > { %3028 = vmatpush.bf16.msrb.mxu1 %v5896_v11  ;;  %3045 = vmatpush.bf16.msrb.mxu2 %v6004_v2  ;;  %v2673_v11 = vpop.f32.mrf.mxu1  ;;  %v7734_v2 = vld [vmem:[%s11482_s2 + $0x7d8] sm:$0xf0]  ;;  %v6385_v17 = vld [vmem:[%s11481_s1 + $0x150] sm:$0xf] }
 0x101   : > { %3062 = vmatpush.bf16.msrb.mxu3 %v6112_v45  ;;  %v7253_v45 = vld [vmem:[%s11481_s1 + $0xb0] sm:$0xf0]  ;;  %v6208_v55 = vor.u32 %v7734_v2, %v6207_v36  ;;  %v6373_v36 = vld [vmem:[%s11481_s1 + $0x138] sm:$0xf]  ;;  %v7271_v2 = vld [vmem:[%s11481_s1 + $0x140] sm:$0xf0] }
 0x102   : > { %3009 = vmatpush.bf16.msrb.mxu0 %v5812_v24  ;;  %v2655_v52 = vpop.f32.mrf.mxu0  ;;  %v6302_v6 = vor.u32 %v7253_v45, %v6301_v50  ;;  %v6397_v24 = vld [vmem:[%s11481_s1 + $0x168] sm:$0xf]  ;;  %v2689_v9 = vpop.f32.mrf.mxu2  ;;  %v6277_v50 = vld [vmem:[%s11481_s1 + $0x78] sm:$0xf]  ;;  %v6481_v45 = vld [vmem:[%s11481_s1 + $0x210] sm:$0xf] }
 0x103   : > { %v2656_v41 = vadd.f32 %v2655_v52, %v9596_v48  ;;  %v9740_v22 = vadd.f32 %v2689_v9, %v2672_v27  ;;  %v6493_v48 = vld [vmem:[%s11481_s1 + $0x228] sm:$0xf]  ;;  %v7250_v27 = vld [vmem:[%s11481_s1 + $0x98] sm:$0xf0]  ;;  %v6398_v15 = vor.u32 %v7277_v1, %v6397_v24  ;;  %v6278_v49 = vor.u32 %v7247_v14, %v6277_v50  ;;  %v7265_v14 = vld [vmem:[%s11481_s1 + $0x110] sm:$0xf0] }
 0x104   : > { %3029 = vmatpush.bf16.msrb.mxu1 %v5884_v16  ;;  %3046 = vmatpush.bf16.msrb.mxu2 %v5992_v59  ;;  %v6290_v5 = vor.u32 %v7250_v27, %v6289_v58  ;;  %v7274_v16 = vld [vmem:[%s11481_s1 + $0x158] sm:$0xf0]  ;;  %v6195_v59 = vld [vmem:[%s11482_s2 + $0x7b8] sm:$0xf]  ;;  %v6374_v58 = vor.u32 %v7271_v2, %v6373_v36  ;;  %v6361_v27 = vld [vmem:[%s11481_s1 + $0x120] sm:$0xf] }
 0x105   : > { %3063 = vmatpush.bf16.msrb.mxu3 %v6100_v0  ;;  %v7301_v0 = vld [vmem:[%s11481_s1 + $0x230] sm:$0xf0]  ;;  %v2674_v40 = vadd.f32 %v2673_v11, %v2656_v41  ;;  %v7298_v52 = vld [vmem:[%s11481_s1 + $0x218] sm:$0xf0]  ;;  %v6386_v24 = vor.u32 %v7274_v16, %v6385_v17  ;;  %2945 = vmatmul.bf16.gmra.mxu0 %v8373_v28  ;;  %v6253_v17 = vld [vmem:[%s11481_s1 + $0x48] sm:$0xf] }
 0x106   : > { %3010 = vmatpush.bf16.msrb.mxu0 %v5800_v44  ;;  %v9754_v44 = vpop.f32.mrf.mxu3  ;;  %v6494_v42 = vor.u32 %v7301_v0, %v6493_v48  ;;  %v6265_v0 = vld [vmem:[%s11481_s1 + $0x60] sm:$0xf]  ;;  %2963 = vmatmul.bf16.gmra.mxu1 %v8376_v60  ;;  %v7292_v60 = vld [vmem:[%s11481_s1 + $0x1e8] sm:$0xf0]  ;;  %v7241_v16 = vld [vmem:[%s11481_s1 + $0x50] sm:$0xf0] }
 0x108   : > { %4462 = vmatpush.bf16.msra.mxu1 %v6302_v6  ;;  %3047 = vmatpush.bf16.msrb.mxu2 %v5980_v39  ;;  %v2676_v11 = vpop.f32.mrf.mxu1 }
 0x109   : > { %3064 = vmatpush.bf16.msrb.mxu3 %v6088_v38  ;;  %v6196_v38 = vor.u32 %v7731_v46, %v6195_v59  ;;  %2981 = vmatmul.bf16.gmra.mxu2 %v8636_v33  ;;  %v6254_v59 = vor.u32 %v7241_v16, %v6253_v17  ;;  %v6349_v46 = vld [vmem:[%s11481_s1 + $0x108] sm:$0xf] }
 0x10a   : > { %3011 = vmatpush.bf16.msrb.mxu0 %v5788_v10  ;;  %v2658_v6 = vpop.f32.mrf.mxu0  ;;  %v2691_v9 = vpop.f32.mrf.mxu2  ;;  %v6482_v10 = vor.u32 %v7298_v52, %v6481_v45  ;;  %2999 = vmatmul.bf16.gmra.mxu3 %v8644_v51  ;;  %v6183_v52 = vld [vmem:[%s11482_s2 + $0x7a0] sm:$0xf]  ;;  %v6445_v51 = vld [vmem:[%s11481_s1 + $0x1c8] sm:$0xf]  ;;  %v6350_v36 = vor.u32 %v7265_v14, %v6349_v46  ;;  %v7259_v46 = vld [vmem:[%s11481_s1 + $0xe0] sm:$0xf0] }
 0x10b   : > { %v2659_v41 = vadd.f32 %v2658_v6, %v9642_v43  ;;  %v9787_v1 = vadd.f32 %v2691_v9, %v2674_v40  ;;  %v7295_v43 = vld [vmem:[%s11481_s1 + $0x200] sm:$0xf0]  ;;  %v7244_v40 = vld [vmem:[%s11481_s1 + $0x68] sm:$0xf0]  ;;  %v7289_v9 = vld [vmem:[%s11481_s1 + $0x1d0] sm:$0xf0] }
 0x10c   : > { %4463 = vmatpush.bf16.msra.mxu1 %v6290_v5  ;;  %4480 = vmatpush.bf16.msra.mxu2 %v6398_v15  ;;  %v6266_v28 = vor.u32 %v7244_v40, %v6265_v0  ;;  %v6457_v5 = vld [vmem:[%s11481_s1 + $0x1e0] sm:$0xf]  ;;  %v7725_v0 = vld [vmem:[%s11482_s2 + $0x790] sm:$0xf0]  ;;  %v6229_v40 = vld [vmem:[%s11481_s1 + $0x18] sm:$0xf] }
 0x10d   : > { %3065 = vmatpush.bf16.msrb.mxu3 %v6076_v8  ;;  %v2677_v48 = vadd.f32 %v2676_v11, %v2659_v41  ;;  %v7268_v8 = vld [vmem:[%s11481_s1 + $0x128] sm:$0xf0]  ;;  %v6458_v6 = vor.u32 %v7292_v60, %v6457_v5  ;;  %v6241_v41 = vld [vmem:[%s11481_s1 + $0x30] sm:$0xf]  ;;  %v7238_v11 = vld [vmem:[%s11481_s1 + $0x38] sm:$0xf0] }
 0x10e   : > { %3080 = vmatpush.bf16.msra.mxu0 %v6208_v55  ;;  %v6469_v55 = vld [vmem:[%s11481_s1 + $0x1f8] sm:$0xf]  ;;  %v9802_v39 = vpop.f32.mrf.mxu3  ;;  %v6362_v33 = vor.u32 %v7268_v8, %v6361_v27  ;;  %v6242_v2 = vor.u32 %v7238_v11, %v6241_v41  ;;  %v7235_v27 = vld [vmem:[%s11481_s1 + $0x20] sm:$0xf0]  ;;  %v6433_v8 = vld [vmem:[%s11481_s1 + $0x1b0] sm:$0xf] }
 0x10f   : > { %v6470_v15 = vor.u32 %v7295_v43, %v6469_v55  ;;  %v6337_v55 = vld [vmem:[%s11481_s1 + $0xf0] sm:$0xf]  ;;  %v6171_v43 = vld [vmem:[%s11482_s2 + $0x788] sm:$0xf]  ;;  %v6230_v5 = vor.u32 %v7235_v27, %v6229_v40  ;;  %v7232_v14 = vld [vmem:[%s11481_s1 + $0x8] sm:$0xf0] }
 0x110   : > { %4464 = vmatpush.bf16.msra.mxu1 %v6278_v49  ;;  %4481 = vmatpush.bf16.msra.mxu2 %v6386_v24  ;;  %v2678_v45 = vpop.f32.mrf.mxu1  ;;  %v6409_v11 = vld [vmem:[%s11481_s1 + $0x180] sm:$0xf]  ;;  %v6781_v40 = vld [vmem:[%s11481_s1 + $0x468] sm:$0xf] }
 0x111   : > { %4498 = vmatpush.bf16.msra.mxu3 %v6494_v42  ;;  %v6421_v45 = vld [vmem:[%s11481_s1 + $0x198] sm:$0xf] }
 0x112   : > { %3081 = vmatpush.bf16.msra.mxu0 %v6196_v38  ;;  %v2660_v42 = vpop.f32.mrf.mxu0  ;;  %v2694_v50 = vpop.f32.mrf.mxu2  ;;  %v7728_v38 = vld [vmem:[%s11482_s2 + $0x7a8] sm:$0xf0] }
 0x113   : > { %v9837_v49 = vadd.f32 %v2694_v50, %v2677_v48  ;;  %v6184_v24 = vor.u32 %v7728_v38, %v6183_v52  ;;  %v7262_v48 = vld [vmem:[%s11481_s1 + $0xf8] sm:$0xf0]  ;;  %v6217_v38 = vld [vmem:[%s11481_s1] sm:$0xf] }
 0x114   : > { %4465 = vmatpush.bf16.msra.mxu1 %v6266_v28  ;;  %4482 = vmatpush.bf16.msra.mxu2 %v6374_v58  ;;  %v6446_v58 = vor.u32 %v7289_v9, %v6445_v51  ;;  %v6172_v28 = vor.u32 %v7725_v0, %v6171_v43  ;;  %v6338_v17 = vor.u32 %v7262_v48, %v6337_v55  ;;  %v7256_v9 = vld [vmem:[%s11481_s1 + $0xc8] sm:$0xf0]  ;;  %v7349_v0 = vld [vmem:[%s11481_s1 + $0x3b0] sm:$0xf0] }
 0x115   : > { %4499 = vmatpush.bf16.msra.mxu3 %v6482_v10  ;;  %3012 = vmatmul.bf16.vlgmr.msrb.gmra.mxu0 %v8543_v47  ;;  %v6218_v51 = vor.u32 %v7232_v14, %v6217_v38  ;;  %v6313_v47 = vld [vmem:[%s11481_s1 + $0xc0] sm:$0xf]  ;;  %v7370_v38 = vld [vmem:[%s11481_s1 + $0x458] sm:$0xf0] }
 0x116   : > { %v9851_v10 = vpop.f32.mrf.mxu3  ;;  %3082 = vmatpush.bf16.msra.mxu0 %v6184_v24  ;;  %3030 = vmatmul.bf16.vlgmr.msrb.gmra.mxu1 %v8567_v18  ;;  %v7280_v18 = vld [vmem:[%s11481_s1 + $0x188] sm:$0xf0]  ;;  %v6314_v48 = vor.u32 %v7256_v9, %v6313_v47  ;;  %v7394_v47 = vld [vmem:[%s11481_s1 + $0x518] sm:$0xf0]  ;;  %v6565_v9 = vld [vmem:[%s11481_s1 + $0x2b8] sm:$0xf] }
 0x118   : > { %4466 = vmatpush.bf16.msra.mxu1 %v6254_v59  ;;  %4483 = vmatpush.bf16.msra.mxu2 %v6362_v33  ;;  %v2743_v33 = vpop.f32.mrf.mxu1  ;;  %v6325_v59 = vld [vmem:[%s11481_s1 + $0xd8] sm:$0xf] }
 0x119   : > { %4500 = vmatpush.bf16.msra.mxu3 %v6470_v15  ;;  %v7286_v15 = vld [vmem:[%s11481_s1 + $0x1b8] sm:$0xf0]  ;;  %v6326_v24 = vor.u32 %v7259_v46, %v6325_v59  ;;  %3048 = vmatmul.bf16.vlgmr.msrb.gmra.mxu2 %v8791_v30  ;;  %v6685_v30 = vld [vmem:[%s11481_s1 + $0x3a8] sm:$0xf]  ;;  %v6673_v46 = vld [vmem:[%s11481_s1 + $0x390] sm:$0xf] }
 0x11a   : > { %v2725_v60 = vpop.f32.mrf.mxu0  ;;  %3083 = vmatpush.bf16.msra.mxu0 %v6172_v28  ;;  %v2696_v16 = vpop.f32.mrf.mxu2  ;;  %v6434_v50 = vor.u32 %v7286_v15, %v6433_v8  ;;  %3066 = vmatmul.bf16.vlgmr.msrb.gmra.mxu3 %v8801_v23  ;;  %v6686_v15 = vor.u32 %v7349_v0, %v6685_v30  ;;  %v7322_v59 = vld [vmem:[%s11481_s1 + $0x2d8] sm:$0xf0]  ;;  %v6757_v30 = vld [vmem:[%s11481_s1 + $0x438] sm:$0xf]  ;;  %v7391_v0 = vld [vmem:[%s11481_s1 + $0x500] sm:$0xf0] }
 0x11b   : > { %v2726_v42 = vadd.f32 %v2725_v60, %v9754_v44  ;;  %v7283_v44 = vld [vmem:[%s11481_s1 + $0x1a0] sm:$0xf0]  ;;  %v6877_v60 = vld [vmem:[%s11481_s1 + $0x528] sm:$0xf] }
 0x11c   : > { %4467 = vmatpush.bf16.msra.mxu1 %v6242_v2  ;;  %4484 = vmatpush.bf16.msra.mxu2 %v6350_v36  ;;  %v6422_v41 = vor.u32 %v7283_v44, %v6421_v45  ;;  %v6589_v36 = vld [vmem:[%s11481_s1 + $0x2e8] sm:$0xf]  ;;  %v7325_v2 = vld [vmem:[%s11481_s1 + $0x2f0] sm:$0xf0]  ;;  %v6769_v44 = vld [vmem:[%s11481_s1 + $0x450] sm:$0xf] }
 0x11d   : > { %4501 = vmatpush.bf16.msra.mxu3 %v6458_v6  ;;  %v2744_v52 = vadd.f32 %v2743_v33, %v2726_v42  ;;  %v6590_v43 = vor.u32 %v7325_v2, %v6589_v36  ;;  %v6410_v42 = vor.u32 %v7280_v18, %v6409_v11  ;;  %v6661_v11 = vld [vmem:[%s11481_s1 + $0x378] sm:$0xf]  ;;  %v7343_v18 = vld [vmem:[%s11481_s1 + $0x380] sm:$0xf0] }
 0x11e   : > { %v2714_v6 = vpop.f32.mrf.mxu3 }
 0x11f   : > { %4516 = vmatpush.bf16.msrb.mxu0 %v6590_v43  ;;  %v6853_v43 = vld [vmem:[%s11481_s1 + $0x4f8] sm:$0xf] }
 0x120   : > { %4468 = vmatpush.bf16.msra.mxu1 %v6230_v5  ;;  %4485 = vmatpush.bf16.msra.mxu2 %v6338_v17  ;;  %v2745_v8 = vpop.f32.mrf.mxu1  ;;  %v7397_v17 = vld [vmem:[%s11481_s1 + $0x530] sm:$0xf0] }
 0x121   : > { %4502 = vmatpush.bf16.msra.mxu3 %v6446_v58  ;;  %v7373_v58 = vld [vmem:[%s11481_s1 + $0x470] sm:$0xf0]  ;;  %v6878_v23 = vor.u32 %v7397_v17, %v6877_v60  ;;  %v6854_v60 = vor.u32 %v7391_v0, %v6853_v43  ;;  %v6553_v17 = vld [vmem:[%s11481_s1 + $0x2a0] sm:$0xf]  ;;  %v7310_v43 = vld [vmem:[%s11481_s1 + $0x278] sm:$0xf0] }
 0x122   : > { %v2727_v55 = vpop.f32.mrf.mxu0  ;;  %v2761_v28 = vpop.f32.mrf.mxu2  ;;  %v6782_v5 = vor.u32 %v7373_v58, %v6781_v40  ;;  %v6625_v0 = vld [vmem:[%s11481_s1 + $0x330] sm:$0xf] }
 0x123   : > { %v2728_v27 = vadd.f32 %v2727_v55, %v9802_v39  ;;  %v2762_v16 = vadd.f32 %v2761_v28, %v2744_v52  ;;  %v6577_v39 = vld [vmem:[%s11481_s1 + $0x2d0] sm:$0xf]  ;;  %v7346_v52 = vld [vmem:[%s11481_s1 + $0x398] sm:$0xf0]  ;;  %v7367_v55 = vld [vmem:[%s11481_s1 + $0x440] sm:$0xf0] }
 0x124   : > { %4469 = vmatpush.bf16.msra.mxu1 %v6218_v51  ;;  %4486 = vmatpush.bf16.msra.mxu2 %v6326_v24  ;;  %v6578_v45 = vor.u32 %v7322_v59, %v6577_v39  ;;  %v6674_v6 = vor.u32 %v7346_v52, %v6673_v46  ;;  %v6770_v24 = vor.u32 %v7370_v38, %v6769_v44  ;;  %v6865_v51 = vld [vmem:[%s11481_s1 + $0x510] sm:$0xf]  ;;  %v7364_v39 = vld [vmem:[%s11481_s1 + $0x428] sm:$0xf0]  ;;  %v6541_v44 = vld [vmem:[%s11481_s1 + $0x288] sm:$0xf] }
 0x125   : > { %4503 = vmatpush.bf16.msra.mxu3 %v6434_v50  ;;  %v2746_v33 = vadd.f32 %v2745_v8, %v2728_v27  ;;  %v6866_v36 = vor.u32 %v7394_v47, %v6865_v51  ;;  %v6662_v27 = vor.u32 %v7343_v18, %v6661_v11  ;;  %v6758_v8 = vor.u32 %v7367_v55, %v6757_v30  ;;  %v7313_v38 = vld [vmem:[%s11481_s1 + $0x290] sm:$0xf0]  ;;  %v6733_v47 = vld [vmem:[%s11481_s1 + $0x408] sm:$0xf] }
 0x126   : > { %v2779_v50 = vpop.f32.mrf.mxu3  ;;  %4517 = vmatpush.bf16.msrb.mxu0 %v6578_v45  ;;  %3035 = vmatmul.bf16.gmra.mxu1 %v8695_v19  ;;  %v6841_v19 = vld [vmem:[%s11481_s1 + $0x4e0] sm:$0xf]  ;;  %v6542_v51 = vor.u32 %v7313_v38, %v6541_v44 }
 0x127   : > { %v9955_v14 = vadd.f32 %v2779_v50, %v2762_v16  ;;  %3017 = vmatmul.bf16.gmra.mxu0 %v8656_v61  ;;  %v7316_v16 = vld [vmem:[%s11481_s1 + $0x2a8] sm:$0xf0] }
 0x128   : > { %4534 = vmatpush.bf16.msrb.mxu1 %v6686_v15  ;;  %4487 = vmatpush.bf16.msra.mxu2 %v6314_v48  ;;  %v2748_v28 = vpop.f32.mrf.mxu1  ;;  %v7340_v61 = vld [vmem:[%s11481_s1 + $0x368] sm:$0xf0] }
 0x129   : > { %4504 = vmatpush.bf16.msra.mxu3 %v6422_v41  ;;  %v7319_v41 = vld [vmem:[%s11481_s1 + $0x2c0] sm:$0xf0]  ;;  %v7388_v50 = vld [vmem:[%s11481_s1 + $0x4e8] sm:$0xf0]  ;;  %3053 = vmatmul.bf16.gmra.mxu2 %v8903_v63  ;;  %v7337_v63 = vld [vmem:[%s11481_s1 + $0x350] sm:$0xf0] }
 0x12a   : > { %v6566_v2 = vor.u32 %v7319_v41, %v6565_v9  ;;  %v2730_v48 = vpop.f32.mrf.mxu0  ;;  %v2763_v40 = vpop.f32.mrf.mxu2  ;;  %v6842_v52 = vor.u32 %v7388_v50, %v6841_v19  ;;  %v7361_v9 = vld [vmem:[%s11481_s1 + $0x410] sm:$0xf0]  ;;  %3071 = vmatmul.bf16.gmra.mxu3 %v8915_v34  ;;  %v6529_v34 = vld [vmem:[%s11481_s1 + $0x270] sm:$0xf]  ;;  %v7355_v50 = vld [vmem:[%s11481_s1 + $0x3e0] sm:$0xf0] }
 0x12b   : > { %v2731_v58 = vadd.f32 %v2730_v48, %v9851_v10  ;;  %v2764_v15 = vadd.f32 %v2763_v40, %v2746_v33  ;;  %v6649_v10 = vld [vmem:[%s11481_s1 + $0x360] sm:$0xf]  ;;  %v6554_v33 = vor.u32 %v7316_v16, %v6553_v17  ;;  %v6734_v55 = vor.u32 %v7361_v9, %v6733_v47  ;;  %v7382_v17 = vld [vmem:[%s11481_s1 + $0x4b8] sm:$0xf0]  ;;  %v6517_v16 = vld [vmem:[%s11481_s1 + $0x258] sm:$0xf] }
 0x12c   : > { %4552 = vmatpush.bf16.msrb.mxu2 %v6782_v5  ;;  %4535 = vmatpush.bf16.msrb.mxu1 %v6674_v6  ;;  %v6650_v46 = vor.u32 %v7340_v61, %v6649_v10  ;;  %v6637_v6 = vld [vmem:[%s11481_s1 + $0x348] sm:$0xf]  ;;  %v7331_v61 = vld [vmem:[%s11481_s1 + $0x320] sm:$0xf0]  ;;  %v6505_v9 = vld [vmem:[%s11481_s1 + $0x240] sm:$0xf] }
 0x12d   : > { %4505 = vmatpush.bf16.msra.mxu3 %v6410_v42  ;;  %4518 = vmatpush.bf16.msrb.mxu0 %v6566_v2  ;;  %v2749_v5 = vadd.f32 %v2748_v28, %v2731_v58  ;;  %v6638_v18 = vor.u32 %v7337_v63, %v6637_v6  ;;  %v7385_v2 = vld [vmem:[%s11481_s1 + $0x4d0] sm:$0xf0]  ;;  %v6530_v58 = vor.u32 %v7310_v43, %v6529_v34  ;;  %v7334_v28 = vld [vmem:[%s11481_s1 + $0x338] sm:$0xf0] }
 0x12e   : > { %v2781_v42 = vpop.f32.mrf.mxu3 }
 0x12f   : > { %v10008_v59 = vadd.f32 %v2781_v42, %v2764_v15  ;;  %v7307_v42 = vld [vmem:[%s11481_s1 + $0x260] sm:$0xf0] }
 0x130   : > { %4553 = vmatpush.bf16.msrb.mxu2 %v6770_v24  ;;  %4536 = vmatpush.bf16.msrb.mxu1 %v6662_v27  ;;  %v2750_v11 = vpop.f32.mrf.mxu1  ;;  %v6721_v27 = vld [vmem:[%s11481_s1 + $0x3f0] sm:$0xf] }
 0x131   : > { %4570 = vmatpush.bf16.msrb.mxu3 %v6878_v23  ;;  %v6745_v23 = vld [vmem:[%s11481_s1 + $0x420] sm:$0xf]  ;;  %4519 = vmatpush.bf16.msrb.mxu0 %v6554_v33  ;;  %v6613_v33 = vld [vmem:[%s11481_s1 + $0x318] sm:$0xf] }
 0x132   : > { %v6746_v45 = vor.u32 %v7364_v39, %v6745_v23  ;;  %v2732_v24 = vpop.f32.mrf.mxu0  ;;  %v2766_v41 = vpop.f32.mrf.mxu2  ;;  %v6518_v39 = vor.u32 %v7307_v42, %v6517_v16 }
 0x133   : > { %v2767_v30 = vadd.f32 %v2766_v41, %v2749_v5  ;;  %v6626_v5 = vor.u32 %v7334_v28, %v6625_v0  ;;  %v6614_v24 = vor.u32 %v7331_v61, %v6613_v33  ;;  %v6601_v41 = vld [vmem:[%s11481_s1 + $0x300] sm:$0xf]  ;;  %v6973_v0 = vld [vmem:[%s11481_s1 + $0x5e8] sm:$0xf] }
 0x134   : > { %4554 = vmatpush.bf16.msrb.mxu2 %v6758_v8  ;;  %4537 = vmatpush.bf16.msrb.mxu1 %v6650_v46  ;;  %v7358_v8 = vld [vmem:[%s11481_s1 + $0x3f8] sm:$0xf0]  ;;  %v6709_v46 = vld [vmem:[%s11481_s1 + $0x3d8] sm:$0xf] }
 0x135   : > { %4571 = vmatpush.bf16.msrb.mxu3 %v6866_v36  ;;  %v6829_v36 = vld [vmem:[%s11481_s1 + $0x4c8] sm:$0xf]  ;;  %4520 = vmatpush.bf16.msrb.mxu0 %v6542_v51  ;;  %v6722_v10 = vor.u32 %v7358_v8, %v6721_v27  ;;  %v6710_v63 = vor.u32 %v7355_v50, %v6709_v46  ;;  %v7445_v8 = vld [vmem:[%s11481_s1 + $0x6b0] sm:$0xf0]  ;;  %v7418_v46 = vld [vmem:[%s11481_s1 + $0x5d8] sm:$0xf0] }
 0x136   : > { %v6830_v48 = vor.u32 %v7385_v2, %v6829_v36  ;;  %v2784_v40 = vpop.f32.mrf.mxu3  ;;  %4470 = vmatmul.bf16.vlgmr.msra.gmra.mxu1 %v8128_v56  ;;  %v6697_v36 = vld [vmem:[%s11481_s1 + $0x3c0] sm:$0xf]  ;;  %v7352_v2 = vld [vmem:[%s11481_s1 + $0x3c8] sm:$0xf0] }
 0x137   : > { %v10060_v15 = vadd.f32 %v2784_v40, %v2767_v30  ;;  %6213 = vmatmul.msk.bf16.vlgmr.msra.gmra.mxu0 %vm2493_vm1, %v8818_v57  ;;  %v7328_v57 = vld [vmem:[%s11481_s1 + $0x308] sm:$0xf0]  ;;  %v6698_v34 = vor.u32 %v7352_v2, %v6697_v36  ;;  %v7421_v40 = vld [vmem:[%s11481_s1 + $0x5f0] sm:$0xf0]  ;;  %v7463_v36 = vld [vmem:[%s11481_s1 + $0x740] sm:$0xf0] }
 0x138   : > { %4555 = vmatpush.bf16.msrb.mxu2 %v6746_v45  ;;  %4538 = vmatpush.bf16.msrb.mxu1 %v6638_v18  ;;  %v6805_v45 = vld [vmem:[%s11481_s1 + $0x498] sm:$0xf]  ;;  %v2815_v6 = vpop.f32.mrf.mxu1  ;;  %v6602_v30 = vor.u32 %v7328_v57, %v6601_v41  ;;  %v6974_v27 = vor.u32 %v7421_v40, %v6973_v0 }
 0x139   : > { %4572 = vmatpush.bf16.msrb.mxu3 %v6854_v60  ;;  %v6817_v60 = vld [vmem:[%s11481_s1 + $0x4b0] sm:$0xf]  ;;  %4521 = vmatpush.bf16.msrb.mxu0 %v6530_v58  ;;  %v7069_v58 = vld [vmem:[%s11481_s1 + $0x6a8] sm:$0xf]  ;;  %v7045_v41 = vld [vmem:[%s11481_s1 + $0x678] sm:$0xf] }
 0x13a   : > { %v6818_v23 = vor.u32 %v7382_v17, %v6817_v60  ;;  %v2797_v19 = vpop.f32.mrf.mxu0  ;;  %v2768_v44 = vpop.f32.mrf.mxu2  ;;  %4488 = vmatmul.bf16.vlgmr.msra.gmra.mxu2 %v8135_v62  ;;  %v7469_v60 = vld [vmem:[%s11481_s1 + $0x770] sm:$0xf0]  ;;  %4506 = vmatmul.bf16.vlgmr.msra.gmra.mxu3 %v8154_v12  ;;  %v7070_v42 = vor.u32 %v7445_v8, %v7069_v58  ;;  %v7141_v57 = vld [vmem:[%s11481_s1 + $0x738] sm:$0xf]  ;;  %v6937_v58 = vld [vmem:[%s11481_s1 + $0x5a0] sm:$0xf] }
 0x13b   : > { %v2798_v38 = vadd.f32 %v2797_v19, %v9955_v14  ;;  %v7304_v14 = vld [vmem:[%s11481_s1 + $0x248] sm:$0xf0]  ;;  %v7466_v44 = vld [vmem:[%s11481_s1 + $0x758] sm:$0xf0] }
 0x13c   : > { %4556 = vmatpush.bf16.msrb.mxu2 %v6734_v55  ;;  %4539 = vmatpush.bf16.msrb.mxu1 %v6626_v5  ;;  %v6506_v18 = vor.u32 %v7304_v14, %v6505_v9  ;;  %v6793_v55 = vld [vmem:[%s11481_s1 + $0x480] sm:$0xf]  ;;  %v7165_v5 = vld [vmem:[%s11481_s1 + $0x768] sm:$0xf]  ;;  %v7415_v14 = vld [vmem:[%s11481_s1 + $0x5c0] sm:$0xf0] }
 0x13d   : > { %4573 = vmatpush.bf16.msrb.mxu3 %v6842_v52  ;;  %v7379_v52 = vld [vmem:[%s11481_s1 + $0x4a0] sm:$0xf0]  ;;  %4522 = vmatpush.bf16.msrb.mxu0 %v6518_v39  ;;  %v2816_v51 = vadd.f32 %v2815_v6, %v2798_v38  ;;  %v7166_v33 = vor.u32 %v7469_v60, %v7165_v5  ;;  %v6961_v39 = vld [vmem:[%s11481_s1 + $0x5d0] sm:$0xf]  ;;  %v7213_v6 = vld [vmem:[%s11481_s1 + $0x7c8] sm:$0xf] }
 0x13e   : > { %v6806_v47 = vor.u32 %v7379_v52, %v6805_v45  ;;  %v2786_v11 = vpop.f32.mrf.mxu3  ;;  %v6962_v50 = vor.u32 %v7418_v46, %v6961_v39  ;;  %v7442_v45 = vld [vmem:[%s11481_s1 + $0x698] sm:$0xf0]  ;;  %v7153_v52 = vld [vmem:[%s11481_s1 + $0x750] sm:$0xf]  ;;  %v7129_v5 = vld [vmem:[%s11481_s1 + $0x720] sm:$0xf] }
 0x13f   : > { %v7439_v11 = vld [vmem:[%s11481_s1 + $0x680] sm:$0xf0]  ;;  %v7460_v60 = vld [vmem:[%s11481_s1 + $0x728] sm:$0xf0]  ;;  %v7409_v39 = vld [vmem:[%s11481_s1 + $0x590] sm:$0xf0] }
 0x140   : > { %4557 = vmatpush.bf16.msrb.mxu2 %v6722_v10  ;;  %4540 = vmatpush.bf16.msrb.mxu1 %v6614_v24  ;;  %v2817_v10 = vpop.f32.mrf.mxu1  ;;  %v7481_v24 = vld [vmem:[%s11481_s1 + $0x7d0] sm:$0xf0]  ;;  %v7021_v46 = vld [vmem:[%s11481_s1 + $0x648] sm:$0xf] }
 0x141   : > { %4574 = vmatpush.bf16.msrb.mxu3 %v6830_v48  ;;  %v7376_v48 = vld [vmem:[%s11481_s1 + $0x488] sm:$0xf0]  ;;  %4523 = vmatpush.bf16.msrb.mxu0 %v6506_v18  ;;  %v7214_v9 = vor.u32 %v7481_v24, %v7213_v6 }
 0x142   : > { %v6794_v43 = vor.u32 %v7376_v48, %v6793_v55  ;;  %v2799_v28 = vpop.f32.mrf.mxu0  ;;  %v2833_v17 = vpop.f32.mrf.mxu2 }
 0x143   : > { %v2800_v16 = vadd.f32 %v2799_v28, %v10008_v59  ;;  %v2834_v61 = vadd.f32 %v2833_v17, %v2816_v51  ;;  %v7057_v59 = vld [vmem:[%s11481_s1 + $0x690] sm:$0xf]  ;;  %v7412_v28 = vld [vmem:[%s11481_s1 + $0x5a8] sm:$0xf0] }
 0x144   : > { %4558 = vmatpush.bf16.msrb.mxu2 %v6710_v63  ;;  %4541 = vmatpush.bf16.msrb.mxu1 %v6602_v30  ;;  %v7058_v51 = vor.u32 %v7442_v45, %v7057_v59  ;;  %v7154_v63 = vor.u32 %v7466_v44, %v7153_v52  ;;  %v6938_v8 = vor.u32 %v7412_v28, %v6937_v58  ;;  %v7117_v45 = vld [vmem:[%s11481_s1 + $0x708] sm:$0xf]  ;;  %v7457_v52 = vld [vmem:[%s11481_s1 + $0x710] sm:$0xf0]  ;;  %v6997_v58 = vld [vmem:[%s11481_s1 + $0x618] sm:$0xf] }
 0x145   : > { %4575 = vmatpush.bf16.msrb.mxu3 %v6818_v23  ;;  %4588 = vmatpush.bf16.msra.mxu0 %v6974_v27  ;;  %v2818_v23 = vadd.f32 %v2817_v10, %v2800_v16  ;;  %v7201_v16 = vld [vmem:[%s11481_s1 + $0x7b0] sm:$0xf]  ;;  %v7478_v10 = vld [vmem:[%s11481_s1 + $0x7b8] sm:$0xf0]  ;;  %v7427_v28 = vld [vmem:[%s11481_s1 + $0x620] sm:$0xf0] }
 0x146   : > { %v2851_v19 = vpop.f32.mrf.mxu3  ;;  %4475 = vmatmul.bf16.gmra.mxu1 %v8145_v4 }
 0x147   : > { %v10159_v38 = vadd.f32 %v2851_v19, %v2834_v61  ;;  %6214 = vmatmul.msk.bf16.gmra.mxu0 %vm2493_vm1, %v8936_v32  ;;  %v7436_v32 = vld [vmem:[%s11481_s1 + $0x668] sm:$0xf0]  ;;  %v7130_v61 = vor.u32 %v7460_v60, %v7129_v5 }
 0x148   : > { %4559 = vmatpush.bf16.msrb.mxu2 %v6698_v34  ;;  %4606 = vmatpush.bf16.msra.mxu1 %v7070_v42  ;;  %v2820_v48 = vpop.f32.mrf.mxu1  ;;  %v7046_v34 = vor.u32 %v7439_v11, %v7045_v41 }
 0x149   : > { %4576 = vmatpush.bf16.msrb.mxu3 %v6806_v47  ;;  %v6949_v47 = vld [vmem:[%s11481_s1 + $0x5b8] sm:$0xf]  ;;  %4589 = vmatpush.bf16.msra.mxu0 %v6962_v50  ;;  %v7433_v50 = vld [vmem:[%s11481_s1 + $0x650] sm:$0xf0] }
 0x14a   : > { %v6950_v18 = vor.u32 %v7415_v14, %v6949_v47  ;;  %v2802_v2 = vpop.f32.mrf.mxu0  ;;  %v2835_v30 = vpop.f32.mrf.mxu2  ;;  %4493 = vmatmul.bf16.gmra.mxu2 %v8149_v7  ;;  %4511 = vmatmul.bf16.gmra.mxu3 %v8165_v21  ;;  %v7022_v24 = vor.u32 %v7433_v50, %v7021_v46  ;;  %v6913_v47 = vld [vmem:[%s11481_s1 + $0x570] sm:$0xf]  ;;  %v7424_v50 = vld [vmem:[%s11481_s1 + $0x608] sm:$0xf0] }
 0x14b   : > { %v2803_v55 = vadd.f32 %v2802_v2, %v10060_v15  ;;  %v2836_v0 = vadd.f32 %v2835_v30, %v2818_v23  ;;  %v7033_v15 = vld [vmem:[%s11481_s1 + $0x660] sm:$0xf]  ;;  %v6925_v23 = vld [vmem:[%s11481_s1 + $0x588] sm:$0xf]  ;;  %v7009_v14 = vld [vmem:[%s11481_s1 + $0x630] sm:$0xf] }
 0x14c   : > { %4624 = vmatpush.bf16.msra.mxu2 %v7166_v33  ;;  %4607 = vmatpush.bf16.msra.mxu1 %v7058_v51  ;;  %v7034_v42 = vor.u32 %v7436_v32, %v7033_v15  ;;  %v7202_v33 = vor.u32 %v7478_v10, %v7201_v16  ;;  %v6926_v19 = vor.u32 %v7409_v39, %v6925_v23  ;;  %v7189_v30 = vld [vmem:[%s11481_s1 + $0x798] sm:$0xf]  ;;  %v7451_v32 = vld [vmem:[%s11481_s1 + $0x6e0] sm:$0xf0]  ;;  %v7400_v23 = vld [vmem:[%s11481_s1 + $0x548] sm:$0xf0] }
 0x14d   : > { %4577 = vmatpush.bf16.msrb.mxu3 %v6794_v43  ;;  %v7142_v43 = vor.u32 %v7463_v36, %v7141_v57  ;;  %4590 = vmatpush.bf16.msra.mxu0 %v6950_v18  ;;  %v2821_v40 = vadd.f32 %v2820_v48, %v2803_v55  ;;  %v7430_v18 = vld [vmem:[%s11481_s1 + $0x638] sm:$0xf0]  ;;  %v7105_v57 = vld [vmem:[%s11481_s1 + $0x6f0] sm:$0xf]  ;;  %v7475_v55 = vld [vmem:[%s11481_s1 + $0x7a0] sm:$0xf0]  ;;  %v6998_v10 = vor.u32 %v7427_v28, %v6997_v58 }
 0x14e   : > { %v2853_v27 = vpop.f32.mrf.mxu3  ;;  %v7454_v36 = vld [vmem:[%s11481_s1 + $0x6f8] sm:$0xf0]  ;;  %v7010_v48 = vor.u32 %v7430_v18, %v7009_v14  ;;  %v6495_v18 = vld [vmem:[%s11481_s1 + $0x234] sm:$0xf0]  ;;  %v6291_v58 = vld [vmem:[%s11481_s1 + $0x9c] sm:$0xf0] }
 0x14f   : > { %v10207_v17 = vadd.f32 %v2853_v27, %v2836_v0  ;;  %v7106_v0 = vor.u32 %v7454_v36, %v7105_v57  ;;  %v7273_v28 = vld [vmem:[%s11481_s1 + $0x154] sm:$0xf] }
 0x150   : > { %4625 = vmatpush.bf16.msra.mxu2 %v7154_v63  ;;  %4608 = vmatpush.bf16.msra.mxu1 %v7046_v34  ;;  %v2822_v6 = vpop.f32.mrf.mxu1  ;;  %v7118_v63 = vor.u32 %v7457_v52, %v7117_v45  ;;  %v6901_v34 = vld [vmem:[%s11481_s1 + $0x558] sm:$0xf] }
 0x151   : > { %4646 = vmatpush.bf16.msra.mxu3 %v7214_v9  ;;  %4591 = vmatpush.bf16.msra.mxu0 %v6938_v8  ;;  %v7406_v9 = vld [vmem:[%s11481_s1 + $0x578] sm:$0xf0]  ;;  %v7093_v8 = vld [vmem:[%s11481_s1 + $0x6d8] sm:$0xf]  ;;  %v7448_v6 = vld [vmem:[%s11481_s1 + $0x6c8] sm:$0xf0] }
 0x152   : > { %v2804_v59 = vpop.f32.mrf.mxu0  ;;  %v2838_v44 = vpop.f32.mrf.mxu2  ;;  %v6914_v11 = vor.u32 %v7406_v9, %v6913_v47  ;;  %v7276_v47 = vld [vmem:[%s11481_s1 + $0x16c] sm:$0xf] }
 0x153   : > { %v2839_v51 = vadd.f32 %v2838_v44, %v2821_v40  ;;  %v7403_v40 = vld [vmem:[%s11481_s1 + $0x560] sm:$0xf0]  ;;  %v7472_v59 = vld [vmem:[%s11481_s1 + $0x788] sm:$0xf0]  ;;  %v7081_v44 = vld [vmem:[%s11481_s1 + $0x6c0] sm:$0xf] }
 0x154   : > { %4626 = vmatpush.bf16.msra.mxu2 %v7142_v43  ;;  %4609 = vmatpush.bf16.msra.mxu1 %v7034_v42  ;;  %v7190_v43 = vor.u32 %v7475_v55, %v7189_v30  ;;  %v6902_v15 = vor.u32 %v7403_v40, %v6901_v34  ;;  %v7324_v34 = vld [vmem:[%s11481_s1 + $0x2ec] sm:$0xf] }
 0x155   : > { %4647 = vmatpush.bf16.msra.mxu3 %v7202_v33  ;;  %4592 = vmatpush.bf16.msra.mxu0 %v6926_v19  ;;  %v7094_v33 = vor.u32 %v7451_v32, %v7093_v8  ;;  %v6985_v19 = vld [vmem:[%s11481_s1 + $0x600] sm:$0xf]  ;;  %v7297_v32 = vld [vmem:[%s11481_s1 + $0x214] sm:$0xf] }
 0x156   : > { %v2856_v41 = vpop.f32.mrf.mxu3  ;;  %4542 = vmatmul.bf16.vlgmr.msrb.gmra.mxu1 %v8399_v3  ;;  %v6986_v52 = vor.u32 %v7424_v50, %v6985_v19  ;;  %v6387_v8 = vld [vmem:[%s11481_s1 + $0x15c] sm:$0xf0] }
 0x157   : > { %v10253_v2 = vadd.f32 %v2856_v41, %v2839_v51  ;;  %4524 = vmatmul.bf16.vlgmr.msrb.gmra.mxu0 %v8179_v29  ;;  %v7252_v51 = vld [vmem:[%s11481_s1 + $0xac] sm:$0xf]  ;;  %v6399_v41 = vld [vmem:[%s11481_s1 + $0x174] sm:$0xf0] }
 0x158   : > { %4627 = vmatpush.bf16.msra.mxu2 %v7130_v61  ;;  %4610 = vmatpush.bf16.msra.mxu1 %v7022_v24  ;;  %v2887_v16 = vpop.f32.mrf.mxu1  ;;  %v6889_v61 = vld [vmem:[%s11481_s1 + $0x540] sm:$0xf]  ;;  %v7082_v24 = vor.u32 %v7448_v6, %v7081_v44  ;;  %v6402_v55 = vor.u32 %v7276_v47, %v6399_v41  ;;  %v7318_v44 = vld [vmem:[%s11481_s1 + $0x2bc] sm:$0xf] }
 0x159   : > { %4593 = vmatpush.bf16.msra.mxu0 %v6914_v11  ;;  %4648 = vmatpush.bf16.msra.mxu3 %v7190_v43  ;;  %v6890_v46 = vor.u32 %v7400_v23, %v6889_v61  ;;  %v7300_v11 = vld [vmem:[%s11481_s1 + $0x22c] sm:$0xf]  ;;  %v6591_v43 = vld [vmem:[%s11481_s1 + $0x2f4] sm:$0xf0]  ;;  %v6579_v61 = vld [vmem:[%s11481_s1 + $0x2dc] sm:$0xf0] }
 0x15a   : > { %v2869_v27 = vpop.f32.mrf.mxu0  ;;  %v2840_v5 = vpop.f32.mrf.mxu2  ;;  %4560 = vmatmul.bf16.vlgmr.msrb.gmra.mxu2 %v8406_v13  ;;  %4578 = vmatmul.bf16.vlgmr.msrb.gmra.mxu3 %v8415_v20  ;;  %v7246_v23 = vld [vmem:[%s11481_s1 + $0x7c] sm:$0xf] }
 0x15b   : > { %v2870_v60 = vadd.f32 %v2869_v27, %v10159_v38  ;;  %v7177_v38 = vld [vmem:[%s11481_s1 + $0x780] sm:$0xf] }
 0x15c   : > { %4628 = vmatpush.bf16.msra.mxu2 %v7118_v63  ;;  %4611 = vmatpush.bf16.msra.mxu1 %v7010_v48  ;;  %v7178_v45 = vor.u32 %v7472_v59, %v7177_v38  ;;  %v6303_v63 = vld [vmem:[%s11481_s1 + $0xb4] sm:$0xf0]  ;;  %v6498_v48 = vor.u32 %v7300_v11, %v6495_v18  ;;  %v6483_v5 = vld [vmem:[%s11481_s1 + $0x21c] sm:$0xf0]  ;;  %v6375_v59 = vld [vmem:[%s11481_s1 + $0x144] sm:$0xf0] }
 0x15d   : > { %4594 = vmatpush.bf16.msra.mxu0 %v6902_v15  ;;  %v10280_v42 = vadd.f32 %v2887_v16, %v2870_v60  ;;  %v6306_v14 = vor.u32 %v7252_v51, %v6303_v63  ;;  %v6390_v16 = vor.u32 %v7273_v28, %v6387_v8  ;;  %v6567_v51 = vld [vmem:[%s11481_s1 + $0x2c4] sm:$0xf0]  ;;  %v7243_v11 = vld [vmem:[%s11481_s1 + $0x64] sm:$0xf]  ;;  %v6267_v18 = vld [vmem:[%s11481_s1 + $0x6c] sm:$0xf0] }
 0x15e   : > { %v2858_v39 = vpop.f32.mrf.mxu3  ;;  %4649 = vmatpush.bf16.msra.mxu3 %v7178_v45  ;;  %v7294_v45 = vld [vmem:[%s11481_s1 + $0x1fc] sm:$0xf]  ;;  %v7264_v8 = vld [vmem:[%s11481_s1 + $0x10c] sm:$0xf] }
 0x15f   : > { %v6279_v39 = vld [vmem:[%s11481_s1 + $0x84] sm:$0xf0] }
 0x160   : > { %4629 = vmatpush.bf16.msra.mxu2 %v7106_v0  ;;  %4612 = vmatpush.bf16.msra.mxu1 %v6998_v10  ;;  %v2889_v30 = vpop.f32.mrf.mxu1  ;;  %v6594_v0 = vor.u32 %v7324_v34, %v6591_v43  ;;  %v6486_v10 = vor.u32 %v7297_v32, %v6483_v5  ;;  %v6282_v19 = vor.u32 %v7246_v23, %v6279_v39 }
 0x161   : > { %4595 = vmatpush.bf16.msra.mxu0 %v6890_v46  ;;  %v7270_v46 = vld [vmem:[%s11481_s1 + $0x13c] sm:$0xf] }
 0x162   : > { %v2871_v9 = vpop.f32.mrf.mxu0  ;;  %v2905_v57 = vpop.f32.mrf.mxu2  ;;  %4714 = vmatpush.bf16.msrb.mxu3 %v6594_v0  ;;  %v6378_v50 = vor.u32 %v7270_v46, %v6375_v59  ;;  %v7312_v46 = vld [vmem:[%s11481_s1 + $0x28c] sm:$0xf]  ;;  %v6543_v59 = vld [vmem:[%s11481_s1 + $0x294] sm:$0xf0] }
 0x163   : > { %v2872_v36 = vadd.f32 %v2871_v9, %v10207_v17  ;;  %v7249_v17 = vld [vmem:[%s11481_s1 + $0x94] sm:$0xf] }
 0x164   : > { %4630 = vmatpush.bf16.msra.mxu2 %v7094_v33  ;;  %4613 = vmatpush.bf16.msra.mxu1 %v6986_v52  ;;  %v6294_v27 = vor.u32 %v7249_v17, %v6291_v58  ;;  %v7321_v33 = vld [vmem:[%s11481_s1 + $0x2d4] sm:$0xf]  ;;  %v6471_v52 = vld [vmem:[%s11481_s1 + $0x204] sm:$0xf0]  ;;  %v7315_v17 = vld [vmem:[%s11481_s1 + $0x2a4] sm:$0xf] }
 0x165   : > { %4660 = vmatpush.bf16.msrb.mxu0 %v6306_v14  ;;  %v10335_v40 = vadd.f32 %v2889_v30, %v2872_v36  ;;  %v6582_v38 = vor.u32 %v7321_v33, %v6579_v61  ;;  %v6570_v14 = vor.u32 %v7318_v44, %v6567_v51  ;;  %v6270_v36 = vor.u32 %v7243_v11, %v6267_v18  ;;  %v6363_v30 = vld [vmem:[%s11481_s1 + $0x12c] sm:$0xf0]  ;;  %v6447_v33 = vld [vmem:[%s11481_s1 + $0x1d4] sm:$0xf0]  ;;  %v7285_v51 = vld [vmem:[%s11481_s1 + $0x1b4] sm:$0xf] }
 0x166   : > { %v2923_v15 = vpop.f32.mrf.mxu3  ;;  %4547 = vmatmul.bf16.gmra.mxu1 %v8425_v25  ;;  %v6555_v58 = vld [vmem:[%s11481_s1 + $0x2ac] sm:$0xf0]  ;;  %v7309_v11 = vld [vmem:[%s11481_s1 + $0x274] sm:$0xf]  ;;  %v6531_v18 = vld [vmem:[%s11481_s1 + $0x27c] sm:$0xf0] }
 0x167   : > { %v10355_v60 = vadd.f32 %v2923_v15, %v2905_v57  ;;  %4715 = vmatpush.bf16.msrb.mxu3 %v6582_v38  ;;  %4529 = vmatmul.bf16.gmra.mxu0 %v8188_v35  ;;  %v6558_v28 = vor.u32 %v7315_v17, %v6555_v58  ;;  %v7240_v15 = vld [vmem:[%s11481_s1 + $0x4c] sm:$0xf]  ;;  %v6423_v17 = vld [vmem:[%s11481_s1 + $0x1a4] sm:$0xf0]  ;;  %v7306_v58 = vld [vmem:[%s11481_s1 + $0x25c] sm:$0xf] }
 0x168   : > { %4631 = vmatpush.bf16.msra.mxu2 %v7082_v24  ;;  %4678 = vmatpush.bf16.msrb.mxu1 %v6402_v55  ;;  %v6474_v24 = vor.u32 %v7294_v45, %v6471_v52  ;;  %v2892_v9 = vpop.f32.mrf.mxu1  ;;  %v7291_v55 = vld [vmem:[%s11481_s1 + $0x1e4] sm:$0xf]  ;;  %v6243_v45 = vld [vmem:[%s11481_s1 + $0x3c] sm:$0xf0]  ;;  %v7261_v52 = vld [vmem:[%s11481_s1 + $0xf4] sm:$0xf] }
 0x169   : > { %4661 = vmatpush.bf16.msrb.mxu0 %v6294_v27  ;;  %v6255_v27 = vld [vmem:[%s11481_s1 + $0x54] sm:$0xf0] }
 0x16a   : > { %v2874_v6 = vpop.f32.mrf.mxu0  ;;  %v2907_v63 = vpop.f32.mrf.mxu2  ;;  %4565 = vmatmul.bf16.gmra.mxu2 %v8427_v26  ;;  %v6258_v5 = vor.u32 %v7240_v15, %v6255_v27  ;;  %4583 = vmatmul.bf16.gmra.mxu3 %v8437_v37  ;;  %v6519_v27 = vld [vmem:[%s11481_s1 + $0x264] sm:$0xf0] }
 0x16b   : > { %v2875_v47 = vadd.f32 %v2874_v6, %v10253_v2  ;;  %v7267_v2 = vld [vmem:[%s11481_s1 + $0x124] sm:$0xf]  ;;  %4716 = vmatpush.bf16.msrb.mxu3 %v6570_v14 }
 0x16c   : > { %4696 = vmatpush.bf16.msrb.mxu2 %v6498_v48  ;;  %4679 = vmatpush.bf16.msrb.mxu1 %v6390_v16  ;;  %v6459_v48 = vld [vmem:[%s11481_s1 + $0x1ec] sm:$0xf0]  ;;  %v6366_v43 = vor.u32 %v7267_v2, %v6363_v30  ;;  %v6351_v16 = vld [vmem:[%s11481_s1 + $0x114] sm:$0xf0]  ;;  %v7234_v2 = vld [vmem:[%s11481_s1 + $0x1c] sm:$0xf] }
 0x16d   : > { %4662 = vmatpush.bf16.msrb.mxu0 %v6282_v19  ;;  %v10388_v41 = vadd.f32 %v2892_v9, %v2875_v47  ;;  %v6462_v0 = vor.u32 %v7291_v55, %v6459_v48  ;;  %v6354_v38 = vor.u32 %v7264_v8, %v6351_v16  ;;  %v6546_v19 = vor.u32 %v7312_v46, %v6543_v59  ;;  %v7258_v30 = vld [vmem:[%s11481_s1 + $0xdc] sm:$0xf]  ;;  %v6327_v55 = vld [vmem:[%s11481_s1 + $0xe4] sm:$0xf0]  ;;  %v7279_v46 = vld [vmem:[%s11481_s1 + $0x184] sm:$0xf] }
 0x16e   : > { %v2925_v57 = vpop.f32.mrf.mxu3  ;;  %v6522_v16 = vor.u32 %v7306_v58, %v6519_v27  ;;  %v6411_v59 = vld [vmem:[%s11481_s1 + $0x18c] sm:$0xf0]  ;;  %v7369_v27 = vld [vmem:[%s11481_s1 + $0x454] sm:$0xf] }
 0x16f   : > { %v10410_v34 = vadd.f32 %v2925_v57, %v2907_v63  ;;  %4717 = vmatpush.bf16.msrb.mxu3 %v6558_v28  ;;  %v6435_v63 = vld [vmem:[%s11481_s1 + $0x1bc] sm:$0xf0]  ;;  %v6534_v57 = vor.u32 %v7309_v11, %v6531_v18  ;;  %v7396_v11 = vld [vmem:[%s11481_s1 + $0x52c] sm:$0xf]  ;;  %v6879_v18 = vld [vmem:[%s11481_s1 + $0x534] sm:$0xf0] }
 0x170   : > { %4697 = vmatpush.bf16.msrb.mxu2 %v6486_v10  ;;  %4680 = vmatpush.bf16.msrb.mxu1 %v6378_v50  ;;  %v7288_v10 = vld [vmem:[%s11481_s1 + $0x1cc] sm:$0xf]  ;;  %v2894_v23 = vpop.f32.mrf.mxu1  ;;  %v7237_v50 = vld [vmem:[%s11481_s1 + $0x34] sm:$0xf]  ;;  %v6438_v14 = vor.u32 %v7285_v51, %v6435_v63 }
 0x171   : > { %4663 = vmatpush.bf16.msrb.mxu0 %v6270_v36  ;;  %v6450_v39 = vor.u32 %v7288_v10, %v6447_v33  ;;  %v6246_v6 = vor.u32 %v7237_v50, %v6243_v45  ;;  %v6231_v36 = vld [vmem:[%s11481_s1 + $0x24] sm:$0xf0]  ;;  %v7231_v33 = vld [vmem:[%s11481_s1 + $0x4] sm:$0xf]  ;;  %v6414_v50 = vor.u32 %v7279_v46, %v6411_v59  ;;  %v7372_v51 = vld [vmem:[%s11481_s1 + $0x46c] sm:$0xf] }
 0x172   : > { %v2876_v32 = vpop.f32.mrf.mxu0  ;;  %v2910_v61 = vpop.f32.mrf.mxu2  ;;  %v6234_v48 = vor.u32 %v7234_v2, %v6231_v36  ;;  %v7303_v45 = vld [vmem:[%s11481_s1 + $0x244] sm:$0xf]  ;;  %v11500_v2 = vld [vmem:[#allocation4_spill] sm:$0xff]  ;;  %v6663_v59 = vld [vmem:[%s11481_s1 + $0x384] sm:$0xf0] }
 0x173   : > { %4718 = vmatpush.bf16.msrb.mxu3 %v6546_v19 }
 0x174   : > { %4698 = vmatpush.bf16.msrb.mxu2 %v6474_v24  ;;  %4681 = vmatpush.bf16.msrb.mxu1 %v6366_v43  ;;  %v6339_v24 = vld [vmem:[%s11481_s1 + $0xfc] sm:$0xf0]  ;;  %v6330_v43 = vor.u32 %v7258_v30, %v6327_v55 }
 0x175   : > { %4664 = vmatpush.bf16.msrb.mxu0 %v6258_v5  ;;  %v6342_v9 = vor.u32 %v7261_v52, %v6339_v24  ;;  %v6507_v52 = vld [vmem:[%s11481_s1 + $0x24c] sm:$0xf0]  ;;  %v6687_v24 = vld [vmem:[%s11481_s1 + $0x3b4] sm:$0xf0] }
 0x176   : > { %v2928_v44 = vpop.f32.mrf.mxu3  ;;  %4614 = vmatmul.bf16.vlgmr.msra.gmra.mxu1 %v8632_v31 }
 0x177   : > { %v10462_v47 = vadd.f32 %v2928_v44, %v2910_v61  ;;  %4719 = vmatpush.bf16.msrb.mxu3 %v6534_v57  ;;  %4596 = vmatmul.bf16.vlgmr.msra.gmra.mxu0 %v8452_v54  ;;  %v6219_v61 = vld [vmem:[%s11481_s1 + $0xc] sm:$0xf0]  ;;  %v6510_v44 = vor.u32 %v7303_v45, %v6507_v52 }
 0x178   : > { %4699 = vmatpush.bf16.msrb.mxu2 %v6462_v0  ;;  %4682 = vmatpush.bf16.msrb.mxu1 %v6354_v38  ;;  %v7282_v0 = vld [vmem:[%s11481_s1 + $0x19c] sm:$0xf]  ;;  %v2959_v5 = vpop.f32.mrf.mxu1  ;;  %v6222_v38 = vor.u32 %v7231_v33, %v6219_v61 }
 0x179   : > { %4665 = vmatpush.bf16.msrb.mxu0 %v6246_v6  ;;  %v6426_v15 = vor.u32 %v7282_v0, %v6423_v17  ;;  %v7348_v6 = vld [vmem:[%s11481_s1 + $0x3ac] sm:$0xf]  ;;  %v6975_v0 = vld [vmem:[%s11481_s1 + $0x5f4] sm:$0xf0] }
 0x17a   : > { %v2941_v28 = vpop.f32.mrf.mxu0  ;;  %v2912_v8 = vpop.f32.mrf.mxu2  ;;  %4632 = vmatmul.bf16.vlgmr.msra.gmra.mxu2 %v8652_v53  ;;  %7223 = vmatmul.msk.bf16.vlgmr.msra.gmra.mxu3 %vm2493_vm1, %v11500_v2 }
 0x17b   : > { %v2942_v32 = vadd.f32 %v2941_v28, %v10355_v60  ;;  %v7255_v60 = vld [vmem:[%s11481_s1 + $0xc4] sm:$0xf]  ;;  %4720 = vmatpush.bf16.msrb.mxu3 %v6522_v16  ;;  %v7393_v16 = vld [vmem:[%s11481_s1 + $0x514] sm:$0xf] }
 0x17c   : > { %4700 = vmatpush.bf16.msrb.mxu2 %v6450_v39  ;;  %4683 = vmatpush.bf16.msrb.mxu1 %v6342_v9  ;;  %v6315_v39 = vld [vmem:[%s11481_s1 + $0xcc] sm:$0xf0]  ;;  %v6690_v9 = vor.u32 %v7348_v6, %v6687_v24  ;;  %v6855_v6 = vld [vmem:[%s11481_s1 + $0x504] sm:$0xf0]  ;;  %v7414_v24 = vld [vmem:[%s11481_s1 + $0x5bc] sm:$0xf] }
 0x17d   : > { %4666 = vmatpush.bf16.msrb.mxu0 %v6234_v48  ;;  %v2960_v10 = vadd.f32 %v2959_v5, %v2942_v32  ;;  %v6318_v19 = vor.u32 %v7255_v60, %v6315_v39  ;;  %v6882_v48 = vor.u32 %v7396_v11, %v6879_v18  ;;  %v6771_v5 = vld [vmem:[%s11481_s1 + $0x45c] sm:$0xf0]  ;;  %v7342_v39 = vld [vmem:[%s11481_s1 + $0x37c] sm:$0xf] }
 0x17e   : > { %v2930_v23 = vpop.f32.mrf.mxu3  ;;  %v6774_v61 = vor.u32 %v7369_v27, %v6771_v5  ;;  %v6666_v45 = vor.u32 %v7342_v39, %v6663_v59  ;;  %v7411_v5 = vld [vmem:[%s11481_s1 + $0x5a4] sm:$0xf]  ;;  %v6735_v59 = vld [vmem:[%s11481_s1 + $0x414] sm:$0xf0] }
 0x17f   : > { %4721 = vmatpush.bf16.msrb.mxu3 %v6510_v44  ;;  %v7417_v23 = vld [vmem:[%s11481_s1 + $0x5d4] sm:$0xf]  ;;  %v7390_v44 = vld [vmem:[%s11481_s1 + $0x4fc] sm:$0xf] }
 0x180   : > { %4701 = vmatpush.bf16.msrb.mxu2 %v6438_v14  ;;  %4684 = vmatpush.bf16.msrb.mxu1 %v6330_v43  ;;  %v6783_v14 = vld [vmem:[%s11481_s1 + $0x474] sm:$0xf0]  ;;  %v2961_v30 = vpop.f32.mrf.mxu1  ;;  %v7420_v43 = vld [vmem:[%s11481_s1 + $0x5ec] sm:$0xf] }
 0x181   : > { %4667 = vmatpush.bf16.msrb.mxu0 %v6222_v38  ;;  %v6786_v55 = vor.u32 %v7372_v51, %v6783_v14  ;;  %v6978_v58 = vor.u32 %v7420_v43, %v6975_v0  ;;  %v6963_v38 = vld [vmem:[%s11481_s1 + $0x5dc] sm:$0xf0]  ;;  %v6651_v43 = vld [vmem:[%s11481_s1 + $0x36c] sm:$0xf0] }
 0x182   : > { %v2943_v63 = vpop.f32.mrf.mxu0  ;;  %v2977_v57 = vpop.f32.mrf.mxu2  ;;  %v6966_v46 = vor.u32 %v7417_v23, %v6963_v38  ;;  %v6639_v23 = vld [vmem:[%s11481_s1 + $0x354] sm:$0xf0]  ;;  %v7360_v38 = vld [vmem:[%s11481_s1 + $0x40c] sm:$0xf] }
 0x183   : > { %v2944_v36 = vadd.f32 %v2943_v63, %v10410_v34  ;;  %v2978_v17 = vadd.f32 %v2977_v57, %v2960_v10  ;;  %v7345_v34 = vld [vmem:[%s11481_s1 + $0x394] sm:$0xf]  ;;  %4786 = vmatpush.bf16.msra.mxu3 %v6978_v58  ;;  %v6867_v10 = vld [vmem:[%s11481_s1 + $0x51c] sm:$0xf0]  ;;  %v6858_v63 = vor.u32 %v7390_v44, %v6855_v6  ;;  %v6738_v6 = vor.u32 %v7360_v38, %v6735_v59  ;;  %v7378_v38 = vld [vmem:[%s11481_s1 + $0x49c] sm:$0xf] }
 0x184   : > { %4702 = vmatpush.bf16.msrb.mxu2 %v6426_v15  ;;  %4685 = vmatpush.bf16.msrb.mxu1 %v6318_v19  ;;  %v6675_v15 = vld [vmem:[%s11481_s1 + $0x39c] sm:$0xf0]  ;;  %v6870_v60 = vor.u32 %v7393_v16, %v6867_v10  ;;  %v7366_v19 = vld [vmem:[%s11481_s1 + $0x43c] sm:$0xf]  ;;  %v6939_v16 = vld [vmem:[%s11481_s1 + $0x5ac] sm:$0xf0] }
 0x185   : > { %4732 = vmatpush.bf16.msra.mxu0 %v6690_v9  ;;  %v2962_v28 = vadd.f32 %v2961_v30, %v2944_v36  ;;  %v6678_v32 = vor.u32 %v7345_v34, %v6675_v15  ;;  %v6951_v9 = vld [vmem:[%s11481_s1 + $0x5c4] sm:$0xf0]  ;;  %v7387_v34 = vld [vmem:[%s11481_s1 + $0x4e4] sm:$0xf]  ;;  %v6843_v15 = vld [vmem:[%s11481_s1 + $0x4ec] sm:$0xf0] }
 0x186   : > { %v2995_v8 = vpop.f32.mrf.mxu3  ;;  %v6954_v57 = vor.u32 %v7414_v24, %v6951_v9  ;;  %v11503_v10 = vld [vmem:[#allocation5_spill] sm:$0xff] }
 0x187   : > { %v10567_v33 = vadd.f32 %v2995_v8, %v2978_v17  ;;  %4787 = vmatpush.bf16.msra.mxu3 %v6966_v46  ;;  %v11502_v17 = vld [vmem:[#allocation3_spill] sm:$0xff] }
 0x188   : > { %4703 = vmatpush.bf16.msrb.mxu2 %v6414_v50  ;;  %4750 = vmatpush.bf16.msra.mxu1 %v6786_v55  ;;  %v6759_v50 = vld [vmem:[%s11481_s1 + $0x444] sm:$0xf0]  ;;  %v2964_v18 = vpop.f32.mrf.mxu1  ;;  %v11501_v55 = vld [vmem:[#allocation2_spill] sm:$0xff] }
 0x189   : > { %4733 = vmatpush.bf16.msra.mxu0 %v6678_v32  ;;  %v6762_v52 = vor.u32 %v7366_v19, %v6759_v50  ;;  %4619 = vmatmul.bf16.gmra.mxu1 %v11502_v17  ;;  %v6846_v32 = vor.u32 %v7387_v34, %v6843_v15  ;;  %v7384_v19 = vld [vmem:[%s11481_s1 + $0x4cc] sm:$0xf]  ;;  %v6831_v50 = vld [vmem:[%s11481_s1 + $0x4d4] sm:$0xf0]  ;;  %v7405_v34 = vld [vmem:[%s11481_s1 + $0x574] sm:$0xf] }
 0x18a   : > { %v2946_v51 = vpop.f32.mrf.mxu0  ;;  %v2979_v14 = vpop.f32.mrf.mxu2  ;;  %4601 = vmatmul.bf16.gmra.mxu0 %v11501_v55  ;;  %4637 = vmatmul.bf16.gmra.mxu2 %v11503_v10  ;;  %v6834_v24 = vor.u32 %v7384_v19, %v6831_v50  ;;  %v6915_v15 = vld [vmem:[%s11481_s1 + $0x57c] sm:$0xf0]  ;;  %v6903_v50 = vld [vmem:[%s11481_s1 + $0x564] sm:$0xf0] }
 0x18b   : > { %v2947_v11 = vadd.f32 %v2946_v51, %v10462_v47  ;;  %v2980_v36 = vadd.f32 %v2979_v14, %v2962_v28  ;;  %v7363_v47 = vld [vmem:[%s11481_s1 + $0x424] sm:$0xf]  ;;  %v6747_v28 = vld [vmem:[%s11481_s1 + $0x42c] sm:$0xf0]  ;;  %4788 = vmatpush.bf16.msra.mxu3 %v6954_v57  ;;  %v7408_v51 = vld [vmem:[%s11481_s1 + $0x58c] sm:$0xf] }
 0x18c   : > { %4768 = vmatpush.bf16.msra.mxu2 %v6882_v48  ;;  %4751 = vmatpush.bf16.msra.mxu1 %v6774_v61  ;;  %v7339_v48 = vld [vmem:[%s11481_s1 + $0x364] sm:$0xf]  ;;  %v6750_v8 = vor.u32 %v7363_v47, %v6747_v28  ;;  %v6942_v61 = vor.u32 %v7411_v5, %v6939_v16  ;;  %v7357_v57 = vld [vmem:[%s11481_s1 + $0x3f4] sm:$0xf]  ;;  %v6819_v47 = vld [vmem:[%s11481_s1 + $0x4bc] sm:$0xf0] }
 0x18d   : > { %4734 = vmatpush.bf16.msra.mxu0 %v6666_v45  ;;  %v2965_v30 = vadd.f32 %v2964_v18, %v2947_v11  ;;  %v6654_v58 = vor.u32 %v7339_v48, %v6651_v43  ;;  %v11504_v45 = vld [vmem:[#allocation6_spill] sm:$0xff]  ;;  %v7333_v11 = vld [vmem:[%s11481_s1 + $0x334] sm:$0xf]  ;;  %v6615_v5 = vld [vmem:[%s11481_s1 + $0x324] sm:$0xf0] }
 0x18e   : > { %v2997_v0 = vpop.f32.mrf.mxu3  ;;  %7224 = vmatmul.msk.bf16.gmra.mxu3 %vm2493_vm1, %v11504_v45  ;;  %v6627_v18 = vld [vmem:[%s11481_s1 + $0x33c] sm:$0xf0]  ;;  %v7381_v43 = vld [vmem:[%s11481_s1 + $0x4b4] sm:$0xf]  ;;  %v7354_v16 = vld [vmem:[%s11481_s1 + $0x3dc] sm:$0xf] }
 0x18f   : > { %v10620_v27 = vadd.f32 %v2997_v0, %v2980_v36  ;;  %4789 = vmatpush.bf16.msra.mxu3 %v6942_v61  ;;  %v6630_v48 = vor.u32 %v7333_v11, %v6627_v18  ;;  %v6822_v28 = vor.u32 %v7381_v43, %v6819_v47  ;;  %v6711_v61 = vld [vmem:[%s11481_s1 + $0x3e4] sm:$0xf0]  ;;  %v6699_v18 = vld [vmem:[%s11481_s1 + $0x3cc] sm:$0xf0]  ;;  %v7399_v43 = vld [vmem:[%s11481_s1 + $0x544] sm:$0xf] }
 0x190   : > { %4769 = vmatpush.bf16.msra.mxu2 %v6870_v60  ;;  %4752 = vmatpush.bf16.msra.mxu1 %v6762_v52  ;;  %v7336_v60 = vld [vmem:[%s11481_s1 + $0x34c] sm:$0xf]  ;;  %v2966_v44 = vpop.f32.mrf.mxu1  ;;  %v6891_v47 = vld [vmem:[%s11481_s1 + $0x54c] sm:$0xf0] }
 0x191   : > { %4735 = vmatpush.bf16.msra.mxu0 %v6654_v58  ;;  %v6642_v46 = vor.u32 %v7336_v60, %v6639_v23  ;;  %v6714_v23 = vor.u32 %v7354_v16, %v6711_v61  ;;  %v6309_v16 = vld [vmem:[%s11481_s1 + $0xb0] sm:$0xf]  ;;  %v7254_v61 = vld [vmem:[%s11481_s1 + $0xb8] sm:$0xf0] }
 0x192   : > { %v2948_v39 = vpop.f32.mrf.mxu0  ;;  %v2982_v52 = vpop.f32.mrf.mxu2 }
 0x193   : > { %v2983_v9 = vadd.f32 %v2982_v52, %v2965_v30  ;;  %v6723_v30 = vld [vmem:[%s11481_s1 + $0x3fc] sm:$0xf0]  ;;  %v6807_v39 = vld [vmem:[%s11481_s1 + $0x4a4] sm:$0xf0] }
 0x194   : > { %4770 = vmatpush.bf16.msra.mxu2 %v6858_v63  ;;  %4753 = vmatpush.bf16.msra.mxu1 %v6750_v8  ;;  %v6927_v63 = vld [vmem:[%s11481_s1 + $0x594] sm:$0xf0]  ;;  %v6726_v58 = vor.u32 %v7357_v57, %v6723_v30  ;;  %v7330_v8 = vld [vmem:[%s11481_s1 + $0x31c] sm:$0xf]  ;;  %v6810_v19 = vor.u32 %v7378_v38, %v6807_v39  ;;  %v7375_v57 = vld [vmem:[%s11481_s1 + $0x484] sm:$0xf] }
 0x195   : > { %4736 = vmatpush.bf16.msra.mxu0 %v6642_v46  ;;  %v6930_v14 = vor.u32 %v7408_v51, %v6927_v63  ;;  %v6618_v60 = vor.u32 %v7330_v8, %v6615_v5  ;;  %v7402_v46 = vld [vmem:[%s11481_s1 + $0x55c] sm:$0xf]  ;;  %v7327_v63 = vld [vmem:[%s11481_s1 + $0x304] sm:$0xf]  ;;  %v7167_v5 = vld [vmem:[%s11481_s1 + $0x774] sm:$0xf0] }
 0x196   : > { %v3000_v36 = vpop.f32.mrf.mxu3 }
 0x197   : > { %v10673_v0 = vadd.f32 %v3000_v36, %v2983_v9  ;;  %4790 = vmatpush.bf16.msra.mxu3 %v6930_v14  ;;  %v6603_v9 = vld [vmem:[%s11481_s1 + $0x30c] sm:$0xf0] }
 0x198   : > { %4771 = vmatpush.bf16.msra.mxu2 %v6846_v32  ;;  %4754 = vmatpush.bf16.msra.mxu1 %v6738_v6  ;;  %v6918_v32 = vor.u32 %v7405_v34, %v6915_v15  ;;  %v3031_v6 = vpop.f32.mrf.mxu1  ;;  %v6606_v11 = vor.u32 %v7327_v63, %v6603_v9  ;;  %v6795_v36 = vld [vmem:[%s11481_s1 + $0x48c] sm:$0xf0]  ;;  %v7071_v34 = vld [vmem:[%s11481_s1 + $0x6b4] sm:$0xf0]  ;;  %v7468_v15 = vld [vmem:[%s11481_s1 + $0x76c] sm:$0xf] }
 0x199   : > { %4737 = vmatpush.bf16.msra.mxu0 %v6630_v48  ;;  %4686 = vmatmul.bf16.vlgmr.msrb.gmra.mxu1 %v8135_v62  ;;  %v6798_v30 = vor.u32 %v7375_v57, %v6795_v36  ;;  %v7170_v39 = vor.u32 %v7468_v15, %v7167_v5  ;;  %v7155_v9 = vld [vmem:[%s11481_s1 + $0x75c] sm:$0xf0]  ;;  %v7438_v36 = vld [vmem:[%s11481_s1 + $0x67c] sm:$0xf]  ;;  %v7477_v15 = vld [vmem:[%s11481_s1 + $0x7b4] sm:$0xf] }
 0x19a   : > { %v3013_v59 = vpop.f32.mrf.mxu0  ;;  %v2984_v52 = vpop.f32.mrf.mxu2  ;;  %4668 = vmatmul.bf16.vlgmr.msrb.gmra.mxu0 %v8128_v56  ;;  %4704 = vmatmul.bf16.vlgmr.msrb.gmra.mxu2 %v8154_v12 }
 0x19b   : > { %v3014_v44 = vadd.f32 %v3013_v59, %v10567_v33  ;;  %4791 = vmatpush.bf16.msra.mxu3 %v6918_v32  ;;  %v7351_v33 = vld [vmem:[%s11481_s1 + $0x3c4] sm:$0xf]  ;;  %v7480_v59 = vld [vmem:[%s11481_s1 + $0x7cc] sm:$0xf] }
 0x19c   : > { %4772 = vmatpush.bf16.msra.mxu2 %v6834_v24  ;;  %4755 = vmatpush.bf16.msra.mxu1 %v6726_v58  ;;  %v6906_v24 = vor.u32 %v7402_v46, %v6903_v50  ;;  %v6702_v48 = vor.u32 %v7351_v33, %v6699_v18  ;;  %v6894_v58 = vor.u32 %v7399_v43, %v6891_v47  ;;  %v6297_v33 = vld [vmem:[%s11481_s1 + $0x98] sm:$0xf]  ;;  %v7143_v47 = vld [vmem:[%s11481_s1 + $0x744] sm:$0xf0] }
 0x19d   : > { %4738 = vmatpush.bf16.msra.mxu0 %v6618_v60  ;;  %v3032_v51 = vadd.f32 %v3031_v6, %v3014_v44  ;;  %v6310_v46 = vor.u32 %v7254_v61, %v6309_v16  ;;  %v7059_v6 = vld [vmem:[%s11481_s1 + $0x69c] sm:$0xf0] }
 0x19e   : > { %v3002_v14 = vpop.f32.mrf.mxu3  ;;  %4722 = vmatmul.bf16.vlgmr.msrb.gmra.mxu3 %v8179_v29 }
 0x19f   : > { %4792 = vmatpush.bf16.msra.mxu3 %v6906_v24  ;;  %v7465_v24 = vld [vmem:[%s11481_s1 + $0x754] sm:$0xf]  ;;  %v7251_v14 = vld [vmem:[%s11481_s1 + $0xa0] sm:$0xf0] }
 0x1a0   : > { %4773 = vmatpush.bf16.msra.mxu2 %v6822_v28  ;;  %4756 = vmatpush.bf16.msra.mxu1 %v6714_v23  ;;  %v7444_v28 = vld [vmem:[%s11481_s1 + $0x6ac] sm:$0xf]  ;;  %v3033_v38 = vpop.f32.mrf.mxu1  ;;  %v7158_v18 = vor.u32 %v7465_v24, %v7155_v9  ;;  %v6298_v57 = vor.u32 %v7251_v14, %v6297_v33  ;;  %v7023_v9 = vld [vmem:[%s11481_s1 + $0x654] sm:$0xf0] }
 0x1a1   : > { %4739 = vmatpush.bf16.msra.mxu0 %v6606_v11  ;;  %v7074_v32 = vor.u32 %v7444_v28, %v7071_v34  ;;  %v7248_v28 = vld [vmem:[%s11481_s1 + $0x88] sm:$0xf0] }
 0x1a2   : > { %v3015_v8 = vpop.f32.mrf.mxu0  ;;  %v3049_v60 = vpop.f32.mrf.mxu2  ;;  %v7456_v33 = vld [vmem:[%s11481_s1 + $0x70c] sm:$0xf] }
 0x1a3   : > { %v3016_v23 = vadd.f32 %v3015_v8, %v10620_v27  ;;  %v3050_v50 = vadd.f32 %v3049_v60, %v3032_v51  ;;  %4793 = vmatpush.bf16.msra.mxu3 %v6894_v58  ;;  %v7441_v27 = vld [vmem:[%s11481_s1 + $0x694] sm:$0xf]  ;;  %v6285_v58 = vld [vmem:[%s11481_s1 + $0x80] sm:$0xf] }
 0x1a4   : > { %4774 = vmatpush.bf16.msra.mxu2 %v6810_v19  ;;  %4757 = vmatpush.bf16.msra.mxu1 %v6702_v48  ;;  %v7215_v19 = vld [vmem:[%s11481_s1 + $0x7d4] sm:$0xf0]  ;;  %v7062_v51 = vor.u32 %v7441_v27, %v7059_v6  ;;  %v7047_v48 = vld [vmem:[%s11481_s1 + $0x684] sm:$0xf0]  ;;  %v7203_v8 = vld [vmem:[%s11481_s1 + $0x7bc] sm:$0xf0]  ;;  %v6286_v5 = vor.u32 %v7248_v28, %v6285_v58 }
 0x1a5   : > { %4804 = vmatpush.bf16.msrb.mxu0 %v7074_v32  ;;  %v7218_v52 = vor.u32 %v7480_v59, %v7215_v19  ;;  %v3034_v44 = vadd.f32 %v3033_v38, %v3016_v23  ;;  %v7050_v43 = vor.u32 %v7438_v36, %v7047_v48  ;;  %v7206_v16 = vor.u32 %v7477_v15, %v7203_v8  ;;  %v7035_v59 = vld [vmem:[%s11481_s1 + $0x66c] sm:$0xf0]  ;;  %v7245_v27 = vld [vmem:[%s11481_s1 + $0x70] sm:$0xf0]  ;;  %v7242_v48 = vld [vmem:[%s11481_s1 + $0x58] sm:$0xf0] }
 0x1a6   : > { %v3067_v63 = vpop.f32.mrf.mxu3  ;;  %v6261_v36 = vld [vmem:[%s11481_s1 + $0x50] sm:$0xf]  ;;  %v7474_v28 = vld [vmem:[%s11481_s1 + $0x79c] sm:$0xf] }
 0x1a7   : > { %4858 = vmatpush.bf16.msrb.mxu3 %v6310_v46  ;;  %v10777_v11 = vadd.f32 %v3067_v63, %v3050_v50  ;;  %v7435_v46 = vld [vmem:[%s11481_s1 + $0x664] sm:$0xf]  ;;  %v6262_v58 = vor.u32 %v7242_v48, %v6261_v36 }
 0x1a8   : > { %4775 = vmatpush.bf16.msra.mxu2 %v6798_v30  ;;  %4822 = vmatpush.bf16.msrb.mxu1 %v7170_v39  ;;  %v7462_v30 = vld [vmem:[%s11481_s1 + $0x73c] sm:$0xf]  ;;  %v3036_v23 = vpop.f32.mrf.mxu1  ;;  %v7038_v50 = vor.u32 %v7435_v46, %v7035_v59 }
 0x1a9   : > { %4805 = vmatpush.bf16.msrb.mxu0 %v7062_v51  ;;  %v7146_v34 = vor.u32 %v7462_v30, %v7143_v47  ;;  %4691 = vmatmul.bf16.gmra.mxu1 %v8149_v7  ;;  %v7432_v51 = vld [vmem:[%s11481_s1 + $0x64c] sm:$0xf] }
 0x1aa   : > { %v3018_v32 = vpop.f32.mrf.mxu0  ;;  %v3051_v61 = vpop.f32.mrf.mxu2  ;;  %4673 = vmatmul.bf16.gmra.mxu0 %v8145_v4  ;;  %4709 = vmatmul.bf16.gmra.mxu2 %v8165_v21 }
 0x1ab   : > { %4859 = vmatpush.bf16.msrb.mxu3 %v6298_v57  ;;  %v3019_v60 = vadd.f32 %v3018_v32, %v10673_v0  ;;  %v3052_v38 = vadd.f32 %v3051_v61, %v3034_v44  ;;  %v7459_v0 = vld [vmem:[%s11481_s1 + $0x724] sm:$0xf]  ;;  %v6273_v44 = vld [vmem:[%s11481_s1 + $0x68] sm:$0xf]  ;;  %v7119_v57 = vld [vmem:[%s11481_s1 + $0x714] sm:$0xf0] }
 0x1ac   : > { %4844 = vmatpush.bf16.msrb.mxu2 %v7218_v52  ;;  %4823 = vmatpush.bf16.msrb.mxu1 %v7158_v18  ;;  %v7131_v52 = vld [vmem:[%s11481_s1 + $0x72c] sm:$0xf0]  ;;  %v6274_v63 = vor.u32 %v7245_v27, %v6273_v44  ;;  %v7026_v18 = vor.u32 %v7432_v51, %v7023_v9  ;;  %v7122_v47 = vor.u32 %v7456_v33, %v7119_v57  ;;  %v7429_v32 = vld [vmem:[%s11481_s1 + $0x634] sm:$0xf]  ;;  %v7095_v27 = vld [vmem:[%s11481_s1 + $0x6e4] sm:$0xf0] }
 0x1ad   : > { %4806 = vmatpush.bf16.msrb.mxu0 %v7050_v43  ;;  %v3037_v39 = vadd.f32 %v3036_v23, %v3019_v60  ;;  %v7134_v24 = vor.u32 %v7459_v0, %v7131_v52  ;;  %v7107_v23 = vld [vmem:[%s11481_s1 + $0x6fc] sm:$0xf0]  ;;  %v7450_v52 = vld [vmem:[%s11481_s1 + $0x6dc] sm:$0xf]  ;;  %v7471_v9 = vld [vmem:[%s11481_s1 + $0x784] sm:$0xf] }
 0x1ae   : > { %v3069_v19 = vpop.f32.mrf.mxu3  ;;  %4727 = vmatmul.bf16.gmra.mxu3 %v8188_v35  ;;  %v7098_v51 = vor.u32 %v7450_v52, %v7095_v27  ;;  %v7179_v33 = vld [vmem:[%s11481_s1 + $0x78c] sm:$0xf0] }
 0x1af   : > { %4860 = vmatpush.bf16.msrb.mxu3 %v6286_v5  ;;  %v10824_v6 = vadd.f32 %v3069_v19, %v3052_v38  ;;  %v7011_v5 = vld [vmem:[%s11481_s1 + $0x63c] sm:$0xf0]  ;;  %v6249_v38 = vld [vmem:[%s11481_s1 + $0x38] sm:$0xf]  ;;  %v7426_v19 = vld [vmem:[%s11481_s1 + $0x61c] sm:$0xf]  ;;  %v7182_v57 = vor.u32 %v7471_v9, %v7179_v33 }
 0x1b0   : > { %4845 = vmatpush.bf16.msrb.mxu2 %v7206_v16  ;;  %4824 = vmatpush.bf16.msrb.mxu1 %v7146_v34  ;;  %v3038_v43 = vpop.f32.mrf.mxu1  ;;  %v7191_v34 = vld [vmem:[%s11481_s1 + $0x7a4] sm:$0xf0]  ;;  %v7453_v16 = vld [vmem:[%s11481_s1 + $0x6f4] sm:$0xf]  ;;  %v7014_v60 = vor.u32 %v7429_v32, %v7011_v5 }
 0x1b1   : > { %4807 = vmatpush.bf16.msrb.mxu0 %v7038_v50  ;;  %v7194_v8 = vor.u32 %v7474_v28, %v7191_v34  ;;  %v7110_v59 = vor.u32 %v7453_v16, %v7107_v23  ;;  %v6999_v50 = vld [vmem:[%s11481_s1 + $0x624] sm:$0xf0]  ;;  %v7083_v34 = vld [vmem:[%s11481_s1 + $0x6cc] sm:$0xf0] }
 0x1b2   : > { %v3020_v14 = vpop.f32.mrf.mxu0  ;;  %v3054_v30 = vpop.f32.mrf.mxu2  ;;  %v7002_v44 = vor.u32 %v7426_v19, %v6999_v50  ;;  %v6405_v16 = vld [vmem:[%s11481_s1 + $0x170] sm:$0xf] }
 0x1b3   : > { %4861 = vmatpush.bf16.msrb.mxu3 %v6274_v63  ;;  %v3055_v15 = vadd.f32 %v3054_v30, %v3037_v39  ;;  %v7239_v39 = vld [vmem:[%s11481_s1 + $0x40] sm:$0xf0]  ;;  %v7236_v63 = vld [vmem:[%s11481_s1 + $0x28] sm:$0xf0] }
 0x1b4   : > { %4825 = vmatpush.bf16.msrb.mxu1 %v7134_v24  ;;  %4846 = vmatpush.bf16.msrb.mxu2 %v7194_v8  ;;  %v6250_v0 = vor.u32 %v7239_v39, %v6249_v38  ;;  %v6237_v24 = vld [vmem:[%s11481_s1 + $0x20] sm:$0xf]  ;;  %v7233_v8 = vld [vmem:[%s11481_s1 + $0x10] sm:$0xf0]  ;;  %v7302_v39 = vld [vmem:[%s11481_s1 + $0x238] sm:$0xf0] }
 0x1b5   : > { %4808 = vmatpush.bf16.msrb.mxu0 %v7026_v18  ;;  %v6238_v18 = vor.u32 %v7236_v63, %v6237_v24  ;;  %v6693_v24 = vld [vmem:[%s11481_s1 + $0x3b0] sm:$0xf]  ;;  %v7350_v63 = vld [vmem:[%s11481_s1 + $0x3b8] sm:$0xf0] }
 0x1b6   : > { %v3072_v61 = vpop.f32.mrf.mxu3  ;;  %v6694_v33 = vor.u32 %v7350_v63, %v6693_v24 }
 0x1b7   : > { %4862 = vmatpush.bf16.msrb.mxu3 %v6262_v58  ;;  %v10870_v46 = vadd.f32 %v3072_v61, %v3055_v15  ;;  %v6987_v58 = vld [vmem:[%s11481_s1 + $0x60c] sm:$0xf0]  ;;  %v6225_v15 = vld [vmem:[%s11481_s1 + $0x8] sm:$0xf]  ;;  %v7278_v61 = vld [vmem:[%s11481_s1 + $0x178] sm:$0xf0] }
 0x1b8   : > { %4826 = vmatpush.bf16.msrb.mxu1 %v7122_v47  ;;  %v4471_v30 = vpop.f32.mrf.mxu1  ;;  %4847 = vmatpush.bf16.msrb.mxu2 %v7182_v57  ;;  %v7423_v47 = vld [vmem:[%s11481_s1 + $0x604] sm:$0xf]  ;;  %v6226_v5 = vor.u32 %v7233_v8, %v6225_v15  ;;  %v6406_v38 = vor.u32 %v7278_v61, %v6405_v16  ;;  %v7272_v8 = vld [vmem:[%s11481_s1 + $0x148] sm:$0xf0] }
 0x1b9   : > { %4809 = vmatpush.bf16.msrb.mxu0 %v7014_v60  ;;  %v4472_v43 = vadd.f32 %v4471_v30, %v9740_v22  ;;  %4758 = vmatmul.bf16.vlgmr.msra.gmra.mxu1 %v8406_v13  ;;  %v6990_v22 = vor.u32 %v7423_v47, %v6987_v58  ;;  %v6501_v60 = vld [vmem:[%s11481_s1 + $0x230] sm:$0xf]  ;;  %v6585_v30 = vld [vmem:[%s11481_s1 + $0x2d8] sm:$0xf] }
 0x1ba   : > { %v3085_v14 = vpop.f32.mrf.mxu0  ;;  %v3056_v36 = vpop.f32.mrf.mxu2  ;;  %4740 = vmatmul.bf16.vlgmr.msra.gmra.mxu0 %v8399_v3  ;;  %4776 = vmatmul.bf16.vlgmr.msra.gmra.mxu2 %v8415_v20 }
 0x1bb   : > { %4863 = vmatpush.bf16.msrb.mxu3 %v6250_v0  ;;  %v10897_v48 = vadd.f32 %v3085_v14, %v10777_v11  ;;  %v7447_v11 = vld [vmem:[%s11481_s1 + $0x6c4] sm:$0xf]  ;;  %v7326_v0 = vld [vmem:[%s11481_s1 + $0x2f8] sm:$0xf0] }
 0x1bc   : > { %4827 = vmatpush.bf16.msrb.mxu1 %v7110_v59  ;;  %v7086_v32 = vor.u32 %v7447_v11, %v7083_v34  ;;  %v6597_v59 = vld [vmem:[%s11481_s1 + $0x2f0] sm:$0xf]  ;;  %v7275_v14 = vld [vmem:[%s11481_s1 + $0x160] sm:$0xf0]  ;;  %v6381_v34 = vld [vmem:[%s11481_s1 + $0x140] sm:$0xf] }
 0x1bd   : > { %4810 = vmatpush.bf16.msrb.mxu0 %v7002_v44  ;;  %v6502_v44 = vor.u32 %v7302_v39, %v6501_v60  ;;  %v6598_v27 = vor.u32 %v7326_v0, %v6597_v59  ;;  %v6382_v16 = vor.u32 %v7272_v8, %v6381_v34  ;;  %v6573_v60 = vld [vmem:[%s11481_s1 + $0x2c0] sm:$0xf]  ;;  %v7344_v0 = vld [vmem:[%s11481_s1 + $0x388] sm:$0xf0]  ;;  %v7290_v8 = vld [vmem:[%s11481_s1 + $0x1d8] sm:$0xf0] }
 0x1be   : > { %v3074_v28 = vpop.f32.mrf.mxu3  ;;  %4794 = vmatmul.bf16.vlgmr.msra.gmra.mxu3 %v8452_v54 }
 0x1bf   : > { %4864 = vmatpush.bf16.msrb.mxu3 %v6238_v18  ;;  %4912 = vmatpush.bf16.msra.mxu2 %v6598_v27  ;;  %v6489_v18 = vld [vmem:[%s11481_s1 + $0x218] sm:$0xf] }
 0x1c0   : > { %4828 = vmatpush.bf16.msrb.mxu1 %v7098_v51  ;;  %v4473_v52 = vpop.f32.mrf.mxu1  ;;  %v6681_v28 = vld [vmem:[%s11481_s1 + $0x398] sm:$0xf] }
 0x1c1   : > { %4811 = vmatpush.bf16.msrb.mxu0 %v6990_v22  ;;  %v4474_v9 = vadd.f32 %v4473_v52, %v9787_v1  ;;  %v7299_v1 = vld [vmem:[%s11481_s1 + $0x220] sm:$0xf0] }
 0x1c2   : > { %v3087_v23 = vpop.f32.mrf.mxu0  ;;  %v4489_v19 = vpop.f32.mrf.mxu2  ;;  %v6490_v58 = vor.u32 %v7299_v1, %v6489_v18  ;;  %v7347_v22 = vld [vmem:[%s11481_s1 + $0x3a0] sm:$0xf0]  ;;  %v7317_v18 = vld [vmem:[%s11481_s1 + $0x2b0] sm:$0xf0] }
 0x1c3   : > { %4865 = vmatpush.bf16.msrb.mxu3 %v6226_v5  ;;  %v10941_v50 = vadd.f32 %v3087_v23, %v10824_v6  ;;  %v4490_v51 = vadd.f32 %v4489_v19, %v4472_v43  ;;  %v6393_v6 = vld [vmem:[%s11481_s1 + $0x158] sm:$0xf]  ;;  %v7323_v43 = vld [vmem:[%s11481_s1 + $0x2e0] sm:$0xf0]  ;;  %v6682_v15 = vor.u32 %v7347_v22, %v6681_v28  ;;  %v7296_v5 = vld [vmem:[%s11481_s1 + $0x208] sm:$0xf0] }
 0x1c4   : > { %4829 = vmatpush.bf16.msrb.mxu1 %v7086_v32  ;;  %v6394_v36 = vor.u32 %v7275_v14, %v6393_v6  ;;  %v6586_v11 = vor.u32 %v7323_v43, %v6585_v30  ;;  %v6477_v32 = vld [vmem:[%s11481_s1 + $0x200] sm:$0xf]  ;;  %v7320_v23 = vld [vmem:[%s11481_s1 + $0x2c8] sm:$0xf0]  ;;  %v6561_v14 = vld [vmem:[%s11481_s1 + $0x2a8] sm:$0xf] }
 0x1c5   : > { %4876 = vmatpush.bf16.msra.mxu0 %v6406_v38  ;;  %v6478_v61 = vor.u32 %v7296_v5, %v6477_v32  ;;  %v6669_v38 = vld [vmem:[%s11481_s1 + $0x380] sm:$0xf]  ;;  %v6574_v59 = vor.u32 %v7320_v23, %v6573_v60  ;;  %v6562_v1 = vor.u32 %v7317_v18, %v6561_v14  ;;  %v6657_v30 = vld [vmem:[%s11481_s1 + $0x368] sm:$0xf]  ;;  %v7341_v43 = vld [vmem:[%s11481_s1 + $0x370] sm:$0xf0] }
 0x1c6   : > { %v4507_v57 = vpop.f32.mrf.mxu3  ;;  %4913 = vmatpush.bf16.msra.mxu2 %v6586_v11  ;;  %v6670_v27 = vor.u32 %v7344_v0, %v6669_v38  ;;  %v6357_v11 = vld [vmem:[%s11481_s1 + $0x110] sm:$0xf]  ;;  %v7266_v28 = vld [vmem:[%s11481_s1 + $0x118] sm:$0xf0]  ;;  %v6633_v14 = vld [vmem:[%s11481_s1 + $0x338] sm:$0xf] }
 0x1c7   : > { %4930 = vmatpush.bf16.msra.mxu3 %v6694_v33  ;;  %v10968_v47 = vadd.f32 %v4507_v57, %v4490_v51  ;;  %v6369_v51 = vld [vmem:[%s11481_s1 + $0x128] sm:$0xf]  ;;  %v7269_v33 = vld [vmem:[%s11481_s1 + $0x130] sm:$0xf0]  ;;  %v6453_v22 = vld [vmem:[%s11481_s1 + $0x1d0] sm:$0xf] }
 0x1c8   : > { %4894 = vmatpush.bf16.msra.mxu1 %v6502_v44  ;;  %v4476_v44 = vpop.f32.mrf.mxu1  ;;  %v6549_v32 = vld [vmem:[%s11481_s1 + $0x290] sm:$0xf]  ;;  %v7314_v5 = vld [vmem:[%s11481_s1 + $0x298] sm:$0xf0]  ;;  %v6454_v60 = vor.u32 %v7290_v8, %v6453_v22  ;;  %v7335_v18 = vld [vmem:[%s11481_s1 + $0x340] sm:$0xf0] }
 0x1c9   : > { %4877 = vmatpush.bf16.msra.mxu0 %v6394_v36  ;;  %v4477_v63 = vadd.f32 %v4476_v44, %v9837_v49  ;;  %4763 = vmatmul.bf16.gmra.mxu1 %v8427_v26  ;;  %v6370_v49 = vor.u32 %v7269_v33, %v6369_v51  ;;  %v6550_v23 = vor.u32 %v7314_v5, %v6549_v32  ;;  %v6645_v38 = vld [vmem:[%s11481_s1 + $0x350] sm:$0xf]  ;;  %v7263_v44 = vld [vmem:[%s11481_s1 + $0x100] sm:$0xf0]  ;;  %v6537_v33 = vld [vmem:[%s11481_s1 + $0x278] sm:$0xf] }
 0x1ca   : > { %v3090_v39 = vpop.f32.mrf.mxu0  ;;  %v4491_v19 = vpop.f32.mrf.mxu2  ;;  %4745 = vmatmul.bf16.gmra.mxu0 %v8425_v25  ;;  %4914 = vmatpush.bf16.msra.mxu2 %v6574_v59  ;;  %v6525_v22 = vld [vmem:[%s11481_s1 + $0x260] sm:$0xf]  ;;  %v7332_v5 = vld [vmem:[%s11481_s1 + $0x328] sm:$0xf0] }
 0x1cb   : > { %4931 = vmatpush.bf16.msra.mxu3 %v6682_v15  ;;  %v11001_v52 = vadd.f32 %v3090_v39, %v10870_v46  ;;  %v4492_v24 = vadd.f32 %v4491_v19, %v4474_v9  ;;  %v6465_v46 = vld [vmem:[%s11481_s1 + $0x1e8] sm:$0xf]  ;;  %v7293_v9 = vld [vmem:[%s11481_s1 + $0x1f0] sm:$0xf0]  ;;  %4781 = vmatmul.bf16.gmra.mxu2 %v8437_v37  ;;  %v6358_v15 = vor.u32 %v7266_v28, %v6357_v11  ;;  %v7338_v39 = vld [vmem:[%s11481_s1 + $0x358] sm:$0xf0] }
 0x1cc   : > { %4895 = vmatpush.bf16.msra.mxu1 %v6490_v58  ;;  %v6466_v36 = vor.u32 %v7293_v9, %v6465_v46  ;;  %v6658_v58 = vor.u32 %v7341_v43, %v6657_v30  ;;  %v6646_v0 = vor.u32 %v7338_v39, %v6645_v38  ;;  %v6345_v19 = vld [vmem:[%s11481_s1 + $0xf8] sm:$0xf]  ;;  %v7311_v46 = vld [vmem:[%s11481_s1 + $0x280] sm:$0xf0]  ;;  %v7260_v30 = vld [vmem:[%s11481_s1 + $0xe8] sm:$0xf0] }
 0x1cd   : > { %4878 = vmatpush.bf16.msra.mxu0 %v6382_v16  ;;  %v6346_v51 = vor.u32 %v7263_v44, %v6345_v19  ;;  %v6538_v9 = vor.u32 %v7311_v46, %v6537_v33  ;;  %v6429_v43 = vld [vmem:[%s11481_s1 + $0x1a0] sm:$0xf]  ;;  %v6321_v39 = vld [vmem:[%s11481_s1 + $0xc8] sm:$0xf]  ;;  %v7281_v44 = vld [vmem:[%s11481_s1 + $0x190] sm:$0xf0] }
 0x1ce   : > { %v4509_v6 = vpop.f32.mrf.mxu3  ;;  %4915 = vmatpush.bf16.msra.mxu2 %v6562_v1  ;;  %4799 = vmatmul.bf16.gmra.mxu3 %v11501_v55  ;;  %v6634_v1 = vor.u32 %v7335_v18, %v6633_v14  ;;  %v6609_v33 = vld [vmem:[%s11481_s1 + $0x308] sm:$0xf]  ;;  %v7329_v46 = vld [vmem:[%s11481_s1 + $0x310] sm:$0xf0]  ;;  %v7374_v14 = vld [vmem:[%s11481_s1 + $0x478] sm:$0xf0] }
 0x1cf   : > { %v11024_v57 = vadd.f32 %v4509_v6, %v4492_v24  ;;  %4932 = vmatpush.bf16.msra.mxu3 %v6670_v27  ;;  %v6441_v27 = vld [vmem:[%s11481_s1 + $0x1b8] sm:$0xf]  ;;  %v6885_v18 = vld [vmem:[%s11481_s1 + $0x530] sm:$0xf] }
 0x1d0   : > { %4896 = vmatpush.bf16.msra.mxu1 %v6478_v61  ;;  %v4478_v61 = vpop.f32.mrf.mxu1 }
 0x1d1   : > { %4879 = vmatpush.bf16.msra.mxu0 %v6370_v49 }
 0x1d2   : > { %v3092_v34 = vpop.f32.mrf.mxu0  ;;  %v4494_v16 = vpop.f32.mrf.mxu2  ;;  %4916 = vmatpush.bf16.msra.mxu2 %v6550_v23 }
 0x1d3   : > { %v4495_v59 = vadd.f32 %v4494_v16, %v4477_v63  ;;  %4933 = vmatpush.bf16.msra.mxu3 %v6658_v58  ;;  %v7287_v63 = vld [vmem:[%s11481_s1 + $0x1c0] sm:$0xf0]  ;;  %v7284_v58 = vld [vmem:[%s11481_s1 + $0x1a8] sm:$0xf0] }
 0x1d4   : > { %4897 = vmatpush.bf16.msra.mxu1 %v6466_v36  ;;  %v6442_v49 = vor.u32 %v7287_v63, %v6441_v27  ;;  %v6333_v36 = vld [vmem:[%s11481_s1 + $0xe0] sm:$0xf]  ;;  %v6430_v28 = vor.u32 %v7284_v58, %v6429_v43  ;;  %v7308_v34 = vld [vmem:[%s11481_s1 + $0x268] sm:$0xf0]  ;;  %v6513_v27 = vld [vmem:[%s11481_s1 + $0x248] sm:$0xf] }
 0x1d5   : > { %4880 = vmatpush.bf16.msra.mxu0 %v6358_v15  ;;  %v6334_v11 = vor.u32 %v7260_v30, %v6333_v36  ;;  %v6621_v15 = vld [vmem:[%s11481_s1 + $0x320] sm:$0xf]  ;;  %v6526_v32 = vor.u32 %v7308_v34, %v6525_v22  ;;  %v7398_v30 = vld [vmem:[%s11481_s1 + $0x538] sm:$0xf0]  ;;  %v6981_v43 = vld [vmem:[%s11481_s1 + $0x5f0] sm:$0xf] }
 0x1d6   : > { %v4512_v24 = vpop.f32.mrf.mxu3  ;;  %4917 = vmatpush.bf16.msra.mxu2 %v6538_v9  ;;  %v6622_v23 = vor.u32 %v7332_v5, %v6621_v15  ;;  %v6789_v9 = vld [vmem:[%s11481_s1 + $0x470] sm:$0xf]  ;;  %v7422_v58 = vld [vmem:[%s11481_s1 + $0x5f8] sm:$0xf0]  ;;  %v6886_v34 = vor.u32 %v7398_v30, %v6885_v18  ;;  %v6957_v18 = vld [vmem:[%s11481_s1 + $0x5c0] sm:$0xf] }
 0x1d7   : > { %v11076_v6 = vadd.f32 %v4512_v24, %v4495_v59  ;;  %4934 = vmatpush.bf16.msra.mxu3 %v6646_v0  ;;  %v7257_v59 = vld [vmem:[%s11481_s1 + $0xd0] sm:$0xf0]  ;;  %v6982_v15 = vor.u32 %v7422_v58, %v6981_v43 }
 0x1d8   : > { %4898 = vmatpush.bf16.msra.mxu1 %v6454_v60  ;;  %v4543_v60 = vpop.f32.mrf.mxu1  ;;  %v6322_v19 = vor.u32 %v7257_v59, %v6321_v39  ;;  %v7305_v24 = vld [vmem:[%s11481_s1 + $0x250] sm:$0xf0]  ;;  %v7395_v39 = vld [vmem:[%s11481_s1 + $0x520] sm:$0xf0]  ;;  %v6969_v59 = vld [vmem:[%s11481_s1 + $0x5d8] sm:$0xf] }
 0x1d9   : > { %4881 = vmatpush.bf16.msra.mxu0 %v6346_v51  ;;  %4830 = vmatmul.bf16.vlgmr.msrb.gmra.mxu1 %v8652_v53  ;;  %v6514_v63 = vor.u32 %v7305_v24, %v6513_v27  ;;  %v7065_v27 = vld [vmem:[%s11481_s1 + $0x698] sm:$0xf]  ;;  %v7443_v24 = vld [vmem:[%s11481_s1 + $0x6a0] sm:$0xf0] }
 0x1da   : > { %v4525_v8 = vpop.f32.mrf.mxu0  ;;  %v4496_v16 = vpop.f32.mrf.mxu2  ;;  %4812 = vmatmul.bf16.vlgmr.msrb.gmra.mxu0 %v8632_v31  ;;  %4918 = vmatpush.bf16.msra.mxu2 %v6526_v32  ;;  %v7446_v32 = vld [vmem:[%s11481_s1 + $0x6b8] sm:$0xf0] }
 0x1db   : > { %v4526_v61 = vadd.f32 %v4525_v8, %v10968_v47  ;;  %4935 = vmatpush.bf16.msra.mxu3 %v6634_v1  ;;  %v6417_v47 = vld [vmem:[%s11481_s1 + $0x188] sm:$0xf]  ;;  %7225 = vmatmul.msk.bf16.vlgmr.msrb.gmra.mxu2 %vm2493_vm1, %v11500_v2  ;;  %v6790_v1 = vor.u32 %v7374_v14, %v6789_v9  ;;  %v7077_v8 = vld [vmem:[%s11481_s1 + $0x6b0] sm:$0xf]  ;;  %v7392_v14 = vld [vmem:[%s11481_s1 + $0x508] sm:$0xf0] }
 0x1dc   : > { %4899 = vmatpush.bf16.msra.mxu1 %v6442_v49  ;;  %v6418_v51 = vor.u32 %v7281_v44, %v6417_v47  ;;  %v6610_v49 = vor.u32 %v7329_v46, %v6609_v33  ;;  %v7078_v16 = vor.u32 %v7446_v32, %v7077_v8  ;;  %v7419_v47 = vld [vmem:[%s11481_s1 + $0x5e0] sm:$0xf0]  ;;  %v7368_v33 = vld [vmem:[%s11481_s1 + $0x448] sm:$0xf0]  ;;  %v6861_v46 = vld [vmem:[%s11481_s1 + $0x500] sm:$0xf] }
 0x1dd   : > { %4882 = vmatpush.bf16.msra.mxu0 %v6334_v11  ;;  %v4544_v38 = vadd.f32 %v4543_v60, %v4526_v61  ;;  %v6873_v60 = vld [vmem:[%s11481_s1 + $0x518] sm:$0xf]  ;;  %v6970_v44 = vor.u32 %v7419_v47, %v6969_v59  ;;  %v6862_v58 = vor.u32 %v7392_v14, %v6861_v46  ;;  %v7365_v32 = vld [vmem:[%s11481_s1 + $0x430] sm:$0xf0]  ;;  %v7041_v59 = vld [vmem:[%s11481_s1 + $0x668] sm:$0xf] }
 0x1de   : > { %v4514_v0 = vpop.f32.mrf.mxu3  ;;  %4919 = vmatpush.bf16.msra.mxu2 %v6514_v63  ;;  %4866 = vmatmul.bf16.vlgmr.msrb.gmra.mxu3 %v8128_v56  ;;  %v6777_v56 = vld [vmem:[%s11481_s1 + $0x458] sm:$0xf]  ;;  %v6765_v63 = vld [vmem:[%s11481_s1 + $0x440] sm:$0xf]  ;;  %v7437_v47 = vld [vmem:[%s11481_s1 + $0x670] sm:$0xf0] }
 0x1df   : > { %4936 = vmatpush.bf16.msra.mxu3 %v6622_v23  ;;  %v6766_v9 = vor.u32 %v7368_v33, %v6765_v63  ;;  %v7386_v33 = vld [vmem:[%s11481_s1 + $0x4d8] sm:$0xf0]  ;;  %v6933_v46 = vld [vmem:[%s11481_s1 + $0x590] sm:$0xf] }
 0x1e0   : > { %4900 = vmatpush.bf16.msra.mxu1 %v6430_v28  ;;  %v4545_v22 = vpop.f32.mrf.mxu1 }
 0x1e1   : > { %4883 = vmatpush.bf16.msra.mxu0 %v6322_v19  ;;  %v6874_v19 = vor.u32 %v7395_v39, %v6873_v60  ;;  %v7413_v60 = vld [vmem:[%s11481_s1 + $0x5b0] sm:$0xf0] }
 0x1e2   : > { %v4527_v36 = vpop.f32.mrf.mxu0  ;;  %v4561_v11 = vpop.f32.mrf.mxu2  ;;  %4984 = vmatpush.bf16.msrb.mxu2 %v6982_v15 }
 0x1e3   : > { %v4528_v28 = vadd.f32 %v4527_v36, %v11024_v57  ;;  %v4562_v5 = vadd.f32 %v4561_v11, %v4544_v38  ;;  %4937 = vmatpush.bf16.msra.mxu3 %v6610_v49  ;;  %v7371_v57 = vld [vmem:[%s11481_s1 + $0x460] sm:$0xf0]  ;;  %v7416_v36 = vld [vmem:[%s11481_s1 + $0x5c8] sm:$0xf0] }
 0x1e4   : > { %4901 = vmatpush.bf16.msra.mxu1 %v6418_v51  ;;  %v6778_v38 = vor.u32 %v7371_v57, %v6777_v56  ;;  %v7066_v51 = vor.u32 %v7443_v24, %v7065_v27  ;;  %v6958_v11 = vor.u32 %v7416_v36, %v6957_v18  ;;  %v7389_v56 = vld [vmem:[%s11481_s1 + $0x4f0] sm:$0xf0]  ;;  %v6945_v57 = vld [vmem:[%s11481_s1 + $0x5a8] sm:$0xf]  ;;  %v7362_v27 = vld [vmem:[%s11481_s1 + $0x418] sm:$0xf0] }
 0x1e5   : > { %4948 = vmatpush.bf16.msrb.mxu0 %v6790_v1  ;;  %v4546_v61 = vadd.f32 %v4545_v22, %v4528_v28  ;;  %v7053_v28 = vld [vmem:[%s11481_s1 + $0x680] sm:$0xf]  ;;  %v7440_v22 = vld [vmem:[%s11481_s1 + $0x688] sm:$0xf0]  ;;  %v6946_v39 = vor.u32 %v7413_v60, %v6945_v57  ;;  %v6837_v24 = vld [vmem:[%s11481_s1 + $0x4d0] sm:$0xf] }
 0x1e6   : > { %v4579_v23 = vpop.f32.mrf.mxu3  ;;  %4985 = vmatpush.bf16.msrb.mxu2 %v6970_v44  ;;  %v7054_v15 = vor.u32 %v7440_v22, %v7053_v28  ;;  %v6741_v44 = vld [vmem:[%s11481_s1 + $0x410] sm:$0xf]  ;;  %v6838_v18 = vor.u32 %v7386_v33, %v6837_v24  ;;  %v6825_v28 = vld [vmem:[%s11481_s1 + $0x4b8] sm:$0xf]  ;;  %v6717_v60 = vld [vmem:[%s11481_s1 + $0x3e0] sm:$0xf] }
 0x1e7   : > { %5002 = vmatpush.bf16.msrb.mxu3 %v7078_v16  ;;  %v11181_v0 = vadd.f32 %v4579_v23, %v4562_v5  ;;  %v6849_v5 = vld [vmem:[%s11481_s1 + $0x4e8] sm:$0xf]  ;;  %v6742_v63 = vor.u32 %v7362_v27, %v6741_v44  ;;  %v6909_v44 = vld [vmem:[%s11481_s1 + $0x560] sm:$0xf]  ;;  %v7404_v27 = vld [vmem:[%s11481_s1 + $0x568] sm:$0xf0] }
 0x1e8   : > { %4966 = vmatpush.bf16.msrb.mxu1 %v6886_v34  ;;  %v4548_v43 = vpop.f32.mrf.mxu1 }
 0x1e9   : > { %4949 = vmatpush.bf16.msrb.mxu0 %v6778_v38  ;;  %4835 = vmatmul.bf16.gmra.mxu1 %v11503_v10  ;;  %v6850_v38 = vor.u32 %v7389_v56, %v6849_v5  ;;  %v7431_v56 = vld [vmem:[%s11481_s1 + $0x640] sm:$0xf0] }
 0x1ea   : > { %v4530_v49 = vpop.f32.mrf.mxu0  ;;  %v4563_v1 = vpop.f32.mrf.mxu2  ;;  %4817 = vmatmul.bf16.gmra.mxu0 %v11502_v17  ;;  %4986 = vmatpush.bf16.msrb.mxu2 %v6958_v11  ;;  %v7359_v11 = vld [vmem:[%s11481_s1 + $0x400] sm:$0xf0] }
 0x1eb   : > { %5003 = vmatpush.bf16.msrb.mxu3 %v7066_v51  ;;  %v4531_v30 = vadd.f32 %v4530_v49, %v11076_v6  ;;  %v4564_v34 = vadd.f32 %v4563_v1, %v4546_v61  ;;  %v6753_v6 = vld [vmem:[%s11481_s1 + $0x428] sm:$0xf]  ;;  %7226 = vmatmul.msk.bf16.gmra.mxu2 %vm2493_vm1, %v11504_v45  ;;  %v7410_v49 = vld [vmem:[%s11481_s1 + $0x598] sm:$0xf0]  ;;  %v7029_v1 = vld [vmem:[%s11481_s1 + $0x650] sm:$0xf] }
 0x1ec   : > { %4967 = vmatpush.bf16.msrb.mxu1 %v6874_v19  ;;  %v6754_v61 = vor.u32 %v7365_v32, %v6753_v6  ;;  %v7042_v19 = vor.u32 %v7437_v47, %v7041_v59  ;;  %v6934_v36 = vor.u32 %v7410_v49, %v6933_v46  ;;  %v7407_v6 = vld [vmem:[%s11481_s1 + $0x580] sm:$0xf0]  ;;  %v6910_v46 = vor.u32 %v7404_v27, %v6909_v44  ;;  %v7005_v49 = vld [vmem:[%s11481_s1 + $0x620] sm:$0xf]  ;;  %v7464_v27 = vld [vmem:[%s11481_s1 + $0x748] sm:$0xf0] }
 0x1ed   : > { %4950 = vmatpush.bf16.msrb.mxu0 %v6766_v9  ;;  %v4549_v8 = vadd.f32 %v4548_v43, %v4531_v30  ;;  %v7434_v30 = vld [vmem:[%s11481_s1 + $0x658] sm:$0xf0]  ;;  %v7149_v44 = vld [vmem:[%s11481_s1 + $0x740] sm:$0xf] }
 0x1ee   : > { %v4581_v16 = vpop.f32.mrf.mxu3  ;;  %4987 = vmatpush.bf16.msrb.mxu2 %v6946_v39  ;;  %4871 = vmatmul.bf16.gmra.mxu3 %v8145_v4  ;;  %v6729_v4 = vld [vmem:[%s11481_s1 + $0x3f8] sm:$0xf]  ;;  %v6813_v39 = vld [vmem:[%s11481_s1 + $0x4a0] sm:$0xf] }
 0x1ef   : > { %v11234_v23 = vadd.f32 %v4581_v16, %v4564_v34  ;;  %5004 = vmatpush.bf16.msrb.mxu3 %v7054_v15  ;;  %v6730_v34 = vor.u32 %v7359_v11, %v6729_v4  ;;  %v7383_v15 = vld [vmem:[%s11481_s1 + $0x4c0] sm:$0xf0]  ;;  %v7401_v4 = vld [vmem:[%s11481_s1 + $0x550] sm:$0xf0] }
 0x1f0   : > { %4968 = vmatpush.bf16.msrb.mxu1 %v6862_v58  ;;  %v4550_v14 = vpop.f32.mrf.mxu1  ;;  %v7030_v58 = vor.u32 %v7434_v30, %v7029_v1  ;;  %v6826_v5 = vor.u32 %v7383_v15, %v6825_v28  ;;  %v6801_v1 = vld [vmem:[%s11481_s1 + $0x488] sm:$0xf]  ;;  %v7173_v15 = vld [vmem:[%s11481_s1 + $0x770] sm:$0xf] }
 0x1f1   : > { %4951 = vmatpush.bf16.msrb.mxu0 %v6754_v61  ;;  %v7017_v61 = vld [vmem:[%s11481_s1 + $0x638] sm:$0xf] }
 0x1f2   : > { %v4532_v51 = vpop.f32.mrf.mxu0  ;;  %v4566_v9 = vpop.f32.mrf.mxu2  ;;  %4988 = vmatpush.bf16.msrb.mxu2 %v6934_v36  ;;  %v7018_v57 = vor.u32 %v7431_v56, %v7017_v61  ;;  %v7353_v36 = vld [vmem:[%s11481_s1 + $0x3d0] sm:$0xf0]  ;;  %v7221_v56 = vld [vmem:[%s11481_s1 + $0x7d0] sm:$0xf] }
 0x1f3   : > { %v4567_v43 = vadd.f32 %v4566_v9, %v4549_v8  ;;  %5005 = vmatpush.bf16.msrb.mxu3 %v7042_v19  ;;  %v6921_v8 = vld [vmem:[%s11481_s1 + $0x578] sm:$0xf]  ;;  %v7380_v19 = vld [vmem:[%s11481_s1 + $0x4a8] sm:$0xf0] }
 0x1f4   : > { %4969 = vmatpush.bf16.msrb.mxu1 %v6850_v38  ;;  %v6922_v16 = vor.u32 %v7407_v6, %v6921_v8  ;;  %v7356_v38 = vld [vmem:[%s11481_s1 + $0x3e8] sm:$0xf0]  ;;  %v6814_v33 = vor.u32 %v7380_v19, %v6813_v39  ;;  %v7470_v8 = vld [vmem:[%s11481_s1 + $0x778] sm:$0xf0] }
 0x1f5   : > { %4952 = vmatpush.bf16.msrb.mxu0 %v6742_v63  ;;  %v6718_v47 = vor.u32 %v7356_v38, %v6717_v60  ;;  %v7428_v9 = vld [vmem:[%s11481_s1 + $0x628] sm:$0xf0] }
 0x1f6   : > { %v4584_v22 = vpop.f32.mrf.mxu3  ;;  %4989 = vmatpush.bf16.msrb.mxu2 %v6922_v16  ;;  %v7006_v14 = vor.u32 %v7428_v9, %v7005_v49 }
 0x1f7   : > { %v11287_v32 = vadd.f32 %v4584_v22, %v4567_v43  ;;  %5006 = vmatpush.bf16.msrb.mxu3 %v7030_v58  ;;  %v6897_v58 = vld [vmem:[%s11481_s1 + $0x548] sm:$0xf]  ;;  %v7425_v22 = vld [vmem:[%s11481_s1 + $0x610] sm:$0xf0] }
 0x1f8   : > { %4970 = vmatpush.bf16.msrb.mxu1 %v6838_v18  ;;  %v4615_v63 = vpop.f32.mrf.mxu1  ;;  %v6898_v28 = vor.u32 %v7401_v4, %v6897_v58 }
 0x1f9   : > { %4953 = vmatpush.bf16.msrb.mxu0 %v6730_v34  ;;  %4902 = vmatmul.bf16.vlgmr.msra.gmra.mxu1 %v8154_v12  ;;  %v6993_v12 = vld [vmem:[%s11481_s1 + $0x608] sm:$0xf] }
 0x1fa   : > { %v4597_v59 = vpop.f32.mrf.mxu0  ;;  %v4568_v24 = vpop.f32.mrf.mxu2  ;;  %4884 = vmatmul.bf16.vlgmr.msra.gmra.mxu0 %v8135_v62  ;;  %4990 = vmatpush.bf16.msrb.mxu2 %v6910_v46  ;;  %v7377_v62 = vld [vmem:[%s11481_s1 + $0x490] sm:$0xf0]  ;;  %v6994_v34 = vor.u32 %v7425_v22, %v6993_v12 }
 0x1fb   : > { %v4598_v51 = vadd.f32 %v4597_v59, %v11181_v0  ;;  %5007 = vmatpush.bf16.msrb.mxu3 %v7018_v57  ;;  %v6705_v0 = vld [vmem:[%s11481_s1 + $0x3c8] sm:$0xf]  ;;  %v6802_v11 = vor.u32 %v7377_v62, %v6801_v1  ;;  %4920 = vmatmul.bf16.vlgmr.msra.gmra.mxu2 %v8179_v29  ;;  %v7482_v57 = vld [vmem:[%s11481_s1 + $0x7d8] sm:$0xf0]  ;;  %v7209_v24 = vld [vmem:[%s11481_s1 + $0x7b8] sm:$0xf] }
 0x1fc   : > { %4971 = vmatpush.bf16.msrb.mxu1 %v6826_v5  ;;  %v6706_v43 = vor.u32 %v7353_v36, %v6705_v0  ;;  %v7174_v5 = vor.u32 %v7470_v8, %v7173_v15  ;;  %v7222_v38 = vor.u32 %v7482_v57, %v7221_v56  ;;  %v7137_v36 = vld [vmem:[%s11481_s1 + $0x728] sm:$0xf]  ;;  %v7461_v1 = vld [vmem:[%s11481_s1 + $0x730] sm:$0xf0]  ;;  %v7458_v62 = vld [vmem:[%s11481_s1 + $0x718] sm:$0xf0] }
 0x1fd   : > { %4954 = vmatpush.bf16.msrb.mxu0 %v6718_v47  ;;  %v4616_v18 = vadd.f32 %v4615_v63, %v4598_v51  ;;  %v7150_v51 = vor.u32 %v7464_v27, %v7149_v44  ;;  %v7479_v63 = vld [vmem:[%s11481_s1 + $0x7c0] sm:$0xf0]  ;;  %v7473_v56 = vld [vmem:[%s11481_s1 + $0x790] sm:$0xf0] }
 0x1fe   : > { %v4586_v30 = vpop.f32.mrf.mxu3  ;;  %4991 = vmatpush.bf16.msrb.mxu2 %v6898_v28  ;;  %4938 = vmatmul.bf16.vlgmr.msra.gmra.mxu3 %v8399_v3  ;;  %v7161_v3 = vld [vmem:[%s11481_s1 + $0x758] sm:$0xf]  ;;  %v7476_v28 = vld [vmem:[%s11481_s1 + $0x7a8] sm:$0xf0] }
 0x1ff   : > { %5008 = vmatpush.bf16.msrb.mxu3 %v7006_v14 }
 0x200   : > { %4972 = vmatpush.bf16.msrb.mxu1 %v6814_v33  ;;  %v4617_v61 = vpop.f32.mrf.mxu1  ;;  %v7210_v33 = vor.u32 %v7479_v63, %v7209_v24 }
 0x201   : > { %4955 = vmatpush.bf16.msrb.mxu0 %v6706_v43 }
 0x202   : > { %v4599_v6 = vpop.f32.mrf.mxu0  ;;  %v4633_v16 = vpop.f32.mrf.mxu2  ;;  %7746 = vmatpush.bf16.msra.mxu2 %v7174_v5 }
 0x203   : > { %v4600_v29 = vadd.f32 %v4599_v6, %v11234_v23  ;;  %v4634_v60 = vadd.f32 %v4633_v16, %v4616_v18  ;;  %5009 = vmatpush.bf16.msrb.mxu3 %v6994_v34  ;;  %v7467_v23 = vld [vmem:[%s11481_s1 + $0x760] sm:$0xf0]  ;;  %v7113_v34 = vld [vmem:[%s11481_s1 + $0x6f8] sm:$0xf]  ;;  %v7452_v16 = vld [vmem:[%s11481_s1 + $0x6e8] sm:$0xf0] }
 0x204   : > { %4973 = vmatpush.bf16.msrb.mxu1 %v6802_v11  ;;  %v7162_v47 = vor.u32 %v7467_v23, %v7161_v3  ;;  %v7089_v3 = vld [vmem:[%s11481_s1 + $0x6c8] sm:$0xf]  ;;  %v7449_v23 = vld [vmem:[%s11481_s1 + $0x6d0] sm:$0xf0] }
 0x205   : > { %5020 = vmatpush.bf16.msra.mxu0 %v7174_v5  ;;  %v4618_v39 = vadd.f32 %v4617_v61, %v4600_v29  ;;  %v7101_v5 = vld [vmem:[%s11481_s1 + $0x6e0] sm:$0xf]  ;;  %v7185_v29 = vld [vmem:[%s11481_s1 + $0x788] sm:$0xf] }
 0x206   : > { %v4651_v59 = vpop.f32.mrf.mxu3  ;;  %7747 = vmatpush.bf16.msra.mxu2 %v7162_v47  ;;  %v7102_v61 = vor.u32 %v7452_v16, %v7101_v5  ;;  %v7186_v57 = vor.u32 %v7473_v56, %v7185_v29 }
 0x207   : > { %7754 = vmatpush.bf16.msra.mxu3 %v7222_v38  ;;  %v11367_v19 = vadd.f32 %v4651_v59, %v4634_v60 }
 0x208   : > { %5042 = vmatpush.bf16.msra.mxu1 %v7222_v38  ;;  %v4620_v14 = vpop.f32.mrf.mxu1 }
 0x209   : > { %5021 = vmatpush.bf16.msra.mxu0 %v7162_v47  ;;  %4907 = vmatmul.bf16.gmra.mxu1 %v8165_v21  ;;  %v7090_v47 = vor.u32 %v7449_v23, %v7089_v3 }
 0x20a   : > { %v4602_v46 = vpop.f32.mrf.mxu0  ;;  %v4635_v49 = vpop.f32.mrf.mxu2  ;;  %4889 = vmatmul.bf16.gmra.mxu0 %v8149_v7  ;;  %7748 = vmatpush.bf16.msra.mxu2 %v7150_v51  ;;  %v7125_v7 = vld [vmem:[%s11481_s1 + $0x710] sm:$0xf] }
 0x20b   : > { %v4603_v9 = vadd.f32 %v4602_v46, %v11287_v32  ;;  %7755 = vmatpush.bf16.msra.mxu3 %v7210_v33  ;;  %v4636_v18 = vadd.f32 %v4635_v49, %v4618_v39  ;;  %v7138_v32 = vor.u32 %v7461_v1, %v7137_v36  ;;  %4925 = vmatmul.bf16.gmra.mxu2 %v8188_v35  ;;  %v7197_v35 = vld [vmem:[%s11481_s1 + $0x7a0] sm:$0xf] }
 0x20c   : > { %5043 = vmatpush.bf16.msra.mxu1 %v7210_v33  ;;  %v7126_v4 = vor.u32 %v7458_v62, %v7125_v7  ;;  %v7198_v22 = vor.u32 %v7476_v28, %v7197_v35 }
 0x20d   : > { %5022 = vmatpush.bf16.msra.mxu0 %v7150_v51  ;;  %v4621_v0 = vadd.f32 %v4620_v14, %v4603_v9 }
 0x20e   : > { %v4653_v30 = vpop.f32.mrf.mxu3  ;;  %7749 = vmatpush.bf16.msra.mxu2 %v7138_v32  ;;  %4943 = vmatmul.bf16.gmra.mxu3 %v8425_v25  ;;  %v7455_v25 = vld [vmem:[%s11481_s1 + $0x700] sm:$0xf0] }
 0x20f   : > { %v11390_v43 = vadd.f32 %v4653_v30, %v4636_v18  ;;  %v7114_v8 = vor.u32 %v7455_v25, %v7113_v34  ;;  %7756 = vmatpush.bf16.msra.mxu3 %v7198_v22 }
 0x210   : > { %v4622_v11 = vpop.f32.mrf.mxu1  ;;  %5044 = vmatpush.bf16.msra.mxu1 %v7198_v22 }
 0x211   : > { %5023 = vmatpush.bf16.msra.mxu0 %v7138_v32 }
 0x212   : > { %v4604_v58 = vpop.f32.mrf.mxu0  ;;  %v4638_v21 = vpop.f32.mrf.mxu2  ;;  %7750 = vmatpush.bf16.msra.mxu2 %v7126_v4 }
 0x213   : > { %v4639_v12 = vadd.f32 %v4638_v21, %v4621_v0  ;;  %7757 = vmatpush.bf16.msra.mxu3 %v7186_v57 }
 0x214   : > { %5045 = vmatpush.bf16.msra.mxu1 %v7186_v57 }
 0x215   : > { %5024 = vmatpush.bf16.msra.mxu0 %v7126_v4 }
 0x216   : > { %v4656_v15 = vpop.f32.mrf.mxu3  ;;  %7751 = vmatpush.bf16.msra.mxu2 %v7114_v8 }
 0x217   : > { %v11412_v6 = vadd.f32 %v4656_v15, %v4639_v12 }
 0x218   : > { %v4687_v39 = vpop.f32.mrf.mxu1 }
 0x219   : > { %5025 = vmatpush.bf16.msra.mxu0 %v7114_v8  ;;  %4974 = vmatmul.bf16.vlgmr.msrb.gmra.mxu1 %v8415_v20 }
 0x21a   : > { %v4669_v60 = vpop.f32.mrf.mxu0  ;;  %v4640_v38 = vpop.f32.mrf.mxu2  ;;  %4956 = vmatmul.bf16.vlgmr.msrb.gmra.mxu0 %v8406_v13  ;;  %7752 = vmatpush.bf16.msra.mxu2 %v7102_v61 }
 0x21b   : > { %4992 = vmatmul.bf16.vlgmr.msrb.gmra.mxu2 %v8452_v54 }
 0x21d   : > { %5026 = vmatpush.bf16.msra.mxu0 %v7102_v61  ;;  %v11452_v61 = vld [vmem:[%s11483_s3] sm:$0x7] }
 0x21e   : > { %v4658_v59 = vpop.f32.mrf.mxu3  ;;  %7753 = vmatpush.bf16.msra.mxu2 %v7090_v47  ;;  %5010 = vmatmul.bf16.vlgmr.msrb.gmra.mxu3 %v8632_v31 }
 0x21f   : > { %v5058_v59 = vperm.slane %v11452_v61, 1 }
 0x220   : > { %v4689_v27 = vpop.f32.mrf.mxu1 }
 0x221   : > { %5027 = vmatpush.bf16.msra.mxu0 %v7090_v47 }
 0x222   : > { %v4671_v44 = vpop.f32.mrf.mxu0  ;;  %v4705_v13 = vpop.f32.mrf.mxu2 }
 0x223   : > { %v4672_v62 = vadd.f32 %v4671_v44, %v10335_v40 }
 0x225   : > { %v4690_v4 = vadd.f32 %v4689_v27, %v4672_v62 }
 0x226   : > { %v4723_v24 = vpop.f32.mrf.mxu3 }
 0x228   : > { %v4692_v33 = vpop.f32.mrf.mxu1 }
 0x229   : > { %4979 = vmatmul.bf16.gmra.mxu1 %v8437_v37 }
 0x22a   : > { %v4674_v51 = vpop.f32.mrf.mxu0  ;;  %v4707_v63 = vpop.f32.mrf.mxu2  ;;  %4961 = vmatmul.bf16.gmra.mxu0 %v8427_v26 }
 0x22b   : > { %4997 = vmatmul.bf16.gmra.mxu2 %v11501_v55  ;;  %v4675_v28 = vadd.f32 %v4674_v51, %v10388_v41 }
 0x22d   : > { %v4693_v25 = vadd.f32 %v4692_v33, %v4675_v28 }
 0x22e   : > { %v4725_v46 = vpop.f32.mrf.mxu3  ;;  %5015 = vmatmul.bf16.gmra.mxu3 %v11502_v17  ;;  %v4670_v17 = vadd.f32 %v4669_v60, %v10280_v42  ;;  %v5057_v60 = vperm.slane %v11452_v61, 0 }
 0x230   : > { %v4694_v49 = vpop.f32.mrf.mxu1  ;;  %v4688_v1 = vadd.f32 %v4687_v39, %v4670_v17  ;;  %v5063_v27 = vadd.f32 %v5057_v60, %v11367_v19 }
 0x232   : > { %v4676_v20 = vpop.f32.mrf.mxu0  ;;  %v4710_v54 = vpop.f32.mrf.mxu2  ;;  %v5072_v49 = vmax.f32 %v5063_v27, 0.0 }
 0x233   : > { %v4711_v40 = vadd.f32 %v4710_v54, %v4693_v25 }
 0x236   : > { %v4728_v9 = vpop.f32.mrf.mxu3 }
 0x237   : > { %v4729_v38 = vadd.f32 %v4728_v9, %v4711_v40 }
 0x238   : > { %v4759_v18 = vpop.f32.mrf.mxu1 }
 0x239   : > { %7227 = vmatmul.msk.bf16.vlgmr.msra.gmra.mxu1 %vm2493_vm1, %v11500_v2 }
 0x23a   : > { %v4741_v31 = vpop.f32.mrf.mxu0  ;;  %v4712_v14 = vpop.f32.mrf.mxu2  ;;  %5028 = vmatmul.bf16.vlgmr.msra.gmra.mxu0 %v8652_v53  ;;  %v4706_v53 = vadd.f32 %v4705_v13, %v4688_v1 }
 0x23b   : > { %5033 = vmatmul.bf16.vlgmr.msra.gmra.mxu2 %v11503_v10 }
 0x23c   : > { %v4724_v2 = vadd.f32 %v4723_v24, %v4706_v53 }
 0x23e   : > { %v4730_v0 = vpop.f32.mrf.mxu3  ;;  %7228 = vmatmul.msk.bf16.vlgmr.msra.gmra.mxu3 %vm2493_vm1, %v11504_v45  ;;  %v4742_v10 = vadd.f32 %v4741_v31, %v4724_v2  ;;  %v4708_v45 = vadd.f32 %v4707_v63, %v4690_v4 }
 0x240   : > { %v4761_v55 = vpop.f32.mrf.mxu1  ;;  %v4760_v12 = vadd.f32 %v4759_v18, %v4742_v10  ;;  %v4726_v22 = vadd.f32 %v4725_v46, %v4708_v45  ;;  %v5069_v10 = vadd.f32 %v5057_v60, %v11412_v6 }
 0x242   : > { %v4743_v26 = vpop.f32.mrf.mxu0  ;;  %v4777_v37 = vpop.f32.mrf.mxu2 }
 0x243   : > { %v4778_v34 = vadd.f32 %v4777_v37, %v4760_v12  ;;  %v4744_v15 = vadd.f32 %v4743_v26, %v4726_v22  ;;  %v5066_v37 = vadd.f32 %v5057_v60, %v11390_v43 }
 0x245   : > { %v4762_v56 = vadd.f32 %v4761_v55, %v4744_v15 }
 0x246   : > { %v4795_v36 = vpop.f32.mrf.mxu3 }
 0x247   : > { %v4796_v29 = vadd.f32 %v4795_v36, %v4778_v34 }
 0x248   : > { %v4764_v7 = vpop.f32.mrf.mxu1 }
 0x24a   : > { %v4746_v30 = vpop.f32.mrf.mxu0  ;;  %v4779_v32 = vpop.f32.mrf.mxu2 }
 0x24b   : > { %v4780_v39 = vadd.f32 %v4779_v32, %v4762_v56  ;;  %v4747_v3 = vadd.f32 %v4746_v30, %v4729_v38  ;;  %v5075_v32 = vmax.f32 %v5066_v37, 0.0 }
 0x24d   : > { %v4765_v63 = vadd.f32 %v4764_v7, %v4747_v3 }
 0x24e   : > { %v4797_v58 = vpop.f32.mrf.mxu3 }
 0x24f   : > { %v4798_v24 = vadd.f32 %v4797_v58, %v4780_v39 }
 0x250   : > { %v4766_v35 = vpop.f32.mrf.mxu1 }
 0x251   : > { %v5078_v35 = vmax.f32 %v5069_v10, 0.0  ;;  %v5059_v10 = vperm.slane %v11452_v61, 2 }
 0x252   : > { %v4748_v21 = vpop.f32.mrf.mxu0  ;;  %v4782_v11 = vpop.f32.mrf.mxu2 }
 0x253   : > { %v4783_v9 = vadd.f32 %v4782_v11, %v4765_v63 }
 0x256   : > { %v4800_v42 = vpop.f32.mrf.mxu3 }
 0x257   : > { %v4801_v55 = vadd.f32 %v4800_v42, %v4783_v9 }
 0x258   : > { %v4831_v16 = vpop.f32.mrf.mxu1 }
 0x25a   : > { %v4813_v8 = vpop.f32.mrf.mxu0  ;;  %v4784_v5 = vpop.f32.mrf.mxu2 }
 0x25b   : > { %v4814_v41 = vadd.f32 %v4813_v8, %v4796_v29 }
 0x25d   : > { %v4832_v23 = vadd.f32 %v4831_v16, %v4814_v41 }
 0x25e   : > { %v4802_v57 = vpop.f32.mrf.mxu3 }
 0x260   : > { %v4833_v13 = vpop.f32.mrf.mxu1 }
 0x262   : > { %v4815_v47 = vpop.f32.mrf.mxu0  ;;  %v4849_v44 = vpop.f32.mrf.mxu2 }
 0x263   : > { %v4850_v51 = vadd.f32 %v4849_v44, %v4832_v23  ;;  %v4816_v20 = vadd.f32 %v4815_v47, %v4798_v24 }
 0x265   : > { %v5064_v33 = vadd.f32 %v5058_v59, %v4850_v51  ;;  %v4834_v19 = vadd.f32 %v4833_v13, %v4816_v20 }
 0x266   : > { %v4867_v46 = vpop.f32.mrf.mxu3 }
 0x267   : > { %v4868_v54 = vadd.f32 %v4867_v46, %v10897_v48  ;;  %v5073_v31 = vmax.f32 %v5064_v33, 0.0 }
 0x268   : > { %v4836_v26 = vpop.f32.mrf.mxu1 }
 0x269   : > { %v5081_v14 = vpack.c.bf16 %v5073_v31, %v5072_v49 }
 0x26a   : > { %v4818_v18 = vpop.f32.mrf.mxu0  ;;  %v4851_v0 = vpop.f32.mrf.mxu2 }
 0x26b   : > { %5087 = vst [vmem:[%s11462_s8] sm:$0xff] %v5081_v14  ;;  %v4852_v48 = vadd.f32 %v4851_v0, %v4834_v19  ;;  %v4819_v1 = vadd.f32 %v4818_v18, %v4801_v55 }
 0x26d   : > { %v5067_v17 = vadd.f32 %v5058_v59, %v4852_v48  ;;  %v4837_v62 = vadd.f32 %v4836_v26, %v4819_v1 }
 0x26e   : > { %v4869_v36 = vpop.f32.mrf.mxu3 }
 0x26f   : > { %v4870_v30 = vadd.f32 %v4869_v36, %v10941_v50  ;;  %v5076_v7 = vmax.f32 %v5067_v17, 0.0 }
 0x270   : > { %v4838_v4 = vpop.f32.mrf.mxu1 }
 0x271   : > { %v5083_v53 = vpack.c.bf16 %v5076_v7, %v5075_v32 }
 0x272   : > { %v4820_v58 = vpop.f32.mrf.mxu0  ;;  %v4854_v2 = vpop.f32.mrf.mxu2 }
 0x273   : > { %5090 = vst [vmem:[%s11462_s8 + $0xc] sm:$0xff] %v5083_v53  ;;  %v4855_v43 = vadd.f32 %v4854_v2, %v4837_v62 }
 0x275   : > { %v5070_v21 = vadd.f32 %v5058_v59, %v4855_v43 }
 0x276   : > { %v4872_v11 = vpop.f32.mrf.mxu3 }
 0x277   : > { %v5079_v45 = vmax.f32 %v5070_v21, 0.0  ;;  %v4873_v51 = vadd.f32 %v4872_v11, %v11001_v52 }
 0x278   : > { %v4903_v50 = vpop.f32.mrf.mxu1 }
 0x279   : > { %v5085_v28 = vpack.c.bf16 %v5079_v45, %v5078_v35 }
 0x27a   : > { %v4885_v12 = vpop.f32.mrf.mxu0  ;;  %v4856_v42 = vpop.f32.mrf.mxu2 }
 0x27b   : > { %5092 = vst [vmem:[%s11462_s8 + $0x18] sm:$0x33] %v5085_v28  ;;  %v4886_v59 = vadd.f32 %v4885_v12, %v4868_v54 }
 0x27d   : > { %v4904_v27 = vadd.f32 %v4903_v50, %v4886_v59 }
 0x27e   : > { %v4874_v22 = vpop.f32.mrf.mxu3 }
 0x280   : > { %v4905_v15 = vpop.f32.mrf.mxu1 }
 0x282   : > { %v4887_v34 = vpop.f32.mrf.mxu0  ;;  %v4921_v25 = vpop.f32.mrf.mxu2 }
 0x283   : > { %v4922_v24 = vadd.f32 %v4921_v25, %v4904_v27  ;;  %v4888_v33 = vadd.f32 %v4887_v34, %v4870_v30 }
 0x285   : > { %v4906_v14 = vadd.f32 %v4905_v15, %v4888_v33 }
 0x286   : > { %v4939_v8 = vpop.f32.mrf.mxu3 }
 0x287   : > { %v4940_v9 = vadd.f32 %v4939_v8, %v4922_v24 }
 0x288   : > { %v4908_v40 = vpop.f32.mrf.mxu1 }
 0x28a   : > { %v4890_v5 = vpop.f32.mrf.mxu0  ;;  %v4923_v16 = vpop.f32.mrf.mxu2 }
 0x28b   : > { %v4891_v49 = vadd.f32 %v4890_v5, %v4873_v51  ;;  %v4924_v0 = vadd.f32 %v4923_v16, %v4906_v14 }
 0x28d   : > { %v4909_v18 = vadd.f32 %v4908_v40, %v4891_v49 }
 0x28e   : > { %v4941_v6 = vpop.f32.mrf.mxu3 }
 0x28f   : > { %v4942_v17 = vadd.f32 %v4941_v6, %v4924_v0 }
 0x290   : > { %v4910_v57 = vpop.f32.mrf.mxu1 }
 0x292   : > { %v4892_v29 = vpop.f32.mrf.mxu0  ;;  %v4926_v56 = vpop.f32.mrf.mxu2 }
 0x293   : > { %v4927_v26 = vadd.f32 %v4926_v56, %v4909_v18 }
 0x296   : > { %v4944_v41 = vpop.f32.mrf.mxu3 }
 0x297   : > { %v4945_v1 = vadd.f32 %v4944_v41, %v4927_v26 }
 0x298   : > { %v4975_v39 = vpop.f32.mrf.mxu1 }
 0x29a   : > { %v4957_v60 = vpop.f32.mrf.mxu0  ;;  %v4928_v38 = vpop.f32.mrf.mxu2 }
 0x29b   : > { %v4958_v19 = vadd.f32 %v4957_v60, %v4940_v9 }
 0x29d   : > { %v4976_v37 = vadd.f32 %v4975_v39, %v4958_v19 }
 0x29e   : > { %v4946_v3 = vpop.f32.mrf.mxu3 }
 0x2a0   : > { %v4977_v44 = vpop.f32.mrf.mxu1 }
 0x2a2   : > { %v4959_v23 = vpop.f32.mrf.mxu0  ;;  %v4993_v47 = vpop.f32.mrf.mxu2 }
 0x2a3   : > { %v4994_v36 = vadd.f32 %v4993_v47, %v4976_v37  ;;  %v4960_v32 = vadd.f32 %v4959_v23, %v4942_v17 }
 0x2a5   : > { %v4978_v62 = vadd.f32 %v4977_v44, %v4960_v32 }
 0x2a6   : > { %v5011_v13 = vpop.f32.mrf.mxu3 }
 0x2a7   : > { %v5012_v7 = vadd.f32 %v5011_v13, %v4994_v36 }
 0x2a8   : > { %v4980_v20 = vpop.f32.mrf.mxu1 }
 0x2aa   : > { %v4962_v63 = vpop.f32.mrf.mxu0  ;;  %v4995_v46 = vpop.f32.mrf.mxu2 }
 0x2ab   : > { %v4963_v30 = vadd.f32 %v4962_v63, %v4945_v1  ;;  %v4996_v21 = vadd.f32 %v4995_v46, %v4978_v62 }
 0x2ad   : > { %v4981_v43 = vadd.f32 %v4980_v20, %v4963_v30 }
 0x2ae   : > { %v5013_v31 = vpop.f32.mrf.mxu3 }
 0x2af   : > { %v5014_v12 = vadd.f32 %v5013_v31, %v4996_v21 }
 0x2b0   : > { %v4982_v48 = vpop.f32.mrf.mxu1 }
 0x2b2   : > { %v4964_v54 = vpop.f32.mrf.mxu0  ;;  %v4998_v55 = vpop.f32.mrf.mxu2 }
 0x2b3   : > { %v4999_v35 = vadd.f32 %v4998_v55, %v4981_v43 }
 0x2b6   : > { %v5016_v52 = vpop.f32.mrf.mxu3 }
 0x2b7   : > { %v5017_v50 = vadd.f32 %v5016_v52, %v4999_v35 }
 0x2b8   : > { %v5047_v4 = vpop.f32.mrf.mxu1 }
 0x2ba   : > { %v5029_v53 = vpop.f32.mrf.mxu0  ;;  %v5000_v58 = vpop.f32.mrf.mxu2 }
 0x2bb   : > { %v5030_v2 = vadd.f32 %v5029_v53, %v5012_v7 }
 0x2bd   : > { %v5048_v11 = vadd.f32 %v5047_v4, %v5030_v2 }
 0x2be   : > { %v5018_v45 = vpop.f32.mrf.mxu3 }
 0x2bf   : > { %v5065_v28 = vadd.f32 %v5059_v10, %v5048_v11 }
 0x2c0   : > { %v5049_v5 = vpop.f32.mrf.mxu1 }
 0x2c1   : > { %v5074_v42 = vmax.f32 %v5065_v28, 0.0 }
 0x2c2   : > { %v5031_v22 = vpop.f32.mrf.mxu0  ;;  %v5034_v25 = vpop.f32.mrf.mxu2 }
 0x2c3   : > { %v5082_v34 = vpack.c.bf16 %v5074_v42, %v5074_v42  ;;  %v5032_v15 = vadd.f32 %v5031_v22, %v5014_v12  ;;  %v5035_v8 = vadd.f32 %v5034_v25, %v5017_v50 }
 0x2c5   : > { %5089 = vst.msk [vmem:[%s11462_s8 + $0x8] sm:$0xf] %vm5088_vm2, %v5082_v34  ;;  %v5050_v61 = vadd.f32 %v5049_v5, %v5032_v15 }
 0x2c6   : > { %v5052_v16 = vpop.f32.mrf.mxu3 }
 0x2c7   : > { %v5053_v40 = vadd.f32 %v5052_v16, %v5035_v8  ;;  %v5068_v6 = vadd.f32 %v5059_v10, %v5050_v61 }
 0x2c9   : > { %v5071_v29 = vadd.f32 %v5059_v10, %v5053_v40  ;;  %v5077_v56 = vmax.f32 %v5068_v6, 0.0 }
 0x2ca   : > { %v5036_v60 = vpop.f32.mrf.mxu2 }
 0x2cb   : > { %v5080_v57 = vmax.f32 %v5071_v29, 0.0  ;;  %v5084_v41 = vpack.c.bf16 %v5077_v56, %v5077_v56 }
 0x2cd   : > { %v5086_v38 = vpack.c.bf16 %v5080_v57, %v5080_v57  ;;  %5091 = vst.msk [vmem:[%s11462_s8 + $0x14] sm:$0xf] %vm5088_vm2, %v5084_v41 }
 0x2ce   : > { %v5054_v39 = vpop.f32.mrf.mxu3 }
 0x2cf   : > { %5094 = vst.msk [vmem:[%s11462_s8 + $0x20] sm:$0x3] %vm5093_vm3, %v5086_v38 }
 0x2d0 PF: > { %s14_s15 = sadd.s32 1, %s7774_s15  }
 0x2d1   : > { %p11_p4 = scmp.ge.s32.totalorder %s14_s15, 4  }
 0x2d3   :  { %13 = sbr.rel (!%p11_p4) target bundleno = 1 (0x1), region = 66 }

// kernel: model_forward.4
= control target key start
LH: loop header
LB: loop body
LE: loop exit
PB: predicated region body
PF: predicated region fallthrough
CT: control target
= control target key end

     0   :  { %s3664_s15 = smov 0   ;;  %s5255_s0 = inlined_call_operand.vmem [shape: bf16[2,10,640], index: 0, kind: input, shape index: {}]   ;;  %s5256_s1 = inlined_call_operand.vmem [shape: bf16[640,288], index: 1, kind: input, shape index: {}]   ;;  %s5257_s2 = inlined_call_operand.vmem [shape: bf16[640,288], index: 2, kind: input, shape index: {}]   ;;  %s5258_s3 = inlined_call_operand.vmem [shape: f32[1,288], index: 3, kind: input, shape index: {}]   ;;  %s5259_s4 = inlined_call_operand.vmem [shape: bf16[2,9,288], index: 4, kind: output, shape index: {}]  }
   0x1 LB: > { %s2387_s16 = sadd.s32 4294967295, %s3637_s15   ;;  %p2391_p0 = scmp.ge.s32.totalorder %s3637_s15, 1  ;;  %s3637_s15 = sphi %s3664_s15, %s14_s15  }
   0x2   : > { %p162_p1 = scmp.lt.s32.totalorder %s3637_s15, 3 }
   0x4   : > { %p163_p2 = pnand %p2391_p0, %p162_p1 }
   0x5   : > { %p188_p3 = scmp.lt.s32.totalorder (!%p163_p2), %s2387_s16, 1 }
   0x6   : > { %166 = sbr.rel (%p163_p2) target bundleno = 415 (0x19f), region = 36 }
   0xb   : > { %v2500_v0 = vld [vmem:[%s5257_s2 + $0xa8] sm:$0xf]  ;;  %v3518_v1 = vld [vmem:[%s5257_s2 + $0xb0] sm:$0xf0]  ;;  %v2488_v11 = vld [vmem:[%s5257_s2 + $0x90] sm:$0xf] }
   0xc   : > { %v2596_v2 = vld [vmem:[%s5257_s2 + $0x168] sm:$0xf]  ;;  %v2501_v3 = vor.u32 %v3518_v1, %v2500_v0  ;;  %v3542_v4 = vld [vmem:[%s5257_s2 + $0x170] sm:$0xf0]  ;;  %v3515_v13 = vld [vmem:[%s5257_s2 + $0x98] sm:$0xf0] }
   0xd   : > { %v2692_v5 = vld [vmem:[%s5257_s2 + $0x228] sm:$0xf]  ;;  %v3566_v6 = vld [vmem:[%s5257_s2 + $0x230] sm:$0xf0]  ;;  %v2597_v7 = vor.u32 %v3542_v4, %v2596_v2  ;;  %v2584_v14 = vld [vmem:[%s5257_s2 + $0x150] sm:$0xf]  ;;  %v2489_v16 = vor.u32 %v3515_v13, %v2488_v11 }
   0xe   : > { %v2693_v8 = vor.u32 %v3566_v6, %v2692_v5  ;;  %v2788_v9 = vld [vmem:[%s5257_s2 + $0x2e8] sm:$0xf]  ;;  %v3590_v10 = vld [vmem:[%s5257_s2 + $0x2f0] sm:$0xf0]  ;;  %1226 = vmatpush.bf16.msra.mxu0 %v2501_v3  ;;  %v3539_v15 = vld [vmem:[%s5257_s2 + $0x158] sm:$0xf0] }
   0xf   : > { %v2789_v12 = vor.u32 %v3590_v10, %v2788_v9  ;;  %1240 = vmatpush.bf16.msra.mxu1 %v2597_v7  ;;  %v2585_v17 = vor.u32 %v3539_v15, %v2584_v14  ;;  %v2680_v18 = vld [vmem:[%s5257_s2 + $0x210] sm:$0xf]  ;;  %v3563_v19 = vld [vmem:[%s5257_s2 + $0x218] sm:$0xf0]  ;;  %v2476_v23 = vld [vmem:[%s5257_s2 + $0x78] sm:$0xf] }
  0x10   : > { %1254 = vmatpush.bf16.msra.mxu2 %v2693_v8  ;;  %v2776_v20 = vld [vmem:[%s5257_s2 + $0x2d0] sm:$0xf]  ;;  %v2681_v21 = vor.u32 %v3563_v19, %v2680_v18  ;;  %v3587_v22 = vld [vmem:[%s5257_s2 + $0x2d8] sm:$0xf0]  ;;  %v3512_v24 = vld [vmem:[%s5257_s2 + $0x80] sm:$0xf0] }
  0x11   : > { %1268 = vmatpush.bf16.msra.mxu3 %v2789_v12  ;;  %v2777_v25 = vor.u32 %v3587_v22, %v2776_v20  ;;  %v2572_v26 = vld [vmem:[%s5257_s2 + $0x138] sm:$0xf]  ;;  %v3536_v27 = vld [vmem:[%s5257_s2 + $0x140] sm:$0xf0]  ;;  %v2477_v29 = vor.u32 %v3512_v24, %v2476_v23  ;;  %v2464_v35 = vld [vmem:[%s5257_s2 + $0x60] sm:$0xf] }
  0x12   : > { %v2668_v28 = vld [vmem:[%s5257_s2 + $0x1f8] sm:$0xf]  ;;  %1227 = vmatpush.bf16.msra.mxu0 %v2489_v16  ;;  %v3560_v30 = vld [vmem:[%s5257_s2 + $0x200] sm:$0xf0]  ;;  %v2573_v33 = vor.u32 %v3536_v27, %v2572_v26  ;;  %v3509_v36 = vld [vmem:[%s5257_s2 + $0x68] sm:$0xf0] }
  0x13   : > { %v2764_v31 = vld [vmem:[%s5257_s2 + $0x2b8] sm:$0xf]  ;;  %v3584_v32 = vld [vmem:[%s5257_s2 + $0x2c0] sm:$0xf0]  ;;  %1241 = vmatpush.bf16.msra.mxu1 %v2585_v17  ;;  %v2669_v34 = vor.u32 %v3560_v30, %v2668_v28  ;;  %v2560_v37 = vld [vmem:[%s5257_s2 + $0x120] sm:$0xf]  ;;  %v2465_v44 = vor.u32 %v3509_v36, %v2464_v35 }
  0x14   : > { %1255 = vmatpush.bf16.msra.mxu2 %v2681_v21  ;;  %v2765_v38 = vor.u32 %v3584_v32, %v2764_v31  ;;  %v3533_v39 = vld [vmem:[%s5257_s2 + $0x128] sm:$0xf0]  ;;  %v2656_v40 = vld [vmem:[%s5257_s2 + $0x1e0] sm:$0xf]  ;;  %v2452_v47 = vld [vmem:[%s5257_s2 + $0x48] sm:$0xf] }
  0x15   : > { %1269 = vmatpush.bf16.msra.mxu3 %v2777_v25  ;;  %v3557_v41 = vld [vmem:[%s5257_s2 + $0x1e8] sm:$0xf0]  ;;  %v2752_v42 = vld [vmem:[%s5257_s2 + $0x2a0] sm:$0xf]  ;;  %v2561_v45 = vor.u32 %v3533_v39, %v2560_v37  ;;  %v3506_v48 = vld [vmem:[%s5257_s2 + $0x50] sm:$0xf0] }
  0x16   : > { %v3581_v43 = vld [vmem:[%s5257_s2 + $0x2a8] sm:$0xf0]  ;;  %1228 = vmatpush.bf16.msra.mxu0 %v2477_v29  ;;  %v2657_v46 = vor.u32 %v3557_v41, %v2656_v40  ;;  %v2548_v49 = vld [vmem:[%s5257_s2 + $0x108] sm:$0xf]  ;;  %v3530_v51 = vld [vmem:[%s5257_s2 + $0x110] sm:$0xf0]  ;;  %v2453_v56 = vor.u32 %v3506_v48, %v2452_v47 }
  0x17   : > { %1242 = vmatpush.bf16.msra.mxu1 %v2573_v33  ;;  %v2753_v50 = vor.u32 %v3581_v43, %v2752_v42  ;;  %v2644_v52 = vld [vmem:[%s5257_s2 + $0x1c8] sm:$0xf]  ;;  %v3554_v53 = vld [vmem:[%s5257_s2 + $0x1d0] sm:$0xf0]  ;;  %v2549_v57 = vor.u32 %v3530_v51, %v2548_v49  ;;  %v2440_v59 = vld [vmem:[%s5257_s2 + $0x30] sm:$0xf] }
  0x18   : > { %1256 = vmatpush.bf16.msra.mxu2 %v2669_v34  ;;  %v2740_v54 = vld [vmem:[%s5257_s2 + $0x288] sm:$0xf]  ;;  %v3578_v55 = vld [vmem:[%s5257_s2 + $0x290] sm:$0xf0]  ;;  %v2645_v58 = vor.u32 %v3554_v53, %v2644_v52  ;;  %v3503_v60 = vld [vmem:[%s5257_s2 + $0x38] sm:$0xf0] }
  0x19   : > { %1270 = vmatpush.bf16.msra.mxu3 %v2765_v38  ;;  %v2536_v61 = vld [vmem:[%s5257_s2 + $0xf0] sm:$0xf]  ;;  %v2741_v62 = vor.u32 %v3578_v55, %v2740_v54  ;;  %v3527_v63 = vld [vmem:[%s5257_s2 + $0xf8] sm:$0xf0]  ;;  %v2441_v4 = vor.u32 %v3503_v60, %v2440_v59  ;;  %v2428_v7 = vld [vmem:[%s5257_s2 + $0x18] sm:$0xf] }
  0x1a   : > { %1229 = vmatpush.bf16.msra.mxu0 %v2465_v44  ;;  %v2632_v0 = vld [vmem:[%s5257_s2 + $0x1b0] sm:$0xf]  ;;  %v3551_v1 = vld [vmem:[%s5257_s2 + $0x1b8] sm:$0xf0]  ;;  %v2537_v5 = vor.u32 %v3527_v63, %v2536_v61  ;;  %v3500_v8 = vld [vmem:[%s5257_s2 + $0x20] sm:$0xf0] }
  0x1b   : > { %1243 = vmatpush.bf16.msra.mxu1 %v2561_v45  ;;  %v2728_v2 = vld [vmem:[%s5257_s2 + $0x270] sm:$0xf]  ;;  %v3575_v3 = vld [vmem:[%s5257_s2 + $0x278] sm:$0xf0]  ;;  %v2633_v6 = vor.u32 %v3551_v1, %v2632_v0  ;;  %v2524_v9 = vld [vmem:[%s5257_s2 + $0xd8] sm:$0xf]  ;;  %v2429_v16 = vor.u32 %v3500_v8, %v2428_v7 }
  0x1c   : > { %1257 = vmatpush.bf16.msra.mxu2 %v2657_v46  ;;  %v2729_v10 = vor.u32 %v3575_v3, %v2728_v2  ;;  %v3524_v11 = vld [vmem:[%s5257_s2 + $0xe0] sm:$0xf0]  ;;  %v2620_v12 = vld [vmem:[%s5257_s2 + $0x198] sm:$0xf]  ;;  %v2416_v17 = vld [vmem:[%s5257_s2] sm:$0xf] }
  0x1d   : > { %1271 = vmatpush.bf16.msra.mxu3 %v2753_v50  ;;  %v3548_v13 = vld [vmem:[%s5257_s2 + $0x1a0] sm:$0xf0]  ;;  %v2716_v14 = vld [vmem:[%s5257_s2 + $0x258] sm:$0xf]  ;;  %v3497_v18 = vld [vmem:[%s5257_s2 + $0x8] sm:$0xf0]  ;;  %v2525_v19 = vor.u32 %v3524_v11, %v2524_v9 }
  0x1e   : > { %1230 = vmatpush.bf16.msra.mxu0 %v2453_v56  ;;  %v3572_v15 = vld [vmem:[%s5257_s2 + $0x260] sm:$0xf0]  ;;  %v2621_v20 = vor.u32 %v3548_v13, %v2620_v12  ;;  %v2512_v21 = vld [vmem:[%s5257_s2 + $0xc0] sm:$0xf]  ;;  %v3521_v22 = vld [vmem:[%s5257_s2 + $0xc8] sm:$0xf0]  ;;  %v2417_v31 = vor.u32 %v3497_v18, %v2416_v17 }
  0x1f   : > { %1244 = vmatpush.bf16.msra.mxu1 %v2549_v57  ;;  %v2608_v23 = vld [vmem:[%s5257_s2 + $0x180] sm:$0xf]  ;;  %v2717_v24 = vor.u32 %v3572_v15, %v2716_v14  ;;  %v3545_v25 = vld [vmem:[%s5257_s2 + $0x188] sm:$0xf0]  ;;  %v2884_v28 = vld [vmem:[%s5257_s2 + $0x3a8] sm:$0xf]  ;;  %v2513_v35 = vor.u32 %v3521_v22, %v2512_v21 }
  0x20   : > { %1258 = vmatpush.bf16.msra.mxu2 %v2645_v58  ;;  %v2704_v26 = vld [vmem:[%s5257_s2 + $0x240] sm:$0xf]  ;;  %v3569_v27 = vld [vmem:[%s5257_s2 + $0x248] sm:$0xf0]  ;;  %v3614_v29 = vld [vmem:[%s5257_s2 + $0x3b0] sm:$0xf0]  ;;  %v2609_v36 = vor.u32 %v3545_v25, %v2608_v23 }
  0x21   : > { %1272 = vmatpush.bf16.msra.mxu3 %v2741_v62  ;;  %v3517_v30 = vld [vmem:[%s5257_s2 + $0xac] sm:$0xf]  ;;  %v2502_v32 = vld [vmem:[%s5257_s2 + $0xb4] sm:$0xf0]  ;;  %v2705_v39 = vor.u32 %v3569_v27, %v2704_v26  ;;  %v2885_v40 = vor.u32 %v3614_v29, %v2884_v28  ;;  %v2872_v43 = vld [vmem:[%s5257_s2 + $0x390] sm:$0xf] }
  0x22   : > { %1231 = vmatpush.bf16.msra.mxu0 %v2441_v4  ;;  %v3541_v33 = vld [vmem:[%s5257_s2 + $0x16c] sm:$0xf]  ;;  %v2598_v34 = vld [vmem:[%s5257_s2 + $0x174] sm:$0xf0]  ;;  %v2505_v41 = vor.u32 %v3517_v30, %v2502_v32  ;;  %v3611_v44 = vld [vmem:[%s5257_s2 + $0x398] sm:$0xf0] }
  0x23   : > { %1245 = vmatpush.bf16.msra.mxu1 %v2537_v5  ;;  %v3565_v37 = vld [vmem:[%s5257_s2 + $0x22c] sm:$0xf]  ;;  %v2694_v38 = vld [vmem:[%s5257_s2 + $0x234] sm:$0xf0]  ;;  %v2601_v42 = vor.u32 %v3541_v33, %v2598_v34  ;;  %v3514_v45 = vld [vmem:[%s5257_s2 + $0x94] sm:$0xf]  ;;  %v2873_v52 = vor.u32 %v3611_v44, %v2872_v43 }
  0x24   : > { %1259 = vmatpush.bf16.msra.mxu2 %v2633_v6  ;;  %v2697_v46 = vor.u32 %v3565_v37, %v2694_v38  ;;  %v2490_v47 = vld [vmem:[%s5257_s2 + $0x9c] sm:$0xf0]  ;;  %v3538_v48 = vld [vmem:[%s5257_s2 + $0x154] sm:$0xf]  ;;  %v2860_v53 = vld [vmem:[%s5257_s2 + $0x378] sm:$0xf] }
  0x25   : > { %1273 = vmatpush.bf16.msra.mxu3 %v2729_v10  ;;  %v2586_v49 = vld [vmem:[%s5257_s2 + $0x15c] sm:$0xf0]  ;;  %v3562_v50 = vld [vmem:[%s5257_s2 + $0x214] sm:$0xf]  ;;  %v3608_v54 = vld [vmem:[%s5257_s2 + $0x380] sm:$0xf0]  ;;  %v2493_v56 = vor.u32 %v3514_v45, %v2490_v47 }
  0x26   : > { %1232 = vmatpush.bf16.msra.mxu0 %v2429_v16  ;;  %v2682_v51 = vld [vmem:[%s5257_s2 + $0x21c] sm:$0xf0]  ;;  %v3511_v55 = vld [vmem:[%s5257_s2 + $0x7c] sm:$0xf]  ;;  %v2589_v57 = vor.u32 %v3538_v48, %v2586_v49  ;;  %v2478_v58 = vld [vmem:[%s5257_s2 + $0x84] sm:$0xf0]  ;;  %v2861_v2 = vor.u32 %v3608_v54, %v2860_v53 }
  0x27   : > { %1246 = vmatpush.bf16.msra.mxu1 %v2525_v19  ;;  %v3535_v59 = vld [vmem:[%s5257_s2 + $0x13c] sm:$0xf]  ;;  %s5261_s16 = smov (!%p188_p3, %s2387_s16), 1  ;;  %v2685_v60 = vor.u32 %v3562_v50, %v2682_v51  ;;  %v2574_v61 = vld [vmem:[%s5257_s2 + $0x144] sm:$0xf0]  ;;  %v2481_v6 = vor.u32 %v3511_v55, %v2478_v58  ;;  %vm2317_vm0 = vcmask 1040384  }
  0x28   : > { %1260 = vmatpush.bf16.msra.mxu2 %v2621_v20  ;;  %v3559_v62 = vld [vmem:[%s5257_s2 + $0x1fc] sm:$0xf]  ;;  %v2670_v63 = vld [vmem:[%s5257_s2 + $0x204] sm:$0xf0]  ;;  %v2848_v0 = vld [vmem:[%s5257_s2 + $0x360] sm:$0xf]  ;;  %v2577_v7 = vor.u32 %v3535_v59, %v2574_v61 }
  0x29   : > { %1274 = vmatpush.bf16.msra.mxu3 %v2717_v24  ;;  %v3605_v1 = vld [vmem:[%s5257_s2 + $0x368] sm:$0xf0]  ;;  %s3621_s29 = smul.u32 40, %s5261_s16  ;;  %v3508_v3 = vld [vmem:[%s5257_s2 + $0x64] sm:$0xf]  ;;  %v2673_v11 = vor.u32 %v3559_v62, %v2670_v63  ;;  %vm2320_vm2 = vcmask 1044484  }
  0x2a   : > { %1233 = vmatpush.bf16.msra.mxu0 %v2417_v31  ;;  %v2466_v4 = vld [vmem:[%s5257_s2 + $0x6c] sm:$0xf0]  ;;  %v3532_v5 = vld [vmem:[%s5257_s2 + $0x124] sm:$0xf]  ;;  %v2836_v16 = vld [vmem:[%s5257_s2 + $0x348] sm:$0xf]  ;;  %v2849_v21 = vor.u32 %v3605_v1, %v2848_v0 }
  0x2b   : > { %1247 = vmatpush.bf16.msra.mxu1 %v2513_v35  ;;  %v2562_v8 = vld [vmem:[%s5257_s2 + $0x12c] sm:$0xf0]  ;;  %v3556_v9 = vld [vmem:[%s5257_s2 + $0x1e4] sm:$0xf]  ;;  %s3970_s20 = scalar_lea.vmem %s5255_s0, %s3621_s29  ;;  %v3602_v17 = vld [vmem:[%s5257_s2 + $0x350] sm:$0xf0]  ;;  %v2469_v22 = vor.u32 %v3508_v3, %v2466_v4 }
  0x2c   : > { %1261 = vmatpush.bf16.msra.mxu2 %v2609_v36  ;;  %v2658_v10 = vld [vmem:[%s5257_s2 + $0x1ec] sm:$0xf0]  ;;  %v2396_v12 = vld [vmem:[%s3970_s20] sm:$0xf]  ;;  %v3618_v13 = vld [vmem:[%s3970_s20 + $0x10] sm:$0x10]  ;;  %v2565_v29 = vor.u32 %v3532_v5, %v2562_v8  ;;  %v2837_v45 = vor.u32 %v3602_v17, %v2836_v16 }
  0x2d   : > { %1275 = vmatpush.bf16.msra.mxu3 %v2705_v39  ;;  %v2404_v14 = vld [vmem:[%s3970_s20 + $0x8] sm:$0xf]  ;;  %v3975_v15 = vor.u32 %v3618_v13, %v2396_v12  ;;  %v3619_v18 = vld [vmem:[%s3970_s20 + $0x18] sm:$0x10]  ;;  %v3617_v19 = vld [vmem:[%s3970_s20 + $0xc] sm:$0xf]  ;;  %v2661_v35 = vor.u32 %v3556_v9, %v2658_v10 }
  0x2e   : > { %1282 = vmatpush.bf16.msrb.mxu0 %v2885_v40  ;;  %v2406_v20 = vld [vmem:[%s3970_s20 + $0x1c] sm:$0x10]  ;;  %v3505_v23 = vld [vmem:[%s5257_s2 + $0x4c] sm:$0xf]  ;;  %v2454_v24 = vld [vmem:[%s5257_s2 + $0x54] sm:$0xf0]  ;;  %v3992_v25 = vor.u32 %v3619_v18, %v2404_v14 }
  0x2f   : > { %1296 = vmatpush.bf16.msrb.mxu1 %v2505_v41  ;;  %v3994_v26 = vor.u32 %v3617_v19, %v2406_v20  ;;  %v3616_v27 = vld [vmem:[%s3970_s20 + $0x4] sm:$0xf]  ;;  %v2398_v28 = vld [vmem:[%s3970_s20 + $0x14] sm:$0x10]  ;;  %v547_v30 = vshrl.u32 %v3975_v15, 16  ;;  %v549_v31 = vshll.u32 %v3975_v15, 16  ;;  %v2457_v50 = vor.u32 %v3505_v23, %v2454_v24 }
  0x30   : > { %1310 = vmatpush.bf16.msrb.mxu2 %v2601_v42  ;;  %v3529_v32 = vld [vmem:[%s5257_s2 + $0x10c] sm:$0xf]  ;;  %v2550_v33 = vld [vmem:[%s5257_s2 + $0x114] sm:$0xf0]  ;;  %v4006_v34 = vor.u32 %v3616_v27, %v2398_v28  ;;  %v561_v37 = vshrl.u32 %v3992_v25, 16  ;;  %v563_v38 = vshll.u32 %v3992_v25, 16 }
  0x31   : > { %1324 = vmatpush.bf16.msrb.mxu3 %v2697_v46  ;;  %v3553_v36 = vld [vmem:[%s5257_s2 + $0x1cc] sm:$0xf]  ;;  %v570_v39 = vshll.u32 %v3994_v26, 16  ;;  %v551_v40 = vrot.slane %v549_v31, 1  ;;  %v2646_v41 = vld [vmem:[%s5257_s2 + $0x1d4] sm:$0xf0]  ;;  %v2553_v51 = vor.u32 %v3529_v32, %v2550_v33 }
  0x32   : > { %1283 = vmatpush.bf16.msrb.mxu0 %v2873_v52  ;;  %v568_v42 = vshrl.u32 %v3994_v26, 16  ;;  %v554_v43 = vshrl.u32 %v4006_v34, 16  ;;  %v556_v44 = vshll.u32 %v4006_v34, 16  ;;  %v565_v46 = vrot.slane %v563_v38, 1  ;;  %v2824_v48 = vld [vmem:[%s5257_s2 + $0x330] sm:$0xf] }
  0x33   : > { %1297 = vmatpush.bf16.msrb.mxu1 %v2493_v56  ;;  %v572_v47 = vrot.slane %v570_v39, 1  ;;  %v4023_v49 = vor.u32 %v551_v40, %v547_v30  ;;  %v3599_v52 = vld [vmem:[%s5257_s2 + $0x338] sm:$0xf0]  ;;  %v3502_v53 = vld [vmem:[%s5257_s2 + $0x34] sm:$0xf]  ;;  %v2649_v55 = vor.u32 %v3553_v36, %v2646_v41  ;;  %s3622_s25 = smul.u32 24, %s5261_s16 }
  0x34   : > { %1311 = vmatpush.bf16.msrb.mxu2 %v2589_v57  ;;  %v558_v54 = vrot.slane %v556_v44, 1  ;;  %v4031_v56 = vor.u32 %v565_v46, %v561_v37  ;;  %v2442_v57 = vld [vmem:[%s5257_s2 + $0x3c] sm:$0xf0]  ;;  %v3526_v58 = vld [vmem:[%s5257_s2 + $0xf4] sm:$0xf]  ;;  %v2825_v0 = vor.u32 %v3599_v52, %v2824_v48  ;;  %vm2315_vm7 = vcmask 257024  }
  0x35   : > { %1325 = vmatpush.bf16.msrb.mxu3 %v2685_v60  ;;  %v2538_v59 = vld [vmem:[%s5257_s2 + $0xfc] sm:$0xf0]  ;;  %1234 = vmatmul.bf16.vlgmr.msra.gmra.mxu0 %v4023_v49  ;;  %v4043_v60 = vor.u32 %v572_v47, %v568_v42  ;;  %v3550_v61 = vld [vmem:[%s5257_s2 + $0x1b4] sm:$0xf]  ;;  %v2812_v1 = vld [vmem:[%s5257_s2 + $0x318] sm:$0xf]  ;;  %v2445_v3 = vor.u32 %v3502_v53, %v2442_v57  ;;  %s5235_s27 = scalar_lea.vmem %s5259_s4, %s3622_s25 }
  0x36   : > { %1284 = vmatpush.bf16.msrb.mxu0 %v2861_v2  ;;  %v2634_v62 = vld [vmem:[%s5257_s2 + $0x1bc] sm:$0xf0]  ;;  %v4051_v63 = vor.u32 %v558_v54, %v554_v43  ;;  %1262 = vmatmul.bf16.vlgmr.msra.gmra.mxu2 %v4031_v56  ;;  %v3596_v2 = vld [vmem:[%s5257_s2 + $0x320] sm:$0xf0]  ;;  %v2541_v4 = vor.u32 %v3526_v58, %v2538_v59  ;;  %v3499_v5 = vld [vmem:[%s5257_s2 + $0x1c] sm:$0xf] }
  0x37   : > { %1298 = vmatpush.bf16.msrb.mxu1 %v2481_v6  ;;  %v2430_v6 = vld [vmem:[%s5257_s2 + $0x24] sm:$0xf0]  ;;  %v2637_v8 = vor.u32 %v3550_v61, %v2634_v62  ;;  %v2412_v10 = vld [vmem:[%s3970_s20 + $0x10] sm:$0xf]  ;;  %1276 = vmatmul.bf16.vlgmr.msra.gmra.mxu3 %v4043_v60  ;;  %v3547_v12 = vld [vmem:[%s5257_s2 + $0x19c] sm:$0xf]  ;;  %v2813_v17 = vor.u32 %v3596_v2, %v2812_v1 }
  0x38   : > { %1312 = vmatpush.bf16.msrb.mxu2 %v2577_v7  ;;  %v3523_v7 = vld [vmem:[%s5257_s2 + $0xdc] sm:$0xf]  ;;  %1248 = vmatmul.bf16.vlgmr.msra.gmra.mxu1 %v4051_v63  ;;  %v2526_v9 = vld [vmem:[%s5257_s2 + $0xe4] sm:$0xf0]  ;;  %v2800_v14 = vld [vmem:[%s5257_s2 + $0x300] sm:$0xf] }
  0x39   : > { %1326 = vmatpush.bf16.msrb.mxu3 %v2673_v11  ;;  %v3620_v11 = vld [vmem:[%s3970_s20 + $0x20] sm:$0x10]  ;;  %v2622_v13 = vld [vmem:[%s5257_s2 + $0x1a4] sm:$0xf0]  ;;  %v3593_v18 = vld [vmem:[%s5257_s2 + $0x308] sm:$0xf0] }
  0x3a   : > { %1285 = vmatpush.bf16.msrb.mxu0 %v2849_v21  ;;  %v4085_v16 = vor.u32 %v3620_v11, %v2412_v10  ;;  %v3496_v19 = vld [vmem:[%s5257_s2 + $0x4] sm:$0xf]  ;;  %v2418_v20 = vld [vmem:[%s5257_s2 + $0xc] sm:$0xf0]  ;;  %v2433_v21 = vor.u32 %v3499_v5, %v2430_v6  ;;  %v2625_v28 = vor.u32 %v3547_v12, %v2622_v13  ;;  %v3589_v31 = vld [vmem:[%s5257_s2 + $0x2ec] sm:$0xf]  ;;  %v2801_v36 = vor.u32 %v3593_v18, %v2800_v14 }
  0x3b   : > { %1299 = vmatpush.bf16.msrb.mxu1 %v2469_v22  ;;  %v2529_v22 = vor.u32 %v3523_v7, %v2526_v9  ;;  %v3520_v23 = vld [vmem:[%s5257_s2 + $0xc4] sm:$0xf]  ;;  %v2514_v24 = vld [vmem:[%s5257_s2 + $0xcc] sm:$0xf0]  ;;  %v2790_v32 = vld [vmem:[%s5257_s2 + $0x2f4] sm:$0xf0]  ;;  %v2421_v41 = vor.u32 %v3496_v19, %v2418_v20 }
  0x3c   : > { %1313 = vmatpush.bf16.msrb.mxu2 %v2565_v29  ;;  %v577_v27 = vshll.u32 %v4085_v16, 16  ;;  %v3544_v29 = vld [vmem:[%s5257_s2 + $0x184] sm:$0xf]  ;;  %v2610_v30 = vld [vmem:[%s5257_s2 + $0x18c] sm:$0xf0]  ;;  %v575_v39 = vshrl.u32 %v4085_v16, 16  ;;  %v2517_v42 = vor.u32 %v3520_v23, %v2514_v24  ;;  %v2793_v46 = vor.u32 %v3589_v31, %v2790_v32 }
  0x3d   : > { %1327 = vmatpush.bf16.msrb.mxu3 %v2661_v35  ;;  %v3613_v33 = vld [vmem:[%s5257_s2 + $0x3ac] sm:$0xf]  ;;  %v2886_v35 = vld [vmem:[%s5257_s2 + $0x3b4] sm:$0xf0]  ;;  %v2508_v37 = vld [vmem:[%s5257_s2 + $0xb0] sm:$0xf] }
  0x3e   : > { %1286 = vmatpush.bf16.msrb.mxu0 %v2837_v45  ;;  %v3519_v38 = vld [vmem:[%s5257_s2 + $0xb8] sm:$0xf0]  ;;  %v579_v40 = vrot.slane %v577_v27, 1  ;;  %v2604_v43 = vld [vmem:[%s5257_s2 + $0x170] sm:$0xf]  ;;  %v2613_v45 = vor.u32 %v3544_v29, %v2610_v30  ;;  %v2889_v47 = vor.u32 %v3613_v33, %v2886_v35  ;;  %vm2327_vm8 = vcmask 253952  }
  0x3f   : > { %1300 = vmatpush.bf16.msrb.mxu1 %v2457_v50  ;;  %v3543_v44 = vld [vmem:[%s5257_s2 + $0x178] sm:$0xf0]  ;;  %v2509_v48 = vor.u32 %v3519_v38, %v2508_v37  ;;  %v3586_v50 = vld [vmem:[%s5257_s2 + $0x2d4] sm:$0xf]  ;;  %v2496_v57 = vld [vmem:[%s5257_s2 + $0x98] sm:$0xf] }
  0x40   : > { %1314 = vmatpush.bf16.msrb.mxu2 %v2553_v51  ;;  %v2778_v51 = vld [vmem:[%s5257_s2 + $0x2dc] sm:$0xf0]  ;;  %v3610_v52 = vld [vmem:[%s5257_s2 + $0x394] sm:$0xf]  ;;  %v2605_v53 = vor.u32 %v3543_v44, %v2604_v43  ;;  %v4143_v54 = vor.u32 %v579_v40, %v575_v39  ;;  %v3516_v58 = vld [vmem:[%s5257_s2 + $0xa0] sm:$0xf0] }
  0x41   : > { %1328 = vmatpush.bf16.msrb.mxu3 %v2649_v55  ;;  %v2874_v55 = vld [vmem:[%s5257_s2 + $0x39c] sm:$0xf0]  ;;  %v2592_v59 = vld [vmem:[%s5257_s2 + $0x158] sm:$0xf]  ;;  %v3540_v61 = vld [vmem:[%s5257_s2 + $0x160] sm:$0xf0]  ;;  %v2781_v62 = vor.u32 %v3586_v50, %v2778_v51  ;;  %v2497_v1 = vor.u32 %v3516_v58, %v2496_v57 }
  0x42   : > { %1287 = vmatpush.bf16.msrb.mxu0 %v2825_v0  ;;  %v2877_v0 = vor.u32 %v3610_v52, %v2874_v55  ;;  %v3583_v2 = vld [vmem:[%s5257_s2 + $0x2bc] sm:$0xf]  ;;  %v2593_v5 = vor.u32 %v3540_v61, %v2592_v59  ;;  %v2862_v6 = vld [vmem:[%s5257_s2 + $0x384] sm:$0xf0]  ;;  %v2484_v7 = vld [vmem:[%s5257_s2 + $0x80] sm:$0xf] }
  0x43   : > { %1301 = vmatpush.bf16.msrb.mxu1 %v2445_v3  ;;  %v2766_v3 = vld [vmem:[%s5257_s2 + $0x2c4] sm:$0xf0]  ;;  %v2580_v9 = vld [vmem:[%s5257_s2 + $0x140] sm:$0xf]  ;;  %v3537_v10 = vld [vmem:[%s5257_s2 + $0x148] sm:$0xf0] }
  0x44   : > { %1315 = vmatpush.bf16.msrb.mxu2 %v2541_v4  ;;  %v3607_v4 = vld [vmem:[%s5257_s2 + $0x37c] sm:$0xf]  ;;  %v2769_v11 = vor.u32 %v3583_v2, %v2766_v3  ;;  %v3580_v14 = vld [vmem:[%s5257_s2 + $0x2a4] sm:$0xf]  ;;  %v2581_v19 = vor.u32 %v3537_v10, %v2580_v9  ;;  %v2850_v20 = vld [vmem:[%s5257_s2 + $0x36c] sm:$0xf0] }
  0x45   : > { %1329 = vmatpush.bf16.msrb.mxu3 %v2637_v8  ;;  %v3513_v8 = vld [vmem:[%s5257_s2 + $0x88] sm:$0xf0]  ;;  %v2865_v12 = vor.u32 %v3607_v4, %v2862_v6  ;;  %v3604_v18 = vld [vmem:[%s5257_s2 + $0x364] sm:$0xf]  ;;  %v2568_v23 = vld [vmem:[%s5257_s2 + $0x128] sm:$0xf] }
  0x46   : > { %1288 = vmatpush.bf16.msrb.mxu0 %v2813_v17  ;;  %v2485_v13 = vor.u32 %v3513_v8, %v2484_v7  ;;  %v2754_v17 = vld [vmem:[%s5257_s2 + $0x2ac] sm:$0xf0]  ;;  %v3534_v24 = vld [vmem:[%s5257_s2 + $0x130] sm:$0xf0]  ;;  %v3577_v30 = vld [vmem:[%s5257_s2 + $0x28c] sm:$0xf] }
  0x47   : > { %1302 = vmatpush.bf16.msrb.mxu1 %v2433_v21  ;;  %v2472_v21 = vld [vmem:[%s5257_s2 + $0x68] sm:$0xf]  ;;  %v2757_v27 = vor.u32 %v3580_v14, %v2754_v17  ;;  %v2742_v31 = vld [vmem:[%s5257_s2 + $0x294] sm:$0xf0]  ;;  %v3601_v32 = vld [vmem:[%s5257_s2 + $0x34c] sm:$0xf]  ;;  %v2569_v33 = vor.u32 %v3534_v24, %v2568_v23 }
  0x48   : > { %1316 = vmatpush.bf16.msrb.mxu2 %v2529_v22  ;;  %v3510_v22 = vld [vmem:[%s5257_s2 + $0x70] sm:$0xf0]  ;;  %v2838_v35 = vld [vmem:[%s5257_s2 + $0x354] sm:$0xf0]  ;;  %v3507_v37 = vld [vmem:[%s5257_s2 + $0x58] sm:$0xf0]  ;;  %v2745_v40 = vor.u32 %v3577_v30, %v2742_v31 }
  0x49   : > { %1330 = vmatpush.bf16.msrb.mxu3 %v2625_v28  ;;  %v2853_v28 = vor.u32 %v3604_v18, %v2850_v20  ;;  %v2473_v29 = vor.u32 %v3510_v22, %v2472_v21  ;;  %v2556_v38 = vld [vmem:[%s5257_s2 + $0x110] sm:$0xf]  ;;  %v3531_v39 = vld [vmem:[%s5257_s2 + $0x118] sm:$0xf0]  ;;  %v3574_v43 = vld [vmem:[%s5257_s2 + $0x274] sm:$0xf] }
  0x4a   : > { %1289 = vmatpush.bf16.msrb.mxu0 %v2801_v36  ;;  %v2460_v36 = vld [vmem:[%s5257_s2 + $0x50] sm:$0xf]  ;;  %v2730_v44 = vld [vmem:[%s5257_s2 + $0x27c] sm:$0xf0]  ;;  %v3504_v50 = vld [vmem:[%s5257_s2 + $0x40] sm:$0xf0] }
  0x4b   : > { %1303 = vmatpush.bf16.msrb.mxu1 %v2421_v41  ;;  %v2841_v41 = vor.u32 %v3601_v32, %v2838_v35  ;;  %v2544_v51 = vld [vmem:[%s5257_s2 + $0xf8] sm:$0xf]  ;;  %v3528_v52 = vld [vmem:[%s5257_s2 + $0x100] sm:$0xf0]  ;;  %v3571_v58 = vld [vmem:[%s5257_s2 + $0x25c] sm:$0xf] }
  0x4c   : > { %1317 = vmatpush.bf16.msrb.mxu2 %v2517_v42  ;;  %v2461_v42 = vor.u32 %v3507_v37, %v2460_v36  ;;  %v2718_v59 = vld [vmem:[%s5257_s2 + $0x264] sm:$0xf0]  ;;  %v3595_v61 = vld [vmem:[%s5257_s2 + $0x31c] sm:$0xf]  ;;  %v3501_v2 = vld [vmem:[%s5257_s2 + $0x28] sm:$0xf0] }
  0x4d   : > { %1331 = vmatpush.bf16.msrb.mxu3 %v2613_v45  ;;  %1290 = vmatmul.bf16.vlgmr.msrb.gmra.mxu0 %v4143_v54  ;;  %v3598_v45 = vld [vmem:[%s5257_s2 + $0x334] sm:$0xf]  ;;  %v2532_v3 = vld [vmem:[%s5257_s2 + $0xe0] sm:$0xf]  ;;  %v3525_v4 = vld [vmem:[%s5257_s2 + $0xe8] sm:$0xf0] }
  0x4e   : > { %1338 = vmatpush.bf16.msra.mxu0 %v2793_v46  ;;  %1304 = vmatmul.bf16.vlgmr.msrb.gmra.mxu1 %v4023_v49  ;;  %v2557_v46 = vor.u32 %v3531_v39, %v2556_v38  ;;  %v3568_v6 = vld [vmem:[%s5257_s2 + $0x244] sm:$0xf]  ;;  %v2706_v7 = vld [vmem:[%s5257_s2 + $0x24c] sm:$0xf0]  ;;  %v3498_v14 = vld [vmem:[%s5257_s2 + $0x10] sm:$0xf0] }
  0x4f   : > { %1352 = vmatpush.bf16.msra.mxu1 %v2889_v47  ;;  %1318 = vmatmul.bf16.vlgmr.msrb.gmra.mxu2 %v4051_v63  ;;  %v2826_v47 = vld [vmem:[%s5257_s2 + $0x33c] sm:$0xf0]  ;;  %v3592_v10 = vld [vmem:[%s5257_s2 + $0x304] sm:$0xf]  ;;  %v2520_v17 = vld [vmem:[%s5257_s2 + $0xc8] sm:$0xf]  ;;  %v2709_v22 = vor.u32 %v3568_v6, %v2706_v7 }
  0x50   : > { %1366 = vmatpush.bf16.msra.mxu2 %v2509_v48  ;;  %1332 = vmatmul.bf16.vlgmr.msrb.gmra.mxu3 %v4031_v56  ;;  %v2448_v48 = vld [vmem:[%s5257_s2 + $0x38] sm:$0xf]  ;;  %v2829_v55 = vor.u32 %v3598_v45, %v2826_v47  ;;  %v3522_v18 = vld [vmem:[%s5257_s2 + $0xd0] sm:$0xf0]  ;;  %v3567_v20 = vld [vmem:[%s5257_s2 + $0x238] sm:$0xf0] }
  0x51   : > { %1380 = vmatpush.bf16.msra.mxu3 %v2605_v53  ;;  %v2733_v53 = vor.u32 %v3574_v43, %v2730_v44  ;;  %v2449_v57 = vor.u32 %v3504_v50, %v2448_v48  ;;  %v2796_v21 = vld [vmem:[%s5257_s2 + $0x2f0] sm:$0xf]  ;;  %v3591_v23 = vld [vmem:[%s5257_s2 + $0x2f8] sm:$0xf0]  ;;  %v2980_v30 = vld [vmem:[%s5256_s1 + $0xa8] sm:$0xf]  ;;  %v2521_v32 = vor.u32 %v3522_v18, %v2520_v17 }
  0x52   : > { %1339 = vmatpush.bf16.msra.mxu0 %v2781_v62  ;;  %v2545_v62 = vor.u32 %v3528_v52, %v2544_v51  ;;  %v2892_v24 = vld [vmem:[%s5257_s2 + $0x3b0] sm:$0xf]  ;;  %v3398_v31 = vld [vmem:[%s5256_s1 + $0xb0] sm:$0xf0]  ;;  %v2797_v35 = vor.u32 %v3591_v23, %v2796_v21  ;;  %v2688_v37 = vld [vmem:[%s5257_s2 + $0x218] sm:$0xf] }
  0x53   : > { %1353 = vmatpush.bf16.msra.mxu1 %v2877_v0  ;;  %v2814_v0 = vld [vmem:[%s5257_s2 + $0x324] sm:$0xf0]  ;;  %v3564_v38 = vld [vmem:[%s5257_s2 + $0x220] sm:$0xf0]  ;;  %v2784_v39 = vld [vmem:[%s5257_s2 + $0x2d8] sm:$0xf] }
  0x54   : > { %1367 = vmatpush.bf16.msra.mxu2 %v2497_v1  ;;  %v2436_v1 = vld [vmem:[%s5257_s2 + $0x20] sm:$0xf]  ;;  %v2817_v8 = vor.u32 %v3595_v61, %v2814_v0  ;;  %v3612_v43 = vld [vmem:[%s5257_s2 + $0x3a0] sm:$0xf0]  ;;  %v2968_v44 = vld [vmem:[%s5256_s1 + $0x90] sm:$0xf] }
  0x55   : > { %1381 = vmatpush.bf16.msra.mxu3 %v2593_v5  ;;  %v2721_v5 = vor.u32 %v3571_v58, %v2718_v59  ;;  %v2437_v9 = vor.u32 %v3501_v2, %v2436_v1  ;;  %v3395_v45 = vld [vmem:[%s5256_s1 + $0x98] sm:$0xf0]  ;;  %v2676_v50 = vld [vmem:[%s5257_s2 + $0x200] sm:$0xf]  ;;  %v3561_v51 = vld [vmem:[%s5257_s2 + $0x208] sm:$0xf0] }
  0x56   : > { %1340 = vmatpush.bf16.msra.mxu0 %v2769_v11  ;;  %v2802_v11 = vld [vmem:[%s5257_s2 + $0x30c] sm:$0xf0]  ;;  %v2772_v52 = vld [vmem:[%s5257_s2 + $0x2c0] sm:$0xf]  ;;  %v3609_v58 = vld [vmem:[%s5257_s2 + $0x388] sm:$0xf0] }
  0x57   : > { %1354 = vmatpush.bf16.msra.mxu1 %v2865_v12  ;;  %v2424_v12 = vld [vmem:[%s5257_s2 + $0x8] sm:$0xf]  ;;  %v2956_v59 = vld [vmem:[%s5256_s1 + $0x78] sm:$0xf]  ;;  %v3392_v61 = vld [vmem:[%s5256_s1 + $0x80] sm:$0xf0] }
  0x58   : > { %1368 = vmatpush.bf16.msra.mxu2 %v2485_v13  ;;  %v2533_v13 = vor.u32 %v3525_v4, %v2532_v3  ;;  %v2664_v2 = vld [vmem:[%s5257_s2 + $0x1e8] sm:$0xf]  ;;  %v3558_v3 = vld [vmem:[%s5257_s2 + $0x1f0] sm:$0xf0]  ;;  %v2957_v4 = vor.u32 %v3392_v61, %v2956_v59  ;;  %v2944_v7 = vld [vmem:[%s5256_s1 + $0x60] sm:$0xf] }
  0x59   : > { %1382 = vmatpush.bf16.msra.mxu3 %v2581_v19  ;;  %v2700_v19 = vld [vmem:[%s5257_s2 + $0x230] sm:$0xf]  ;;  %v3606_v6 = vld [vmem:[%s5257_s2 + $0x370] sm:$0xf0]  ;;  %v3579_v18 = vld [vmem:[%s5257_s2 + $0x298] sm:$0xf0] }
  0x5a   : > { %1341 = vmatpush.bf16.msra.mxu0 %v2757_v27  ;;  %v3615_v27 = vld [vmem:[%s5257_s2 + $0x3b8] sm:$0xf0]  ;;  %v2932_v21 = vld [vmem:[%s5256_s1 + $0x48] sm:$0xf]  ;;  %v3570_v59 = vld [vmem:[%s5257_s2 + $0x250] sm:$0xf0] }
  0x5b   : > { %1355 = vmatpush.bf16.msra.mxu1 %v2853_v28  ;;  %v2805_v28 = vor.u32 %v3592_v10, %v2802_v11  ;;  %v2893_v36 = vor.u32 %v3615_v27, %v2892_v24  ;;  %v2808_v61 = vld [vmem:[%s5257_s2 + $0x308] sm:$0xf]  ;;  %vm2318_vm1 = vsmask.f32 256  ;;  %vm2321_vm3 = vsmask.f32 4352 }
  0x5c   : > { %1369 = vmatpush.bf16.msra.mxu2 %v2473_v29  ;;  %v2425_v29 = vor.u32 %v3498_v14, %v2424_v12  ;;  %v2652_v12 = vld [vmem:[%s5257_s2 + $0x1d0] sm:$0xf]  ;;  %vm2319_vm4 = vmand %vm2317_vm0, %vm2318_vm1 }
  0x5d   : > { %1383 = vmatpush.bf16.msra.mxu3 %v2569_v33  ;;  %v2701_v33 = vor.u32 %v3567_v20, %v2700_v19  ;;  %v2748_v14 = vld [vmem:[%s5257_s2 + $0x290] sm:$0xf]  ;;  %v3603_v20 = vld [vmem:[%s5257_s2 + $0x358] sm:$0xf0]  ;;  %vm2322_vm5 = vmand %vm2320_vm2, %vm2321_vm3 }
  0x5e   : > { %1342 = vmatpush.bf16.msra.mxu0 %v2745_v40  ;;  %v2981_v40 = vor.u32 %v3398_v31, %v2980_v30  ;;  %v2844_v19 = vld [vmem:[%s5257_s2 + $0x350] sm:$0xf]  ;;  %v2749_v24 = vor.u32 %v3579_v18, %v2748_v14  ;;  %v2736_v30 = vld [vmem:[%s5257_s2 + $0x278] sm:$0xf]  ;;  %vm2323_vm6 = vmor %vm2322_vm5, %vm2319_vm4 }
  0x5f   : > { %1356 = vmatpush.bf16.msra.mxu1 %v2841_v41  ;;  %v3588_v41 = vld [vmem:[%s5257_s2 + $0x2e0] sm:$0xf0]  ;;  %v2845_v27 = vor.u32 %v3603_v20, %v2844_v19  ;;  %v3064_v18 = vld [vmem:[%s5256_s1 + $0x150] sm:$0xf]  ;;  %v3419_v19 = vld [vmem:[%s5256_s1 + $0x158] sm:$0xf0] }
  0x60   : > { %1370 = vmatpush.bf16.msra.mxu2 %v2461_v42  ;;  %v2880_v42 = vld [vmem:[%s5257_s2 + $0x398] sm:$0xf]  ;;  %v2785_v47 = vor.u32 %v3588_v41, %v2784_v39  ;;  %v2628_v41 = vld [vmem:[%s5257_s2 + $0x1a0] sm:$0xf]  ;;  %v3160_v20 = vld [vmem:[%s5256_s1 + $0x210] sm:$0xf] }
  0x61   : > { %1384 = vmatpush.bf16.msra.mxu3 %v2557_v46  ;;  %v2689_v46 = vor.u32 %v3564_v38, %v2688_v37  ;;  %v2881_v48 = vor.u32 %v3612_v43, %v2880_v42  ;;  %v3383_v37 = vld [vmem:[%s5256_s1 + $0x38] sm:$0xf0]  ;;  %v3549_v42 = vld [vmem:[%s5257_s2 + $0x1a8] sm:$0xf0]  ;;  %v2724_v43 = vld [vmem:[%s5257_s2 + $0x260] sm:$0xf] }
  0x62   : > { %1343 = vmatpush.bf16.msra.mxu0 %v2733_v53  ;;  %v2969_v53 = vor.u32 %v3395_v45, %v2968_v44  ;;  %v3573_v45 = vld [vmem:[%s5257_s2 + $0x268] sm:$0xf0]  ;;  %vm2328_vm9 = vmand %vm2327_vm8, %vm2318_vm1 }
  0x63   : > { %1357 = vmatpush.bf16.msra.mxu1 %v2829_v55  ;;  %v3585_v55 = vld [vmem:[%s5257_s2 + $0x2c8] sm:$0xf0] }
  0x64   : > { %1371 = vmatpush.bf16.msra.mxu2 %v2449_v57  ;;  %v2868_v57 = vld [vmem:[%s5257_s2 + $0x380] sm:$0xf]  ;;  %v2773_v0 = vor.u32 %v3585_v55, %v2772_v52  ;;  %v2616_v52 = vld [vmem:[%s5257_s2 + $0x188] sm:$0xf]  ;;  %v2725_v55 = vor.u32 %v3573_v45, %v2724_v43  ;;  %v3413_v45 = vld [vmem:[%s5256_s1 + $0x128] sm:$0xf0] }
  0x65   : > { %1385 = vmatpush.bf16.msra.mxu3 %v2545_v62  ;;  %v2677_v62 = vor.u32 %v3561_v51, %v2676_v50  ;;  %v2869_v1 = vor.u32 %v3609_v58, %v2868_v57  ;;  %v3380_v50 = vld [vmem:[%s5256_s1 + $0x20] sm:$0xf0]  ;;  %v2629_v51 = vor.u32 %v3549_v42, %v2628_v41  ;;  %v2712_v58 = vld [vmem:[%s5257_s2 + $0x248] sm:$0xf] }
  0x66   : > { %1344 = vmatpush.bf16.msra.mxu0 %v2721_v5  ;;  %v2856_v5 = vld [vmem:[%s5257_s2 + $0x368] sm:$0xf]  ;;  %v3488_v41 = vld [vmem:[%s5256_s1 + $0x380] sm:$0xf0] }
  0x67   : > { %1358 = vmatpush.bf16.msra.mxu1 %v2817_v8  ;;  %v3389_v8 = vld [vmem:[%s5256_s1 + $0x68] sm:$0xf0]  ;;  %v2857_v11 = vor.u32 %v3606_v6, %v2856_v5  ;;  %v3446_v5 = vld [vmem:[%s5256_s1 + $0x230] sm:$0xf0]  ;;  %v3268_v6 = vld [vmem:[%s5256_s1 + $0x2e8] sm:$0xf] }
  0x68   : > { %1372 = vmatpush.bf16.msra.mxu2 %v2437_v9  ;;  %v2665_v9 = vor.u32 %v3558_v3, %v2664_v2  ;;  %v2945_v17 = vor.u32 %v3389_v8, %v2944_v7  ;;  %v3377_v2 = vld [vmem:[%s5256_s1 + $0x8] sm:$0xf0]  ;;  %v3076_v3 = vld [vmem:[%s5256_s1 + $0x168] sm:$0xf]  ;;  %v3470_v7 = vld [vmem:[%s5256_s1 + $0x2f0] sm:$0xf0]  ;;  %v2713_v8 = vor.u32 %v3570_v59, %v2712_v58 }
  0x69   : > { %1386 = vmatpush.bf16.msra.mxu3 %v2533_v13  ;;  %v3555_v13 = vld [vmem:[%s5257_s2 + $0x1d8] sm:$0xf0]  ;;  %v3410_v58 = vld [vmem:[%s5256_s1 + $0x110] sm:$0xf0]  ;;  %v3124_v59 = vld [vmem:[%s5256_s1 + $0x1c8] sm:$0xf] }
  0x6a   : > { %1345 = vmatpush.bf16.msra.mxu0 %v2709_v22  ;;  %v3386_v22 = vld [vmem:[%s5256_s1 + $0x50] sm:$0xf0]  ;;  %v2653_v23 = vor.u32 %v3555_v13, %v2652_v12 }
  0x6b   : > { %1359 = vmatpush.bf16.msra.mxu1 %v2805_v28  ;;  %v2640_v28 = vld [vmem:[%s5257_s2 + $0x1b8] sm:$0xf]  ;;  %v2933_v31 = vor.u32 %v3386_v22, %v2932_v21  ;;  %v3443_v22 = vld [vmem:[%s5256_s1 + $0x218] sm:$0xf0] }
  0x6c   : > { %1373 = vmatpush.bf16.msra.mxu2 %v2425_v29  ;;  %v3552_v29 = vld [vmem:[%s5257_s2 + $0x1c0] sm:$0xf0] }
  0x6d   : > { %1387 = vmatpush.bf16.msra.mxu3 %v2521_v32  ;;  %1346 = vmatmul.bf16.vlgmr.msra.gmra.mxu0 %v4043_v60  ;;  %v3576_v32 = vld [vmem:[%s5257_s2 + $0x280] sm:$0xf0]  ;;  %v2641_v38 = vor.u32 %v3552_v29, %v2640_v28  ;;  %v3491_v28 = vld [vmem:[%s5256_s1 + $0x398] sm:$0xf0]  ;;  %v3065_v29 = vor.u32 %v3419_v19, %v3064_v18  ;;  %v3004_v19 = vld [vmem:[%s5256_s1 + $0xd8] sm:$0xf] }
  0x6e   : > { %1394 = vmatpush.bf16.msrb.mxu0 %v2701_v33  ;;  %1360 = vmatmul.bf16.vlgmr.msra.gmra.mxu1 %v4143_v54  ;;  %v2832_v33 = vld [vmem:[%s5257_s2 + $0x338] sm:$0xf]  ;;  %v2737_v39 = vor.u32 %v3576_v32, %v2736_v30  ;;  %v3161_v30 = vor.u32 %v3443_v22, %v3160_v20  ;;  %v3404_v20 = vld [vmem:[%s5256_s1 + $0xe0] sm:$0xf0] }
  0x6f   : > { %1408 = vmatpush.bf16.msrb.mxu1 %v2797_v35  ;;  %1374 = vmatmul.bf16.vlgmr.msra.gmra.mxu2 %v4023_v49  ;;  %v3582_v49 = vld [vmem:[%s5257_s2 + $0x2b0] sm:$0xf0]  ;;  %v3600_v35 = vld [vmem:[%s5257_s2 + $0x340] sm:$0xf0]  ;;  %v3052_v32 = vld [vmem:[%s5256_s1 + $0x138] sm:$0xf] }
  0x70   : > { %1422 = vmatpush.bf16.msrb.mxu2 %v2893_v36  ;;  %1388 = vmatmul.bf16.vlgmr.msra.gmra.mxu3 %v4051_v63  ;;  %v2760_v63 = vld [vmem:[%s5257_s2 + $0x2a8] sm:$0xf]  ;;  %v2920_v36 = vld [vmem:[%s5256_s1 + $0x30] sm:$0xf] }
  0x71   : > { %2081 = vmatpush.bf16.msrb.mxu3 %v2981_v40  ;;  %v2761_v10 = vor.u32 %v3582_v49, %v2760_v63  ;;  %v2833_v40 = vor.u32 %v3600_v35, %v2832_v33  ;;  %v2921_v44 = vor.u32 %v3383_v37, %v2920_v36  ;;  %v3422_v63 = vld [vmem:[%s5256_s1 + $0x170] sm:$0xf0]  ;;  %v3416_v33 = vld [vmem:[%s5256_s1 + $0x140] sm:$0xf0]  ;;  %v3148_v35 = vld [vmem:[%s5256_s1 + $0x1f8] sm:$0xf] }
  0x72   : > { %1395 = vmatpush.bf16.msrb.mxu0 %v2689_v46  ;;  %v2820_v46 = vld [vmem:[%s5257_s2 + $0x320] sm:$0xf]  ;;  %v3077_v13 = vor.u32 %v3422_v63, %v3076_v3  ;;  %v3440_v37 = vld [vmem:[%s5256_s1 + $0x200] sm:$0xf0]  ;;  %v3053_v42 = vor.u32 %v3416_v33, %v3052_v32  ;;  %v3482_v3 = vld [vmem:[%s5256_s1 + $0x350] sm:$0xf0] }
  0x73   : > { %1409 = vmatpush.bf16.msrb.mxu1 %v2785_v47  ;;  %v3597_v47 = vld [vmem:[%s5257_s2 + $0x328] sm:$0xf0]  ;;  %v3149_v43 = vor.u32 %v3440_v37, %v3148_v35 }
  0x74   : > { %1423 = vmatpush.bf16.msrb.mxu2 %v2881_v48  ;;  %v2908_v48 = vld [vmem:[%s5256_s1 + $0x18] sm:$0xf]  ;;  %v2821_v57 = vor.u32 %v3597_v47, %v2820_v46  ;;  %v3232_v47 = vld [vmem:[%s5256_s1 + $0x2a0] sm:$0xf]  ;;  %v3401_v32 = vld [vmem:[%s5256_s1 + $0xc8] sm:$0xf0] }
  0x75   : > { %2082 = vmatpush.bf16.msrb.mxu3 %v2969_v53  ;;  %v3546_v53 = vld [vmem:[%s5257_s2 + $0x190] sm:$0xf0]  ;;  %v3425_v37 = vld [vmem:[%s5256_s1 + $0x188] sm:$0xf0] }
  0x76   : > { %1396 = vmatpush.bf16.msrb.mxu0 %v2677_v62  ;;  %v2909_v62 = vor.u32 %v3380_v50, %v2908_v48  ;;  %v2617_v49 = vor.u32 %v3546_v53, %v2616_v52  ;;  %v3461_v48 = vld [vmem:[%s5256_s1 + $0x2a8] sm:$0xf0]  ;;  %v3328_v50 = vld [vmem:[%s5256_s1 + $0x360] sm:$0xf] }
  0x77   : > { %1410 = vmatpush.bf16.msrb.mxu1 %v2773_v0  ;;  %v3594_v0 = vld [vmem:[%s5257_s2 + $0x310] sm:$0xf0] }
  0x78   : > { %1424 = vmatpush.bf16.msrb.mxu2 %v2869_v1  ;;  %v2896_v1 = vld [vmem:[%s5256_s1] sm:$0xf] }
  0x79   : > { %2083 = vmatpush.bf16.msrb.mxu3 %v2957_v4  ;;  %v3172_v4 = vld [vmem:[%s5256_s1 + $0x228] sm:$0xf]  ;;  %v2897_v12 = vor.u32 %v3377_v2, %v2896_v1  ;;  %v3458_v1 = vld [vmem:[%s5256_s1 + $0x290] sm:$0xf0] }
  0x7a   : > { %1397 = vmatpush.bf16.msrb.mxu0 %v2665_v9  ;;  %v2809_v9 = vor.u32 %v3594_v0, %v2808_v61  ;;  %v3173_v14 = vor.u32 %v3446_v5, %v3172_v4  ;;  %v3220_v0 = vld [vmem:[%s5256_s1 + $0x288] sm:$0xf]  ;;  %v3016_v5 = vld [vmem:[%s5256_s1 + $0xf0] sm:$0xf] }
  0x7b   : > { %1411 = vmatpush.bf16.msrb.mxu1 %v2761_v10  ;;  %v3364_v10 = vld [vmem:[%s5256_s1 + $0x3a8] sm:$0xf] }
  0x7c   : > { %1425 = vmatpush.bf16.msrb.mxu2 %v2857_v11  ;;  %v3494_v11 = vld [vmem:[%s5256_s1 + $0x3b0] sm:$0xf0]  ;;  %v3316_v2 = vld [vmem:[%s5256_s1 + $0x348] sm:$0xf] }
  0x7d   : > { %2084 = vmatpush.bf16.msrb.mxu3 %v2945_v17  ;;  %v3269_v17 = vor.u32 %v3470_v7, %v3268_v6  ;;  %v3365_v21 = vor.u32 %v3494_v11, %v3364_v10  ;;  %v3407_v6 = vld [vmem:[%s5256_s1 + $0xf8] sm:$0xf0]  ;;  %v3112_v7 = vld [vmem:[%s5256_s1 + $0x1b0] sm:$0xf] }
  0x7e   : > { %1398 = vmatpush.bf16.msrb.mxu0 %v2653_v23  ;;  %v3256_v23 = vld [vmem:[%s5256_s1 + $0x2d0] sm:$0xf]  ;;  %v3455_v11 = vld [vmem:[%s5256_s1 + $0x278] sm:$0xf0] }
  0x7f   : > { %1412 = vmatpush.bf16.msrb.mxu1 %v2749_v24  ;;  %v3467_v24 = vld [vmem:[%s5256_s1 + $0x2d8] sm:$0xf0]  ;;  %v3208_v10 = vld [vmem:[%s5256_s1 + $0x270] sm:$0xf] }
  0x80   : > { %1426 = vmatpush.bf16.msrb.mxu2 %v2845_v27  ;;  %v3352_v27 = vld [vmem:[%s5256_s1 + $0x390] sm:$0xf]  ;;  %v3209_v18 = vor.u32 %v3455_v11, %v3208_v10  ;;  %v3439_v10 = vld [vmem:[%s5256_s1 + $0x1fc] sm:$0xf]  ;;  %v3150_v11 = vld [vmem:[%s5256_s1 + $0x204] sm:$0xf0] }
  0x81   : > { %2085 = vmatpush.bf16.msrb.mxu3 %v2933_v31  ;;  %v3257_v31 = vor.u32 %v3467_v24, %v3256_v23  ;;  %v3353_v36 = vor.u32 %v3491_v28, %v3352_v27  ;;  %v3428_v23 = vld [vmem:[%s5256_s1 + $0x1a0] sm:$0xf0]  ;;  %v3196_v24 = vld [vmem:[%s5256_s1 + $0x258] sm:$0xf] }
  0x82   : > { %1399 = vmatpush.bf16.msrb.mxu0 %v2641_v38  ;;  %v3244_v38 = vld [vmem:[%s5256_s1 + $0x2b8] sm:$0xf]  ;;  %v3452_v27 = vld [vmem:[%s5256_s1 + $0x260] sm:$0xf0] }
  0x83   : > { %1413 = vmatpush.bf16.msrb.mxu1 %v2737_v39  ;;  %v3464_v39 = vld [vmem:[%s5256_s1 + $0x2c0] sm:$0xf0]  ;;  %v3292_v28 = vld [vmem:[%s5256_s1 + $0x318] sm:$0xf]  ;;  %v3197_v35 = vor.u32 %v3452_v27, %v3196_v24  ;;  %v3138_v27 = vld [vmem:[%s5256_s1 + $0x1ec] sm:$0xf0] }
  0x84   : > { %1427 = vmatpush.bf16.msrb.mxu2 %v2833_v40  ;;  %v3340_v40 = vld [vmem:[%s5256_s1 + $0x378] sm:$0xf]  ;;  %v3436_v24 = vld [vmem:[%s5256_s1 + $0x1e4] sm:$0xf] }
  0x85   : > { %2086 = vmatpush.bf16.msrb.mxu3 %v2921_v44  ;;  %v3040_v44 = vld [vmem:[%s5256_s1 + $0x120] sm:$0xf]  ;;  %v3341_v46 = vor.u32 %v3488_v41, %v3340_v40  ;;  %v3449_v40 = vld [vmem:[%s5256_s1 + $0x248] sm:$0xf0] }
  0x86   : > { %1400 = vmatpush.bf16.msrb.mxu0 %v2629_v51  ;;  %v3485_v51 = vld [vmem:[%s5256_s1 + $0x368] sm:$0xf0]  ;;  %v3041_v52 = vor.u32 %v3413_v45, %v3040_v44 }
  0x87   : > { %1414 = vmatpush.bf16.msrb.mxu1 %v2725_v55  ;;  %v3233_v55 = vor.u32 %v3461_v48, %v3232_v47  ;;  %v3329_v61 = vor.u32 %v3485_v51, %v3328_v50  ;;  %v3397_v41 = vld [vmem:[%s5256_s1 + $0xac] sm:$0xf] }
  0x88   : > { %1428 = vmatpush.bf16.msrb.mxu2 %v2821_v57  ;;  %v3028_v57 = vld [vmem:[%s5256_s1 + $0x108] sm:$0xf]  ;;  %v3445_v44 = vld [vmem:[%s5256_s1 + $0x22c] sm:$0xf] }
  0x89   : > { %2087 = vmatpush.bf16.msrb.mxu3 %v2909_v62  ;;  %v3434_v62 = vld [vmem:[%s5256_s1 + $0x1d0] sm:$0xf0]  ;;  %v3029_v63 = vor.u32 %v3410_v58, %v3028_v57 }
  0x8a   : > { %1401 = vmatpush.bf16.msrb.mxu0 %v2617_v49  ;;  %v3125_v4 = vor.u32 %v3434_v62, %v3124_v59  ;;  %v3221_v49 = vor.u32 %v3458_v1, %v3220_v0  ;;  %v3394_v58 = vld [vmem:[%s5256_s1 + $0x94] sm:$0xf]  ;;  %v2970_v59 = vld [vmem:[%s5256_s1 + $0x9c] sm:$0xf0] }
  0x8b   : > { %1415 = vmatpush.bf16.msrb.mxu1 %v2713_v8  ;;  %v3317_v8 = vor.u32 %v3482_v3, %v3316_v2  ;;  %v3066_v62 = vld [vmem:[%s5256_s1 + $0x15c] sm:$0xf0]  ;;  %v3442_v0 = vld [vmem:[%s5256_s1 + $0x214] sm:$0xf]  ;;  %v2973_v3 = vor.u32 %v3394_v58, %v2970_v59  ;;  %v3379_v59 = vld [vmem:[%s5256_s1 + $0x1c] sm:$0xf] }
  0x8c   : > { %1429 = vmatpush.bf16.msrb.mxu2 %v2809_v9  ;;  %v3431_v9 = vld [vmem:[%s5256_s1 + $0x1b8] sm:$0xf0]  ;;  %v3162_v1 = vld [vmem:[%s5256_s1 + $0x21c] sm:$0xf0] }
  0x8d   : > { %2088 = vmatpush.bf16.msrb.mxu3 %v2897_v12  ;;  %1402 = vmatmul.bf16.vlgmr.msrb.gmra.mxu0 %v4031_v56  ;;  %v3245_v56 = vor.u32 %v3464_v39, %v3244_v38  ;;  %v3304_v12 = vld [vmem:[%s5256_s1 + $0x330] sm:$0xf]  ;;  %v3184_v38 = vld [vmem:[%s5256_s1 + $0x240] sm:$0xf] }
  0x8e   : > { %2095 = vmatpush.bf16.msra.mxu0 %v3077_v13  ;;  %1416 = vmatmul.bf16.vlgmr.msrb.gmra.mxu1 %v4043_v60  ;;  %v3437_v60 = vld [vmem:[%s5256_s1 + $0x1e8] sm:$0xf0]  ;;  %v3479_v13 = vld [vmem:[%s5256_s1 + $0x338] sm:$0xf0]  ;;  %v3185_v48 = vor.u32 %v3449_v40, %v3184_v38  ;;  %v3030_v38 = vld [vmem:[%s5256_s1 + $0x114] sm:$0xf0] }
  0x8f   : > { %2109 = vmatpush.bf16.msra.mxu1 %v3173_v14  ;;  %1430 = vmatmul.bf16.vlgmr.msrb.gmra.mxu2 %v4143_v54  ;;  %v3136_v54 = vld [vmem:[%s5256_s1 + $0x1e0] sm:$0xf]  ;;  %v3017_v14 = vor.u32 %v3407_v6, %v3016_v5  ;;  %v3305_v22 = vor.u32 %v3479_v13, %v3304_v12  ;;  %v3165_v5 = vor.u32 %v3442_v0, %v3162_v1  ;;  %v3391_v6 = vld [vmem:[%s5256_s1 + $0x7c] sm:$0xf]  ;;  %v3126_v40 = vld [vmem:[%s5256_s1 + $0x1d4] sm:$0xf0] }
  0x90   : > { %2123 = vmatpush.bf16.msra.mxu2 %v3269_v17  ;;  %2089 = vmatmul.bf16.vlgmr.msrb.gmra.mxu3 %v3975_v15  ;;  %v3137_v53 = vor.u32 %v3437_v60, %v3136_v54  ;;  %v3113_v17 = vor.u32 %v3431_v9, %v3112_v7  ;;  %v3174_v54 = vld [vmem:[%s5256_s1 + $0x234] sm:$0xf0]  ;;  %v3473_v60 = vld [vmem:[%s5256_s1 + $0x308] sm:$0xf0]  ;;  %v2958_v7 = vld [vmem:[%s5256_s1 + $0x84] sm:$0xf0] }
  0x91   : > { %2137 = vmatpush.bf16.msra.mxu3 %v3365_v21  ;;  %v3100_v21 = vld [vmem:[%s5256_s1 + $0x198] sm:$0xf]  ;;  %v3054_v9 = vld [vmem:[%s5256_s1 + $0x144] sm:$0xf0]  ;;  %v2961_v13 = vor.u32 %v3391_v6, %v2958_v7  ;;  %v3427_v1 = vld [vmem:[%s5256_s1 + $0x19c] sm:$0xf] }
  0x92   : > { %2096 = vmatpush.bf16.msra.mxu0 %v3065_v29  ;;  %v3476_v29 = vld [vmem:[%s5256_s1 + $0x320] sm:$0xf0]  ;;  %v3101_v33 = vor.u32 %v3428_v23, %v3100_v21  ;;  %v2946_v21 = vld [vmem:[%s5256_s1 + $0x6c] sm:$0xf0]  ;;  %v3006_v0 = vld [vmem:[%s5256_s1 + $0xe4] sm:$0xf0] }
  0x93   : > { %2110 = vmatpush.bf16.msra.mxu1 %v3161_v30  ;;  %v3005_v30 = vor.u32 %v3404_v20, %v3004_v19  ;;  %v3293_v39 = vor.u32 %v3476_v29, %v3292_v28  ;;  %v3153_v19 = vor.u32 %v3439_v10, %v3150_v11  ;;  %v3388_v20 = vld [vmem:[%s5256_s1 + $0x64] sm:$0xf]  ;;  %v3042_v23 = vld [vmem:[%s5256_s1 + $0x12c] sm:$0xf0] }
  0x94   : > { %2124 = vmatpush.bf16.msra.mxu2 %v3257_v31  ;;  %v2992_v31 = vld [vmem:[%s5256_s1 + $0xc0] sm:$0xf]  ;;  %v2949_v29 = vor.u32 %v3388_v20, %v2946_v21  ;;  %v3376_v6 = vld [vmem:[%s5256_s1 + $0x4] sm:$0xf]  ;;  %v2898_v7 = vld [vmem:[%s5256_s1 + $0xc] sm:$0xf0] }
  0x95   : > { %2138 = vmatpush.bf16.msra.mxu3 %v3353_v36  ;;  %v3088_v36 = vld [vmem:[%s5256_s1 + $0x180] sm:$0xf]  ;;  %v2993_v45 = vor.u32 %v3401_v32, %v2992_v31  ;;  %v3234_v31 = vld [vmem:[%s5256_s1 + $0x2ac] sm:$0xf0]  ;;  %v3400_v10 = vld [vmem:[%s5256_s1 + $0xc4] sm:$0xf] }
  0x96   : > { %2097 = vmatpush.bf16.msra.mxu0 %v3053_v42  ;;  %v2982_v42 = vld [vmem:[%s5256_s1 + $0xb4] sm:$0xf0]  ;;  %v3089_v47 = vor.u32 %v3425_v37, %v3088_v36  ;;  %v3409_v37 = vld [vmem:[%s5256_s1 + $0x10c] sm:$0xf]  ;;  %v2994_v11 = vld [vmem:[%s5256_s1 + $0xcc] sm:$0xf0] }
  0x97   : > { %2111 = vmatpush.bf16.msra.mxu1 %v3149_v43  ;;  %v3421_v43 = vld [vmem:[%s5256_s1 + $0x16c] sm:$0xf]  ;;  %v2985_v50 = vor.u32 %v3397_v41, %v2982_v42  ;;  %v2934_v36 = vld [vmem:[%s5256_s1 + $0x54] sm:$0xf0]  ;;  %v3399_v20 = vld [vmem:[%s5256_s1 + $0xb8] sm:$0xf0] }
  0x98   : > { %2125 = vmatpush.bf16.msra.mxu2 %v3245_v56  ;;  %v3078_v56 = vld [vmem:[%s5256_s1 + $0x174] sm:$0xf0]  ;;  %v3084_v21 = vld [vmem:[%s5256_s1 + $0x170] sm:$0xf] }
  0x99   : > { %2139 = vmatpush.bf16.msra.mxu3 %v3341_v46  ;;  %v3280_v46 = vld [vmem:[%s5256_s1 + $0x300] sm:$0xf]  ;;  %v3081_v51 = vor.u32 %v3421_v43, %v3078_v56  ;;  %v3457_v43 = vld [vmem:[%s5256_s1 + $0x28c] sm:$0xf]  ;;  %v3222_v56 = vld [vmem:[%s5256_s1 + $0x294] sm:$0xf0] }
  0x9a   : > { %2098 = vmatpush.bf16.msra.mxu0 %v3041_v52  ;;  %v3469_v52 = vld [vmem:[%s5256_s1 + $0x2ec] sm:$0xf]  ;;  %v3281_v57 = vor.u32 %v3473_v60, %v3280_v46  ;;  %v2922_v46 = vld [vmem:[%s5256_s1 + $0x3c] sm:$0xf0]  ;;  %v3406_v60 = vld [vmem:[%s5256_s1 + $0xf4] sm:$0xf] }
  0x9b   : > { %2112 = vmatpush.bf16.msra.mxu1 %v3137_v53  ;;  %v3270_v53 = vld [vmem:[%s5256_s1 + $0x2f4] sm:$0xf0] }
  0x9c   : > { %2126 = vmatpush.bf16.msra.mxu2 %v3233_v55  ;;  %v3177_v55 = vor.u32 %v3445_v44, %v3174_v54  ;;  %v3273_v2 = vor.u32 %v3469_v52, %v3270_v53  ;;  %v3033_v44 = vor.u32 %v3409_v37, %v3030_v38  ;;  %v3382_v54 = vld [vmem:[%s5256_s1 + $0x34] sm:$0xf] }
  0x9d   : > { %2140 = vmatpush.bf16.msra.mxu3 %v3329_v61  ;;  %v3418_v61 = vld [vmem:[%s5256_s1 + $0x154] sm:$0xf]  ;;  %v2925_v52 = vor.u32 %v3382_v54, %v2922_v46  ;;  %v3420_v54 = vld [vmem:[%s5256_s1 + $0x160] sm:$0xf0] }
  0x9e   : > { %2099 = vmatpush.bf16.msra.mxu0 %v3029_v63  ;;  %v3466_v63 = vld [vmem:[%s5256_s1 + $0x2d4] sm:$0xf] }
  0x9f   : > { %2113 = vmatpush.bf16.msra.mxu1 %v3125_v4  ;;  %v3258_v4 = vld [vmem:[%s5256_s1 + $0x2dc] sm:$0xf0]  ;;  %v3454_v53 = vld [vmem:[%s5256_s1 + $0x274] sm:$0xf] }
  0xa0   : > { %2127 = vmatpush.bf16.msra.mxu2 %v3221_v49  ;;  %v3069_v49 = vor.u32 %v3418_v61, %v3066_v62  ;;  %v3261_v12 = vor.u32 %v3466_v63, %v3258_v4  ;;  %v2910_v61 = vld [vmem:[%s5256_s1 + $0x24] sm:$0xf0]  ;;  %v3403_v62 = vld [vmem:[%s5256_s1 + $0xdc] sm:$0xf] }
  0xa1   : > { %2141 = vmatpush.bf16.msra.mxu3 %v3317_v8  ;;  %v3415_v8 = vld [vmem:[%s5256_s1 + $0x13c] sm:$0xf] }
  0xa2   : > { %2100 = vmatpush.bf16.msra.mxu0 %v3017_v14  ;;  %v3463_v14 = vld [vmem:[%s5256_s1 + $0x2bc] sm:$0xf] }
  0xa3   : > { %2114 = vmatpush.bf16.msra.mxu1 %v3113_v17  ;;  %v3246_v17 = vld [vmem:[%s5256_s1 + $0x2c4] sm:$0xf0]  ;;  %v3451_v63 = vld [vmem:[%s5256_s1 + $0x25c] sm:$0xf] }
  0xa4   : > { %2128 = vmatpush.bf16.msra.mxu2 %v3209_v18  ;;  %v3057_v18 = vor.u32 %v3415_v8, %v3054_v9  ;;  %v3249_v28 = vor.u32 %v3463_v14, %v3246_v17  ;;  %v3009_v8 = vor.u32 %v3403_v62, %v3006_v0  ;;  %v3493_v14 = vld [vmem:[%s5256_s1 + $0x3ac] sm:$0xf]  ;;  %v3366_v17 = vld [vmem:[%s5256_s1 + $0x3b4] sm:$0xf0]  ;;  %v3060_v62 = vld [vmem:[%s5256_s1 + $0x140] sm:$0xf] }
  0xa5   : > { %2142 = vmatpush.bf16.msra.mxu3 %v3305_v22  ;;  %v3412_v22 = vld [vmem:[%s5256_s1 + $0x124] sm:$0xf]  ;;  %v3417_v0 = vld [vmem:[%s5256_s1 + $0x148] sm:$0xf0] }
  0xa6   : > { %2101 = vmatpush.bf16.msra.mxu0 %v3005_v30  ;;  %v3460_v30 = vld [vmem:[%s5256_s1 + $0x2a4] sm:$0xf]  ;;  %v3045_v32 = vor.u32 %v3412_v22, %v3042_v23  ;;  %v2901_v23 = vor.u32 %v3376_v6, %v2898_v7 }
  0xa7   : > { %2115 = vmatpush.bf16.msra.mxu1 %v3101_v33  ;;  %v3141_v33 = vor.u32 %v3436_v24, %v3138_v27  ;;  %v3237_v41 = vor.u32 %v3460_v30, %v3234_v31  ;;  %v3423_v24 = vld [vmem:[%s5256_s1 + $0x178] sm:$0xf0]  ;;  %v2997_v30 = vor.u32 %v3400_v10, %v2994_v11  ;;  %v3484_v7 = vld [vmem:[%s5256_s1 + $0x364] sm:$0xf]  ;;  %v3390_v11 = vld [vmem:[%s5256_s1 + $0x70] sm:$0xf0] }
  0xa8   : > { %2129 = vmatpush.bf16.msra.mxu2 %v3197_v35  ;;  %v3385_v35 = vld [vmem:[%s5256_s1 + $0x4c] sm:$0xf]  ;;  %v3085_v37 = vor.u32 %v3423_v24, %v3084_v21  ;;  %v3144_v21 = vld [vmem:[%s5256_s1 + $0x1e8] sm:$0xf] }
  0xa9   : > { %2143 = vmatpush.bf16.msra.mxu3 %v3293_v39  ;;  %v3433_v39 = vld [vmem:[%s5256_s1 + $0x1cc] sm:$0xf]  ;;  %v2937_v42 = vor.u32 %v3385_v35, %v2934_v36  ;;  %v3180_v35 = vld [vmem:[%s5256_s1 + $0x230] sm:$0xf]  ;;  %v3447_v36 = vld [vmem:[%s5256_s1 + $0x238] sm:$0xf0] }
  0xaa   : > { %2102 = vmatpush.bf16.msra.mxu0 %v2993_v45  ;;  %v3129_v45 = vor.u32 %v3433_v39, %v3126_v40  ;;  %v3490_v40 = vld [vmem:[%s5256_s1 + $0x394] sm:$0xf]  ;;  %v3181_v46 = vor.u32 %v3447_v36, %v3180_v35 }
  0xab   : > { %2116 = vmatpush.bf16.msra.mxu1 %v3089_v47  ;;  %v3018_v47 = vld [vmem:[%s5256_s1 + $0xfc] sm:$0xf0] }
  0xac   : > { %2130 = vmatpush.bf16.msra.mxu2 %v3185_v48  ;;  %v3430_v48 = vld [vmem:[%s5256_s1 + $0x1b4] sm:$0xf] }
  0xad   : > { %2144 = vmatpush.bf16.msra.mxu3 %v3281_v57  ;;  %2103 = vmatmul.bf16.vlgmr.msra.gmra.mxu0 %v4006_v34  ;;  %v3021_v57 = vor.u32 %v3406_v60, %v3018_v47 }
  0xae   : > { %2151 = vmatpush.bf16.msrb.mxu0 %v2985_v50  ;;  %2117 = vmatmul.bf16.vlgmr.msra.gmra.mxu1 %v3992_v25  ;;  %v3114_v50 = vld [vmem:[%s5256_s1 + $0x1bc] sm:$0xf0] }
  0xaf   : > { %2165 = vmatpush.bf16.msrb.mxu1 %v3081_v51  ;;  %2131 = vmatmul.bf16.vlgmr.msra.gmra.mxu2 %v3994_v26  ;;  %v3225_v51 = vor.u32 %v3457_v43, %v3222_v56  ;;  %v3117_v58 = vor.u32 %v3430_v48, %v3114_v50  ;;  %v3168_v48 = vld [vmem:[%s5256_s1 + $0x218] sm:$0xf]  ;;  %v3444_v50 = vld [vmem:[%s5256_s1 + $0x220] sm:$0xf0] }
  0xb0   : > { %2179 = vmatpush.bf16.msrb.mxu2 %v3177_v55  ;;  %2145 = vmatmul.bf16.vlgmr.msra.gmra.mxu3 %v4085_v16  ;;  %v3210_v55 = vld [vmem:[%s5256_s1 + $0x27c] sm:$0xf0] }
  0xb1   : > { %2193 = vmatpush.bf16.msrb.mxu3 %v3273_v2  ;;  %v3102_v2 = vld [vmem:[%s5256_s1 + $0x1a4] sm:$0xf0] }
  0xb2   : > { %2152 = vmatpush.bf16.msrb.mxu0 %v2973_v3  ;;  %v3213_v3 = vor.u32 %v3454_v53, %v3210_v55  ;;  %v1235_v4 = vpop.f32.mrf.mxu0  ;;  %v3105_v9 = vor.u32 %v3427_v1, %v3102_v2  ;;  %v3487_v55 = vld [vmem:[%s5256_s1 + $0x37c] sm:$0xf]  ;;  %v3169_v2 = vor.u32 %v3444_v50, %v3168_v48  ;;  %v3120_v48 = vld [vmem:[%s5256_s1 + $0x1b8] sm:$0xf]  ;;  %v3432_v50 = vld [vmem:[%s5256_s1 + $0x1c0] sm:$0xf0] }
  0xb3   : > { %2166 = vmatpush.bf16.msrb.mxu1 %v3069_v49  ;;  %v2913_v49 = vor.u32 %v3379_v59, %v2910_v61  ;;  %v3393_v61 = vld [vmem:[%s5256_s1 + $0x88] sm:$0xf0] }
  0xb4   : > { %2180 = vmatpush.bf16.msrb.mxu2 %v3165_v5  ;;  %v3198_v5 = vld [vmem:[%s5256_s1 + $0x264] sm:$0xf0] }
  0xb5   : > { %2194 = vmatpush.bf16.msrb.mxu3 %v3261_v12  ;;  %v3424_v12 = vld [vmem:[%s5256_s1 + $0x184] sm:$0xf]  ;;  %v1249_v22 = vpop.f32.mrf.mxu1 }
  0xb6   : > { %2153 = vmatpush.bf16.msrb.mxu0 %v2961_v13  ;;  %v3090_v13 = vld [vmem:[%s5256_s1 + $0x18c] sm:$0xf0]  ;;  %v1250_v27 = vadd.f32 %v1249_v22, %v1235_v4  ;;  %v3441_v4 = vld [vmem:[%s5256_s1 + $0x208] sm:$0xf0]  ;;  %v3438_v22 = vld [vmem:[%s5256_s1 + $0x1f0] sm:$0xf0] }
  0xb7   : > { %2167 = vmatpush.bf16.msrb.mxu1 %v3057_v18  ;;  %v3201_v18 = vor.u32 %v3451_v63, %v3198_v5  ;;  %v3093_v31 = vor.u32 %v3424_v12, %v3090_v13  ;;  %v3156_v63 = vld [vmem:[%s5256_s1 + $0x200] sm:$0xf]  ;;  %v3061_v5 = vor.u32 %v3417_v0, %v3060_v62  ;;  %v3048_v12 = vld [vmem:[%s5256_s1 + $0x128] sm:$0xf]  ;;  %v3414_v13 = vld [vmem:[%s5256_s1 + $0x130] sm:$0xf0]  ;;  %v3145_v35 = vor.u32 %v3438_v22, %v3144_v21 }
  0xb8   : > { %2181 = vmatpush.bf16.msrb.mxu2 %v3153_v19  ;;  %v2988_v19 = vld [vmem:[%s5256_s1 + $0xb0] sm:$0xf]  ;;  %v3049_v24 = vor.u32 %v3414_v13, %v3048_v12  ;;  %v3121_v62 = vor.u32 %v3432_v50, %v3120_v48  ;;  %v3495_v13 = vld [vmem:[%s5256_s1 + $0x3b8] sm:$0xf0] }
  0xb9   : > { %2195 = vmatpush.bf16.msrb.mxu3 %v3249_v28  ;;  %v3448_v28 = vld [vmem:[%s5256_s1 + $0x244] sm:$0xf]  ;;  %v1263_v39 = vpop.f32.mrf.mxu2  ;;  %v3372_v12 = vld [vmem:[%s5256_s1 + $0x3b0] sm:$0xf]  ;;  %v3483_v48 = vld [vmem:[%s5256_s1 + $0x358] sm:$0xf0] }
  0xba   : > { %2154 = vmatpush.bf16.msrb.mxu0 %v2949_v29  ;;  %v3186_v29 = vld [vmem:[%s5256_s1 + $0x24c] sm:$0xf0]  ;;  %v1237_v43 = vpop.f32.mrf.mxu0  ;;  %v1264_v56 = vadd.f32 %v1263_v39, %v1250_v27  ;;  %v1277_v47 = vpop.f32.mrf.mxu3 }
  0xbb   : > { %2168 = vmatpush.bf16.msrb.mxu1 %v3045_v32  ;;  %v3369_v32 = vor.u32 %v3493_v14, %v3366_v17  ;;  %v3189_v38 = vor.u32 %v3448_v28, %v3186_v29  ;;  %v3157_v14 = vor.u32 %v3441_v4, %v3156_v63  ;;  %v3481_v28 = vld [vmem:[%s5256_s1 + $0x34c] sm:$0xf]  ;;  %v3318_v29 = vld [vmem:[%s5256_s1 + $0x354] sm:$0xf0] }
  0xbc   : > { %2182 = vmatpush.bf16.msrb.mxu2 %v3141_v33  ;;  %v2989_v33 = vor.u32 %v3399_v20, %v2988_v19  ;;  %v1278_v53 = vadd.f32 %v1277_v47, %v1264_v56  ;;  %v3321_v36 = vor.u32 %v3481_v28, %v3318_v29  ;;  %v3384_v56 = vld [vmem:[%s5256_s1 + $0x40] sm:$0xf0]  ;;  %v3264_v29 = vld [vmem:[%s5256_s1 + $0x2d8] sm:$0xf] }
  0xbd   : > { %2196 = vmatpush.bf16.msrb.mxu3 %v3237_v41  ;;  %v3354_v41 = vld [vmem:[%s5256_s1 + $0x39c] sm:$0xf0]  ;;  %v1251_v59 = vpop.f32.mrf.mxu1 }
  0xbe   : > { %2155 = vmatpush.bf16.msrb.mxu0 %v2937_v42  ;;  %v2976_v42 = vld [vmem:[%s5256_s1 + $0x98] sm:$0xf]  ;;  %v3357_v60 = vor.u32 %v3490_v40, %v3354_v41  ;;  %v1252_v1 = vadd.f32 %v1251_v59, %v1237_v43  ;;  %v3478_v41 = vld [vmem:[%s5256_s1 + $0x334] sm:$0xf]  ;;  %v3012_v59 = vld [vmem:[%s5256_s1 + $0xe0] sm:$0xf] }
  0xbf   : > { %2169 = vmatpush.bf16.msrb.mxu1 %v3033_v44  ;;  %v3396_v44 = vld [vmem:[%s5256_s1 + $0xa0] sm:$0xf0]  ;;  %v2928_v43 = vld [vmem:[%s5256_s1 + $0x38] sm:$0xf] }
  0xc0   : > { %2183 = vmatpush.bf16.msrb.mxu2 %v3129_v45  ;;  %v3072_v45 = vld [vmem:[%s5256_s1 + $0x158] sm:$0xf] }
  0xc1   : > { %2197 = vmatpush.bf16.msrb.mxu3 %v3225_v51  ;;  %v2977_v51 = vor.u32 %v3396_v44, %v2976_v42  ;;  %v1265_v6 = vpop.f32.mrf.mxu2  ;;  %v3306_v42 = vld [vmem:[%s5256_s1 + $0x33c] sm:$0xf0]  ;;  %v3024_v44 = vld [vmem:[%s5256_s1 + $0xf8] sm:$0xf] }
  0xc2   : > { %2156 = vmatpush.bf16.msrb.mxu0 %v2925_v52  ;;  %v3073_v52 = vor.u32 %v3420_v54, %v3072_v45  ;;  %v1266_v10 = vadd.f32 %v1265_v6, %v1252_v1  ;;  %v1279_v20 = vpop.f32.mrf.mxu3  ;;  %v3408_v45 = vld [vmem:[%s5256_s1 + $0x100] sm:$0xf0]  ;;  %v3309_v47 = vor.u32 %v3478_v41, %v3306_v42  ;;  %v3108_v1 = vld [vmem:[%s5256_s1 + $0x1a0] sm:$0xf]  ;;  %v3378_v6 = vld [vmem:[%s5256_s1 + $0x10] sm:$0xf0] }
  0xc3   : > { %2170 = vmatpush.bf16.msrb.mxu1 %v3021_v57  ;;  %v3342_v57 = vld [vmem:[%s5256_s1 + $0x384] sm:$0xf0] }
  0xc4   : > { %2184 = vmatpush.bf16.msrb.mxu2 %v3117_v58  ;;  %v2964_v58 = vld [vmem:[%s5256_s1 + $0x80] sm:$0xf]  ;;  %v1280_v27 = vadd.f32 %v1279_v20, %v1266_v10  ;;  %v3336_v42 = vld [vmem:[%s5256_s1 + $0x368] sm:$0xf] }
  0xc5   : > { %2198 = vmatpush.bf16.msrb.mxu3 %v3213_v3  ;;  %v3345_v3 = vor.u32 %v3487_v55, %v3342_v57  ;;  %v3294_v55 = vld [vmem:[%s5256_s1 + $0x324] sm:$0xf0]  ;;  %v2916_v57 = vld [vmem:[%s5256_s1 + $0x20] sm:$0xf] }
  0xc6   : > { %2157 = vmatpush.bf16.msrb.mxu0 %v2913_v49  ;;  %v2965_v49 = vor.u32 %v3393_v61, %v2964_v58  ;;  %v3381_v58 = vld [vmem:[%s5256_s1 + $0x28] sm:$0xf0] }
  0xc7   : > { %2171 = vmatpush.bf16.msrb.mxu1 %v3009_v8  ;;  %v3330_v8 = vld [vmem:[%s5256_s1 + $0x36c] sm:$0xf0]  ;;  %v3405_v61 = vld [vmem:[%s5256_s1 + $0xe8] sm:$0xf0]  ;;  %v2917_v63 = vor.u32 %v3381_v58, %v2916_v57  ;;  %v3480_v57 = vld [vmem:[%s5256_s1 + $0x340] sm:$0xf0] }
  0xc8   : > { %2185 = vmatpush.bf16.msrb.mxu2 %v3105_v9  ;;  %v2952_v9 = vld [vmem:[%s5256_s1 + $0x68] sm:$0xf]  ;;  %v3333_v19 = vor.u32 %v3484_v7, %v3330_v8  ;;  %v3013_v4 = vor.u32 %v3405_v61, %v3012_v59  ;;  %v3402_v8 = vld [vmem:[%s5256_s1 + $0xd0] sm:$0xf0] }
  0xc9   : > { %2199 = vmatpush.bf16.msrb.mxu3 %v3201_v18  ;;  %v3000_v7 = vld [vmem:[%s5256_s1 + $0xc8] sm:$0xf] }
  0xca   : > { %2158 = vmatpush.bf16.msrb.mxu0 %v2901_v23  ;;  %v1291_v17 = vpop.f32.mrf.mxu0  ;;  %v2953_v23 = vor.u32 %v3390_v11, %v2952_v9  ;;  %v3276_v9 = vld [vmem:[%s5256_s1 + $0x2f0] sm:$0xf]  ;;  %v3471_v11 = vld [vmem:[%s5256_s1 + $0x2f8] sm:$0xf0]  ;;  %v3001_v21 = vor.u32 %v3402_v8, %v3000_v7  ;;  %v3450_v7 = vld [vmem:[%s5256_s1 + $0x250] sm:$0xf0] }
  0xcb   : > { %2172 = vmatpush.bf16.msrb.mxu1 %v2997_v30  ;;  %v4990_v18 = vadd.f32 %v1291_v17, %v1278_v53  ;;  %v2940_v30 = vld [vmem:[%s5256_s1 + $0x50] sm:$0xf]  ;;  %v3475_v53 = vld [vmem:[%s5256_s1 + $0x31c] sm:$0xf]  ;;  %v3096_v17 = vld [vmem:[%s5256_s1 + $0x188] sm:$0xf]  ;;  %v3277_v22 = vor.u32 %v3471_v11, %v3276_v9 }
  0xcc   : > { %2186 = vmatpush.bf16.msrb.mxu2 %v3093_v31  ;;  %v3387_v31 = vld [vmem:[%s5256_s1 + $0x58] sm:$0xf0]  ;;  %v3297_v0 = vor.u32 %v3475_v53, %v3294_v55  ;;  %v3456_v53 = vld [vmem:[%s5256_s1 + $0x280] sm:$0xf0]  ;;  %v3312_v55 = vld [vmem:[%s5256_s1 + $0x338] sm:$0xf] }
  0xcd   : > { %2200 = vmatpush.bf16.msrb.mxu3 %v3189_v38  ;;  %2159 = vmatmul.bf16.vlgmr.msrb.gmra.mxu0 %v3975_v15  ;;  %v3435_v38 = vld [vmem:[%s5256_s1 + $0x1d8] sm:$0xf0]  ;;  %v2941_v39 = vor.u32 %v3387_v31, %v2940_v30  ;;  %v3468_v30 = vld [vmem:[%s5256_s1 + $0x2e0] sm:$0xf0]  ;;  %v3360_v31 = vld [vmem:[%s5256_s1 + $0x398] sm:$0xf] }
  0xce   : > { %2207 = vmatpush.bf16.msra.mxu0 %v3369_v32  ;;  %2173 = vmatmul.bf16.vlgmr.msrb.gmra.mxu1 %v4006_v34  ;;  %v3036_v32 = vld [vmem:[%s5256_s1 + $0x110] sm:$0xf]  ;;  %v3288_v8 = vld [vmem:[%s5256_s1 + $0x308] sm:$0xf]  ;;  %v3474_v9 = vld [vmem:[%s5256_s1 + $0x310] sm:$0xf0] }
  0xcf   : > { %2221 = vmatpush.bf16.msra.mxu1 %v2989_v33  ;;  %2187 = vmatmul.bf16.vlgmr.msrb.gmra.mxu2 %v3992_v25  ;;  %v3411_v33 = vld [vmem:[%s5256_s1 + $0x118] sm:$0xf0] }
  0xd0   : > { %2235 = vmatpush.bf16.msra.mxu2 %v3085_v37  ;;  %2201 = vmatmul.bf16.vlgmr.msrb.gmra.mxu3 %v3994_v26  ;;  %v3132_v37 = vld [vmem:[%s5256_s1 + $0x1d0] sm:$0xf]  ;;  %v3037_v40 = vor.u32 %v3411_v33, %v3036_v32  ;;  %v3492_v32 = vld [vmem:[%s5256_s1 + $0x3a0] sm:$0xf0]  ;;  %v3265_v33 = vor.u32 %v3468_v30, %v3264_v29 }
  0xd1   : > { %2249 = vmatpush.bf16.msra.mxu3 %v3181_v46  ;;  %v3133_v54 = vor.u32 %v3435_v38, %v3132_v37  ;;  %v3465_v37 = vld [vmem:[%s5256_s1 + $0x2c8] sm:$0xf0]  ;;  %v3348_v38 = vld [vmem:[%s5256_s1 + $0x380] sm:$0xf] }
  0xd2   : > { %2208 = vmatpush.bf16.msra.mxu0 %v3357_v60  ;;  %v1293_v46 = vpop.f32.mrf.mxu0  ;;  %v5110_v28 = vpop.f32.mrf.mxu2 }
  0xd3   : > { %2222 = vmatpush.bf16.msra.mxu1 %v2977_v51  ;;  %v5040_v60 = vadd.f32 %v1293_v46, %v1280_v27  ;;  %v2929_v51 = vor.u32 %v3384_v56, %v2928_v43  ;;  %v3459_v46 = vld [vmem:[%s5256_s1 + $0x298] sm:$0xf0] }
  0xd4   : > { %2236 = vmatpush.bf16.msra.mxu2 %v3073_v52  ;;  %v3025_v52 = vor.u32 %v3408_v45, %v3024_v44 }
  0xd5   : > { %2250 = vmatpush.bf16.msra.mxu3 %v3169_v2  ;;  %v3429_v2 = vld [vmem:[%s5256_s1 + $0x1a8] sm:$0xf0] }
  0xd6   : > { %2209 = vmatpush.bf16.msra.mxu0 %v3345_v3  ;;  %v3472_v3 = vld [vmem:[%s5256_s1 + $0x304] sm:$0xf]  ;;  %v3109_v10 = vor.u32 %v3429_v2, %v3108_v1  ;;  %v3204_v1 = vld [vmem:[%s5256_s1 + $0x260] sm:$0xf]  ;;  %v3453_v2 = vld [vmem:[%s5256_s1 + $0x268] sm:$0xf0] }
  0xd7   : > { %2223 = vmatpush.bf16.msra.mxu1 %v2965_v49  ;;  %v3282_v49 = vld [vmem:[%s5256_s1 + $0x30c] sm:$0xf0] }
  0xd8   : > { %2237 = vmatpush.bf16.msra.mxu2 %v3061_v5  ;;  %v2904_v5 = vld [vmem:[%s5256_s1 + $0x8] sm:$0xf] }
  0xd9   : > { %2251 = vmatpush.bf16.msra.mxu3 %v3157_v14  ;;  %v3285_v14 = vor.u32 %v3472_v3, %v3282_v49  ;;  %v2905_v20 = vor.u32 %v3378_v6, %v2904_v5  ;;  %v3300_v3 = vld [vmem:[%s5256_s1 + $0x320] sm:$0xf]  ;;  %v3205_v49 = vor.u32 %v3453_v2, %v3204_v1  ;;  %v3192_v6 = vld [vmem:[%s5256_s1 + $0x248] sm:$0xf] }
  0xda   : > { %2210 = vmatpush.bf16.msra.mxu0 %v3333_v19  ;;  %v3426_v19 = vld [vmem:[%s5256_s1 + $0x190] sm:$0xf0]  ;;  %v5154_v56 = vpop.f32.mrf.mxu2 }
  0xdb   : > { %2224 = vmatpush.bf16.msra.mxu1 %v2953_v23  ;;  %v3373_v23 = vor.u32 %v3495_v13, %v3372_v12  ;;  %v3097_v27 = vor.u32 %v3426_v19, %v3096_v17  ;;  %v3193_v12 = vor.u32 %v3450_v7, %v3192_v6 }
  0xdc   : > { %2238 = vmatpush.bf16.msra.mxu2 %v3049_v24  ;;  %v5108_v24 = vpop.f32.mrf.mxu3 }
  0xdd   : > { %2252 = vmatpush.bf16.msra.mxu3 %v3145_v35  ;;  %v3361_v35 = vor.u32 %v3492_v32, %v3360_v31 }
  0xde   : > { %2211 = vmatpush.bf16.msra.mxu0 %v3321_v36  ;;  %v3252_v36 = vld [vmem:[%s5256_s1 + $0x2c0] sm:$0xf] }
  0xdf   : > { %2225 = vmatpush.bf16.msra.mxu1 %v2941_v39  ;;  %v3489_v39 = vld [vmem:[%s5256_s1 + $0x388] sm:$0xf0] }
  0xe0   : > { %2239 = vmatpush.bf16.msra.mxu2 %v3037_v40  ;;  %v3253_v40 = vor.u32 %v3465_v37, %v3252_v36  ;;  %v3349_v41 = vor.u32 %v3489_v39, %v3348_v38 }
  0xe1   : > { %2253 = vmatpush.bf16.msra.mxu3 %v3133_v54  ;;  %v3228_v54 = vld [vmem:[%s5256_s1 + $0x290] sm:$0xf] }
  0xe2   : > { %2212 = vmatpush.bf16.msra.mxu0 %v3309_v47  ;;  %v3324_v47 = vld [vmem:[%s5256_s1 + $0x350] sm:$0xf]  ;;  %v3229_v50 = vor.u32 %v3459_v46, %v3228_v54 }
  0xe3   : > { %2226 = vmatpush.bf16.msra.mxu1 %v2929_v51  ;;  %v3325_v51 = vor.u32 %v3483_v48, %v3324_v47 }
  0xe4   : > { %2240 = vmatpush.bf16.msra.mxu2 %v3025_v52  ;;  %v5152_v43 = vpop.f32.mrf.mxu3  ;;  %v3216_v52 = vld [vmem:[%s5256_s1 + $0x278] sm:$0xf] }
  0xe5   : > { %2254 = vmatpush.bf16.msra.mxu3 %v3121_v62  ;;  %v3217_v61 = vor.u32 %v3456_v53, %v3216_v52 }
  0xe6   : > { %2213 = vmatpush.bf16.msra.mxu0 %v3297_v0  ;;  %v3313_v0 = vor.u32 %v3480_v57, %v3312_v55 }
  0xe7   : > { %2227 = vmatpush.bf16.msra.mxu1 %v2917_v63  ;;  %v3477_v63 = vld [vmem:[%s5256_s1 + $0x328] sm:$0xf0] }
  0xe8   : > { %2241 = vmatpush.bf16.msra.mxu2 %v3013_v4  ;;  %v3301_v5 = vor.u32 %v3477_v63, %v3300_v3 }
  0xe9   : > { %2255 = vmatpush.bf16.msra.mxu3 %v3109_v10 }
  0xea   : > { %2214 = vmatpush.bf16.msra.mxu0 %v3285_v14  ;;  %v1347_v4 = vpop.f32.mrf.mxu0  ;;  %v3289_v14 = vor.u32 %v3474_v9, %v3288_v8 }
  0xeb   : > { %2228 = vmatpush.bf16.msra.mxu1 %v2905_v20  ;;  %v1305_v20 = vpop.f32.mrf.mxu1 }
  0xec   : > { %2242 = vmatpush.bf16.msra.mxu2 %v3001_v21 }
  0xed   : > { %2256 = vmatpush.bf16.msra.mxu3 %v3097_v27  ;;  %2215 = vmatmul.bf16.vlgmr.msra.gmra.mxu0 %v4085_v16 }
  0xee   : > { %2263 = vmatpush.bf16.msrb.mxu0 %v3277_v22  ;;  %2229 = vmatmul.bf16.vlgmr.msra.gmra.mxu1 %v3975_v15  ;;  %v3240_v15 = vld [vmem:[%s5256_s1 + $0x2a8] sm:$0xf] }
  0xef   : > { %2277 = vmatpush.bf16.msrb.mxu1 %v3373_v23  ;;  %2243 = vmatmul.bf16.vlgmr.msra.gmra.mxu2 %v4006_v34  ;;  %v3462_v34 = vld [vmem:[%s5256_s1 + $0x2b0] sm:$0xf0] }
  0xf0   : > { %2257 = vmatmul.bf16.vlgmr.msra.gmra.mxu3 %v3992_v25  ;;  %v3486_v25 = vld [vmem:[%s5256_s1 + $0x370] sm:$0xf0]  ;;  %v3241_v44 = vor.u32 %v3462_v34, %v3240_v15 }
  0xf1   : > { %v3337_v45 = vor.u32 %v3486_v25, %v3336_v42 }
  0xf2   : > { %2264 = vmatpush.bf16.msrb.mxu0 %v3265_v33  ;;  %v1375_v59 = vpop.f32.mrf.mxu2  ;;  %v1349_v17 = vpop.f32.mrf.mxu0 }
  0xf3   : > { %2278 = vmatpush.bf16.msrb.mxu1 %v3361_v35  ;;  %v1389_v58 = vpop.f32.mrf.mxu3  ;;  %v1307_v27 = vpop.f32.mrf.mxu1 }
  0xf4   : > { %v1390_v62 = vadd.f32 %v1389_v58, %v1375_v59 }
  0xf6   : > { %2265 = vmatpush.bf16.msrb.mxu0 %v3253_v40  ;;  %v1320_v40 = vadd.f32 %v5110_v28, %v1305_v20 }
  0xf7   : > { %2279 = vmatpush.bf16.msrb.mxu1 %v3349_v41 }
  0xf8   : > { %v1334_v15 = vadd.f32 %v5108_v24, %v1320_v40 }
  0xfa   : > { %2266 = vmatpush.bf16.msrb.mxu0 %v3241_v44  ;;  %v1377_v11 = vpop.f32.mrf.mxu2  ;;  %v1348_v44 = vadd.f32 %v1347_v4, %v1334_v15 }
  0xfb   : > { %2280 = vmatpush.bf16.msrb.mxu1 %v3337_v45  ;;  %v1391_v10 = vpop.f32.mrf.mxu3  ;;  %v1361_v29 = vpop.f32.mrf.mxu1  ;;  %v1322_v45 = vadd.f32 %v5154_v56, %v1307_v27  ;;  %v5227_v56 = vld [vmem:[%s5258_s3] sm:$0x7] }
  0xfc   : > { %v1392_v13 = vadd.f32 %v1391_v10, %v1377_v11  ;;  %v1362_v47 = vadd.f32 %v1361_v29, %v1348_v44  ;;  %v2292_v1 = vperm.slane %v5227_v56, 0 }
  0xfe   : > { %2267 = vmatpush.bf16.msrb.mxu0 %v3229_v50 }
  0xff   : > { %2281 = vmatpush.bf16.msrb.mxu1 %v3325_v51  ;;  %v1336_v51 = vadd.f32 %v5152_v43, %v1322_v45 }
 0x101   : > { %v1350_v28 = vadd.f32 %v1349_v17, %v1336_v51  ;;  %v2294_v51 = vperm.slane %v5227_v56, 2 }
 0x102   : > { %2268 = vmatpush.bf16.msrb.mxu0 %v3217_v61 }
 0x103   : > { %2282 = vmatpush.bf16.msrb.mxu1 %v3313_v0  ;;  %v1363_v30 = vpop.f32.mrf.mxu1 }
 0x104   : > { %v1364_v61 = vadd.f32 %v1363_v30, %v1350_v28 }
 0x106   : > { %2269 = vmatpush.bf16.msrb.mxu0 %v3205_v49 }
 0x107   : > { %2283 = vmatpush.bf16.msrb.mxu1 %v3301_v5 }
 0x10a   : > { %2270 = vmatpush.bf16.msrb.mxu0 %v3193_v12  ;;  %v1403_v19 = vpop.f32.mrf.mxu0 }
 0x10b   : > { %2284 = vmatpush.bf16.msrb.mxu1 %v3289_v14  ;;  %v5206_v21 = vadd.f32 %v1403_v19, %v1390_v62  ;;  %v5210_v31 = vpop.f32.mrf.mxu1 }
 0x10d   : > { %2271 = vmatmul.bf16.vlgmr.msrb.gmra.mxu0 %v3994_v26 }
 0x10e   : > { %2285 = vmatmul.bf16.vlgmr.msrb.gmra.mxu1 %v4085_v16 }
 0x112   : > { %v1405_v22 = vpop.f32.mrf.mxu0  ;;  %v5212_v32 = vpop.f32.mrf.mxu2 }
 0x113   : > { %v5208_v23 = vadd.f32 %v1405_v22, %v1392_v13  ;;  %v2090_v33 = vpop.f32.mrf.mxu3  ;;  %v5214_v35 = vpop.f32.mrf.mxu1 }
 0x114   : > { %v2091_v54 = vadd.f32 %v2090_v33, %v4990_v18 }
 0x115   : > { %v1420_v44 = vadd.f32 %v5214_v35, %v5208_v23 }
 0x11a   : > { %v5216_v26 = vpop.f32.mrf.mxu2 }
 0x11b   : > { %v2092_v36 = vpop.f32.mrf.mxu3 }
 0x11c   : > { %v2093_v24 = vadd.f32 %v2092_v36, %v5040_v60  ;;  %v2293_v60 = vperm.slane %v5227_v56, 1  ;;  %v2329_v56 = vld [vmem:[%s5235_s27 + $0x14] sm:$0x1] }
 0x12a   : > { %v2104_v16 = vpop.f32.mrf.mxu0 }
 0x12b   : > { %v2118_v37 = vpop.f32.mrf.mxu1  ;;  %v2105_v48 = vadd.f32 %v2104_v16, %v2091_v54  ;;  %v1434_v54 = vadd.f32 %v5216_v26, %v1420_v44 }
 0x12d   : > { %v2119_v55 = vadd.f32 %v2118_v37, %v2105_v48  ;;  %v2324_v37 = vld [vmem:[%s5235_s27 + $0xc] sm:$0x11] }
 0x132   : > { %v2132_v38 = vpop.f32.mrf.mxu2  ;;  %v2106_v39 = vpop.f32.mrf.mxu0 }
 0x133   : > { %v2146_v41 = vpop.f32.mrf.mxu3  ;;  %v2120_v34 = vpop.f32.mrf.mxu1  ;;  %v2133_v58 = vadd.f32 %v2132_v38, %v2119_v55  ;;  %v2107_v62 = vadd.f32 %v2106_v39, %v2093_v24  ;;  %v1418_v39 = vadd.f32 %v5210_v31, %v5206_v21 }
 0x135   : > { %v2147_v43 = vadd.f32 %v2146_v41, %v2133_v58  ;;  %v2121_v63 = vadd.f32 %v2120_v34, %v2107_v62  ;;  %v1432_v15 = vadd.f32 %v5212_v32, %v1418_v39 }
 0x137   : > { %v2298_v6 = vadd.f32 %v2292_v1, %v2147_v43 }
 0x139   : > { %v2304_v13 = vmax.f32 %v2298_v6, 0.0 }
 0x13a   : > { %v2134_v42 = vpop.f32.mrf.mxu2 }
 0x13b   : > { %v2148_v46 = vpop.f32.mrf.mxu3  ;;  %v2135_v7 = vadd.f32 %v2134_v42, %v2121_v63 }
 0x13d   : > { %v2149_v14 = vadd.f32 %v2148_v46, %v2135_v7 }
 0x13f   : > { %v2301_v27 = vadd.f32 %v2292_v1, %v2149_v14 }
 0x141   : > { %v2307_v33 = vmax.f32 %v2301_v27, 0.0 }
 0x14a   : > { %v2160_v25 = vpop.f32.mrf.mxu0 }
 0x14b   : > { %v2174_v50 = vpop.f32.mrf.mxu1  ;;  %v2161_v52 = vadd.f32 %v2160_v25, %v1362_v47 }
 0x14d   : > { %v2175_v59 = vadd.f32 %v2174_v50, %v2161_v52 }
 0x152   : > { %v2188_v53 = vpop.f32.mrf.mxu2  ;;  %v2162_v57 = vpop.f32.mrf.mxu0 }
 0x153   : > { %v2202_v18 = vpop.f32.mrf.mxu3  ;;  %v2189_v0 = vadd.f32 %v2188_v53, %v2175_v59  ;;  %v2163_v2 = vadd.f32 %v2162_v57, %v1364_v61  ;;  %v2176_v3 = vpop.f32.mrf.mxu1 }
 0x155   : > { %v2203_v4 = vadd.f32 %v2202_v18, %v2189_v0  ;;  %v2177_v8 = vadd.f32 %v2176_v3, %v2163_v2 }
 0x15a   : > { %v2190_v49 = vpop.f32.mrf.mxu2 }
 0x15b   : > { %v2191_v10 = vadd.f32 %v2190_v49, %v2177_v8  ;;  %v2204_v12 = vpop.f32.mrf.mxu3 }
 0x15d   : > { %v2205_v19 = vadd.f32 %v2204_v12, %v2191_v10 }
 0x16a   : > { %v2216_v5 = vpop.f32.mrf.mxu0 }
 0x16b   : > { %v2217_v9 = vadd.f32 %v2216_v5, %v2203_v4  ;;  %v2230_v16 = vpop.f32.mrf.mxu1 }
 0x16c   : > { %v2231_v34 = vadd.f32 %v2230_v16, %v1432_v15 }
 0x16d   : > { %v2299_v11 = vadd.f32 %v2293_v60, %v2217_v9 }
 0x16f   : > { %v2305_v17 = vmax.f32 %v2299_v11, 0.0 }
 0x171   : > { %v2310_v20 = vpack.c.bf16 %v2305_v17, %v2304_v13 }
 0x172   : > { %v2218_v22 = vpop.f32.mrf.mxu0  ;;  %v2244_v41 = vpop.f32.mrf.mxu2 }
 0x173   : > { %2314 = vst [vmem:[%s5235_s27] sm:$0xff] %v2310_v20  ;;  %v2219_v29 = vadd.f32 %v2218_v22, %v2205_v19  ;;  %v2232_v42 = vpop.f32.mrf.mxu1  ;;  %v2258_v25 = vpop.f32.mrf.mxu3  ;;  %v2245_v45 = vadd.f32 %v2244_v41, %v2231_v34 }
 0x174   : > { %v2233_v50 = vadd.f32 %v2232_v42, %v1434_v54 }
 0x175   : > { %v2302_v30 = vadd.f32 %v2293_v60, %v2219_v29  ;;  %v2259_v46 = vadd.f32 %v2258_v25, %v2245_v45 }
 0x177   : > { %v2308_v36 = vmax.f32 %v2302_v30, 0.0 }
 0x179   : > { %v2312_v38 = vpack.c.bf16 %v2308_v36, %v2307_v33 }
 0x17a   : > { %v2246_v47 = vpop.f32.mrf.mxu2 }
 0x17b   : > { %v2325_v40 = vsel %vm2323_vm6, %v2312_v38, %v2324_v37  ;;  %v2247_v52 = vadd.f32 %v2246_v47, %v2233_v50  ;;  %v2260_v53 = vpop.f32.mrf.mxu3 }
 0x17c   : > { %2326 = vst [vmem:[%s5235_s27 + $0xc] sm:$0x11] %v2325_v40 }
 0x17d   : > { %v2261_v55 = vadd.f32 %v2260_v53, %v2247_v52 }
 0x18a   : > { %v2272_v48 = vpop.f32.mrf.mxu0 }
 0x18b   : > { %v2273_v21 = vadd.f32 %v2272_v48, %v2259_v46  ;;  %v2286_v31 = vpop.f32.mrf.mxu1 }
 0x18d   : > { %v2287_v32 = vadd.f32 %v2286_v31, %v2273_v21 }
 0x18f   : > { %v2300_v28 = vadd.f32 %v2294_v51, %v2287_v32 }
 0x191   : > { %v2306_v23 = vmax.f32 %v2300_v28, 0.0 }
 0x192   : > { %v2274_v35 = vpop.f32.mrf.mxu0 }
 0x193   : > { %v2311_v26 = vpack.c.bf16 %v2306_v23, %v2306_v23  ;;  %v2275_v57 = vadd.f32 %v2274_v35, %v2261_v55  ;;  %v2288_v24 = vpop.f32.mrf.mxu1 }
 0x195   : > { %2316 = vst.msk [vmem:[%s5235_s27 + $0x8] sm:$0xf] %vm2315_vm7, %v2311_v26  ;;  %v2289_v58 = vadd.f32 %v2288_v24, %v2275_v57 }
 0x197   : > { %v2303_v59 = vadd.f32 %v2294_v51, %v2289_v58 }
 0x199   : > { %v2309_v18 = vmax.f32 %v2303_v59, 0.0 }
 0x19b   : > { %v2313_v61 = vpack.c.bf16 %v2309_v18, %v2309_v18 }
 0x19d   : > { %v2330_v62 = vsel %vm2328_vm9, %v2313_v61, %v2329_v56 }
 0x19e   : > { %2331 = vst [vmem:[%s5235_s27 + $0x14] sm:$0x1] %v2330_v62 }
 0x19f PF: > { %s14_s15 = sadd.s32 1, %s3637_s15  }
 0x1a0   : > { %p11_p4 = scmp.ge.s32.totalorder %s14_s15, 4  }
 0x1a2   :  { %13 = sbr.rel (!%p11_p4) target bundleno = 1 (0x1), region = 66 }

// kernel: model_forward.5
= control target key start
LH: loop header
LB: loop body
LE: loop exit
PB: predicated region body
PF: predicated region fallthrough
CT: control target
= control target key end

     0   :  { %vm2021_vm0 = vcmask 261120   ;;  %vm2738_vm4 = vcmask 58368   ;;  %s6627_s1 = inlined_call_operand.vmem [shape: bf16[2592,256], index: 1, kind: input, shape index: {}]   ;;  %s6628_s0 = inlined_call_operand.vmem [shape: bf16[2,2592], index: 0, kind: input, shape index: {}]   ;;  %s6629_s2 = inlined_call_operand.vmem [shape: f32[1,256], index: 2, kind: input, shape index: {}]   ;;  %s6630_s3 = inlined_call_operand.vmem [shape: bf16[256,8], index: 3, kind: input, shape index: {}]   ;;  %s6631_s4 = inlined_call_operand.vmem [shape: f32[1,8], index: 4, kind: input, shape index: {}]   ;;  %s6632_s5 = inlined_call_operand.vmem [shape: f32[2,8], index: 5, kind: output, shape index: {}]  }
   0x1   :  { %v2817_v0 = vld [vmem:[%s6627_s1 + $0x70] sm:$0xf]  ;;  %v4136_v1 = vld [vmem:[%s6627_s1 + $0x74] sm:$0xf0]  ;;  %v2809_v11 = vld [vmem:[%s6627_s1 + $0x60] sm:$0xf] }
   0x2   :  { %v2881_v2 = vld [vmem:[%s6627_s1 + $0xf0] sm:$0xf]  ;;  %v2818_v3 = vor.u32 %v4136_v1, %v2817_v0  ;;  %v4152_v4 = vld [vmem:[%s6627_s1 + $0xf4] sm:$0xf0]  ;;  %v4134_v13 = vld [vmem:[%s6627_s1 + $0x64] sm:$0xf0] }
   0x3   :  { %v2945_v5 = vld [vmem:[%s6627_s1 + $0x170] sm:$0xf]  ;;  %v4168_v6 = vld [vmem:[%s6627_s1 + $0x174] sm:$0xf0]  ;;  %v2882_v7 = vor.u32 %v4152_v4, %v2881_v2  ;;  %v2873_v14 = vld [vmem:[%s6627_s1 + $0xe0] sm:$0xf]  ;;  %v2810_v16 = vor.u32 %v4134_v13, %v2809_v11 }
   0x4   :  { %v2946_v8 = vor.u32 %v4168_v6, %v2945_v5  ;;  %v3009_v9 = vld [vmem:[%s6627_s1 + $0x1f0] sm:$0xf]  ;;  %v4184_v10 = vld [vmem:[%s6627_s1 + $0x1f4] sm:$0xf0]  ;;  %2024 = vmatpush.bf16.msra.mxu0 %v2818_v3  ;;  %v4150_v15 = vld [vmem:[%s6627_s1 + $0xe4] sm:$0xf0] }
   0x5   :  { %v3010_v12 = vor.u32 %v4184_v10, %v3009_v9  ;;  %2037 = vmatpush.bf16.msra.mxu1 %v2882_v7  ;;  %v2874_v17 = vor.u32 %v4150_v15, %v2873_v14  ;;  %v2937_v18 = vld [vmem:[%s6627_s1 + $0x160] sm:$0xf]  ;;  %v4166_v19 = vld [vmem:[%s6627_s1 + $0x164] sm:$0xf0]  ;;  %v2801_v23 = vld [vmem:[%s6627_s1 + $0x50] sm:$0xf] }
   0x6   :  { %2050 = vmatpush.bf16.msra.mxu2 %v2946_v8  ;;  %v3001_v20 = vld [vmem:[%s6627_s1 + $0x1e0] sm:$0xf]  ;;  %v2938_v21 = vor.u32 %v4166_v19, %v2937_v18  ;;  %v4182_v22 = vld [vmem:[%s6627_s1 + $0x1e4] sm:$0xf0]  ;;  %v4132_v24 = vld [vmem:[%s6627_s1 + $0x54] sm:$0xf0] }
   0x7   :  { %2063 = vmatpush.bf16.msra.mxu3 %v3010_v12  ;;  %v3002_v25 = vor.u32 %v4182_v22, %v3001_v20  ;;  %v2865_v26 = vld [vmem:[%s6627_s1 + $0xd0] sm:$0xf]  ;;  %v4148_v27 = vld [vmem:[%s6627_s1 + $0xd4] sm:$0xf0]  ;;  %v2802_v29 = vor.u32 %v4132_v24, %v2801_v23  ;;  %v2793_v35 = vld [vmem:[%s6627_s1 + $0x40] sm:$0xf] }
   0x8   :  { %v2929_v28 = vld [vmem:[%s6627_s1 + $0x150] sm:$0xf]  ;;  %2025 = vmatpush.bf16.msra.mxu0 %v2810_v16  ;;  %v4164_v30 = vld [vmem:[%s6627_s1 + $0x154] sm:$0xf0]  ;;  %v2866_v33 = vor.u32 %v4148_v27, %v2865_v26  ;;  %v4130_v36 = vld [vmem:[%s6627_s1 + $0x44] sm:$0xf0] }
   0x9   :  { %v2993_v31 = vld [vmem:[%s6627_s1 + $0x1d0] sm:$0xf]  ;;  %v4180_v32 = vld [vmem:[%s6627_s1 + $0x1d4] sm:$0xf0]  ;;  %2038 = vmatpush.bf16.msra.mxu1 %v2874_v17  ;;  %v2930_v34 = vor.u32 %v4164_v30, %v2929_v28  ;;  %v2857_v37 = vld [vmem:[%s6627_s1 + $0xc0] sm:$0xf]  ;;  %v2794_v44 = vor.u32 %v4130_v36, %v2793_v35 }
   0xa   :  { %2051 = vmatpush.bf16.msra.mxu2 %v2938_v21  ;;  %v2994_v38 = vor.u32 %v4180_v32, %v2993_v31  ;;  %v4146_v39 = vld [vmem:[%s6627_s1 + $0xc4] sm:$0xf0]  ;;  %v2921_v40 = vld [vmem:[%s6627_s1 + $0x140] sm:$0xf]  ;;  %v2785_v47 = vld [vmem:[%s6627_s1 + $0x30] sm:$0xf] }
   0xb   :  { %2064 = vmatpush.bf16.msra.mxu3 %v3002_v25  ;;  %v4162_v41 = vld [vmem:[%s6627_s1 + $0x144] sm:$0xf0]  ;;  %v2985_v42 = vld [vmem:[%s6627_s1 + $0x1c0] sm:$0xf]  ;;  %v2858_v45 = vor.u32 %v4146_v39, %v2857_v37  ;;  %v4128_v48 = vld [vmem:[%s6627_s1 + $0x34] sm:$0xf0] }
   0xc   :  { %v4178_v43 = vld [vmem:[%s6627_s1 + $0x1c4] sm:$0xf0]  ;;  %2026 = vmatpush.bf16.msra.mxu0 %v2802_v29  ;;  %v2922_v46 = vor.u32 %v4162_v41, %v2921_v40  ;;  %v2849_v49 = vld [vmem:[%s6627_s1 + $0xb0] sm:$0xf]  ;;  %v4144_v51 = vld [vmem:[%s6627_s1 + $0xb4] sm:$0xf0]  ;;  %v2786_v56 = vor.u32 %v4128_v48, %v2785_v47 }
   0xd   :  { %2039 = vmatpush.bf16.msra.mxu1 %v2866_v33  ;;  %v2986_v50 = vor.u32 %v4178_v43, %v2985_v42  ;;  %v2913_v52 = vld [vmem:[%s6627_s1 + $0x130] sm:$0xf]  ;;  %v4160_v53 = vld [vmem:[%s6627_s1 + $0x134] sm:$0xf0]  ;;  %v2850_v57 = vor.u32 %v4144_v51, %v2849_v49  ;;  %v2777_v59 = vld [vmem:[%s6627_s1 + $0x20] sm:$0xf] }
   0xe   :  { %2052 = vmatpush.bf16.msra.mxu2 %v2930_v34  ;;  %v2977_v54 = vld [vmem:[%s6627_s1 + $0x1b0] sm:$0xf]  ;;  %v4176_v55 = vld [vmem:[%s6627_s1 + $0x1b4] sm:$0xf0]  ;;  %v2914_v58 = vor.u32 %v4160_v53, %v2913_v52  ;;  %v4126_v60 = vld [vmem:[%s6627_s1 + $0x24] sm:$0xf0] }
   0xf   :  { %2065 = vmatpush.bf16.msra.mxu3 %v2994_v38  ;;  %v2841_v61 = vld [vmem:[%s6627_s1 + $0xa0] sm:$0xf]  ;;  %v2978_v62 = vor.u32 %v4176_v55, %v2977_v54  ;;  %v4142_v63 = vld [vmem:[%s6627_s1 + $0xa4] sm:$0xf0]  ;;  %v2778_v4 = vor.u32 %v4126_v60, %v2777_v59  ;;  %v2769_v7 = vld [vmem:[%s6627_s1 + $0x10] sm:$0xf] }
  0x10   :  { %2027 = vmatpush.bf16.msra.mxu0 %v2794_v44  ;;  %v2905_v0 = vld [vmem:[%s6627_s1 + $0x120] sm:$0xf]  ;;  %v4158_v1 = vld [vmem:[%s6627_s1 + $0x124] sm:$0xf0]  ;;  %v2842_v5 = vor.u32 %v4142_v63, %v2841_v61  ;;  %v4124_v8 = vld [vmem:[%s6627_s1 + $0x14] sm:$0xf0] }
  0x11   :  { %2040 = vmatpush.bf16.msra.mxu1 %v2858_v45  ;;  %v2969_v2 = vld [vmem:[%s6627_s1 + $0x1a0] sm:$0xf]  ;;  %v4174_v3 = vld [vmem:[%s6627_s1 + $0x1a4] sm:$0xf0]  ;;  %v2906_v6 = vor.u32 %v4158_v1, %v2905_v0  ;;  %v2833_v9 = vld [vmem:[%s6627_s1 + $0x90] sm:$0xf]  ;;  %v2770_v16 = vor.u32 %v4124_v8, %v2769_v7 }
  0x12   :  { %2053 = vmatpush.bf16.msra.mxu2 %v2922_v46  ;;  %v2970_v10 = vor.u32 %v4174_v3, %v2969_v2  ;;  %v4140_v11 = vld [vmem:[%s6627_s1 + $0x94] sm:$0xf0]  ;;  %v2897_v12 = vld [vmem:[%s6627_s1 + $0x110] sm:$0xf]  ;;  %v2761_v17 = vld [vmem:[%s6627_s1] sm:$0xf] }
  0x13   :  { %2066 = vmatpush.bf16.msra.mxu3 %v2986_v50  ;;  %v4156_v13 = vld [vmem:[%s6627_s1 + $0x114] sm:$0xf0]  ;;  %v2961_v14 = vld [vmem:[%s6627_s1 + $0x190] sm:$0xf]  ;;  %v4122_v18 = vld [vmem:[%s6627_s1 + $0x4] sm:$0xf0]  ;;  %v2834_v19 = vor.u32 %v4140_v11, %v2833_v9 }
  0x14   :  { %2028 = vmatpush.bf16.msra.mxu0 %v2786_v56  ;;  %v4172_v15 = vld [vmem:[%s6627_s1 + $0x194] sm:$0xf0]  ;;  %v2898_v20 = vor.u32 %v4156_v13, %v2897_v12  ;;  %v2825_v21 = vld [vmem:[%s6627_s1 + $0x80] sm:$0xf]  ;;  %v4138_v22 = vld [vmem:[%s6627_s1 + $0x84] sm:$0xf0]  ;;  %v2762_v31 = vor.u32 %v4122_v18, %v2761_v17 }
  0x15   :  { %2041 = vmatpush.bf16.msra.mxu1 %v2850_v57  ;;  %v2889_v23 = vld [vmem:[%s6627_s1 + $0x100] sm:$0xf]  ;;  %v2962_v24 = vor.u32 %v4172_v15, %v2961_v14  ;;  %v4154_v25 = vld [vmem:[%s6627_s1 + $0x104] sm:$0xf0]  ;;  %v3073_v28 = vld [vmem:[%s6627_s1 + $0x270] sm:$0xf]  ;;  %v2826_v35 = vor.u32 %v4138_v22, %v2825_v21 }
  0x16   :  { %2054 = vmatpush.bf16.msra.mxu2 %v2914_v58  ;;  %v2953_v26 = vld [vmem:[%s6627_s1 + $0x180] sm:$0xf]  ;;  %v4170_v27 = vld [vmem:[%s6627_s1 + $0x184] sm:$0xf0]  ;;  %v4200_v29 = vld [vmem:[%s6627_s1 + $0x274] sm:$0xf0]  ;;  %v2890_v36 = vor.u32 %v4154_v25, %v2889_v23 }
  0x17   :  { %2067 = vmatpush.bf16.msra.mxu3 %v2978_v62  ;;  %v3137_v30 = vld [vmem:[%s6627_s1 + $0x2f0] sm:$0xf]  ;;  %v4216_v32 = vld [vmem:[%s6627_s1 + $0x2f4] sm:$0xf0]  ;;  %v2954_v39 = vor.u32 %v4170_v27, %v2953_v26  ;;  %v3074_v40 = vor.u32 %v4200_v29, %v3073_v28  ;;  %v3065_v43 = vld [vmem:[%s6627_s1 + $0x260] sm:$0xf] }
  0x18   :  { %2029 = vmatpush.bf16.msra.mxu0 %v2778_v4  ;;  %v3201_v33 = vld [vmem:[%s6627_s1 + $0x370] sm:$0xf]  ;;  %v4232_v34 = vld [vmem:[%s6627_s1 + $0x374] sm:$0xf0]  ;;  %v3138_v41 = vor.u32 %v4216_v32, %v3137_v30  ;;  %v4198_v44 = vld [vmem:[%s6627_s1 + $0x264] sm:$0xf0] }
  0x19   :  { %2042 = vmatpush.bf16.msra.mxu1 %v2842_v5  ;;  %v3265_v37 = vld [vmem:[%s6627_s1 + $0x3f0] sm:$0xf]  ;;  %v4248_v38 = vld [vmem:[%s6627_s1 + $0x3f4] sm:$0xf0]  ;;  %v3202_v42 = vor.u32 %v4232_v34, %v3201_v33  ;;  %v3129_v45 = vld [vmem:[%s6627_s1 + $0x2e0] sm:$0xf]  ;;  %v3066_v52 = vor.u32 %v4198_v44, %v3065_v43 }
  0x1a   :  { %2055 = vmatpush.bf16.msra.mxu2 %v2906_v6  ;;  %v3266_v46 = vor.u32 %v4248_v38, %v3265_v37  ;;  %v4214_v47 = vld [vmem:[%s6627_s1 + $0x2e4] sm:$0xf0]  ;;  %v3193_v48 = vld [vmem:[%s6627_s1 + $0x360] sm:$0xf]  ;;  %v3057_v53 = vld [vmem:[%s6627_s1 + $0x250] sm:$0xf] }
  0x1b   :  { %2068 = vmatpush.bf16.msra.mxu3 %v2970_v10  ;;  %v4230_v49 = vld [vmem:[%s6627_s1 + $0x364] sm:$0xf0]  ;;  %v3257_v50 = vld [vmem:[%s6627_s1 + $0x3e0] sm:$0xf]  ;;  %v4196_v54 = vld [vmem:[%s6627_s1 + $0x254] sm:$0xf0]  ;;  %v3130_v55 = vor.u32 %v4214_v47, %v3129_v45 }
  0x1c   :  { %2030 = vmatpush.bf16.msra.mxu0 %v2770_v16  ;;  %v4246_v51 = vld [vmem:[%s6627_s1 + $0x3e4] sm:$0xf0]  ;;  %v3194_v56 = vor.u32 %v4230_v49, %v3193_v48  ;;  %v3121_v57 = vld [vmem:[%s6627_s1 + $0x2d0] sm:$0xf]  ;;  %v4212_v58 = vld [vmem:[%s6627_s1 + $0x2d4] sm:$0xf0]  ;;  %v3058_v1 = vor.u32 %v4196_v54, %v3057_v53 }
  0x1d   :  { %2043 = vmatpush.bf16.msra.mxu1 %v2834_v19  ;;  %v21_v59 = vld [vmem:[%s6628_s0] sm:$0xff]  ;;  %v3258_v60 = vor.u32 %v4246_v51, %v3257_v50  ;;  %v3185_v61 = vld [vmem:[%s6627_s1 + $0x350] sm:$0xf]  ;;  %v4228_v62 = vld [vmem:[%s6627_s1 + $0x354] sm:$0xf0]  ;;  %v3122_v2 = vor.u32 %v4212_v58, %v3121_v57 }
  0x1e   :  { %2056 = vmatpush.bf16.msra.mxu2 %v2898_v20  ;;  %355 = vst [vmem:[#allocation1] ss:$9 sm:$0xff] %v21_v59  ;;  %v3249_v63 = vld [vmem:[%s6627_s1 + $0x3d0] sm:$0xf]  ;;  %v4244_v0 = vld [vmem:[%s6627_s1 + $0x3d4] sm:$0xf0]  ;;  %v3186_v3 = vor.u32 %v4228_v62, %v3185_v61 }
  0x1f   :  { %2069 = vmatpush.bf16.msra.mxu3 %v2962_v24  ;;  %v3049_v4 = vld [vmem:[%s6627_s1 + $0x240] sm:$0xf]  ;;  %v4194_v5 = vld [vmem:[%s6627_s1 + $0x244] sm:$0xf0]  ;;  %v3250_v7 = vor.u32 %v4244_v0, %v3249_v63  ;;  %v3041_v13 = vld [vmem:[%s6627_s1 + $0x230] sm:$0xf] }
  0x20   :  { %2031 = vmatpush.bf16.msra.mxu0 %v2762_v31  ;;  %v3113_v6 = vld [vmem:[%s6627_s1 + $0x2c0] sm:$0xf]  ;;  %v4210_v8 = vld [vmem:[%s6627_s1 + $0x2c4] sm:$0xf0]  ;;  %v3050_v14 = vor.u32 %v4194_v5, %v3049_v4  ;;  %v4192_v15 = vld [vmem:[%s6627_s1 + $0x234] sm:$0xf0] }
  0x21   :  { %2044 = vmatpush.bf16.msra.mxu1 %v2826_v35  ;;  %v3177_v9 = vld [vmem:[%s6627_s1 + $0x340] sm:$0xf]  ;;  %v4226_v10 = vld [vmem:[%s6627_s1 + $0x344] sm:$0xf0]  ;;  %v3105_v16 = vld [vmem:[%s6627_s1 + $0x2b0] sm:$0xf]  ;;  %v3114_v18 = vor.u32 %v4210_v8, %v3113_v6  ;;  %v3042_v29 = vor.u32 %v4192_v15, %v3041_v13 }
  0x22   :  { %2057 = vmatpush.bf16.msra.mxu2 %v2890_v36  ;;  %v3241_v11 = vld [vmem:[%s6627_s1 + $0x3c0] sm:$0xf]  ;;  %v4242_v12 = vld [vmem:[%s6627_s1 + $0x3c4] sm:$0xf0]  ;;  %v4208_v17 = vld [vmem:[%s6627_s1 + $0x2b4] sm:$0xf0]  ;;  %v3178_v19 = vor.u32 %v4226_v10, %v3177_v9 }
  0x23   :  { %2070 = vmatpush.bf16.msra.mxu3 %v2954_v39  ;;  %v3242_v23 = vor.u32 %v4242_v12, %v3241_v11  ;;  %v3169_v24 = vld [vmem:[%s6627_s1 + $0x330] sm:$0xf]  ;;  %v4224_v25 = vld [vmem:[%s6627_s1 + $0x334] sm:$0xf0]  ;;  %v3106_v30 = vor.u32 %v4208_v17, %v3105_v16  ;;  %v3033_v32 = vld [vmem:[%s6627_s1 + $0x220] sm:$0xf] }
  0x24   :  { %2076 = vmatpush.bf16.msrb.mxu0 %v3074_v40  ;;  %v3233_v27 = vld [vmem:[%s6627_s1 + $0x3b0] sm:$0xf]  ;;  %v4240_v28 = vld [vmem:[%s6627_s1 + $0x3b4] sm:$0xf0]  ;;  %v3170_v31 = vor.u32 %v4224_v25, %v3169_v24  ;;  %v4190_v33 = vld [vmem:[%s6627_s1 + $0x224] sm:$0xf0] }
  0x25   :  { %2089 = vmatpush.bf16.msrb.mxu1 %v3138_v41  ;;  %v4805_v20 = vld [vmem:[#allocation1 + $0x12] sm:$0xff]  ;;  %v4807_v21 = vld [vmem:[#allocation1] sm:$0xff]  ;;  %v4818_v26 = vld [vmem:[#allocation1 + $0x9] sm:$0xff]  ;;  %v3234_v35 = vor.u32 %v4240_v28, %v3233_v27  ;;  %v3034_v43 = vor.u32 %v4190_v33, %v3033_v32 }
  0x26   :  { %2102 = vmatpush.bf16.msrb.mxu2 %v3202_v42  ;;  %v4809_v22 = vld [vmem:[#allocation1 + $0x1b] sm:$0xff]  ;;  %2032 = vmatmul.bf16.vlgmr.msra.gmra.mxu0 %v4807_v21  ;;  %v22_v36 = vld [vmem:[%s6628_s0 + $0x8] sm:$0xff]  ;;  %v3025_v42 = vld [vmem:[%s6627_s1 + $0x210] sm:$0xf] }
  0x27   :  { %2115 = vmatpush.bf16.msrb.mxu3 %v3266_v46  ;;  %2058 = vmatmul.bf16.vlgmr.msra.gmra.mxu2 %v4805_v20  ;;  %v3097_v34 = vld [vmem:[%s6627_s1 + $0x2a0] sm:$0xf]  ;;  %v4206_v37 = vld [vmem:[%s6627_s1 + $0x2a4] sm:$0xf0]  ;;  %v4188_v44 = vld [vmem:[%s6627_s1 + $0x214] sm:$0xf0] }
  0x28   :  { %2077 = vmatpush.bf16.msrb.mxu0 %v3066_v52  ;;  %2071 = vmatmul.bf16.vlgmr.msra.gmra.mxu3 %v4809_v22  ;;  %v3161_v38 = vld [vmem:[%s6627_s1 + $0x320] sm:$0xf]  ;;  %v4222_v39 = vld [vmem:[%s6627_s1 + $0x324] sm:$0xf0]  ;;  %v3089_v45 = vld [vmem:[%s6627_s1 + $0x290] sm:$0xf]  ;;  %v3098_v47 = vor.u32 %v4206_v37, %v3097_v34  ;;  %v3026_v58 = vor.u32 %v4188_v44, %v3025_v42 }
  0x29   :  { %2090 = vmatpush.bf16.msrb.mxu1 %v3130_v55  ;;  %v3225_v40 = vld [vmem:[%s6627_s1 + $0x3a0] sm:$0xf]  ;;  %v4238_v41 = vld [vmem:[%s6627_s1 + $0x3a4] sm:$0xf0]  ;;  %v4204_v46 = vld [vmem:[%s6627_s1 + $0x294] sm:$0xf0]  ;;  %v3162_v48 = vor.u32 %v4222_v39, %v3161_v38 }
  0x2a   :  { %2103 = vmatpush.bf16.msrb.mxu2 %v3194_v56  ;;  %2045 = vmatmul.bf16.vlgmr.msra.gmra.mxu1 %v4818_v26  ;;  %v3153_v49 = vld [vmem:[%s6627_s1 + $0x310] sm:$0xf]  ;;  %v4220_v50 = vld [vmem:[%s6627_s1 + $0x314] sm:$0xf0]  ;;  %v3226_v52 = vor.u32 %v4238_v41, %v3225_v40  ;;  %v4876_v53 = vld [vmem:[#allocation1 + $0x24] sm:$0xff]  ;;  %v3090_v61 = vor.u32 %v4204_v46, %v3089_v45 }
  0x2b   :  { %2116 = vmatpush.bf16.msrb.mxu3 %v3258_v60  ;;  %v4874_v51 = vld [vmem:[#allocation1 + $0x36] sm:$0xff]  ;;  %v4878_v54 = vld [vmem:[#allocation1 + $0x3f] sm:$0xff]  ;;  %v4880_v55 = vld [vmem:[#allocation1 + $0x2d] sm:$0xff]  ;;  %v3154_v62 = vor.u32 %v4220_v50, %v3153_v49 }
  0x2c   :  { %2078 = vmatpush.bf16.msrb.mxu0 %v3058_v1  ;;  %v3217_v56 = vld [vmem:[%s6627_s1 + $0x390] sm:$0xf]  ;;  %v4236_v57 = vld [vmem:[%s6627_s1 + $0x394] sm:$0xf0]  ;;  %365 = vst [vmem:[#allocation1] ss:$9 sm:$0xff] %v22_v36 }
  0x2d   :  { %2091 = vmatpush.bf16.msrb.mxu1 %v3122_v2  ;;  %v3017_v59 = vld [vmem:[%s6627_s1 + $0x200] sm:$0xf]  ;;  %v4186_v60 = vld [vmem:[%s6627_s1 + $0x204] sm:$0xf0]  ;;  %v3218_v2 = vor.u32 %v4236_v57, %v3217_v56  ;;  %v3329_v6 = vld [vmem:[%s6627_s1 + $0x470] sm:$0xf] }
  0x2e   :  { %2104 = vmatpush.bf16.msrb.mxu2 %v3186_v3  ;;  %v3081_v63 = vld [vmem:[%s6627_s1 + $0x280] sm:$0xf]  ;;  %v4202_v0 = vld [vmem:[%s6627_s1 + $0x284] sm:$0xf0]  ;;  %v3393_v8 = vld [vmem:[%s6627_s1 + $0x4f0] sm:$0xf]  ;;  %v3018_v9 = vor.u32 %v4186_v60, %v3017_v59 }
  0x2f   :  { %2117 = vmatpush.bf16.msrb.mxu3 %v3250_v7  ;;  %v3145_v1 = vld [vmem:[%s6627_s1 + $0x300] sm:$0xf]  ;;  %v4218_v3 = vld [vmem:[%s6627_s1 + $0x304] sm:$0xf0]  ;;  %v4264_v7 = vld [vmem:[%s6627_s1 + $0x474] sm:$0xf0]  ;;  %v3082_v13 = vor.u32 %v4202_v0, %v3081_v63 }
  0x30   :  { %2079 = vmatpush.bf16.msrb.mxu0 %v3050_v14  ;;  %v3209_v4 = vld [vmem:[%s6627_s1 + $0x380] sm:$0xf]  ;;  %v4234_v5 = vld [vmem:[%s6627_s1 + $0x384] sm:$0xf0]  ;;  %v4280_v10 = vld [vmem:[%s6627_s1 + $0x4f4] sm:$0xf0]  ;;  %v3146_v14 = vor.u32 %v4218_v3, %v3145_v1 }
  0x31   :  { %2092 = vmatpush.bf16.msrb.mxu1 %v3114_v18  ;;  %v3457_v11 = vld [vmem:[%s6627_s1 + $0x570] sm:$0xf]  ;;  %v4296_v12 = vld [vmem:[%s6627_s1 + $0x574] sm:$0xf0]  ;;  %v3210_v17 = vor.u32 %v4234_v5, %v3209_v4  ;;  %v3330_v18 = vor.u32 %v4264_v7, %v3329_v6  ;;  %v3321_v24 = vld [vmem:[%s6627_s1 + $0x460] sm:$0xf] }
  0x32   :  { %2105 = vmatpush.bf16.msrb.mxu2 %v3178_v19  ;;  %v3521_v15 = vld [vmem:[%s6627_s1 + $0x5f0] sm:$0xf]  ;;  %v4312_v16 = vld [vmem:[%s6627_s1 + $0x5f4] sm:$0xf0]  ;;  %v3394_v19 = vor.u32 %v4280_v10, %v3393_v8  ;;  %v4262_v25 = vld [vmem:[%s6627_s1 + $0x464] sm:$0xf0] }
  0x33   :  { %2118 = vmatpush.bf16.msrb.mxu3 %v3242_v23  ;;  %v3458_v23 = vor.u32 %v4296_v12, %v3457_v11  ;;  %v3385_v27 = vld [vmem:[%s6627_s1 + $0x4e0] sm:$0xf]  ;;  %v3522_v28 = vor.u32 %v4312_v16, %v3521_v15  ;;  %v4310_v33 = vld [vmem:[%s6627_s1 + $0x5e4] sm:$0xf0]  ;;  %v3322_v34 = vor.u32 %v4262_v25, %v3321_v24  ;;  %v3313_v37 = vld [vmem:[%s6627_s1 + $0x450] sm:$0xf] }
  0x34   :  { %2080 = vmatpush.bf16.msrb.mxu0 %v3042_v29  ;;  %v4278_v29 = vld [vmem:[%s6627_s1 + $0x4e4] sm:$0xf0]  ;;  %v3513_v32 = vld [vmem:[%s6627_s1 + $0x5e0] sm:$0xf]  ;;  %v4260_v38 = vld [vmem:[%s6627_s1 + $0x454] sm:$0xf0] }
  0x35   :  { %2093 = vmatpush.bf16.msrb.mxu1 %v3106_v30  ;;  %v3449_v30 = vld [vmem:[%s6627_s1 + $0x560] sm:$0xf]  ;;  %v3377_v39 = vld [vmem:[%s6627_s1 + $0x4d0] sm:$0xf]  ;;  %v3514_v40 = vor.u32 %v4310_v33, %v3513_v32  ;;  %v4276_v41 = vld [vmem:[%s6627_s1 + $0x4d4] sm:$0xf0]  ;;  %v3314_v46 = vor.u32 %v4260_v38, %v3313_v37 }
  0x36   :  { %2106 = vmatpush.bf16.msrb.mxu2 %v3170_v31  ;;  %v4294_v31 = vld [vmem:[%s6627_s1 + $0x564] sm:$0xf0]  ;;  %v3441_v42 = vld [vmem:[%s6627_s1 + $0x550] sm:$0xf]  ;;  %v4308_v45 = vld [vmem:[%s6627_s1 + $0x5d4] sm:$0xf0] }
  0x37   :  { %2119 = vmatpush.bf16.msrb.mxu3 %v3234_v35  ;;  %v3386_v35 = vor.u32 %v4278_v29, %v3385_v27  ;;  %v3450_v36 = vor.u32 %v4294_v31, %v3449_v30  ;;  %v3505_v44 = vld [vmem:[%s6627_s1 + $0x5d0] sm:$0xf]  ;;  %v3305_v49 = vld [vmem:[%s6627_s1 + $0x440] sm:$0xf]  ;;  %v4258_v50 = vld [vmem:[%s6627_s1 + $0x444] sm:$0xf0] }
  0x38   :  { %2081 = vmatpush.bf16.msrb.mxu0 %v3034_v43  ;;  %v4292_v43 = vld [vmem:[%s6627_s1 + $0x554] sm:$0xf0]  ;;  %v3506_v56 = vor.u32 %v4308_v45, %v3505_v44  ;;  %v4274_v57 = vld [vmem:[%s6627_s1 + $0x4c4] sm:$0xf0]  ;;  %v3497_v60 = vld [vmem:[%s6627_s1 + $0x5c0] sm:$0xf] }
  0x39   :  { %2094 = vmatpush.bf16.msrb.mxu1 %v3098_v47  ;;  %v3378_v47 = vor.u32 %v4276_v41, %v3377_v39  ;;  %v4290_v59 = vld [vmem:[%s6627_s1 + $0x544] sm:$0xf0]  ;;  %v3297_v1 = vld [vmem:[%s6627_s1 + $0x430] sm:$0xf]  ;;  %v4272_v5 = vld [vmem:[%s6627_s1 + $0x4b4] sm:$0xf0] }
  0x3a   :  { %2107 = vmatpush.bf16.msrb.mxu2 %v3162_v48  ;;  %v3442_v48 = vor.u32 %v4292_v43, %v3441_v42  ;;  %v3361_v3 = vld [vmem:[%s6627_s1 + $0x4b0] sm:$0xf]  ;;  %v4288_v7 = vld [vmem:[%s6627_s1 + $0x534] sm:$0xf0]  ;;  %v3353_v15 = vld [vmem:[%s6627_s1 + $0x4a0] sm:$0xf] }
  0x3b   :  { %2120 = vmatpush.bf16.msrb.mxu3 %v3226_v52  ;;  %v3369_v52 = vld [vmem:[%s6627_s1 + $0x4c0] sm:$0xf]  ;;  %v3425_v6 = vld [vmem:[%s6627_s1 + $0x530] sm:$0xf]  ;;  %v3362_v11 = vor.u32 %v4272_v5, %v3361_v3  ;;  %v4302_v24 = vld [vmem:[%s6627_s1 + $0x5a4] sm:$0xf0] }
  0x3c   :  { %2082 = vmatpush.bf16.msrb.mxu0 %v3026_v58  ;;  %v3433_v58 = vld [vmem:[%s6627_s1 + $0x540] sm:$0xf]  ;;  %v3370_v63 = vor.u32 %v4274_v57, %v3369_v52  ;;  %v3489_v8 = vld [vmem:[%s6627_s1 + $0x5b0] sm:$0xf]  ;;  %v3426_v12 = vor.u32 %v4288_v7, %v3425_v6  ;;  %v4252_v30 = vld [vmem:[%s6627_s1 + $0x414] sm:$0xf0] }
  0x3d   :  { %2095 = vmatpush.bf16.msrb.mxu1 %v3090_v61  ;;  %v4306_v61 = vld [vmem:[%s6627_s1 + $0x5c4] sm:$0xf0]  ;;  %v3434_v0 = vor.u32 %v4290_v59, %v3433_v58  ;;  %v3281_v29 = vld [vmem:[%s6627_s1 + $0x410] sm:$0xf]  ;;  %v4268_v33 = vld [vmem:[%s6627_s1 + $0x494] sm:$0xf0] }
  0x3e   :  { %2108 = vmatpush.bf16.msrb.mxu2 %v3154_v62  ;;  %v3306_v62 = vor.u32 %v4258_v50, %v3305_v49  ;;  %v3498_v4 = vor.u32 %v4306_v61, %v3497_v60  ;;  %v3345_v31 = vld [vmem:[%s6627_s1 + $0x490] sm:$0xf]  ;;  %v4300_v37 = vld [vmem:[%s6627_s1 + $0x594] sm:$0xf0]  ;;  %v3282_v38 = vor.u32 %v4252_v30, %v3281_v29  ;;  %v3273_v39 = vld [vmem:[%s6627_s1 + $0x400] sm:$0xf] }
  0x3f   :  { %2121 = vmatpush.bf16.msrb.mxu3 %v3218_v2  ;;  %v4256_v2 = vld [vmem:[%s6627_s1 + $0x434] sm:$0xf0]  ;;  %v3346_v41 = vor.u32 %v4268_v33, %v3345_v31  ;;  %v3337_v43 = vld [vmem:[%s6627_s1 + $0x480] sm:$0xf]  ;;  %v4266_v44 = vld [vmem:[%s6627_s1 + $0x484] sm:$0xf0] }
  0x40   :  { %2083 = vmatpush.bf16.msrb.mxu0 %v3018_v9  ;;  %v4304_v9 = vld [vmem:[%s6627_s1 + $0x5b4] sm:$0xf0]  ;;  %v3298_v10 = vor.u32 %v4256_v2, %v3297_v1  ;;  %v3401_v45 = vld [vmem:[%s6627_s1 + $0x500] sm:$0xf]  ;;  %v4298_v49 = vld [vmem:[%s6627_s1 + $0x584] sm:$0xf0]  ;;  %v3338_v61 = vor.u32 %v4266_v44, %v3337_v43 }
  0x41   :  { %2096 = vmatpush.bf16.msrb.mxu1 %v3082_v13  ;;  %v3289_v13 = vld [vmem:[%s6627_s1 + $0x420] sm:$0xf]  ;;  %v3490_v16 = vor.u32 %v4304_v9, %v3489_v8  ;;  %v3585_v50 = vld [vmem:[%s6627_s1 + $0x670] sm:$0xf]  ;;  %v4328_v52 = vld [vmem:[%s6627_s1 + $0x674] sm:$0xf0] }
  0x42   :  { %2109 = vmatpush.bf16.msrb.mxu2 %v3146_v14  ;;  %v4254_v14 = vld [vmem:[%s6627_s1 + $0x424] sm:$0xf0]  ;;  %v4344_v58 = vld [vmem:[%s6627_s1 + $0x6f4] sm:$0xf0]  ;;  %v3713_v59 = vld [vmem:[%s6627_s1 + $0x770] sm:$0xf]  ;;  %v3586_v2 = vor.u32 %v4328_v52, %v3585_v50 }
  0x43   :  { %2122 = vmatpush.bf16.msrb.mxu3 %v3210_v17  ;;  %2084 = vmatmul.bf16.vlgmr.msrb.gmra.mxu0 %v4876_v53  ;;  %v4270_v17 = vld [vmem:[%s6627_s1 + $0x4a4] sm:$0xf0]  ;;  %v3290_v25 = vor.u32 %v4254_v14, %v3289_v13  ;;  %v4360_v60 = vld [vmem:[%s6627_s1 + $0x774] sm:$0xf0]  ;;  %v3577_v3 = vld [vmem:[%s6627_s1 + $0x660] sm:$0xf] }
  0x44   :  { %2128 = vmatpush.bf16.msra.mxu0 %v3330_v18  ;;  %2097 = vmatmul.bf16.vlgmr.msrb.gmra.mxu1 %v4880_v55  ;;  %v3417_v18 = vld [vmem:[%s6627_s1 + $0x520] sm:$0xf]  ;;  %v3354_v27 = vor.u32 %v4270_v17, %v3353_v15  ;;  %v3714_v6 = vor.u32 %v4360_v60, %v3713_v59  ;;  %v4326_v8 = vld [vmem:[%s6627_s1 + $0x664] sm:$0xf0]  ;;  %v5181_v31 = vld [vmem:[#allocation1 + $0x36] sm:$0xff] }
  0x45   :  { %2141 = vmatpush.bf16.msra.mxu1 %v3394_v19  ;;  %2110 = vmatmul.bf16.vlgmr.msrb.gmra.mxu2 %v4874_v51  ;;  %v4286_v19 = vld [vmem:[%s6627_s1 + $0x524] sm:$0xf0]  ;;  %v5138_v7 = vld [vmem:[#allocation1] sm:$0xff]  ;;  %v4320_v59 = vld [vmem:[%s6627_s1 + $0x634] sm:$0xf0] }
  0x46   :  { %2154 = vmatpush.bf16.msra.mxu2 %v3458_v23  ;;  %2123 = vmatmul.bf16.vlgmr.msrb.gmra.mxu3 %v4878_v54  ;;  %v3481_v23 = vld [vmem:[%s6627_s1 + $0x5a0] sm:$0xf]  ;;  %v5151_v13 = vld [vmem:[#allocation1 + $0x9] sm:$0xff] }
  0x47   :  { %2167 = vmatpush.bf16.msra.mxu3 %v3522_v28  ;;  %v3418_v28 = vor.u32 %v4286_v19, %v3417_v18  ;;  %v3482_v32 = vor.u32 %v4302_v24, %v3481_v23  ;;  %v3641_v9 = vld [vmem:[%s6627_s1 + $0x6e0] sm:$0xf]  ;;  %v4358_v15 = vld [vmem:[%s6627_s1 + $0x764] sm:$0xf0]  ;;  %v3569_v19 = vld [vmem:[%s6627_s1 + $0x650] sm:$0xf]  ;;  %v3578_v24 = vor.u32 %v4326_v8, %v3577_v3 }
  0x48   :  { %2129 = vmatpush.bf16.msra.mxu0 %v3322_v34  ;;  %v3409_v34 = vld [vmem:[%s6627_s1 + $0x510] sm:$0xf]  ;;  %v3705_v14 = vld [vmem:[%s6627_s1 + $0x760] sm:$0xf]  ;;  %v4374_v18 = vld [vmem:[%s6627_s1 + $0x7e4] sm:$0xf0] }
  0x49   :  { %2142 = vmatpush.bf16.msra.mxu1 %v3386_v35  ;;  %v4284_v35 = vld [vmem:[%s6627_s1 + $0x514] sm:$0xf0]  ;;  %v3706_v30 = vor.u32 %v4358_v15, %v3705_v14  ;;  %v5185_v33 = vld [vmem:[#allocation1 + $0x3f] sm:$0xff]  ;;  %v4322_v43 = vld [vmem:[%s6627_s1 + $0x644] sm:$0xf0] }
  0x4a   :  { %2155 = vmatpush.bf16.msra.mxu2 %v3450_v36  ;;  %v3473_v36 = vld [vmem:[%s6627_s1 + $0x590] sm:$0xf]  ;;  %v3410_v42 = vor.u32 %v4284_v35, %v3409_v34  ;;  %v5162_v17 = vld [vmem:[#allocation1 + $0x1b] sm:$0xff]  ;;  %v4370_v50 = vld [vmem:[%s6627_s1 + $0x7c4] sm:$0xf0] }
  0x4b   :  { %2168 = vmatpush.bf16.msra.mxu3 %v3514_v40  ;;  %v4250_v40 = vld [vmem:[%s6627_s1 + $0x404] sm:$0xf0]  ;;  %v4324_v23 = vld [vmem:[%s6627_s1 + $0x654] sm:$0xf0]  ;;  %v3697_v35 = vld [vmem:[%s6627_s1 + $0x750] sm:$0xf] }
  0x4c   :  { %2130 = vmatpush.bf16.msra.mxu0 %v3314_v46  ;;  %v3474_v46 = vor.u32 %v4300_v37, %v3473_v36  ;;  %v3274_v57 = vor.u32 %v4250_v40, %v3273_v39  ;;  %v4356_v36 = vld [vmem:[%s6627_s1 + $0x754] sm:$0xf0]  ;;  %v3761_v37 = vld [vmem:[%s6627_s1 + $0x7d0] sm:$0xf]  ;;  %v3570_v39 = vor.u32 %v4324_v23, %v3569_v19  ;;  %v3625_v44 = vld [vmem:[%s6627_s1 + $0x6c0] sm:$0xf] }
  0x4d   :  { %2143 = vmatpush.bf16.msra.mxu1 %v3378_v47  ;;  %v4282_v47 = vld [vmem:[%s6627_s1 + $0x504] sm:$0xf0]  ;;  %v3617_v60 = vld [vmem:[%s6627_s1 + $0x6b0] sm:$0xf]  ;;  %v3673_v14 = vld [vmem:[%s6627_s1 + $0x720] sm:$0xf] }
  0x4e   :  { %2156 = vmatpush.bf16.msra.mxu2 %v3442_v48  ;;  %v3465_v48 = vld [vmem:[%s6627_s1 + $0x580] sm:$0xf]  ;;  %v4318_v8 = vld [vmem:[%s6627_s1 + $0x624] sm:$0xf0] }
  0x4f   :  { %2169 = vmatpush.bf16.msra.mxu3 %v3506_v56  ;;  %v3649_v56 = vld [vmem:[%s6627_s1 + $0x6f0] sm:$0xf]  ;;  %v3466_v1 = vor.u32 %v4298_v49, %v3465_v48  ;;  %v4354_v48 = vld [vmem:[%s6627_s1 + $0x744] sm:$0xf0]  ;;  %v3753_v49 = vld [vmem:[%s6627_s1 + $0x7c0] sm:$0xf] }
  0x50   :  { %2131 = vmatpush.bf16.msra.mxu0 %v3306_v62  ;;  %v3402_v62 = vor.u32 %v4282_v47, %v3401_v45  ;;  %v3650_v5 = vor.u32 %v4344_v58, %v3649_v56  ;;  %v3689_v47 = vld [vmem:[%s6627_s1 + $0x740] sm:$0xf]  ;;  %v3553_v58 = vld [vmem:[%s6627_s1 + $0x630] sm:$0xf]  ;;  %v4350_v15 = vld [vmem:[%s6627_s1 + $0x724] sm:$0xf0] }
  0x51   :  { %2144 = vmatpush.bf16.msra.mxu1 %v3370_v63  ;;  %v3777_v63 = vld [vmem:[%s6627_s1 + $0x7f0] sm:$0xf]  ;;  %v3554_v3 = vor.u32 %v4320_v59, %v3553_v58  ;;  %v4408_v59 = vld [vmem:[%s6627_s1 + $0x8f4] sm:$0xf0] }
  0x52   :  { %2157 = vmatpush.bf16.msra.mxu2 %v3434_v0  ;;  %v4376_v0 = vld [vmem:[%s6627_s1 + $0x7f4] sm:$0xf0] }
  0x53   :  { %2170 = vmatpush.bf16.msra.mxu3 %v3498_v4  ;;  %v23_v4 = vld [vmem:[%s6628_s0 + $0x10] sm:$0x1f] }
  0x54   :  { %2132 = vmatpush.bf16.msra.mxu0 %v3298_v10  ;;  %v4342_v10 = vld [vmem:[%s6627_s1 + $0x6e4] sm:$0xf0] }
  0x55   :  { %2145 = vmatpush.bf16.msra.mxu1 %v3362_v11  ;;  %v3778_v11 = vor.u32 %v4376_v0, %v3777_v63  ;;  %v3642_v29 = vor.u32 %v4342_v10, %v3641_v9  ;;  %v3681_v63 = vld [vmem:[%s6627_s1 + $0x730] sm:$0xf]  ;;  %v4352_v0 = vld [vmem:[%s6627_s1 + $0x734] sm:$0xf0]  ;;  %v3609_v9 = vld [vmem:[%s6627_s1 + $0x6a0] sm:$0xf] }
  0x56   :  { %2158 = vmatpush.bf16.msra.mxu2 %v3426_v12  ;;  %v5149_v12 = vld [vmem:[#allocation1 + $0x12] sm:$0xff] }
  0x57   :  { %2171 = vmatpush.bf16.msra.mxu3 %v3490_v16  ;;  %v3769_v16 = vld [vmem:[%s6627_s1 + $0x7e0] sm:$0xf] }
  0x58   :  { %2133 = vmatpush.bf16.msra.mxu0 %v3290_v25  ;;  %v3633_v25 = vld [vmem:[%s6627_s1 + $0x6d0] sm:$0xf]  ;;  %v3770_v34 = vor.u32 %v4374_v18, %v3769_v16  ;;  %v3737_v16 = vld [vmem:[%s6627_s1 + $0x7a0] sm:$0xf]  ;;  %v4366_v18 = vld [vmem:[%s6627_s1 + $0x7a4] sm:$0xf0] }
  0x59   :  { %2146 = vmatpush.bf16.msra.mxu1 %v3354_v27  ;;  %v4340_v27 = vld [vmem:[%s6627_s1 + $0x6d4] sm:$0xf0] }
  0x5a   :  { %2159 = vmatpush.bf16.msra.mxu2 %v3418_v28  ;;  %v5179_v28 = vld [vmem:[#allocation1 + $0x24] sm:$0xff]  ;;  %v3634_v40 = vor.u32 %v4340_v27, %v3633_v25  ;;  %v3537_v25 = vld [vmem:[%s6627_s1 + $0x610] sm:$0xf]  ;;  %v4316_v27 = vld [vmem:[%s6627_s1 + $0x614] sm:$0xf0] }
  0x5b   :  { %2172 = vmatpush.bf16.msra.mxu3 %v3482_v32  ;;  %v5183_v32 = vld [vmem:[#allocation1 + $0x2d] sm:$0xff] }
  0x5c   :  { %2134 = vmatpush.bf16.msra.mxu0 %v3282_v38  ;;  %375 = vst [vmem:[#allocation1] ss:$9 sm:$0xff] %v23_v4  ;;  %v4372_v38 = vld [vmem:[%s6627_s1 + $0x7d4] sm:$0xf0] }
  0x5d   :  { %2147 = vmatpush.bf16.msra.mxu1 %v3346_v41  ;;  %v3698_v41 = vor.u32 %v4356_v36, %v3697_v35  ;;  %v3762_v45 = vor.u32 %v4372_v38, %v3761_v37  ;;  %v3665_v35 = vld [vmem:[%s6627_s1 + $0x710] sm:$0xf]  ;;  %v4348_v36 = vld [vmem:[%s6627_s1 + $0x714] sm:$0xf0] }
  0x5e   :  { %2160 = vmatpush.bf16.msra.mxu2 %v3410_v42  ;;  %v3561_v42 = vld [vmem:[%s6627_s1 + $0x640] sm:$0xf]  ;;  %v3729_v37 = vld [vmem:[%s6627_s1 + $0x790] sm:$0xf]  ;;  %v4364_v38 = vld [vmem:[%s6627_s1 + $0x794] sm:$0xf0] }
  0x5f   :  { %2173 = vmatpush.bf16.msra.mxu3 %v3474_v46  ;;  %v4338_v46 = vld [vmem:[%s6627_s1 + $0x6c4] sm:$0xf0]  ;;  %v3562_v52 = vor.u32 %v4322_v43, %v3561_v42  ;;  %v3666_v43 = vor.u32 %v4348_v36, %v3665_v35  ;;  %v3953_v35 = vld [vmem:[%s6627_s1 + $0x950] sm:$0xf]  ;;  %v4420_v36 = vld [vmem:[%s6627_s1 + $0x954] sm:$0xf0] }
  0x60   :  { %2135 = vmatpush.bf16.msra.mxu0 %v3274_v57  ;;  %v3626_v56 = vor.u32 %v4338_v46, %v3625_v44  ;;  %v3690_v57 = vor.u32 %v4354_v48, %v3689_v47  ;;  %v3593_v44 = vld [vmem:[%s6627_s1 + $0x680] sm:$0xf]  ;;  %v3730_v47 = vor.u32 %v4364_v38, %v3729_v37  ;;  %v4346_v48 = vld [vmem:[%s6627_s1 + $0x704] sm:$0xf0]  ;;  %v4017_v37 = vld [vmem:[%s6627_s1 + $0x9d0] sm:$0xf] }
  0x61   :  { %2148 = vmatpush.bf16.msra.mxu1 %v3338_v61  ;;  %v3754_v61 = vor.u32 %v4370_v50, %v3753_v49  ;;  %v3657_v46 = vld [vmem:[%s6627_s1 + $0x700] sm:$0xf]  ;;  %v4362_v50 = vld [vmem:[%s6627_s1 + $0x784] sm:$0xf0]  ;;  %v4436_v38 = vld [vmem:[%s6627_s1 + $0x9d4] sm:$0xf0] }
  0x62   :  { %2161 = vmatpush.bf16.msra.mxu2 %v3402_v62  ;;  %v4336_v62 = vld [vmem:[%s6627_s1 + $0x6b4] sm:$0xf0]  ;;  %v3721_v49 = vld [vmem:[%s6627_s1 + $0x780] sm:$0xf] }
  0x63   :  { %2174 = vmatpush.bf16.msra.mxu3 %v3466_v1  ;;  %2136 = vmatmul.bf16.vlgmr.msra.gmra.mxu0 %v5138_v7  ;;  %v3745_v1 = vld [vmem:[%s6627_s1 + $0x7b0] sm:$0xf]  ;;  %v3618_v4 = vor.u32 %v4336_v62, %v3617_v60 }
  0x64   :  { %2180 = vmatpush.bf16.msrb.mxu0 %v3586_v2  ;;  %2149 = vmatmul.bf16.vlgmr.msra.gmra.mxu1 %v5151_v13  ;;  %v4368_v2 = vld [vmem:[%s6627_s1 + $0x7b4] sm:$0xf0]  ;;  %v3969_v60 = vld [vmem:[%s6627_s1 + $0x970] sm:$0xf] }
  0x65   :  { %2193 = vmatpush.bf16.msrb.mxu1 %v3650_v5  ;;  %2162 = vmatmul.bf16.vlgmr.msra.gmra.mxu2 %v5149_v12  ;;  %v3682_v5 = vor.u32 %v4352_v0, %v3681_v63  ;;  %v3746_v10 = vor.u32 %v4368_v2, %v3745_v1  ;;  %v3658_v63 = vor.u32 %v4346_v48, %v3657_v46  ;;  %v4033_v0 = vld [vmem:[%s6627_s1 + $0x9f0] sm:$0xf]  ;;  %v4440_v1 = vld [vmem:[%s6627_s1 + $0x9f4] sm:$0xf0]  ;;  %v4402_v46 = vld [vmem:[%s6627_s1 + $0x8c4] sm:$0xf0] }
  0x66   :  { %2206 = vmatpush.bf16.msrb.mxu2 %v3714_v6  ;;  %2175 = vmatmul.bf16.vlgmr.msra.gmra.mxu3 %v5162_v17  ;;  %v3545_v6 = vld [vmem:[%s6627_s1 + $0x620] sm:$0xf]  ;;  %v3722_v2 = vor.u32 %v4362_v50, %v3721_v49  ;;  %v4418_v48 = vld [vmem:[%s6627_s1 + $0x944] sm:$0xf0] }
  0x67   :  { %2219 = vmatpush.bf16.msrb.mxu3 %v3778_v11  ;;  %v4334_v11 = vld [vmem:[%s6627_s1 + $0x6a4] sm:$0xf0]  ;;  %v3546_v19 = vor.u32 %v4318_v8, %v3545_v6  ;;  %v3833_v6 = vld [vmem:[%s6627_s1 + $0x860] sm:$0xf] }
  0x68   :  { %2181 = vmatpush.bf16.msrb.mxu0 %v3578_v24  ;;  %v3610_v23 = vor.u32 %v4334_v11, %v3609_v9  ;;  %v3674_v24 = vor.u32 %v4350_v15, %v3673_v14  ;;  %v4390_v8 = vld [vmem:[%s6627_s1 + $0x864] sm:$0xf0]  ;;  %v3897_v9 = vld [vmem:[%s6627_s1 + $0x8e0] sm:$0xf] }
  0x69   :  { %2194 = vmatpush.bf16.msrb.mxu1 %v3642_v29  ;;  %v3601_v29 = vld [vmem:[%s6627_s1 + $0x690] sm:$0xf]  ;;  %v4406_v11 = vld [vmem:[%s6627_s1 + $0x8e4] sm:$0xf0]  ;;  %v3961_v14 = vld [vmem:[%s6627_s1 + $0x960] sm:$0xf] }
  0x6a   :  { %2207 = vmatpush.bf16.msrb.mxu2 %v3706_v30  ;;  %v3738_v30 = vor.u32 %v4366_v18, %v3737_v16  ;;  %v4422_v15 = vld [vmem:[%s6627_s1 + $0x964] sm:$0xf0]  ;;  %v4025_v16 = vld [vmem:[%s6627_s1 + $0x9e0] sm:$0xf] }
  0x6b   :  { %2220 = vmatpush.bf16.msrb.mxu3 %v3770_v34  ;;  %v4332_v34 = vld [vmem:[%s6627_s1 + $0x694] sm:$0xf0]  ;;  %v4438_v18 = vld [vmem:[%s6627_s1 + $0x9e4] sm:$0xf0]  ;;  %v4009_v49 = vld [vmem:[%s6627_s1 + $0x9c0] sm:$0xf] }
  0x6c   :  { %2182 = vmatpush.bf16.msrb.mxu0 %v3570_v39  ;;  %v3538_v39 = vor.u32 %v4316_v27, %v3537_v25  ;;  %v3602_v42 = vor.u32 %v4332_v34, %v3601_v29  ;;  %v3825_v25 = vld [vmem:[%s6627_s1 + $0x850] sm:$0xf]  ;;  %v4388_v27 = vld [vmem:[%s6627_s1 + $0x854] sm:$0xf0]  ;;  %v4434_v50 = vld [vmem:[%s6627_s1 + $0x9c4] sm:$0xf0] }
  0x6d   :  { %2195 = vmatpush.bf16.msrb.mxu1 %v3634_v40  ;;  %v3529_v40 = vld [vmem:[%s6627_s1 + $0x600] sm:$0xf]  ;;  %v3889_v29 = vld [vmem:[%s6627_s1 + $0x8d0] sm:$0xf]  ;;  %v4404_v34 = vld [vmem:[%s6627_s1 + $0x8d4] sm:$0xf0] }
  0x6e   :  { %2208 = vmatpush.bf16.msrb.mxu2 %v3698_v41  ;;  %v4314_v41 = vld [vmem:[%s6627_s1 + $0x604] sm:$0xf0] }
  0x6f   :  { %2221 = vmatpush.bf16.msrb.mxu3 %v3762_v45  ;;  %v4330_v45 = vld [vmem:[%s6627_s1 + $0x684] sm:$0xf0]  ;;  %v3530_v58 = vor.u32 %v4314_v41, %v3529_v40  ;;  %v3890_v40 = vor.u32 %v4404_v34, %v3889_v29  ;;  %v3954_v41 = vor.u32 %v4420_v36, %v3953_v35  ;;  %v3857_v29 = vld [vmem:[%s6627_s1 + $0x890] sm:$0xf]  ;;  %v4396_v34 = vld [vmem:[%s6627_s1 + $0x894] sm:$0xf0] }
  0x70   :  { %2183 = vmatpush.bf16.msrb.mxu0 %v3562_v52  ;;  %v3841_v52 = vld [vmem:[%s6627_s1 + $0x870] sm:$0xf]  ;;  %v3594_v62 = vor.u32 %v4330_v45, %v3593_v44  ;;  %v3881_v44 = vld [vmem:[%s6627_s1 + $0x8c0] sm:$0xf]  ;;  %v4018_v45 = vor.u32 %v4436_v38, %v4017_v37  ;;  %v4412_v36 = vld [vmem:[%s6627_s1 + $0x914] sm:$0xf0] }
  0x71   :  { %2196 = vmatpush.bf16.msrb.mxu1 %v3626_v56  ;;  %v4392_v56 = vld [vmem:[%s6627_s1 + $0x874] sm:$0xf0]  ;;  %v3921_v35 = vld [vmem:[%s6627_s1 + $0x910] sm:$0xf] }
  0x72   :  { %2209 = vmatpush.bf16.msrb.mxu2 %v3690_v57  ;;  %v3905_v57 = vld [vmem:[%s6627_s1 + $0x8f0] sm:$0xf]  ;;  %v4428_v38 = vld [vmem:[%s6627_s1 + $0x994] sm:$0xf0] }
  0x73   :  { %2222 = vmatpush.bf16.msrb.mxu3 %v3754_v61  ;;  %v4424_v61 = vld [vmem:[%s6627_s1 + $0x974] sm:$0xf0]  ;;  %v3985_v37 = vld [vmem:[%s6627_s1 + $0x990] sm:$0xf] }
  0x74   :  { %2184 = vmatpush.bf16.msrb.mxu0 %v3554_v3  ;;  %v3842_v3 = vor.u32 %v4392_v56, %v3841_v52  ;;  %v3882_v56 = vor.u32 %v4402_v46, %v3881_v44  ;;  %v3849_v44 = vld [vmem:[%s6627_s1 + $0x880] sm:$0xf] }
  0x75   :  { %2197 = vmatpush.bf16.msrb.mxu1 %v3618_v4  ;;  %v3906_v4 = vor.u32 %v4408_v59, %v3905_v57  ;;  %v4384_v59 = vld [vmem:[%s6627_s1 + $0x834] sm:$0xf0]  ;;  %v3913_v46 = vld [vmem:[%s6627_s1 + $0x900] sm:$0xf] }
  0x76   :  { %2210 = vmatpush.bf16.msrb.mxu2 %v3682_v5  ;;  %v3970_v5 = vor.u32 %v4424_v61, %v3969_v60  ;;  %v3873_v60 = vld [vmem:[%s6627_s1 + $0x8b0] sm:$0xf]  ;;  %v4010_v61 = vor.u32 %v4434_v50, %v4009_v49  ;;  %v3977_v49 = vld [vmem:[%s6627_s1 + $0x980] sm:$0xf]  ;;  %v4426_v50 = vld [vmem:[%s6627_s1 + $0x984] sm:$0xf0] }
  0x77   :  { %2223 = vmatpush.bf16.msrb.mxu3 %v3746_v10  ;;  %v4034_v10 = vor.u32 %v4440_v1, %v4033_v0  ;;  %v4416_v0 = vld [vmem:[%s6627_s1 + $0x934] sm:$0xf0]  ;;  %v4001_v1 = vld [vmem:[%s6627_s1 + $0x9b0] sm:$0xf] }
  0x78   :  { %2185 = vmatpush.bf16.msrb.mxu0 %v3546_v19  ;;  %v3834_v19 = vor.u32 %v4390_v8, %v3833_v6  ;;  %v3801_v6 = vld [vmem:[%s6627_s1 + $0x820] sm:$0xf]  ;;  %v4382_v8 = vld [vmem:[%s6627_s1 + $0x824] sm:$0xf0] }
  0x79   :  { %2198 = vmatpush.bf16.msrb.mxu1 %v3610_v23  ;;  %v3898_v23 = vor.u32 %v4406_v11, %v3897_v9  ;;  %v3865_v9 = vld [vmem:[%s6627_s1 + $0x8a0] sm:$0xf]  ;;  %v4398_v11 = vld [vmem:[%s6627_s1 + $0x8a4] sm:$0xf0] }
  0x7a   :  { %2211 = vmatpush.bf16.msrb.mxu2 %v3674_v24  ;;  %v3962_v24 = vor.u32 %v4422_v15, %v3961_v14  ;;  %v3929_v14 = vld [vmem:[%s6627_s1 + $0x920] sm:$0xf]  ;;  %v4414_v15 = vld [vmem:[%s6627_s1 + $0x924] sm:$0xf0] }
  0x7b   :  { %2224 = vmatpush.bf16.msrb.mxu3 %v3738_v30  ;;  %v4026_v30 = vor.u32 %v4438_v18, %v4025_v16  ;;  %v3993_v16 = vld [vmem:[%s6627_s1 + $0x9a0] sm:$0xf]  ;;  %v4430_v18 = vld [vmem:[%s6627_s1 + $0x9a4] sm:$0xf0] }
  0x7c   :  { %2186 = vmatpush.bf16.msrb.mxu0 %v3538_v39  ;;  %v3826_v39 = vor.u32 %v4388_v27, %v3825_v25  ;;  %v3793_v25 = vld [vmem:[%s6627_s1 + $0x810] sm:$0xf]  ;;  %v4380_v27 = vld [vmem:[%s6627_s1 + $0x814] sm:$0xf0] }
  0x7d   :  { %2199 = vmatpush.bf16.msrb.mxu1 %v3602_v42  ;;  %v3817_v42 = vld [vmem:[%s6627_s1 + $0x840] sm:$0xf] }
  0x7e   :  { %2212 = vmatpush.bf16.msrb.mxu2 %v3666_v43  ;;  %v4386_v43 = vld [vmem:[%s6627_s1 + $0x844] sm:$0xf0] }
  0x7f   :  { %2225 = vmatpush.bf16.msrb.mxu3 %v3730_v47  ;;  %v3945_v47 = vld [vmem:[%s6627_s1 + $0x940] sm:$0xf]  ;;  %v3818_v52 = vor.u32 %v4386_v43, %v3817_v42  ;;  %v3858_v42 = vor.u32 %v4396_v34, %v3857_v29  ;;  %v3922_v43 = vor.u32 %v4412_v36, %v3921_v35  ;;  %v4183_v29 = vld [vmem:[%s6627_s1 + $0x1f4] sm:$0xf] }
  0x80   :  { %2187 = vmatpush.bf16.msrb.mxu0 %v3530_v58  ;;  %v3946_v57 = vor.u32 %v4418_v48, %v3945_v47  ;;  %v3809_v58 = vld [vmem:[%s6627_s1 + $0x830] sm:$0xf]  ;;  %v3986_v47 = vor.u32 %v4428_v38, %v3985_v37  ;;  %v4410_v48 = vld [vmem:[%s6627_s1 + $0x904] sm:$0xf0]  ;;  %v4131_v36 = vld [vmem:[%s6627_s1 + $0x54] sm:$0xf] }
  0x81   :  { %2200 = vmatpush.bf16.msrb.mxu1 %v3594_v62  ;;  %v4400_v62 = vld [vmem:[%s6627_s1 + $0x8b4] sm:$0xf0]  ;;  %v2803_v37 = vld [vmem:[%s6627_s1 + $0x58] sm:$0xf0]  ;;  %v4147_v38 = vld [vmem:[%s6627_s1 + $0xd4] sm:$0xf] }
  0x82   :  { %2213 = vmatpush.bf16.msrb.mxu2 %v3658_v63  ;;  %v3937_v63 = vld [vmem:[%s6627_s1 + $0x930] sm:$0xf] }
  0x83   :  { %2226 = vmatpush.bf16.msrb.mxu3 %v3722_v2  ;;  %2188 = vmatmul.bf16.vlgmr.msrb.gmra.mxu0 %v5179_v28  ;;  %v4432_v2 = vld [vmem:[%s6627_s1 + $0x9b4] sm:$0xf0] }
  0x84   :  { %2232 = vmatpush.bf16.msra.mxu0 %v3842_v3  ;;  %2201 = vmatmul.bf16.vlgmr.msrb.gmra.mxu1 %v5183_v32  ;;  %v3810_v3 = vor.u32 %v4384_v59, %v3809_v58  ;;  %v2883_v59 = vld [vmem:[%s6627_s1 + $0xf8] sm:$0xf0] }
  0x85   :  { %2245 = vmatpush.bf16.msra.mxu1 %v3906_v4  ;;  %2214 = vmatmul.bf16.vlgmr.msrb.gmra.mxu2 %v5181_v31  ;;  %v3874_v4 = vor.u32 %v4400_v62, %v3873_v60  ;;  %v4167_v60 = vld [vmem:[%s6627_s1 + $0x174] sm:$0xf] }
  0x86   :  { %2258 = vmatpush.bf16.msra.mxu2 %v3970_v5  ;;  %2227 = vmatmul.bf16.vlgmr.msrb.gmra.mxu3 %v5185_v33  ;;  %v3938_v5 = vor.u32 %v4416_v0, %v3937_v63  ;;  %v3914_v63 = vor.u32 %v4410_v48, %v3913_v46  ;;  %v4049_v0 = vld [vmem:[%s6627_s1 + $0xa10] sm:$0xf]  ;;  %v3003_v46 = vld [vmem:[%s6627_s1 + $0x1e8] sm:$0xf0] }
  0x87   :  { %2271 = vmatpush.bf16.msra.mxu3 %v4034_v10  ;;  %v4002_v10 = vor.u32 %v4432_v2, %v4001_v1  ;;  %v4444_v1 = vld [vmem:[%s6627_s1 + $0xa14] sm:$0xf0]  ;;  %v3978_v2 = vor.u32 %v4426_v50, %v3977_v49  ;;  %v4129_v49 = vld [vmem:[%s6627_s1 + $0x44] sm:$0xf]  ;;  %v2795_v50 = vld [vmem:[%s6627_s1 + $0x48] sm:$0xf0] }
  0x88   :  { %2233 = vmatpush.bf16.msra.mxu0 %v3834_v19  ;;  %v3802_v19 = vor.u32 %v4382_v8, %v3801_v6  ;;  %v378_v6 = vld [vmem:[#allocation1 + $0x12] sm:$0xff]  ;;  %v4133_v8 = vld [vmem:[%s6627_s1 + $0x64] sm:$0xf] }
  0x89   :  { %2246 = vmatpush.bf16.msra.mxu1 %v3898_v23  ;;  %v3866_v23 = vor.u32 %v4398_v11, %v3865_v9  ;;  %v2811_v9 = vld [vmem:[%s6627_s1 + $0x68] sm:$0xf0]  ;;  %v4050_v11 = vor.u32 %v4444_v1, %v4049_v0 }
  0x8a   :  { %2259 = vmatpush.bf16.msra.mxu2 %v3962_v24  ;;  %v3930_v24 = vor.u32 %v4414_v15, %v3929_v14  ;;  %v376_v14 = vld [vmem:[#allocation1] sm:$0xff]  ;;  %v2875_v15 = vld [vmem:[%s6627_s1 + $0xe8] sm:$0xf0] }
  0x8b   :  { %2272 = vmatpush.bf16.msra.mxu3 %v4026_v30  ;;  %v3994_v30 = vor.u32 %v4430_v18, %v3993_v16  ;;  %v4165_v16 = vld [vmem:[%s6627_s1 + $0x164] sm:$0xf]  ;;  %v2939_v18 = vld [vmem:[%s6627_s1 + $0x168] sm:$0xf0] }
  0x8c   :  { %2234 = vmatpush.bf16.msra.mxu0 %v3826_v39  ;;  %v3794_v39 = vor.u32 %v4380_v27, %v3793_v25  ;;  %v379_v25 = vld [vmem:[#allocation1 + $0x1b] sm:$0xff]  ;;  %v2814_v27 = vor.u32 %v4133_v8, %v2811_v9  ;;  %v2942_v35 = vor.u32 %v4165_v16, %v2939_v18 }
  0x8d   :  { %2247 = vmatpush.bf16.msra.mxu1 %v3890_v40  ;;  %v3785_v40 = vld [vmem:[%s6627_s1 + $0x800] sm:$0xf] }
  0x8e   :  { %2260 = vmatpush.bf16.msra.mxu2 %v3954_v41  ;;  %v4378_v41 = vld [vmem:[%s6627_s1 + $0x804] sm:$0xf0]  ;;  %v348_v8 = vld [vmem:[%s6629_s2] sm:$0x3] }
  0x8f   :  { %2273 = vmatpush.bf16.msra.mxu3 %v4018_v45  ;;  %v4394_v45 = vld [vmem:[%s6627_s1 + $0x884] sm:$0xf0]  ;;  %v3786_v58 = vor.u32 %v4378_v41, %v3785_v40  ;;  %v2867_v40 = vld [vmem:[%s6627_s1 + $0xd8] sm:$0xf0]  ;;  %v4163_v41 = vld [vmem:[%s6627_s1 + $0x154] sm:$0xf] }
  0x90   :  { %2235 = vmatpush.bf16.msra.mxu0 %v3818_v52  ;;  %v4135_v52 = vld [vmem:[%s6627_s1 + $0x74] sm:$0xf]  ;;  %v3850_v62 = vor.u32 %v4394_v45, %v3849_v44  ;;  %v2806_v44 = vor.u32 %v4131_v36, %v2803_v37  ;;  %v4181_v45 = vld [vmem:[%s6627_s1 + $0x1e4] sm:$0xf]  ;;  %v2979_v37 = vld [vmem:[%s6627_s1 + $0x1b8] sm:$0xf0] }
  0x91   :  { %2248 = vmatpush.bf16.msra.mxu1 %v3882_v56  ;;  %v2819_v56 = vld [vmem:[%s6627_s1 + $0x78] sm:$0xf0]  ;;  %v4175_v36 = vld [vmem:[%s6627_s1 + $0x1b4] sm:$0xf] }
  0x92   :  { %2261 = vmatpush.bf16.msra.mxu2 %v3946_v57  ;;  %v4151_v57 = vld [vmem:[%s6627_s1 + $0xf4] sm:$0xf] }
  0x93   :  { %2274 = vmatpush.bf16.msra.mxu3 %v4010_v61  ;;  %v2947_v61 = vld [vmem:[%s6627_s1 + $0x178] sm:$0xf0] }
  0x94   :  { %2236 = vmatpush.bf16.msra.mxu0 %v3810_v3  ;;  %v2822_v3 = vor.u32 %v4135_v52, %v2819_v56  ;;  %v4145_v52 = vld [vmem:[%s6627_s1 + $0xc4] sm:$0xf]  ;;  %v2859_v56 = vld [vmem:[%s6627_s1 + $0xc8] sm:$0xf0] }
  0x95   :  { %2249 = vmatpush.bf16.msra.mxu1 %v3874_v4  ;;  %v2886_v4 = vor.u32 %v4151_v57, %v2883_v59  ;;  %v4161_v57 = vld [vmem:[%s6627_s1 + $0x144] sm:$0xf]  ;;  %v3006_v59 = vor.u32 %v4181_v45, %v3003_v46  ;;  %v2862_v0 = vor.u32 %v4145_v52, %v2859_v56  ;;  %v2835_v46 = vld [vmem:[%s6627_s1 + $0x98] sm:$0xf0] }
  0x96   :  { %2262 = vmatpush.bf16.msra.mxu2 %v3938_v5  ;;  %v2950_v5 = vor.u32 %v4167_v60, %v2947_v61  ;;  %v2798_v60 = vor.u32 %v4129_v49, %v2795_v50  ;;  %v4179_v61 = vld [vmem:[%s6627_s1 + $0x1d4] sm:$0xf]  ;;  %v2982_v50 = vor.u32 %v4175_v36, %v2979_v37  ;;  %v4173_v56 = vld [vmem:[%s6627_s1 + $0x1a4] sm:$0xf]  ;;  %v3067_v36 = vld [vmem:[%s6627_s1 + $0x268] sm:$0xf0] }
  0x97   :  { %2275 = vmatpush.bf16.msra.mxu3 %v4002_v10  ;;  %v4149_v10 = vld [vmem:[%s6627_s1 + $0xe4] sm:$0xf] }
  0x98   :  { %2237 = vmatpush.bf16.msra.mxu0 %v3802_v19  ;;  %v377_v19 = vld [vmem:[#allocation1 + $0x9] sm:$0xff]  ;;  %v2878_v34 = vor.u32 %v4149_v10, %v2875_v15  ;;  %v4125_v15 = vld [vmem:[%s6627_s1 + $0x24] sm:$0xf] }
  0x99   :  { %2250 = vmatpush.bf16.msra.mxu1 %v3866_v23  ;;  %v4041_v23 = vld [vmem:[%s6627_s1 + $0xa00] sm:$0xf]  ;;  %v4213_v37 = vld [vmem:[%s6627_s1 + $0x2e4] sm:$0xf] }
  0x9a   :  { %2263 = vmatpush.bf16.msra.mxu2 %v3930_v24  ;;  %v4442_v24 = vld [vmem:[%s6627_s1 + $0xa04] sm:$0xf0] }
  0x9b   :  { %2276 = vmatpush.bf16.msra.mxu3 %v3994_v30  ;;  %v3011_v30 = vld [vmem:[%s6627_s1 + $0x1f8] sm:$0xf0] }
  0x9c   :  { %2238 = vmatpush.bf16.msra.mxu0 %v3794_v39  ;;  %v4042_v39 = vor.u32 %v4442_v24, %v4041_v23  ;;  %v4141_v23 = vld [vmem:[%s6627_s1 + $0xa4] sm:$0xf]  ;;  %v350_v24 = vperm.slane %v348_v8, 0  ;;  %v4215_v8 = vld [vmem:[%s6627_s1 + $0x2f4] sm:$0xf] }
  0x9d   :  { %2251 = vmatpush.bf16.msra.mxu1 %v3858_v42  ;;  %v2931_v42 = vld [vmem:[%s6627_s1 + $0x158] sm:$0xf0] }
  0x9e   :  { %2264 = vmatpush.bf16.msra.mxu2 %v3922_v43  ;;  %v3014_v43 = vor.u32 %v4183_v29, %v3011_v30  ;;  %v2934_v48 = vor.u32 %v4163_v41, %v2931_v42  ;;  %v2907_v29 = vld [vmem:[%s6627_s1 + $0x128] sm:$0xf0]  ;;  %v380_v30 = vld [vmem:[#allocation1 + $0x24] sm:$0xff]  ;;  %v4123_v41 = vld [vmem:[%s6627_s1 + $0x14] sm:$0xf] }
  0x9f   :  { %2277 = vmatpush.bf16.msra.mxu3 %v3986_v47  ;;  %v2870_v47 = vor.u32 %v4147_v38, %v2867_v40  ;;  %v2771_v42 = vld [vmem:[%s6627_s1 + $0x18] sm:$0xf0] }
  0xa0   :  { %2239 = vmatpush.bf16.msra.mxu0 %v3786_v58  ;;  %v2923_v58 = vld [vmem:[%s6627_s1 + $0x148] sm:$0xf0]  ;;  %v2774_v52 = vor.u32 %v4123_v41, %v2771_v42  ;;  %v4169_v42 = vld [vmem:[%s6627_s1 + $0x184] sm:$0xf] }
  0xa1   :  { %2252 = vmatpush.bf16.msra.mxu1 %v3850_v62  ;;  %v2995_v62 = vld [vmem:[%s6627_s1 + $0x1d8] sm:$0xf0]  ;;  %v2926_v1 = vor.u32 %v4161_v57, %v2923_v58  ;;  %v2971_v57 = vld [vmem:[%s6627_s1 + $0x1a8] sm:$0xf0]  ;;  %v4121_v58 = vld [vmem:[%s6627_s1 + $0x4] sm:$0xf] }
  0xa2   :  { %2265 = vmatpush.bf16.msra.mxu2 %v3914_v63  ;;  %v4127_v63 = vld [vmem:[%s6627_s1 + $0x34] sm:$0xf]  ;;  %v2998_v9 = vor.u32 %v4179_v61, %v2995_v62  ;;  %v2763_v61 = vld [vmem:[%s6627_s1 + $0x8] sm:$0xf0]  ;;  %v4137_v62 = vld [vmem:[%s6627_s1 + $0x84] sm:$0xf] }
  0xa3   :  { %2278 = vmatpush.bf16.msra.mxu3 %v3978_v2  ;;  %2240 = vmatmul.bf16.vlgmr.msra.gmra.mxu0 %v376_v14  ;;  %v2787_v2 = vld [vmem:[%s6627_s1 + $0x38] sm:$0xf0]  ;;  %v2987_v14 = vld [vmem:[%s6627_s1 + $0x1c8] sm:$0xf0]  ;;  %v2033_v38 = vpop.f32.mrf.mxu0 }
  0xa4   :  { %2290 = vmatpush.bf16.msrb.mxu0 %v4050_v11  ;;  %2253 = vmatmul.bf16.vlgmr.msra.gmra.mxu1 %v377_v19  ;;  %v2790_v10 = vor.u32 %v4127_v63, %v2787_v2  ;;  %v4177_v11 = vld [vmem:[%s6627_s1 + $0x1c4] sm:$0xf]  ;;  %v2779_v19 = vld [vmem:[%s6627_s1 + $0x28] sm:$0xf0] }
  0xa5   :  { %2297 = vmatpush.bf16.msrb.mxu1 %v2822_v3  ;;  %2266 = vmatmul.bf16.vlgmr.msra.gmra.mxu2 %v378_v6  ;;  %v4143_v3 = vld [vmem:[%s6627_s1 + $0xb4] sm:$0xf]  ;;  %v2915_v6 = vld [vmem:[%s6627_s1 + $0x138] sm:$0xf0]  ;;  %v2827_v63 = vld [vmem:[%s6627_s1 + $0x88] sm:$0xf0] }
  0xa6   :  { %2310 = vmatpush.bf16.msrb.mxu2 %v2886_v4  ;;  %2279 = vmatmul.bf16.vlgmr.msra.gmra.mxu3 %v379_v25  ;;  %v2851_v4 = vld [vmem:[%s6627_s1 + $0xb8] sm:$0xf0]  ;;  %v2843_v25 = vld [vmem:[%s6627_s1 + $0xa8] sm:$0xf0] }
  0xa7   :  { %2323 = vmatpush.bf16.msrb.mxu3 %v2950_v5  ;;  %v4159_v5 = vld [vmem:[%s6627_s1 + $0x134] sm:$0xf]  ;;  %v2854_v16 = vor.u32 %v4143_v3, %v2851_v4  ;;  %v2046_v45 = vpop.f32.mrf.mxu1  ;;  %v2891_v2 = vld [vmem:[%s6627_s1 + $0x108] sm:$0xf0] }
  0xa8   :  { %2291 = vmatpush.bf16.msrb.mxu0 %v4042_v39  ;;  %v2918_v18 = vor.u32 %v4159_v5, %v2915_v6  ;;  %v2846_v39 = vor.u32 %v4141_v23, %v2843_v25  ;;  %v4199_v3 = vld [vmem:[%s6627_s1 + $0x274] sm:$0xf]  ;;  %v3075_v6 = vld [vmem:[%s6627_s1 + $0x278] sm:$0xf0]  ;;  %v3195_v41 = vld [vmem:[%s6627_s1 + $0x368] sm:$0xf0] }
  0xa9   :  { %2298 = vmatpush.bf16.msrb.mxu1 %v2814_v27  ;;  %v4157_v27 = vld [vmem:[%s6627_s1 + $0x124] sm:$0xf]  ;;  %v2963_v25 = vld [vmem:[%s6627_s1 + $0x198] sm:$0xf0] }
  0xaa   :  { %2311 = vmatpush.bf16.msrb.mxu2 %v2878_v34  ;;  %v2990_v34 = vor.u32 %v4177_v11, %v2987_v14  ;;  %v2910_v40 = vor.u32 %v4157_v27, %v2907_v29  ;;  %v2766_v11 = vor.u32 %v4121_v58, %v2763_v61  ;;  %v4231_v14 = vld [vmem:[%s6627_s1 + $0x374] sm:$0xf]  ;;  %v3078_v29 = vor.u32 %v4199_v3, %v3075_v6  ;;  %v3123_v58 = vld [vmem:[%s6627_s1 + $0x2d8] sm:$0xf0]  ;;  %v4209_v3 = vld [vmem:[%s6627_s1 + $0x2c4] sm:$0xf] }
  0xab   :  { %2324 = vmatpush.bf16.msrb.mxu3 %v2942_v35  ;;  %v2782_v35 = vor.u32 %v4125_v15, %v2779_v19  ;;  %v2072_v5 = vpop.f32.mrf.mxu3  ;;  %v3203_v15 = vld [vmem:[%s6627_s1 + $0x378] sm:$0xf0]  ;;  %v2830_v19 = vor.u32 %v4137_v62, %v2827_v63  ;;  %v3179_v6 = vld [vmem:[%s6627_s1 + $0x348] sm:$0xf0] }
  0xac   :  { %2336 = vmatpush.bf16.msra.mxu0 %v3014_v43  ;;  %v4139_v43 = vld [vmem:[%s6627_s1 + $0x94] sm:$0xf]  ;;  %v3187_v61 = vld [vmem:[%s6627_s1 + $0x358] sm:$0xf0] }
  0xad   :  { %2299 = vmatpush.bf16.msrb.mxu1 %v2806_v44  ;;  %v2034_v44 = vadd.f32 %v2033_v38, %v350_v24  ;;  %v4171_v24 = vld [vmem:[%s6627_s1 + $0x194] sm:$0xf]  ;;  %v3131_v38 = vld [vmem:[%s6627_s1 + $0x2e8] sm:$0xf0] }
  0xae   :  { %2312 = vmatpush.bf16.msrb.mxu2 %v2870_v47  ;;  %v4155_v47 = vld [vmem:[%s6627_s1 + $0x114] sm:$0xf] }
  0xaf   :  { %2325 = vmatpush.bf16.msrb.mxu3 %v2934_v48  ;;  %v2899_v48 = vld [vmem:[%s6627_s1 + $0x118] sm:$0xf0]  ;;  %v2047_v49 = vadd.f32 %v2046_v45, %v2034_v44  ;;  %v2048_v27 = vpop.f32.mrf.mxu1 }
  0xb0   :  { %2337 = vmatpush.bf16.msra.mxu0 %v3006_v59  ;;  %v2838_v59 = vor.u32 %v4139_v43, %v2835_v46  ;;  %v2955_v43 = vld [vmem:[%s6627_s1 + $0x188] sm:$0xf0]  ;;  %v3134_v46 = vor.u32 %v4213_v37, %v3131_v38  ;;  %v3107_v27 = vld [vmem:[%s6627_s1 + $0x2b8] sm:$0xf0]  ;;  %v4241_v38 = vld [vmem:[%s6627_s1 + $0x3c4] sm:$0xf] }
  0xb1   :  { %2300 = vmatpush.bf16.msrb.mxu1 %v2798_v60  ;;  %v2902_v60 = vor.u32 %v4155_v47, %v2899_v48  ;;  %v4247_v47 = vld [vmem:[%s6627_s1 + $0x3f4] sm:$0xf]  ;;  %v3267_v48 = vld [vmem:[%s6627_s1 + $0x3f8] sm:$0xf0] }
  0xb2   :  { %2313 = vmatpush.bf16.msrb.mxu2 %v2862_v0  ;;  %v2059_v0 = vpop.f32.mrf.mxu2  ;;  %v3270_v62 = vor.u32 %v4247_v47, %v3267_v48  ;;  %v3163_v47 = vld [vmem:[%s6627_s1 + $0x328] sm:$0xf0] }
  0xb3   :  { %2326 = vmatpush.bf16.msrb.mxu3 %v2926_v1  ;;  %4055 = vmatmul.msk.bf16.vlgmr.msrb.gmra.mxu0 %vm2021_vm0, %v380_v30  ;;  %v4153_v1 = vld [vmem:[%s6627_s1 + $0x104] sm:$0xf]  ;;  %v2060_v4 = vadd.f32 %v2059_v0, %v2047_v49  ;;  %v4195_v49 = vld [vmem:[%s6627_s1 + $0x254] sm:$0xf] }
  0xb4   :  { %2338 = vmatpush.bf16.msra.mxu0 %v2998_v9  ;;  %v3139_v9 = vld [vmem:[%s6627_s1 + $0x2f8] sm:$0xf0]  ;;  %v2894_v23 = vor.u32 %v4153_v1, %v2891_v2  ;;  %v3259_v1 = vld [vmem:[%s6627_s1 + $0x3e8] sm:$0xf0]  ;;  %v4193_v2 = vld [vmem:[%s6627_s1 + $0x244] sm:$0xf] }
  0xb5   :  { %2301 = vmatpush.bf16.msrb.mxu1 %v2790_v10  ;;  %v2974_v10 = vor.u32 %v4173_v56, %v2971_v57  ;;  %v3142_v30 = vor.u32 %v4215_v8, %v3139_v9  ;;  %v3059_v56 = vld [vmem:[%s6627_s1 + $0x258] sm:$0xf0]  ;;  %v4211_v57 = vld [vmem:[%s6627_s1 + $0x2d4] sm:$0xf] }
  0xb6   :  { %2314 = vmatpush.bf16.msrb.mxu2 %v2854_v16  ;;  %v5733_v16 = vadd.f32 %v2072_v5, %v2060_v4  ;;  %v3062_v63 = vor.u32 %v4195_v49, %v3059_v56  ;;  %v3126_v0 = vor.u32 %v4211_v57, %v3123_v58  ;;  %v3115_v4 = vld [vmem:[%s6627_s1 + $0x2c8] sm:$0xf0]  ;;  %v4225_v5 = vld [vmem:[%s6627_s1 + $0x344] sm:$0xf]  ;;  %v4239_v57 = vld [vmem:[%s6627_s1 + $0x3b4] sm:$0xf] }
  0xb7   :  { %2327 = vmatpush.bf16.msrb.mxu3 %v2918_v18  ;;  %v2035_v18 = vpop.f32.mrf.mxu0  ;;  %v3235_v58 = vld [vmem:[%s6627_s1 + $0x3b8] sm:$0xf0] }
  0xb8   :  { %2339 = vmatpush.bf16.msra.mxu0 %v2990_v34  ;;  %v4197_v34 = vld [vmem:[%s6627_s1 + $0x264] sm:$0xf]  ;;  %v4191_v18 = vld [vmem:[%s6627_s1 + $0x234] sm:$0xf] }
  0xb9   :  { %2302 = vmatpush.bf16.msrb.mxu1 %v2782_v35  ;;  %v3206_v35 = vor.u32 %v4231_v14, %v3203_v15  ;;  %v3070_v45 = vor.u32 %v4197_v34, %v3067_v36  ;;  %v3251_v14 = vld [vmem:[%s6627_s1 + $0x3d8] sm:$0xf0] }
  0xba   :  { %2315 = vmatpush.bf16.msrb.mxu2 %v2846_v39  ;;  %v2966_v39 = vor.u32 %v4171_v24, %v2963_v25  ;;  %v2061_v44 = vpop.f32.mrf.mxu2  ;;  %v3043_v24 = vld [vmem:[%s6627_s1 + $0x238] sm:$0xf0]  ;;  %v4207_v25 = vld [vmem:[%s6627_s1 + $0x2b4] sm:$0xf] }
  0xbb   :  { %2328 = vmatpush.bf16.msrb.mxu3 %v2910_v40  ;;  %v4229_v40 = vld [vmem:[%s6627_s1 + $0x364] sm:$0xf]  ;;  %v3046_v36 = vor.u32 %v4191_v18, %v3043_v24  ;;  %v3110_v37 = vor.u32 %v4207_v25, %v3107_v27  ;;  %v3099_v44 = vld [vmem:[%s6627_s1 + $0x2a8] sm:$0xf0]  ;;  %v4279_v24 = vld [vmem:[%s6627_s1 + $0x4f4] sm:$0xf] }
  0xbc   :  { %2340 = vmatpush.bf16.msra.mxu0 %v2982_v50  ;;  %v2074_v50 = vpop.f32.mrf.mxu3 }
  0xbd   :  { %2303 = vmatpush.bf16.msrb.mxu1 %v2774_v52  ;;  %v3198_v52 = vor.u32 %v4229_v40, %v3195_v41 }
  0xbe   :  { %2316 = vmatpush.bf16.msrb.mxu2 %v2838_v59  ;;  %v2958_v59 = vor.u32 %v4169_v42, %v2955_v43  ;;  %v3035_v42 = vld [vmem:[%s6627_s1 + $0x228] sm:$0xf0]  ;;  %v4205_v43 = vld [vmem:[%s6627_s1 + $0x2a4] sm:$0xf] }
  0xbf   :  { %2329 = vmatpush.bf16.msrb.mxu3 %v2902_v60  ;;  %v4227_v60 = vld [vmem:[%s6627_s1 + $0x354] sm:$0xf] }
  0xc0   :  { %2341 = vmatpush.bf16.msra.mxu0 %v2974_v10  ;;  %v3118_v10 = vor.u32 %v4209_v3, %v3115_v4  ;;  %v2085_v15 = vpop.f32.mrf.mxu0  ;;  %v3227_v3 = vld [vmem:[%s6627_s1 + $0x3a8] sm:$0xf0] }
  0xc1   :  { %2304 = vmatpush.bf16.msrb.mxu1 %v2766_v11  ;;  %v4243_v11 = vld [vmem:[%s6627_s1 + $0x3d4] sm:$0xf] }
  0xc2   :  { %2317 = vmatpush.bf16.msrb.mxu2 %v2830_v19  ;;  %v3182_v19 = vor.u32 %v4225_v5, %v3179_v6  ;;  %v3254_v34 = vor.u32 %v4243_v11, %v3251_v14  ;;  %v4185_v6 = vld [vmem:[%s6627_s1 + $0x204] sm:$0xf]  ;;  %v3083_v11 = vld [vmem:[%s6627_s1 + $0x288] sm:$0xf0] }
  0xc3   :  { %2330 = vmatpush.bf16.msrb.mxu3 %v2894_v23  ;;  %v2086_v23 = vadd.f32 %v2085_v15, %v5733_v16  ;;  %v3171_v16 = vld [vmem:[%s6627_s1 + $0x338] sm:$0xf0]  ;;  %v4217_v14 = vld [vmem:[%s6627_s1 + $0x304] sm:$0xf]  ;;  %v3147_v15 = vld [vmem:[%s6627_s1 + $0x308] sm:$0xf0] }
  0xc4   :  { %2305 = vmatmul.bf16.vlgmr.msrb.gmra.mxu1 %v4807_v21  ;;  %2342 = vmatpush.bf16.msra.mxu0 %v2966_v39  ;;  %v4245_v21 = vld [vmem:[%s6627_s1 + $0x3e4] sm:$0xf] }
  0xc5   :  { %2349 = vmatpush.bf16.msra.mxu1 %v3078_v29  ;;  %2318 = vmatmul.bf16.vlgmr.msrb.gmra.mxu2 %v4818_v26  ;;  %v3190_v26 = vor.u32 %v4227_v60, %v3187_v61  ;;  %v3262_v8 = vor.u32 %v4245_v21, %v3259_v1  ;;  %v2098_v29 = vpop.f32.mrf.mxu1  ;;  %v4189_v39 = vld [vmem:[%s6627_s1 + $0x224] sm:$0xf]  ;;  %v4219_v1 = vld [vmem:[%s6627_s1 + $0x314] sm:$0xf] }
  0xc6   :  { %2362 = vmatpush.bf16.msra.mxu2 %v3142_v30  ;;  %2331 = vmatmul.bf16.vlgmr.msrb.gmra.mxu3 %v4805_v20  ;;  %v3051_v20 = vld [vmem:[%s6627_s1 + $0x248] sm:$0xf0]  ;;  %v4223_v30 = vld [vmem:[%s6627_s1 + $0x334] sm:$0xf]  ;;  %v3038_v50 = vor.u32 %v4189_v39, %v3035_v42 }
  0xc7   :  { %2375 = vmatpush.bf16.msra.mxu3 %v3206_v35  ;;  %v3054_v9 = vor.u32 %v4193_v2, %v3051_v20  ;;  %v2099_v35 = vadd.f32 %v2098_v29, %v2086_v23  ;;  %v3174_v40 = vor.u32 %v4223_v30, %v3171_v16  ;;  %v3155_v2 = vld [vmem:[%s6627_s1 + $0x318] sm:$0xf0]  ;;  %v4237_v20 = vld [vmem:[%s6627_s1 + $0x3a4] sm:$0xf]  ;;  %v4295_v30 = vld [vmem:[%s6627_s1 + $0x574] sm:$0xf] }
  0xc8   :  { %2343 = vmatpush.bf16.msra.mxu0 %v2958_v59  ;;  %v2111_v41 = vpop.f32.mrf.mxu2  ;;  %v4187_v59 = vld [vmem:[%s6627_s1 + $0x214] sm:$0xf]  ;;  %v2087_v60 = vpop.f32.mrf.mxu0  ;;  %v3331_v23 = vld [vmem:[%s6627_s1 + $0x478] sm:$0xf0]  ;;  %v3230_v27 = vor.u32 %v4237_v20, %v3227_v3  ;;  %v3323_v42 = vld [vmem:[%s6627_s1 + $0x468] sm:$0xf0] }
  0xc9   :  { %2350 = vmatpush.bf16.msra.mxu1 %v3070_v45  ;;  %v2112_v45 = vadd.f32 %v2111_v41, %v2099_v35  ;;  %v2124_v48 = vpop.f32.mrf.mxu3  ;;  %v3395_v29 = vld [vmem:[%s6627_s1 + $0x4f8] sm:$0xf0]  ;;  %v4261_v41 = vld [vmem:[%s6627_s1 + $0x464] sm:$0xf]  ;;  %v4259_v60 = vld [vmem:[%s6627_s1 + $0x454] sm:$0xf] }
  0xca   :  { %2363 = vmatpush.bf16.msra.mxu2 %v3134_v46  ;;  %v4221_v46 = vld [vmem:[%s6627_s1 + $0x324] sm:$0xf]  ;;  %v3459_v16 = vld [vmem:[%s6627_s1 + $0x578] sm:$0xf0]  ;;  %v3398_v39 = vor.u32 %v4279_v24, %v3395_v29  ;;  %v3515_v20 = vld [vmem:[%s6627_s1 + $0x5e8] sm:$0xf0] }
  0xcb   :  { %2376 = vmatpush.bf16.msra.mxu3 %v3198_v52  ;;  %2344 = vmatmul.bf16.vlgmr.msra.gmra.mxu0 %v4809_v22  ;;  %v3243_v22 = vld [vmem:[%s6627_s1 + $0x3c8] sm:$0xf0]  ;;  %v3102_v52 = vor.u32 %v4205_v43, %v3099_v44  ;;  %v5866_v56 = vadd.f32 %v2124_v48, %v2112_v45  ;;  %v3166_v61 = vor.u32 %v4221_v46, %v3163_v47  ;;  %v4277_v43 = vld [vmem:[%s6627_s1 + $0x4e4] sm:$0xf]  ;;  %v3299_v29 = vld [vmem:[%s6627_s1 + $0x438] sm:$0xf0] }
  0xcc   :  { %2388 = vmatpush.bf16.msrb.mxu0 %v3270_v62  ;;  %v3246_v49 = vor.u32 %v4241_v38, %v3243_v22  ;;  %v3027_v62 = vld [vmem:[%s6627_s1 + $0x218] sm:$0xf0]  ;;  %v3150_v38 = vor.u32 %v4217_v14, %v3147_v15  ;;  %v3387_v45 = vld [vmem:[%s6627_s1 + $0x4e8] sm:$0xf0]  ;;  %v4293_v46 = vld [vmem:[%s6627_s1 + $0x564] sm:$0xf] }
  0xcd   :  { %2351 = vmatpush.bf16.msra.mxu1 %v3062_v63  ;;  %v4203_v63 = vld [vmem:[%s6627_s1 + $0x294] sm:$0xf]  ;;  %v2100_v21 = vpop.f32.mrf.mxu1  ;;  %v3030_v4 = vor.u32 %v4187_v59, %v3027_v62  ;;  %v3451_v47 = vld [vmem:[%s6627_s1 + $0x568] sm:$0xf0]  ;;  %v4233_v48 = vld [vmem:[%s6627_s1 + $0x384] sm:$0xf] }
  0xce   :  { %2364 = vmatpush.bf16.msra.mxu2 %v3126_v0  ;;  %v3091_v0 = vld [vmem:[%s6627_s1 + $0x298] sm:$0xf0]  ;;  %v3454_v59 = vor.u32 %v4293_v46, %v3451_v47  ;;  %v4275_v62 = vld [vmem:[%s6627_s1 + $0x4d4] sm:$0xf] }
  0xcf   :  { %2377 = vmatpush.bf16.msra.mxu3 %v3190_v26  ;;  %v3238_v26 = vor.u32 %v4239_v57, %v3235_v58  ;;  %v3094_v5 = vor.u32 %v4203_v63, %v3091_v0  ;;  %v3523_v57 = vld [vmem:[%s6627_s1 + $0x5f8] sm:$0xf0]  ;;  %v3390_v58 = vor.u32 %v4277_v43, %v3387_v45  ;;  %v4291_v21 = vld [vmem:[%s6627_s1 + $0x554] sm:$0xf]  ;;  %v3355_v43 = vld [vmem:[%s6627_s1 + $0x4a8] sm:$0xf0] }
  0xd0   :  { %2389 = vmatpush.bf16.msrb.mxu0 %v3262_v8  ;;  %v3019_v8 = vld [vmem:[%s6627_s1 + $0x208] sm:$0xf0]  ;;  %v2113_v18 = vpop.f32.mrf.mxu2  ;;  %v3379_v0 = vld [vmem:[%s6627_s1 + $0x4d8] sm:$0xf0]  ;;  %v4307_v15 = vld [vmem:[%s6627_s1 + $0x5d4] sm:$0xf] }
  0xd1   :  { %2352 = vmatpush.bf16.msra.mxu1 %v3054_v9  ;;  %v4201_v9 = vld [vmem:[%s6627_s1 + $0x284] sm:$0xf]  ;;  %v2126_v25 = vpop.f32.mrf.mxu3  ;;  %v3382_v3 = vor.u32 %v4275_v62, %v3379_v0  ;;  %v3507_v18 = vld [vmem:[%s6627_s1 + $0x5d8] sm:$0xf0]  ;;  %v3419_v45 = vld [vmem:[%s6627_s1 + $0x528] sm:$0xf0] }
  0xd2   :  { %2365 = vmatpush.bf16.msra.mxu2 %v3118_v10  ;;  %v3158_v10 = vor.u32 %v4219_v1, %v3155_v2  ;;  %v3086_v35 = vor.u32 %v4201_v9, %v3083_v11  ;;  %v3443_v1 = vld [vmem:[%s6627_s1 + $0x558] sm:$0xf0]  ;;  %v3435_v9 = vld [vmem:[%s6627_s1 + $0x548] sm:$0xf0] }
  0xd3   :  { %2378 = vmatpush.bf16.msra.mxu3 %v3182_v19  ;;  %v4263_v19 = vld [vmem:[%s6627_s1 + $0x474] sm:$0xf]  ;;  %v3283_v62 = vld [vmem:[%s6627_s1 + $0x418] sm:$0xf0] }
  0xd4   :  { %2390 = vmatpush.bf16.msrb.mxu0 %v3254_v34  ;;  %v3022_v34 = vor.u32 %v4185_v6, %v3019_v8  ;;  %v3334_v22 = vor.u32 %v4263_v19, %v3331_v23  ;;  %v3371_v6 = vld [vmem:[%s6627_s1 + $0x4c8] sm:$0xf0]  ;;  %v4289_v8 = vld [vmem:[%s6627_s1 + $0x544] sm:$0xf] }
  0xd5   :  { %2353 = vmatpush.bf16.msra.mxu1 %v3046_v36  ;;  %v4235_v36 = vld [vmem:[%s6627_s1 + $0x394] sm:$0xf]  ;;  %v3438_v24 = vor.u32 %v4289_v8, %v3435_v9  ;;  %v4265_v8 = vld [vmem:[%s6627_s1 + $0x484] sm:$0xf]  ;;  %v3339_v9 = vld [vmem:[%s6627_s1 + $0x488] sm:$0xf0] }
  0xd6   :  { %2366 = vmatpush.bf16.msra.mxu2 %v3110_v37  ;;  %v3219_v37 = vld [vmem:[%s6627_s1 + $0x398] sm:$0xf0] }
  0xd7   :  { %2379 = vmatpush.bf16.msra.mxu3 %v3174_v40  ;;  %v3462_v40 = vor.u32 %v4295_v30, %v3459_v16  ;;  %v3222_v44 = vor.u32 %v4235_v36, %v3219_v37  ;;  %v4271_v30 = vld [vmem:[%s6627_s1 + $0x4b4] sm:$0xf]  ;;  %v3510_v36 = vor.u32 %v4307_v15, %v3507_v18  ;;  %v3587_v15 = vld [vmem:[%s6627_s1 + $0x678] sm:$0xf0] }
  0xd8   :  { %2391 = vmatpush.bf16.msrb.mxu0 %v3246_v49  ;;  %v3211_v49 = vld [vmem:[%s6627_s1 + $0x388] sm:$0xf0]  ;;  %v4287_v16 = vld [vmem:[%s6627_s1 + $0x534] sm:$0xf] }
  0xd9   :  { %2354 = vmatpush.bf16.msra.mxu1 %v3038_v50  ;;  %v3326_v50 = vor.u32 %v4261_v41, %v3323_v42  ;;  %v3214_v63 = vor.u32 %v4233_v48, %v3211_v49  ;;  %v3291_v41 = vld [vmem:[%s6627_s1 + $0x428] sm:$0xf0]  ;;  %v4269_v42 = vld [vmem:[%s6627_s1 + $0x4a4] sm:$0xf] }
  0xda   :  { %2367 = vmatpush.bf16.msra.mxu2 %v3102_v52  ;;  %v4311_v52 = vld [vmem:[%s6627_s1 + $0x5f4] sm:$0xf] }
  0xdb   :  { %2380 = vmatpush.bf16.msra.mxu3 %v3166_v61  ;;  %v3315_v61 = vld [vmem:[%s6627_s1 + $0x458] sm:$0xf0]  ;;  %v3526_v2 = vor.u32 %v4311_v52, %v3523_v57  ;;  %v4303_v52 = vld [vmem:[%s6627_s1 + $0x5b4] sm:$0xf] }
  0xdc   :  { %2392 = vmatpush.bf16.msrb.mxu0 %v3238_v26  ;;  %v4309_v26 = vld [vmem:[%s6627_s1 + $0x5e4] sm:$0xf]  ;;  %v3491_v57 = vld [vmem:[%s6627_s1 + $0x5b8] sm:$0xf0] }
  0xdd   :  { %2355 = vmatpush.bf16.msra.mxu1 %v3030_v4  ;;  %v3446_v4 = vor.u32 %v4291_v21, %v3443_v1  ;;  %v3347_v1 = vld [vmem:[%s6627_s1 + $0x498] sm:$0xf0] }
  0xde   :  { %2368 = vmatpush.bf16.msra.mxu2 %v3094_v5  ;;  %v4273_v5 = vld [vmem:[%s6627_s1 + $0x4c4] sm:$0xf] }
  0xdf   :  { %2381 = vmatpush.bf16.msra.mxu3 %v3158_v10  ;;  %v3518_v10 = vor.u32 %v4309_v26, %v3515_v20  ;;  %v3374_v23 = vor.u32 %v4273_v5, %v3371_v6  ;;  %v3494_v26 = vor.u32 %v4303_v52, %v3491_v57  ;;  %v4301_v20 = vld [vmem:[%s6627_s1 + $0x5a4] sm:$0xf] }
  0xe0   :  { %2393 = vmatpush.bf16.msrb.mxu0 %v3230_v27  ;;  %v2137_v11 = vpop.f32.mrf.mxu0  ;;  %v4255_v27 = vld [vmem:[%s6627_s1 + $0x434] sm:$0xf] }
  0xe1   :  { %2356 = vmatpush.bf16.msra.mxu1 %v3022_v34  ;;  %v2138_v19 = vadd.f32 %v2137_v11, %v5866_v56  ;;  %v2150_v25 = vpop.f32.mrf.mxu1  ;;  %v3363_v56 = vld [vmem:[%s6627_s1 + $0x4b8] sm:$0xf0]  ;;  %v3302_v37 = vor.u32 %v4255_v27, %v3299_v29  ;;  %v3403_v11 = vld [vmem:[%s6627_s1 + $0x508] sm:$0xf0] }
  0xe2   :  { %2369 = vmatpush.bf16.msra.mxu2 %v3086_v35  ;;  %v3427_v34 = vld [vmem:[%s6627_s1 + $0x538] sm:$0xf0] }
  0xe3   :  { %2382 = vmatpush.bf16.msra.mxu3 %v3150_v38  ;;  %v2151_v35 = vadd.f32 %v2150_v25, %v2138_v19  ;;  %v3499_v38 = vld [vmem:[%s6627_s1 + $0x5c8] sm:$0xf0]  ;;  %v4343_v19 = vld [vmem:[%s6627_s1 + $0x6f4] sm:$0xf]  ;;  %v3715_v29 = vld [vmem:[%s6627_s1 + $0x778] sm:$0xf0] }
  0xe4   :  { %2394 = vmatpush.bf16.msrb.mxu0 %v3222_v44  ;;  %2357 = vmatmul.bf16.vlgmr.msra.gmra.mxu1 %v4876_v53  ;;  %v3307_v53 = vld [vmem:[%s6627_s1 + $0x448] sm:$0xf0]  ;;  %v4285_v44 = vld [vmem:[%s6627_s1 + $0x524] sm:$0xf] }
  0xe5   :  { %2401 = vmatpush.bf16.msrb.mxu1 %v3334_v22  ;;  %2370 = vmatmul.bf16.vlgmr.msra.gmra.mxu2 %v4880_v55  ;;  %v3318_v55 = vor.u32 %v4259_v60, %v3315_v61  ;;  %v3366_v22 = vor.u32 %v4271_v30, %v3363_v56  ;;  %v3422_v60 = vor.u32 %v4285_v44, %v3419_v45  ;;  %v4251_v61 = vld [vmem:[%s6627_s1 + $0x414] sm:$0xf]  ;;  %v3475_v56 = vld [vmem:[%s6627_s1 + $0x598] sm:$0xf0]  ;;  %v4297_v44 = vld [vmem:[%s6627_s1 + $0x584] sm:$0xf] }
  0xe6   :  { %2414 = vmatpush.bf16.msrb.mxu2 %v3398_v39  ;;  %2383 = vmatmul.bf16.vlgmr.msra.gmra.mxu3 %v4874_v51  ;;  %v4257_v51 = vld [vmem:[%s6627_s1 + $0x444] sm:$0xf]  ;;  %v3430_v39 = vor.u32 %v4287_v16, %v3427_v34  ;;  %v4299_v30 = vld [vmem:[%s6627_s1 + $0x594] sm:$0xf]  ;;  %v3342_v34 = vor.u32 %v4265_v8, %v3339_v9  ;;  %v3467_v45 = vld [vmem:[%s6627_s1 + $0x588] sm:$0xf0] }
  0xe7   :  { %2427 = vmatpush.bf16.msrb.mxu3 %v3462_v40  ;;  %v3310_v14 = vor.u32 %v4257_v51, %v3307_v53  ;;  %v4253_v40 = vld [vmem:[%s6627_s1 + $0x424] sm:$0xf]  ;;  %v3275_v53 = vld [vmem:[%s6627_s1 + $0x408] sm:$0xf0]  ;;  %v3470_v57 = vor.u32 %v4297_v44, %v3467_v45  ;;  %v4315_v44 = vld [vmem:[%s6627_s1 + $0x614] sm:$0xf] }
  0xe8   :  { %2395 = vmatpush.bf16.msrb.mxu0 %v3214_v63  ;;  %v2163_v46 = vpop.f32.mrf.mxu2  ;;  %v4267_v63 = vld [vmem:[%s6627_s1 + $0x494] sm:$0xf]  ;;  %v4249_v51 = vld [vmem:[%s6627_s1 + $0x404] sm:$0xf] }
  0xe9   :  { %2402 = vmatpush.bf16.msrb.mxu1 %v3326_v50  ;;  %v2164_v48 = vadd.f32 %v2163_v46, %v2151_v35  ;;  %v2176_v49 = vpop.f32.mrf.mxu3  ;;  %v3294_v50 = vor.u32 %v4253_v40, %v3291_v41  ;;  %v2152_v0 = vpop.f32.mrf.mxu1  ;;  %v3350_v5 = vor.u32 %v4267_v63, %v3347_v1  ;;  %v3278_v27 = vor.u32 %v4249_v51, %v3275_v53  ;;  %v4341_v40 = vld [vmem:[%s6627_s1 + $0x6e4] sm:$0xf]  ;;  %v3643_v41 = vld [vmem:[%s6627_s1 + $0x6e8] sm:$0xf0]  ;;  %v4375_v46 = vld [vmem:[%s6627_s1 + $0x7f4] sm:$0xf] }
  0xea   :  { %2415 = vmatpush.bf16.msrb.mxu2 %v3390_v58  ;;  %v2139_v58 = vpop.f32.mrf.mxu0  ;;  %v3699_v63 = vld [vmem:[%s6627_s1 + $0x758] sm:$0xf0]  ;;  %v4373_v0 = vld [vmem:[%s6627_s1 + $0x7e4] sm:$0xf]  ;;  %v3691_v51 = vld [vmem:[%s6627_s1 + $0x748] sm:$0xf0] }
  0xeb   :  { %2428 = vmatpush.bf16.msrb.mxu3 %v3454_v59  ;;  %2396 = vmatmul.bf16.vlgmr.msrb.gmra.mxu0 %v4878_v54  ;;  %v4305_v54 = vld [vmem:[%s6627_s1 + $0x5c4] sm:$0xf]  ;;  %v3358_v59 = vor.u32 %v4269_v42, %v3355_v43  ;;  %v6080_v21 = vadd.f32 %v2176_v49, %v2164_v48  ;;  %v3707_v43 = vld [vmem:[%s6627_s1 + $0x768] sm:$0xf0]  ;;  %v3646_v49 = vor.u32 %v4341_v40, %v3643_v41  ;;  %v3571_v58 = vld [vmem:[%s6627_s1 + $0x658] sm:$0xf0] }
  0xec   :  { %2440 = vmatpush.bf16.msra.mxu0 %v3526_v2  ;;  %v3502_v47 = vor.u32 %v4305_v54, %v3499_v38  ;;  %v4283_v2 = vld [vmem:[%s6627_s1 + $0x514] sm:$0xf]  ;;  %v4325_v54 = vld [vmem:[%s6627_s1 + $0x664] sm:$0xf]  ;;  %v3579_v38 = vld [vmem:[%s6627_s1 + $0x668] sm:$0xf0] }
  0xed   :  { %2403 = vmatpush.bf16.msrb.mxu1 %v3318_v55  ;;  %v3411_v55 = vld [vmem:[%s6627_s1 + $0x518] sm:$0xf0]  ;;  %v4357_v42 = vld [vmem:[%s6627_s1 + $0x764] sm:$0xf]  ;;  %v3582_v48 = vor.u32 %v4325_v54, %v3579_v38  ;;  %v4371_v53 = vld [vmem:[%s6627_s1 + $0x7d4] sm:$0xf] }
  0xee   :  { %2416 = vmatpush.bf16.msrb.mxu2 %v3382_v3  ;;  %v3286_v3 = vor.u32 %v4251_v61, %v3283_v62  ;;  %v3414_v6 = vor.u32 %v4283_v2, %v3411_v55  ;;  %v3710_v52 = vor.u32 %v4357_v42, %v3707_v43  ;;  %v4355_v62 = vld [vmem:[%s6627_s1 + $0x754] sm:$0xf]  ;;  %v4321_v2 = vld [vmem:[%s6627_s1 + $0x644] sm:$0xf]  ;;  %v3675_v38 = vld [vmem:[%s6627_s1 + $0x728] sm:$0xf0] }
  0xef   :  { %2429 = vmatpush.bf16.msrb.mxu3 %v3446_v4  ;;  %v3483_v4 = vld [vmem:[%s6627_s1 + $0x5a8] sm:$0xf0]  ;;  %v3702_v55 = vor.u32 %v4355_v62, %v3699_v63  ;;  %v4349_v54 = vld [vmem:[%s6627_s1 + $0x724] sm:$0xf]  ;;  %v3747_v40 = vld [vmem:[%s6627_s1 + $0x7b8] sm:$0xf0] }
  0xf0   :  { %2441 = vmatpush.bf16.msra.mxu0 %v3518_v10  ;;  %v4281_v10 = vld [vmem:[%s6627_s1 + $0x504] sm:$0xf]  ;;  %v3486_v18 = vor.u32 %v4301_v20, %v3483_v4  ;;  %v2165_v25 = vpop.f32.mrf.mxu2  ;;  %v3627_v20 = vld [vmem:[%s6627_s1 + $0x6c8] sm:$0xf0] }
  0xf1   :  { %2404 = vmatpush.bf16.msrb.mxu1 %v3310_v14  ;;  %v4327_v14 = vld [vmem:[%s6627_s1 + $0x674] sm:$0xf]  ;;  %v2178_v16 = vpop.f32.mrf.mxu3  ;;  %v3406_v35 = vor.u32 %v4281_v10, %v3403_v11  ;;  %v4353_v4 = vld [vmem:[%s6627_s1 + $0x744] sm:$0xf] }
  0xf2   :  { %2417 = vmatpush.bf16.msrb.mxu2 %v3374_v23  ;;  %v3651_v23 = vld [vmem:[%s6627_s1 + $0x6f8] sm:$0xf0]  ;;  %v4319_v10 = vld [vmem:[%s6627_s1 + $0x634] sm:$0xf]  ;;  %v3694_v11 = vor.u32 %v4353_v4, %v3691_v51  ;;  %v4369_v25 = vld [vmem:[%s6627_s1 + $0x7c4] sm:$0xf] }
  0xf3   :  { %2430 = vmatpush.bf16.msrb.mxu3 %v3438_v24  ;;  %v4359_v24 = vld [vmem:[%s6627_s1 + $0x774] sm:$0xf]  ;;  %v4313_v63 = vld [vmem:[%s6627_s1 + $0x604] sm:$0xf]  ;;  %v3907_v4 = vld [vmem:[%s6627_s1 + $0x8f8] sm:$0xf0] }
  0xf4   :  { %2442 = vmatpush.bf16.msra.mxu0 %v3510_v36  ;;  %v3590_v36 = vor.u32 %v4327_v14, %v3587_v15  ;;  %v3555_v15 = vld [vmem:[%s6627_s1 + $0x638] sm:$0xf0]  ;;  %v4423_v51 = vld [vmem:[%s6627_s1 + $0x974] sm:$0xf] }
  0xf5   :  { %2405 = vmatpush.bf16.msrb.mxu1 %v3302_v37  ;;  %v3654_v37 = vor.u32 %v4343_v19, %v3651_v23  ;;  %v3619_v19 = vld [vmem:[%s6627_s1 + $0x6b8] sm:$0xf0] }
  0xf6   :  { %2418 = vmatpush.bf16.msrb.mxu2 %v3366_v22  ;;  %v3718_v22 = vor.u32 %v4359_v24, %v3715_v29  ;;  %v3683_v24 = vld [vmem:[%s6627_s1 + $0x738] sm:$0xf0]  ;;  %v3558_v29 = vor.u32 %v4319_v10, %v3555_v15  ;;  %v4363_v10 = vld [vmem:[%s6627_s1 + $0x794] sm:$0xf] }
  0xf7   :  { %2431 = vmatpush.bf16.msrb.mxu3 %v3430_v39  ;;  %v3478_v39 = vor.u32 %v4299_v30, %v3475_v56  ;;  %v4317_v56 = vld [vmem:[%s6627_s1 + $0x624] sm:$0xf] }
  0xf8   :  { %2443 = vmatpush.bf16.msra.mxu0 %v3502_v47  ;;  %v3779_v47 = vld [vmem:[%s6627_s1 + $0x7f8] sm:$0xf0] }
  0xf9   :  { %2406 = vmatpush.bf16.msrb.mxu1 %v3294_v50  ;;  %v4323_v50 = vld [vmem:[%s6627_s1 + $0x654] sm:$0xf]  ;;  %v3782_v61 = vor.u32 %v4375_v46, %v3779_v47  ;;  %v3678_v46 = vor.u32 %v4349_v54, %v3675_v38  ;;  %v3539_v47 = vld [vmem:[%s6627_s1 + $0x618] sm:$0xf0] }
  0xfa   :  { %2419 = vmatpush.bf16.msrb.mxu2 %v3358_v59  ;;  %v4339_v59 = vld [vmem:[%s6627_s1 + $0x6d4] sm:$0xf]  ;;  %v4035_v54 = vld [vmem:[%s6627_s1 + $0x9f8] sm:$0xf0] }
  0xfb   :  { %2432 = vmatpush.bf16.msrb.mxu3 %v3422_v60  ;;  %v3635_v60 = vld [vmem:[%s6627_s1 + $0x6d8] sm:$0xf0] }
  0xfc   :  { %2444 = vmatpush.bf16.msra.mxu0 %v3494_v26  ;;  %v3638_v1 = vor.u32 %v4339_v59, %v3635_v60  ;;  %v4337_v26 = vld [vmem:[%s6627_s1 + $0x6c4] sm:$0xf]  ;;  %v3739_v60 = vld [vmem:[%s6627_s1 + $0x7a8] sm:$0xf0] }
  0xfd   :  { %2407 = vmatpush.bf16.msrb.mxu1 %v3286_v3  ;;  %v3630_v9 = vor.u32 %v4337_v26, %v3627_v20  ;;  %v4365_v59 = vld [vmem:[%s6627_s1 + $0x7a4] sm:$0xf]  ;;  %v4391_v26 = vld [vmem:[%s6627_s1 + $0x874] sm:$0xf]  ;;  %v3843_v20 = vld [vmem:[%s6627_s1 + $0x878] sm:$0xf0] }
  0xfe   :  { %2420 = vmatpush.bf16.msrb.mxu2 %v3350_v5  ;;  %v3763_v5 = vld [vmem:[%s6627_s1 + $0x7d8] sm:$0xf0] }
  0xff   :  { %2433 = vmatpush.bf16.msrb.mxu3 %v3414_v6  ;;  %v3766_v23 = vor.u32 %v4371_v53, %v3763_v5  ;;  %v3971_v53 = vld [vmem:[%s6627_s1 + $0x978] sm:$0xf0] }
 0x100   :  { %2445 = vmatpush.bf16.msra.mxu0 %v3486_v18  ;;  %v6220_v6 = vpop.f32.mrf.mxu0  ;;  %v4335_v18 = vld [vmem:[%s6627_s1 + $0x6b4] sm:$0xf] }
 0x101   :  { %2408 = vmatpush.bf16.msrb.mxu1 %v3278_v27  ;;  %v6226_v14 = vpop.f32.mrf.mxu1  ;;  %v3755_v27 = vld [vmem:[%s6627_s1 + $0x7c8] sm:$0xf0]  ;;  %v3622_v30 = vor.u32 %v4335_v18, %v3619_v19  ;;  %v3846_v19 = vor.u32 %v4391_v26, %v3843_v20 }
 0x102   :  { %2421 = vmatpush.bf16.msrb.mxu2 %v3342_v34  ;;  %v3547_v34 = vld [vmem:[%s6627_s1 + $0x628] sm:$0xf0] }
 0x103   :  { %2434 = vmatpush.bf16.msrb.mxu3 %v3406_v35  ;;  %v4333_v35 = vld [vmem:[%s6627_s1 + $0x6a4] sm:$0xf]  ;;  %v3550_v42 = vor.u32 %v4317_v56, %v3547_v34 }
 0x104   :  { %2446 = vmatpush.bf16.msra.mxu0 %v3478_v39  ;;  %2409 = vmatmul.bf16.vlgmr.msrb.gmra.mxu1 %v5138_v7  ;;  %v3771_v7 = vld [vmem:[%s6627_s1 + $0x7e8] sm:$0xf0]  ;;  %v4367_v39 = vld [vmem:[%s6627_s1 + $0x7b4] sm:$0xf]  ;;  %v4421_v56 = vld [vmem:[%s6627_s1 + $0x964] sm:$0xf] }
 0x105   :  { %2453 = vmatpush.bf16.msra.mxu1 %v3590_v36  ;;  %2422 = vmatmul.bf16.vlgmr.msrb.gmra.mxu2 %v5151_v13  ;;  %v3574_v13 = vor.u32 %v4323_v50, %v3571_v58  ;;  %v3774_v3 = vor.u32 %v4373_v0, %v3771_v7  ;;  %v3611_v36 = vld [vmem:[%s6627_s1 + $0x6a8] sm:$0xf0]  ;;  %v3667_v58 = vld [vmem:[%s6627_s1 + $0x718] sm:$0xf0]  ;;  %v4329_v7 = vld [vmem:[%s6627_s1 + $0x684] sm:$0xf] }
 0x106   :  { %2466 = vmatpush.bf16.msra.mxu2 %v3654_v37  ;;  %2435 = vmatmul.bf16.vlgmr.msrb.gmra.mxu3 %v5149_v12  ;;  %v3563_v12 = vld [vmem:[%s6627_s1 + $0x648] sm:$0xf0]  ;;  %v3758_v37 = vor.u32 %v4369_v25, %v3755_v27  ;;  %v3614_v43 = vor.u32 %v4333_v35, %v3611_v36  ;;  %v4405_v27 = vld [vmem:[%s6627_s1 + $0x8e4] sm:$0xf] }
 0x107   :  { %2479 = vmatpush.bf16.msra.mxu3 %v3718_v22  ;;  %v3566_v8 = vor.u32 %v4321_v2, %v3563_v12  ;;  %v3531_v0 = vld [vmem:[%s6627_s1 + $0x608] sm:$0xf0]  ;;  %v4345_v2 = vld [vmem:[%s6627_s1 + $0x704] sm:$0xf]  ;;  %v3742_v12 = vor.u32 %v4365_v59, %v3739_v60 }
 0x108   :  { %2447 = vmatpush.bf16.msra.mxu0 %v3470_v57  ;;  %v6267_v22 = vpop.f32.mrf.mxu2  ;;  %v2191_v45 = vpop.f32.mrf.mxu0  ;;  %v4347_v57 = vld [vmem:[%s6627_s1 + $0x714] sm:$0xf]  ;;  %v3835_v25 = vld [vmem:[%s6627_s1 + $0x868] sm:$0xf0]  ;;  %v4361_v34 = vld [vmem:[%s6627_s1 + $0x784] sm:$0xf] }
 0x109   :  { %2454 = vmatpush.bf16.msra.mxu1 %v3582_v48  ;;  %v6275_v41 = vpop.f32.mrf.mxu3  ;;  %v4331_v48 = vld [vmem:[%s6627_s1 + $0x694] sm:$0xf]  ;;  %v2204_v50 = vpop.f32.mrf.mxu1  ;;  %v3723_v35 = vld [vmem:[%s6627_s1 + $0x788] sm:$0xf0]  ;;  %v3891_v45 = vld [vmem:[%s6627_s1 + $0x8d8] sm:$0xf0] }
 0x10a   :  { %2467 = vmatpush.bf16.msra.mxu2 %v3646_v49  ;;  %v3603_v49 = vld [vmem:[%s6627_s1 + $0x698] sm:$0xf0]  ;;  %v4027_v50 = vld [vmem:[%s6627_s1 + $0x9e8] sm:$0xf0]  ;;  %v4417_v60 = vld [vmem:[%s6627_s1 + $0x944] sm:$0xf] }
 0x10b   :  { %2480 = vmatpush.bf16.msra.mxu3 %v3710_v52  ;;  %2448 = vmatmul.bf16.vlgmr.msra.gmra.mxu0 %v5162_v17  ;;  %v4351_v17 = vld [vmem:[%s6627_s1 + $0x734] sm:$0xf]  ;;  %v3750_v52 = vor.u32 %v4367_v39, %v3747_v40  ;;  %v3606_v62 = vor.u32 %v4331_v48, %v3603_v49  ;;  %v4437_v49 = vld [vmem:[%s6627_s1 + $0x9e4] sm:$0xf]  ;;  %v3883_v59 = vld [vmem:[%s6627_s1 + $0x8c8] sm:$0xf0] }
 0x10c   :  { %2492 = vmatpush.bf16.msrb.mxu0 %v3782_v61  ;;  %v3686_v16 = vor.u32 %v4351_v17, %v3683_v24  ;;  %v3542_v61 = vor.u32 %v4315_v44, %v3539_v47  ;;  %v3974_v17 = vor.u32 %v4423_v51, %v3971_v53  ;;  %v4389_v24 = vld [vmem:[%s6627_s1 + $0x864] sm:$0xf]  ;;  %v4387_v40 = vld [vmem:[%s6627_s1 + $0x854] sm:$0xf]  ;;  %v3726_v44 = vor.u32 %v4361_v34, %v3723_v35  ;;  %v3955_v47 = vld [vmem:[%s6627_s1 + $0x958] sm:$0xf0] }
 0x10d   :  { %2455 = vmatpush.bf16.msra.mxu1 %v3574_v13  ;;  %v3670_v13 = vor.u32 %v4347_v57, %v3667_v58  ;;  %v3838_v36 = vor.u32 %v4389_v24, %v3835_v25  ;;  %v4401_v58 = vld [vmem:[%s6627_s1 + $0x8c4] sm:$0xf]  ;;  %v3939_v51 = vld [vmem:[%s6627_s1 + $0x938] sm:$0xf0]  ;;  %v4379_v35 = vld [vmem:[%s6627_s1 + $0x814] sm:$0xf] }
 0x10e   :  { %2468 = vmatpush.bf16.msra.mxu2 %v3638_v1  ;;  %v3595_v1 = vld [vmem:[%s6627_s1 + $0x688] sm:$0xf0] }
 0x10f   :  { %2481 = vmatpush.bf16.msra.mxu3 %v3702_v55  ;;  %v3659_v55 = vld [vmem:[%s6627_s1 + $0x708] sm:$0xf0] }
 0x110   :  { %2493 = vmatpush.bf16.msrb.mxu0 %v3774_v3  ;;  %v4407_v3 = vld [vmem:[%s6627_s1 + $0x8f4] sm:$0xf]  ;;  %v2217_v5 = vpop.f32.mrf.mxu2  ;;  %v3662_v18 = vor.u32 %v4345_v2, %v3659_v55  ;;  %v3811_v55 = vld [vmem:[%s6627_s1 + $0x838] sm:$0xf0] }
 0x111   :  { %2456 = vmatpush.bf16.msra.mxu1 %v3566_v8  ;;  %v3534_v8 = vor.u32 %v4313_v63, %v3531_v0  ;;  %v2230_v15 = vpop.f32.mrf.mxu3  ;;  %v4435_v0 = vld [vmem:[%s6627_s1 + $0x9d4] sm:$0xf] }
 0x112   :  { %2469 = vmatpush.bf16.msra.mxu2 %v3630_v9  ;;  %v3598_v9 = vor.u32 %v4329_v7, %v3595_v1  ;;  %v4019_v7 = vld [vmem:[%s6627_s1 + $0x9d8] sm:$0xf0]  ;;  %v4383_v2 = vld [vmem:[%s6627_s1 + $0x834] sm:$0xf]  ;;  %v3803_v15 = vld [vmem:[%s6627_s1 + $0x828] sm:$0xf0] }
 0x113   :  { %2482 = vmatpush.bf16.msra.mxu3 %v3694_v11  ;;  %v3731_v11 = vld [vmem:[%s6627_s1 + $0x798] sm:$0xf0]  ;;  %v4022_v53 = vor.u32 %v4435_v0, %v4019_v7  ;;  %v3814_v5 = vor.u32 %v4383_v2, %v3811_v55 }
 0x114   :  { %2494 = vmatpush.bf16.msrb.mxu0 %v3766_v23  ;;  %v3910_v23 = vor.u32 %v4407_v3, %v3907_v4  ;;  %v3875_v3 = vld [vmem:[%s6627_s1 + $0x8b8] sm:$0xf0]  ;;  %v4415_v4 = vld [vmem:[%s6627_s1 + $0x934] sm:$0xf] }
 0x115   :  { %2457 = vmatpush.bf16.msra.mxu1 %v3558_v29  ;;  %v3734_v29 = vor.u32 %v4363_v10, %v3731_v11  ;;  %v3942_v10 = vor.u32 %v4415_v4, %v3939_v51  ;;  %v4381_v11 = vld [vmem:[%s6627_s1 + $0x824] sm:$0xf]  ;;  %v4452_v2 = vld [vmem:[%s6630_s3 + $0x38] sm:$0xff]  ;;  %v4043_v51 = vld [vmem:[%s6627_s1 + $0xa08] sm:$0xf0] }
 0x116   :  { %2470 = vmatpush.bf16.msra.mxu2 %v3622_v30  ;;  %v3899_v30 = vld [vmem:[%s6627_s1 + $0x8e8] sm:$0xf0]  ;;  %v4441_v4 = vld [vmem:[%s6627_s1 + $0xa04] sm:$0xf] }
 0x117   :  { %2483 = vmatpush.bf16.msra.mxu3 %v3686_v16  ;;  %v3963_v16 = vld [vmem:[%s6627_s1 + $0x968] sm:$0xf0]  ;;  %v3902_v38 = vor.u32 %v4405_v27, %v3899_v30  ;;  %v3806_v27 = vor.u32 %v4381_v11, %v3803_v15  ;;  %v4003_v30 = vld [vmem:[%s6627_s1 + $0x9b8] sm:$0xf0]  ;;  %v4468_v11 = vld [vmem:[#allocation1 + $0x12] sm:$0xff] }
 0x118   :  { %2495 = vmatpush.bf16.msrb.mxu0 %v3758_v37  ;;  %v4439_v37 = vld [vmem:[%s6627_s1 + $0x9f4] sm:$0xf]  ;;  %v3966_v39 = vor.u32 %v4421_v56, %v3963_v16 }
 0x119   :  { %2458 = vmatpush.bf16.msra.mxu1 %v3550_v42  ;;  %v3827_v42 = vld [vmem:[%s6627_s1 + $0x858] sm:$0xf0]  ;;  %v4038_v48 = vor.u32 %v4439_v37, %v4035_v54  ;;  %v4395_v37 = vld [vmem:[%s6627_s1 + $0x894] sm:$0xf] }
 0x11a   :  { %2471 = vmatpush.bf16.msra.mxu2 %v3614_v43  ;;  %v4403_v43 = vld [vmem:[%s6627_s1 + $0x8d4] sm:$0xf] }
 0x11b   :  { %2484 = vmatpush.bf16.msra.mxu3 %v3678_v46  ;;  %v4419_v46 = vld [vmem:[%s6627_s1 + $0x954] sm:$0xf] }
 0x11c   :  { %2496 = vmatpush.bf16.msrb.mxu0 %v3750_v52  ;;  %v3894_v52 = vor.u32 %v4403_v43, %v3891_v45  ;;  %v3958_v57 = vor.u32 %v4419_v46, %v3955_v47  ;;  %v4429_v45 = vld [vmem:[%s6627_s1 + $0x9a4] sm:$0xf]  ;;  %v3995_v46 = vld [vmem:[%s6627_s1 + $0x9a8] sm:$0xf0] }
 0x11d   :  { %2459 = vmatpush.bf16.msra.mxu1 %v3542_v61  ;;  %v3947_v61 = vld [vmem:[%s6627_s1 + $0x948] sm:$0xf0] }
 0x11e   :  { %2472 = vmatpush.bf16.msra.mxu2 %v3606_v62  ;;  %v4030_v62 = vor.u32 %v4437_v49, %v4027_v50  ;;  %v3950_v1 = vor.u32 %v4417_v60, %v3947_v61  ;;  %v3787_v49 = vld [vmem:[%s6627_s1 + $0x808] sm:$0xf0]  ;;  %v4393_v50 = vld [vmem:[%s6627_s1 + $0x884] sm:$0xf] }
 0x11f   :  { %2485 = vmatpush.bf16.msra.mxu3 %v3670_v13  ;;  %v3886_v13 = vor.u32 %v4401_v58, %v3883_v59  ;;  %v4443_v58 = vld [vmem:[%s6627_s1 + $0xa14] sm:$0xf]  ;;  %v4051_v59 = vld [vmem:[%s6627_s1 + $0xa18] sm:$0xf0] }
 0x120   :  { %2497 = vmatpush.bf16.msrb.mxu0 %v3742_v12  ;;  %v4399_v12 = vld [vmem:[%s6627_s1 + $0x8b4] sm:$0xf]  ;;  %v6433_v26 = vpop.f32.mrf.mxu0  ;;  %v4054_v55 = vor.u32 %v4443_v58, %v4051_v59 }
 0x121   :  { %2460 = vmatpush.bf16.msra.mxu1 %v3534_v8  ;;  %v6436_v20 = vpop.f32.mrf.mxu1  ;;  %v4011_v8 = vld [vmem:[%s6627_s1 + $0x9c8] sm:$0xf0] }
 0x122   :  { %2473 = vmatpush.bf16.msra.mxu2 %v3598_v9  ;;  %v3878_v9 = vor.u32 %v4399_v12, %v3875_v3  ;;  %v2190_v12 = vadd.f32 %v6220_v6, %v6080_v21  ;;  %v4451_v21 = vld [vmem:[%s6630_s3 + $0x30] sm:$0xff]  ;;  %v4046_v6 = vor.u32 %v4441_v4, %v4043_v51  ;;  %v4458_v51 = vld [vmem:[%s6630_s3 + $0x68] sm:$0xff] }
 0x123   :  { %2486 = vmatpush.bf16.msra.mxu3 %v3662_v18  ;;  %v4397_v18 = vld [vmem:[%s6627_s1 + $0x8a4] sm:$0xf] }
 0x124   :  { %2498 = vmatpush.bf16.msrb.mxu0 %v3734_v29  ;;  %2461 = vmatmul.bf16.vlgmr.msra.gmra.mxu1 %v5179_v28  ;;  %v3830_v28 = vor.u32 %v4387_v40, %v3827_v42  ;;  %v4431_v29 = vld [vmem:[%s6627_s1 + $0x9b4] sm:$0xf]  ;;  %v3923_v40 = vld [vmem:[%s6627_s1 + $0x918] sm:$0xf0] }
 0x125   :  { %2505 = vmatpush.bf16.msrb.mxu1 %v3846_v19  ;;  %2474 = vmatmul.bf16.vlgmr.msra.gmra.mxu2 %v5183_v32  ;;  %v4385_v32 = vld [vmem:[%s6627_s1 + $0x844] sm:$0xf]  ;;  %v3867_v19 = vld [vmem:[%s6627_s1 + $0x8a8] sm:$0xf0]  ;;  %v4006_v43 = vor.u32 %v4431_v29, %v4003_v30 }
 0x126   :  { %2518 = vmatpush.bf16.msrb.mxu2 %v3910_v23  ;;  %2487 = vmatmul.bf16.vlgmr.msra.gmra.mxu3 %v5181_v31  ;;  %v3819_v31 = vld [vmem:[%s6627_s1 + $0x848] sm:$0xf0]  ;;  %v4413_v23 = vld [vmem:[%s6627_s1 + $0x924] sm:$0xf]  ;;  %v3870_v16 = vor.u32 %v4397_v18, %v3867_v19 }
 0x127   :  { %2531 = vmatpush.bf16.msrb.mxu3 %v3974_v17  ;;  %v3822_v63 = vor.u32 %v4385_v32, %v3819_v31  ;;  %v3931_v17 = vld [vmem:[%s6627_s1 + $0x928] sm:$0xf0]  ;;  %v3998_v31 = vor.u32 %v4429_v45, %v3995_v46  ;;  %v4445_v45 = vld [vmem:[%s6630_s3] sm:$0xff] }
 0x128   :  { %2499 = vmatpush.bf16.msrb.mxu0 %v3726_v44  ;;  %v6471_v24 = vpop.f32.mrf.mxu2  ;;  %v3934_v34 = vor.u32 %v4413_v23, %v3931_v17  ;;  %v2243_v54 = vpop.f32.mrf.mxu0  ;;  %v3915_v32 = vld [vmem:[%s6627_s1 + $0x908] sm:$0xf0]  ;;  %v4469_v23 = vld [vmem:[#allocation1 + $0x1b] sm:$0xff] }
 0x129   :  { %2506 = vmatpush.bf16.msrb.mxu1 %v3838_v36  ;;  %v6479_v56 = vpop.f32.mrf.mxu3  ;;  %v3795_v36 = vld [vmem:[%s6627_s1 + $0x818] sm:$0xf0]  ;;  %v2256_v42 = vpop.f32.mrf.mxu1  ;;  %v4450_v18 = vld [vmem:[%s6630_s3 + $0x28] sm:$0xff]  ;;  %v4449_v17 = vld [vmem:[%s6630_s3 + $0x20] sm:$0xff] }
 0x12a   :  { %2519 = vmatpush.bf16.msrb.mxu2 %v3902_v38  ;;  %v3859_v38 = vld [vmem:[%s6627_s1 + $0x898] sm:$0xf0]  ;;  %v3798_v44 = vor.u32 %v4379_v35, %v3795_v36  ;;  %v4447_v36 = vld [vmem:[%s6630_s3 + $0x10] sm:$0xff] }
 0x12b   :  { %2532 = vmatpush.bf16.msrb.mxu3 %v3966_v39  ;;  %2500 = vmatmul.bf16.vlgmr.msrb.gmra.mxu0 %v5185_v33  ;;  %v4433_v33 = vld [vmem:[%s6627_s1 + $0x9c4] sm:$0xf]  ;;  %v4411_v39 = vld [vmem:[%s6627_s1 + $0x914] sm:$0xf]  ;;  %v3862_v47 = vor.u32 %v4395_v37, %v3859_v38 }
 0x12c   :  { %2544 = vmatpush.bf16.msra.mxu0 %v4038_v48  ;;  %v4014_v25 = vor.u32 %v4433_v33, %v4011_v8  ;;  %v3926_v48 = vor.u32 %v4411_v39, %v3923_v40  ;;  %v2203_v33 = vadd.f32 %v6226_v14, %v2190_v12  ;;  %v4466_v8 = vld [vmem:[#allocation1] sm:$0xff] }
 0x12d   :  { %2507 = vmatpush.bf16.msrb.mxu1 %v3830_v28  ;;  %v4377_v28 = vld [vmem:[%s6627_s1 + $0x804] sm:$0xf] }
 0x12e   :  { %2520 = vmatpush.bf16.msrb.mxu2 %v3894_v52  ;;  %v3851_v52 = vld [vmem:[%s6627_s1 + $0x888] sm:$0xf0]  ;;  %v3790_v61 = vor.u32 %v4377_v28, %v3787_v49  ;;  %v2216_v15 = vadd.f32 %v6267_v22, %v2203_v33  ;;  %v4470_v22 = vld [vmem:[%s6629_s2] sm:$0x3] }
 0x12f   :  { %2533 = vmatpush.bf16.msrb.mxu3 %v3958_v57  ;;  %v4409_v57 = vld [vmem:[%s6627_s1 + $0x904] sm:$0xf]  ;;  %v3854_v0 = vor.u32 %v4393_v50, %v3851_v52 }
 0x130   :  { %2545 = vmatpush.bf16.msra.mxu0 %v4030_v62  ;;  %v2269_v60 = vpop.f32.mrf.mxu2  ;;  %v4427_v62 = vld [vmem:[%s6627_s1 + $0x994] sm:$0xf]  ;;  %v3918_v7 = vor.u32 %v4409_v57, %v3915_v32  ;;  %v2229_v14 = vadd.f32 %v6275_v41, %v2216_v15  ;;  %v4448_v41 = vld [vmem:[%s6630_s3 + $0x18] sm:$0xff] }
 0x131   :  { %2508 = vmatpush.bf16.msrb.mxu1 %v3822_v63  ;;  %v3987_v63 = vld [vmem:[%s6627_s1 + $0x998] sm:$0xf0] }
 0x132   :  { %2521 = vmatpush.bf16.msrb.mxu2 %v3886_v13  ;;  %v2282_v13 = vpop.f32.mrf.mxu3  ;;  %v3990_v3 = vor.u32 %v4427_v62, %v3987_v63  ;;  %v2242_v29 = vadd.f32 %v6433_v26, %v2229_v14  ;;  %v4471_v26 = vld [vmem:[#allocation1 + $0x24] sm:$0xff] }
 0x133   :  { %2534 = vmatpush.bf16.msrb.mxu3 %v3950_v1  ;;  %v2293_v1 = vpop.f32.mrf.mxu0 }
 0x134   :  { %2546 = vmatpush.bf16.msra.mxu0 %v4022_v53  ;;  %v4425_v53 = vld [vmem:[%s6627_s1 + $0x984] sm:$0xf] }
 0x135   :  { %2509 = vmatpush.bf16.msrb.mxu1 %v3814_v5  ;;  %v3979_v5 = vld [vmem:[%s6627_s1 + $0x988] sm:$0xf0] }
 0x136   :  { %2522 = vmatpush.bf16.msrb.mxu2 %v3878_v9  ;;  %v3982_v9 = vor.u32 %v4425_v53, %v3979_v5  ;;  %v4457_v53 = vld [vmem:[%s6630_s3 + $0x60] sm:$0xff] }
 0x137   :  { %2535 = vmatpush.bf16.msrb.mxu3 %v3942_v10  ;;  %v4467_v10 = vld [vmem:[#allocation1 + $0x9] sm:$0xff] }
 0x138   :  { %2547 = vmatpush.bf16.msra.mxu0 %v4014_v25  ;;  %v351_v25 = vperm.slane %v4470_v22, 1  ;;  %v4453_v22 = vld [vmem:[%s6630_s3 + $0x40] sm:$0xff] }
 0x139   :  { %2510 = vmatpush.bf16.msrb.mxu1 %v3806_v27 }
 0x13a   :  { %2523 = vmatpush.bf16.msrb.mxu2 %v3870_v16  ;;  %v2255_v16 = vadd.f32 %v6436_v20, %v2242_v29  ;;  %v4446_v20 = vld [vmem:[%s6630_s3 + $0x8] sm:$0xff] }
 0x13b   :  { %2536 = vmatpush.bf16.msrb.mxu3 %v3934_v34  ;;  %v2295_v19 = vpop.f32.mrf.mxu0 }
 0x13c   :  { %2548 = vmatpush.bf16.msra.mxu0 %v4006_v43  ;;  %v2268_v34 = vadd.f32 %v6471_v24, %v2255_v16 }
 0x13d   :  { %2511 = vmatpush.bf16.msrb.mxu1 %v3798_v44 }
 0x13e   :  { %2524 = vmatpush.bf16.msrb.mxu2 %v3862_v47  ;;  %v2281_v42 = vadd.f32 %v6479_v56, %v2268_v34 }
 0x13f   :  { %2537 = vmatpush.bf16.msrb.mxu3 %v3926_v48 }
 0x140   :  { %2549 = vmatpush.bf16.msra.mxu0 %v3998_v31  ;;  %v2294_v43 = vadd.f32 %v2293_v1, %v2281_v42 }
 0x141   :  { %2512 = vmatpush.bf16.msrb.mxu1 %v3790_v61  ;;  %v2306_v27 = vpop.f32.mrf.mxu1 }
 0x142   :  { %2525 = vmatpush.bf16.msrb.mxu2 %v3854_v0  ;;  %v2307_v30 = vadd.f32 %v2306_v27, %v351_v25  ;;  %v2570_v48 = vmax.f32 %v2294_v43, 0.0 }
 0x143   :  { %2538 = vmatpush.bf16.msrb.mxu3 %v3918_v7 }
 0x144   :  { %2550 = vmatpush.bf16.msra.mxu0 %v3990_v3  ;;  %2513 = vmatmul.bf16.vlgmr.msrb.gmra.mxu1 %v4466_v8  ;;  %v2572_v28 = vpack.c.bf16 %v2570_v48, %v2570_v48 }
 0x145   :  { %2563 = vmatpush.bf16.msra.mxu1 %v4054_v55  ;;  %2526 = vmatmul.bf16.vlgmr.msrb.gmra.mxu2 %v4467_v10  ;;  %v4459_v55 = vld [vmem:[%s6630_s3 + $0x70] sm:$0xff] }
 0x146   :  { %2706 = vmatpush.bf16.msra.mxu2 %v4452_v2  ;;  %2539 = vmatmul.bf16.vlgmr.msrb.gmra.mxu3 %v4468_v11  ;;  %v4460_v2 = vld [vmem:[%s6630_s3 + $0x78] sm:$0xff]  ;;  %v4455_v10 = vld [vmem:[%s6630_s3 + $0x50] sm:$0xff] }
 0x147   :  { %2719 = vmatpush.bf16.msra.mxu3 %v4460_v2 }
 0x148   :  { %2551 = vmatpush.bf16.msra.mxu0 %v3982_v9  ;;  %v2319_v35 = vpop.f32.mrf.mxu2  ;;  %v2345_v38 = vpop.f32.mrf.mxu0 }
 0x149   :  { %2564 = vmatpush.bf16.msra.mxu1 %v4046_v6  ;;  %v2320_v37 = vadd.f32 %v2319_v35, %v2307_v30  ;;  %v2332_v54 = vpop.f32.mrf.mxu3  ;;  %v2308_v39 = vpop.f32.mrf.mxu1 }
 0x14a   :  { %2707 = vmatpush.bf16.msra.mxu2 %v4451_v21  ;;  %v4456_v21 = vld [vmem:[%s6630_s3 + $0x58] sm:$0xff] }
 0x14b   :  { %2552 = vmatmul.bf16.vlgmr.msra.gmra.mxu0 %v4469_v23  ;;  %v2333_v40 = vadd.f32 %v2332_v54, %v2320_v37  ;;  %2720 = vmatpush.bf16.msra.mxu3 %v4459_v55 }
 0x14d   :  { %v2346_v24 = vadd.f32 %v2345_v38, %v2333_v40 }
 0x14e   :  { %2708 = vmatpush.bf16.msra.mxu2 %v4450_v18  ;;  %v4454_v18 = vld [vmem:[%s6630_s3 + $0x48] sm:$0xff] }
 0x14f   :  { %2721 = vmatpush.bf16.msra.mxu3 %v4458_v51 }
 0x150   :  { %v2321_v44 = vpop.f32.mrf.mxu2  ;;  %v2347_v47 = vpop.f32.mrf.mxu0 }
 0x151   :  { %v2334_v46 = vpop.f32.mrf.mxu3 }
 0x152   :  { %2709 = vmatpush.bf16.msra.mxu2 %v4449_v17 }
 0x153   :  { %2722 = vmatpush.bf16.msra.mxu3 %v4457_v53 }
 0x154   :  { %4056 = vmatmul.msk.bf16.vlgmr.msra.gmra.mxu1 %vm2021_vm0, %v4471_v26 }
 0x156   :  { %2710 = vmatpush.bf16.msra.mxu2 %v4448_v41 }
 0x157   :  { %2723 = vmatpush.bf16.msra.mxu3 %v4456_v21 }
 0x15a   :  { %2711 = vmatpush.bf16.msra.mxu2 %v4447_v36 }
 0x15b   :  { %2724 = vmatpush.bf16.msra.mxu3 %v4455_v10 }
 0x15e   :  { %2712 = vmatpush.bf16.msra.mxu2 %v4446_v20 }
 0x15f   :  { %2725 = vmatpush.bf16.msra.mxu3 %v4454_v18 }
 0x161   :  { %v2358_v56 = vpop.f32.mrf.mxu1 }
 0x162   :  { %2713 = vmatpush.bf16.msra.mxu2 %v4445_v45  ;;  %v2359_v49 = vadd.f32 %v2358_v56, %v2346_v24 }
 0x163   :  { %2726 = vmatpush.bf16.msra.mxu3 %v4453_v22 }
 0x165   :  { %2714 = vmatmul.bf16.vlgmr.msra.gmra.mxu2 %v2572_v28  ;;  %v2732_v28 = vlaneseq }
 0x167   :  { %v2733_v56 = vand.u32 127, %v2732_v28 }
 0x168   :  { %v2371_v50 = vpop.f32.mrf.mxu2  ;;  %v2397_v32 = vpop.f32.mrf.mxu0 }
 0x169   :  { %v2372_v52 = vadd.f32 %v2371_v50, %v2359_v49  ;;  %v2384_v57 = vpop.f32.mrf.mxu3  ;;  %v2360_v58 = vpop.f32.mrf.mxu1  ;;  %v4461_v49 = vld [vmem:[%s6631_s4] ss:$0 sm:$0xff]  ;;  %vm2734_vm1 = vcmp.ge.s32.totalorder %v2733_v56, 1  ;;  %vm2735_vm2 = vcmp.le.s32.totalorder %v2733_v56, 4 }
 0x16a   :  { %vm6611_vm3 = vmand %vm2734_vm1, %vm2735_vm2 }
 0x16b   :  { %v2385_v31 = vadd.f32 %v2384_v57, %v2372_v52 }
 0x16d   :  { %v2398_v59 = vadd.f32 %v2397_v32, %v2385_v31 }
 0x170   :  { %v2373_v60 = vpop.f32.mrf.mxu2  ;;  %v2399_v62 = vpop.f32.mrf.mxu0 }
 0x171   :  { %v2386_v61 = vpop.f32.mrf.mxu3 }
 0x181   :  { %v2410_v63 = vpop.f32.mrf.mxu1 }
 0x182   :  { %v2411_v11 = vadd.f32 %v2410_v63, %v2398_v59 }
 0x188   :  { %v2423_v0 = vpop.f32.mrf.mxu2  ;;  %v2449_v13 = vpop.f32.mrf.mxu0 }
 0x189   :  { %v2436_v7 = vpop.f32.mrf.mxu3  ;;  %v2412_v1 = vpop.f32.mrf.mxu1  ;;  %v2424_v15 = vadd.f32 %v2423_v0, %v2411_v11 }
 0x18b   :  { %v2437_v17 = vadd.f32 %v2436_v7, %v2424_v15 }
 0x18d   :  { %v2450_v25 = vadd.f32 %v2449_v13, %v2437_v17 }
 0x190   :  { %v2425_v12 = vpop.f32.mrf.mxu2  ;;  %v2451_v4 = vpop.f32.mrf.mxu0 }
 0x191   :  { %v2438_v3 = vpop.f32.mrf.mxu3 }
 0x1a1   :  { %v2462_v5 = vpop.f32.mrf.mxu1 }
 0x1a2   :  { %v2463_v27 = vadd.f32 %v2462_v5, %v2450_v25 }
 0x1a8   :  { %v2475_v6 = vpop.f32.mrf.mxu2  ;;  %v2501_v8 = vpop.f32.mrf.mxu0 }
 0x1a9   :  { %v2488_v33 = vpop.f32.mrf.mxu3  ;;  %v2464_v9 = vpop.f32.mrf.mxu1  ;;  %v2476_v29 = vadd.f32 %v2475_v6, %v2463_v27 }
 0x1ab   :  { %v2489_v41 = vadd.f32 %v2488_v33, %v2476_v29 }
 0x1ad   :  { %v2502_v16 = vadd.f32 %v2501_v8, %v2489_v41 }
 0x1b0   :  { %v2477_v19 = vpop.f32.mrf.mxu2  ;;  %v2503_v23 = vpop.f32.mrf.mxu0 }
 0x1b1   :  { %v2490_v14 = vpop.f32.mrf.mxu3 }
 0x1c1   :  { %v2514_v30 = vpop.f32.mrf.mxu1 }
 0x1c2   :  { %v2515_v34 = vadd.f32 %v2514_v30, %v2502_v16 }
 0x1c8   :  { %v2527_v35 = vpop.f32.mrf.mxu2  ;;  %v2553_v54 = vpop.f32.mrf.mxu0 }
 0x1c9   :  { %v2540_v36 = vpop.f32.mrf.mxu3  ;;  %v2528_v37 = vadd.f32 %v2527_v35, %v2515_v34  ;;  %v2516_v38 = vpop.f32.mrf.mxu1 }
 0x1cb   :  { %v2541_v26 = vadd.f32 %v2540_v36, %v2528_v37 }
 0x1cd   :  { %v2554_v39 = vadd.f32 %v2553_v54, %v2541_v26 }
 0x1d0   :  { %v2529_v40 = vpop.f32.mrf.mxu2  ;;  %v2555_v20 = vpop.f32.mrf.mxu0 }
 0x1d1   :  { %v2542_v42 = vpop.f32.mrf.mxu3  ;;  %v2566_v24 = vpop.f32.mrf.mxu1 }
 0x1d2   :  { %v2567_v43 = vadd.f32 %v2566_v24, %v2554_v39 }
 0x1d4   :  { %v2571_v44 = vmax.f32 %v2567_v43, 0.0 }
 0x1d6   :  { %v2573_v45 = vpack.c.bf16 %v2571_v44, %v2571_v44 }
 0x1d8   :  { %2727 = vmatmul.bf16.vlgmr.msra.gmra.mxu3 %v2573_v45 }
 0x1d9   :  { %v2568_v46 = vpop.f32.mrf.mxu1 }
 0x1e8   :  { %v2715_v47 = vpop.f32.mrf.mxu2 }
 0x1e9   :  { %v2716_v50 = vadd.f32 %v4461_v49, %v2715_v47 }
 0x1f0   :  { %v2717_v48 = vpop.f32.mrf.mxu2 }
 0x25b   :  { %v2728_v52 = vpop.f32.mrf.mxu3 }
 0x25c   :  { %v2729_v32 = vadd.f32 %v2728_v52, %v2716_v50 }
 0x25e   :  { %v2737_v31 = vsel %vm6611_vm3, %v2729_v32, -inf }
 0x25f   :  { %v2739_v58 = vsel %vm2738_vm4, %v2737_v31, -inf }
 0x260   :  { %2740 = vmax.xlane.f32.xlu0 %v2739_v58 }
 0x263   :  { %v2730_v59 = vpop.f32.mrf.mxu3 }
 0x2d3   :  { %v2741_v60 = vpop.xlane.xlu0 %2740 }
 0x2d4   :  { %v2742_v61 = vsub.f32 %v2729_v32, %v2741_v60 }
 0x2d6   :  { %v2743_v62 = vmul.f32 1.442695, %v2742_v61 }
 0x2d8   :  { %4462 = vpow2.f32 %v2743_v62 }
 0x2de   :  { %v4463_v63 = vpop.eup %4462 }
 0x2df   :  { %v2745_v0 = vsel %vm6611_vm3, %v4463_v63, 0.0 }
 0x2e0   :  { %v2746_v7 = vsel %vm2738_vm4, %v2745_v0, 0.0 }
 0x2e1   :  { %2747 = vadd.xlane.f32.xlu0 %v2746_v7 }
 0x354   :  { %v2748_v13 = vpop.xlane.xlu0 %2747 }
 0x355   :  { %4464 = vlog2.f32 %v2748_v13 }
 0x35b   :  { %v4465_v1 = vpop.eup %4464 }
 0x35c   :  { %v2750_v2 = vmul.f32 0.6931472, %v4465_v1 }
 0x35e   :  { %v2751_v55 = vadd.f32 %v2750_v2, %v2741_v60 }
 0x360   :  { %v2752_v12 = vsub.f32 %v2729_v32, %v2751_v55 }
 0x362   :  { %v2753_v3 = vsel %vm6611_vm3, %v2752_v12, %v2729_v32 }
 0x363   :  { %2754 = vst.msk [vmem:[%s6632_s5] sm:$0x3] %vm2738_vm4, %v2753_v3 }

</bundles_post_ra>
